<compile_context>
chip_gen: v5e
topology: v5e:2x2
jax: 0.10.0
libtpu: 0.0.40
codegen_flags: <defaults>
</compile_context>

<pallas_src>
import math

import jax
import jax.numpy as jnp
from jax.experimental import pallas as pl
from jax.experimental.pallas import tpu as pltpu

NEG = -1e9


# ----------------------------------------------------------------------------
# In-kernel building blocks (pure functions over jnp values)
# ----------------------------------------------------------------------------

def _layernorm(x, g, b):
    mu = jnp.mean(x, axis=-1, keepdims=True)
    var = jnp.mean(jnp.square(x - mu), axis=-1, keepdims=True)
    return (x - mu) * jax.lax.rsqrt(var + 1e-5) * g + b


def _ffn(x, w1, b1, w2, b2):
    # w1/w2 are bf16; cast activations at the dot sites only, accumulate in f32.
    h = jnp.dot(x.astype(jnp.bfloat16), w1, preferred_element_type=jnp.float32) + b1
    h = jnp.maximum(h, 0.0)  # ReLU
    return jnp.dot(h.astype(jnp.bfloat16), w2, preferred_element_type=jnp.float32) + b2


def _mha(x_q, x_kv, mask_add, wq, bq, wk, bk, wv, bv, wo, bo,
         B, Sq, Skv, n_heads, Dh):
    """Multi-head attention, fully in VMEM, returned as a value.

    x_q:  [B*Sq,  H] f32   x_kv: [B*Skv, H] f32
    mask_add: [B, Sq, Skv] additive f32 (0 / -1e9)
    w*: bf16 projection weights, b*: f32 biases.
    Returns [B*Sq, H] f32.
    """
    H = n_heads * Dh
    q = jnp.dot(x_q.astype(jnp.bfloat16), wq, preferred_element_type=jnp.float32) + bq
    k = jnp.dot(x_kv.astype(jnp.bfloat16), wk, preferred_element_type=jnp.float32) + bk
    v = jnp.dot(x_kv.astype(jnp.bfloat16), wv, preferred_element_type=jnp.float32) + bv
    q = q * (1.0 / math.sqrt(Dh))                 # fold scale into q

    q3 = q.reshape(B, Sq, H)
    k3 = k.reshape(B, Skv, H)
    v3 = v.reshape(B, Skv, H)

    parts = []
    for h in range(n_heads):                      # static unroll, but each op is B-batched
        lo, hi = h * Dh, (h + 1) * Dh
        s = jnp.einsum('bqd,bkd->bqk', q3[:, :, lo:hi], k3[:, :, lo:hi],
                       preferred_element_type=jnp.float32)     # [B, Sq, Skv]
        s = s + mask_add
        m = jnp.maximum(jnp.max(s, axis=-1, keepdims=True), NEG)   # all-masked-row guard
        p = jnp.exp(s - m)
        p = p * pl.reciprocal(jnp.sum(p, axis=-1, keepdims=True), approx=True)
        parts.append(jnp.einsum('bqk,bkd->bqd', p, v3[:, :, lo:hi],
                                preferred_element_type=jnp.float32))  # [B, Sq, Dh]

    ctx = jnp.concatenate(parts, axis=-1).reshape(B * Sq, H)
    # One K=128 output projection instead of n_heads K=32 accumulating matmuls.
    return jnp.dot(ctx.astype(jnp.bfloat16), wo, preferred_element_type=jnp.float32) + bo


# ----------------------------------------------------------------------------
# Fused encoder stack: one grid-less pallas_call, static layer loop in VMEM
# ----------------------------------------------------------------------------

_ENC_KEYS = ("wq", "bq", "wk", "bk", "wv", "bv", "wo", "bo",
             "g1", "be1", "w1", "b1", "w2", "b2", "g2", "be2")


def encoder_stack(x2, self_add, p, B, S, n_heads):
    """x2: [B*S, H] f32, self_add: [B, S, S] additive mask. Returns [B*S, H] f32."""
    L, H, _ = p["wq"].shape
    Dh = H // n_heads

    def kernel(x_ref, m_ref, *rest):
        w = dict(zip(_ENC_KEYS, rest[:16]))
        o_ref = rest[16]

        x = x_ref[...]
        mask = m_ref[...]
        for l in range(L):                         # static: all weights already in VMEM
            a = _mha(x, x, mask,
                     w["wq"][l], w["bq"][l], w["wk"][l], w["bk"][l],
                     w["wv"][l], w["bv"][l], w["wo"][l], w["bo"][l],
                     B, S, S, n_heads, Dh)
            x = _layernorm(x + a, w["g1"][l], w["be1"][l])
            x = _layernorm(x + _ffn(x, w["w1"][l], w["b1"][l], w["w2"][l], w["b2"][l]),
                           w["g2"][l], w["be2"][l])
        o_ref[...] = x

    args = (x2, self_add) + tuple(p[k] for k in _ENC_KEYS)
    return pl.pallas_call(
        kernel,
        out_shape=jax.ShapeDtypeStruct((B * S, H), jnp.float32),
        in_specs=[pl.BlockSpec(memory_space=pltpu.MemorySpace.VMEM)] * len(args),
        out_specs=pl.BlockSpec(memory_space=pltpu.MemorySpace.VMEM),
    )(*args)


# ----------------------------------------------------------------------------
# Fused decoder stack + vocab projection: one grid-less pallas_call
# ----------------------------------------------------------------------------

_DEC_KEYS = ("swq", "sbq", "swk", "sbk", "swv", "sbv", "swo", "sbo", "g1", "be1",
             "cwq", "cbq", "cwk", "cbk", "cwv", "cbv", "cwo", "cbo", "g2", "be2",
             "w1", "b1", "w2", "b2", "g3", "be3")


def decoder_stack(y2, enc2, self_add, cross_add, p, w_out, b_out,
                  B, S_dec, S_enc, n_heads):
    """y2: [B*S_dec, H], enc2: [B*S_enc, H]. Returns logits [B*S_dec, V] f32."""
    L, H, _ = p["swq"].shape
    V = w_out.shape[1]
    Dh = H // n_heads

    def kernel(y_ref, enc_ref, sm_ref, cm_ref, *rest):
        w = dict(zip(_DEC_KEYS, rest[:26]))
        wout_ref, bout_ref = rest[26], rest[27]
        o_ref = rest[28]

        y = y_ref[...]
        enc = enc_ref[...]
        sm = sm_ref[...]                           # [B, S_dec, S_dec]
        cm = cm_ref[...]                           # [B, S_dec, S_enc]

        for l in range(L):
            a = _mha(y, y, sm,
                     w["swq"][l], w["sbq"][l], w["swk"][l], w["sbk"][l],
                     w["swv"][l], w["sbv"][l], w["swo"][l], w["sbo"][l],
                     B, S_dec, S_dec, n_heads, Dh)
            y = _layernorm(y + a, w["g1"][l], w["be1"][l])
            c = _mha(y, enc, cm,
                     w["cwq"][l], w["cbq"][l], w["cwk"][l], w["cbk"][l],
                     w["cwv"][l], w["cbv"][l], w["cwo"][l], w["cbo"][l],
                     B, S_dec, S_enc, n_heads, Dh)
            y = _layernorm(y + c, w["g2"][l], w["be2"][l])
            y = _layernorm(y + _ffn(y, w["w1"][l], w["b1"][l], w["w2"][l], w["b2"][l]),
                           w["g3"][l], w["be3"][l])

        o_ref[...] = (jnp.dot(y.astype(jnp.bfloat16), wout_ref[...],
                              preferred_element_type=jnp.float32)
                      + bout_ref[...]).astype(o_ref.dtype)

    args = (y2, enc2, self_add, cross_add) + tuple(p[k] for k in _DEC_KEYS) + (w_out, b_out)
    return pl.pallas_call(
        kernel,
        out_shape=jax.ShapeDtypeStruct((B * S_dec, V), jnp.float32),
        in_specs=[pl.BlockSpec(memory_space=pltpu.MemorySpace.VMEM)] * len(args),
        out_specs=pl.BlockSpec(memory_space=pltpu.MemorySpace.VMEM),
    )(*args)


# ----------------------------------------------------------------------------
# Model forward (JAX glue: embeddings, masks; hot paths in the two kernels)
# ----------------------------------------------------------------------------

def forward(params, enc_ids, enc_pad_mask, dec_ids, dec_positions,
            dec_self_mask, cross_block_mask, n_heads):
    B, S_enc = enc_ids.shape
    S_dec = dec_ids.shape[1]
    H = params["tok_emb_in"].shape[1]
    scale = math.sqrt(H)

    # ---- encode ----
    pos_enc = params["pos_emb"][jnp.arange(S_enc)]
    x = (params["tok_emb_in"][enc_ids] * scale + pos_enc[None, :, :]).reshape(B * S_enc, H)
    enc_self_add = jnp.where(
        jnp.broadcast_to(enc_pad_mask[:, None, :], (B, S_enc, S_enc)), NEG, 0.0
    ).astype(jnp.float32)                                             # [B, S, S]
    enc = encoder_stack(x, enc_self_add, params["enc"], B, S_enc, n_heads)   # [B*S, H]

    # ---- decode ----
    pos_dec = params["pos_emb"][dec_positions]                        # [B, Sd, H]
    y = (params["tok_emb_out"][dec_ids] * scale + pos_dec).reshape(B * S_dec, H)
    dec_self_add = jnp.where(dec_self_mask, 0.0, NEG).astype(jnp.float32)    # [B, Sd, Sd]
    cross_allowed = cross_block_mask & (~enc_pad_mask[:, None, :])           # no double -1e9
    cross_add = jnp.where(cross_allowed, 0.0, NEG).astype(jnp.float32)       # [B, Sd, Se]

    logits = decoder_stack(y, enc, dec_self_add, cross_add, params["dec"],
                           params["w_out"], params["b_out"], B, S_dec, S_enc, n_heads)
    return logits.reshape(B, S_dec, -1)


# ----------------------------------------------------------------------------
# Mask / position helpers (mirror utils.square_causal_block_mask etc.)
# ----------------------------------------------------------------------------

def _group_ids(lengths, size):
    ids = []
    for g, L in enumerate(lengths):
        ids += [g] * int(L)
    ids += [len(lengths)] * (size - len(ids))     # padding positions get their own group
    return jnp.array(ids, jnp.int32)


def square_causal_block_mask(size, lengths):
    gid = _group_ids(lengths, size)
    i = jnp.arange(size)[:, None]
    j = jnp.arange(size)[None, :]
    allowed = (gid[:, None] == gid[None, :]) & (j <= i)
    return allowed | (i == j)


def rectangular_block_mask(q_size, k_size, q_lengths, k_lengths):
    qg = _group_ids(q_lengths, q_size)
    kg = _group_ids(k_lengths, k_size)
    allowed = qg[:, None] == kg[None, :]
    # padded decoder rows: allow everything to avoid all -inf softmax rows
    pad_q = jnp.arange(q_size)[:, None] >= int(sum(q_lengths))
    return allowed | pad_q


def decoder_positions_from_groups(enc_group_lengths, dec_group_lengths, size):
    starts = [0]
    for L in enc_group_lengths[:-1]:
        starts.append(starts[-1] + int(L))
    pos = []
    for s, dl in zip(starts, dec_group_lengths):
        pos += list(range(s, s + int(dl)))
    pos += [0] * (size - len(pos))
    return jnp.array(pos, jnp.int32)


# ----------------------------------------------------------------------------
# Parameter init (deterministic, synthetic; matmul weights stored bf16)
# ----------------------------------------------------------------------------

def init_params(key, vocab_in, vocab_out, H, FF, n_enc, n_dec, max_len,
                pad_in, pad_out):
    keys = iter(jax.random.split(key, 64))

    def nrm(shape, std=0.02):
        return jax.random.normal(next(keys), shape, jnp.float32) * std

    def lin(L, din, dout):
        return nrm((L, din, dout)).astype(jnp.bfloat16), jnp.zeros((L, 1, dout), jnp.float32)

    def ln(L):
        return jnp.ones((L, 1, H), jnp.float32), jnp.zeros((L, 1, H), jnp.float32)

    enc = {}
    enc["wq"], enc["bq"] = lin(n_enc, H, H)
    enc["wk"], enc["bk"] = lin(n_enc, H, H)
    enc["wv"], enc["bv"] = lin(n_enc, H, H)
    enc["wo"], enc["bo"] = lin(n_enc, H, H)
    enc["g1"], enc["be1"] = ln(n_enc)
    enc["w1"], enc["b1"] = lin(n_enc, H, FF)
    enc["w2"], enc["b2"] = lin(n_enc, FF, H)
    enc["g2"], enc["be2"] = ln(n_enc)

    dec = {}
    dec["swq"], dec["sbq"] = lin(n_dec, H, H)
    dec["swk"], dec["sbk"] = lin(n_dec, H, H)
    dec["swv"], dec["sbv"] = lin(n_dec, H, H)
    dec["swo"], dec["sbo"] = lin(n_dec, H, H)
    dec["g1"], dec["be1"] = ln(n_dec)
    dec["cwq"], dec["cbq"] = lin(n_dec, H, H)
    dec["cwk"], dec["cbk"] = lin(n_dec, H, H)
    dec["cwv"], dec["cbv"] = lin(n_dec, H, H)
    dec["cwo"], dec["cbo"] = lin(n_dec, H, H)
    dec["g2"], dec["be2"] = ln(n_dec)
    dec["w1"], dec["b1"] = lin(n_dec, H, FF)
    dec["w2"], dec["b2"] = lin(n_dec, FF, H)
    dec["g3"], dec["be3"] = ln(n_dec)

    tok_in = nrm((vocab_in, H)).at[pad_in].set(0.0)      # padding_idx -> zero row
    tok_out = nrm((vocab_out, H)).at[pad_out].set(0.0)

    return {
        "tok_emb_in": tok_in,
        "tok_emb_out": tok_out,
        "pos_emb": nrm((max_len, H)),
        "enc": enc,
        "dec": dec,
        "w_out": nrm((H, vocab_out)).astype(jnp.bfloat16),
        "b_out": jnp.zeros((1, vocab_out), jnp.float32),
    }


# ----------------------------------------------------------------------------
# Main
# ----------------------------------------------------------------------------

if __name__ == "__main__":
    B = 2
    S_ENC = 16          # padded encoder length (context node sequence)
    S_DEC = 16          # padded decoder length (cfg.max_output_length analogue)
    H = 128             # cfg.node_hidden_dim (lane-dense)
    NH = 4
    FF = 256
    N_ENC_LAYERS = 2
    N_DEC_LAYERS = 2    # cfg.num_decoder_layers
    VOCAB_IN = 50       # input tokenizer vocab
    VOCAB_OUT = 128     # output tokenizer vocab (lane-dense final projection)
    MAX_LEN = 64
    PAD_IN = 0
    PAD_OUT = 0

    key = jax.random.PRNGKey(0)
    k_par, k_enc, k_dec = jax.random.split(key, 3)
    params = init_params(k_par, VOCAB_IN, VOCAB_OUT, H, FF,
                         N_ENC_LAYERS, N_DEC_LAYERS, MAX_LEN, PAD_IN, PAD_OUT)

    # variable-length inputs, padded like utils.pad()
    enc_lengths = [16, 12]
    dec_lengths = [14, 10]
    encoder_group_lengths = [[6, 5, 5], [4, 4, 4]]   # sums == enc_lengths
    decoder_group_lengths = [[5, 6, 3], [3, 4, 3]]   # sums == dec_lengths

    enc_raw = jax.random.randint(k_enc, (B, S_ENC), 1, VOCAB_IN, jnp.int32)
    dec_raw = jax.random.randint(k_dec, (B, S_DEC), 1, VOCAB_OUT, jnp.int32)
    enc_pos = jnp.arange(S_ENC)[None, :]
    dec_pos_idx = jnp.arange(S_DEC)[None, :]
    enc_len_arr = jnp.array(enc_lengths)[:, None]
    dec_len_arr = jnp.array(dec_lengths)[:, None]
    enc_ids = jnp.where(enc_pos < enc_len_arr, enc_raw, PAD_IN)
    dec_ids = jnp.where(dec_pos_idx < dec_len_arr, dec_raw, PAD_OUT)
    enc_pad_mask = enc_pos >= enc_len_arr            # True = padding

    dec_self_mask = jnp.stack(
        [square_causal_block_mask(S_DEC, decoder_group_lengths[b]) for b in range(B)])
    cross_block_mask = jnp.stack(
        [rectangular_block_mask(S_DEC, S_ENC, decoder_group_lengths[b],
                                encoder_group_lengths[b]) for b in range(B)])
    dec_positions = jnp.stack(
        [decoder_positions_from_groups(encoder_group_lengths[b],
                                       decoder_group_lengths[b], S_DEC)
         for b in range(B)])

    fwd = jax.jit(lambda p, a, b_, c, d, e, f: forward(p, a, b_, c, d, e, f, NH))
    logits = fwd(params, enc_ids, enc_pad_mask, dec_ids, dec_positions,
                 dec_self_mask, cross_block_mask)
    jax.block_until_ready(logits)

    assert logits.shape == (B, S_DEC, VOCAB_OUT)
    assert bool(jnp.all(jnp.isfinite(logits)))
    print("KERNEL_OK")
</pallas_src>

<mosaic_0001>
module attributes {stable_mosaic.version = 11 : i64} {
  func.func @kernel(%arg0: memref<32x128xf32, #tpu.memory_space<vmem>>, %arg1: memref<2x16x16xf32, #tpu.memory_space<vmem>>, %arg2: memref<2x128x128xbf16, #tpu.memory_space<vmem>>, %arg3: memref<2x1x128xf32, #tpu.memory_space<vmem>>, %arg4: memref<2x128x128xbf16, #tpu.memory_space<vmem>>, %arg5: memref<2x1x128xf32, #tpu.memory_space<vmem>>, %arg6: memref<2x128x128xbf16, #tpu.memory_space<vmem>>, %arg7: memref<2x1x128xf32, #tpu.memory_space<vmem>>, %arg8: memref<2x128x128xbf16, #tpu.memory_space<vmem>>, %arg9: memref<2x1x128xf32, #tpu.memory_space<vmem>>, %arg10: memref<2x1x128xf32, #tpu.memory_space<vmem>>, %arg11: memref<2x1x128xf32, #tpu.memory_space<vmem>>, %arg12: memref<2x128x256xbf16, #tpu.memory_space<vmem>>, %arg13: memref<2x1x256xf32, #tpu.memory_space<vmem>>, %arg14: memref<2x256x128xbf16, #tpu.memory_space<vmem>>, %arg15: memref<2x1x128xf32, #tpu.memory_space<vmem>>, %arg16: memref<2x1x128xf32, #tpu.memory_space<vmem>>, %arg17: memref<2x1x128xf32, #tpu.memory_space<vmem>>, %arg18: memref<32x128xf32, #tpu.memory_space<vmem>>) attributes {dimension_semantics = [], scalar_prefetch = 0 : i64, scratch_operands = 0 : i64, tpu.core_type = #tpu.core_type<tc>} {
    %c0 = arith.constant 0 : index
    %c0_0 = arith.constant 0 : index
    %0 = vector.load %arg0[%c0, %c0_0] : memref<32x128xf32, #tpu.memory_space<vmem>>, vector<32x128xf32>
    %c0_1 = arith.constant 0 : index
    %c0_2 = arith.constant 0 : index
    %c0_3 = arith.constant 0 : index
    %1 = vector.load %arg1[%c0_1, %c0_2, %c0_3] : memref<2x16x16xf32, #tpu.memory_space<vmem>>, vector<2x16x16xf32>
    %c0_4 = arith.constant 0 : index
    %c0_5 = arith.constant 0 : index
    %c0_6 = arith.constant 0 : index
    %2 = vector.load %arg2[%c0_4, %c0_5, %c0_6] : memref<2x128x128xbf16, #tpu.memory_space<vmem>>, vector<1x128x128xbf16>
    %3 = vector.shape_cast %2 : vector<1x128x128xbf16> to vector<128x128xbf16>
    %c0_7 = arith.constant 0 : index
    %c0_8 = arith.constant 0 : index
    %c0_9 = arith.constant 0 : index
    %4 = vector.load %arg3[%c0_7, %c0_8, %c0_9] : memref<2x1x128xf32, #tpu.memory_space<vmem>>, vector<1x1x128xf32>
    %5 = vector.shape_cast %4 : vector<1x1x128xf32> to vector<1x128xf32>
    %c0_10 = arith.constant 0 : index
    %c0_11 = arith.constant 0 : index
    %c0_12 = arith.constant 0 : index
    %6 = vector.load %arg4[%c0_10, %c0_11, %c0_12] : memref<2x128x128xbf16, #tpu.memory_space<vmem>>, vector<1x128x128xbf16>
    %7 = vector.shape_cast %6 : vector<1x128x128xbf16> to vector<128x128xbf16>
    %c0_13 = arith.constant 0 : index
    %c0_14 = arith.constant 0 : index
    %c0_15 = arith.constant 0 : index
    %8 = vector.load %arg5[%c0_13, %c0_14, %c0_15] : memref<2x1x128xf32, #tpu.memory_space<vmem>>, vector<1x1x128xf32>
    %9 = vector.shape_cast %8 : vector<1x1x128xf32> to vector<1x128xf32>
    %c0_16 = arith.constant 0 : index
    %c0_17 = arith.constant 0 : index
    %c0_18 = arith.constant 0 : index
    %10 = vector.load %arg6[%c0_16, %c0_17, %c0_18] : memref<2x128x128xbf16, #tpu.memory_space<vmem>>, vector<1x128x128xbf16>
    %11 = vector.shape_cast %10 : vector<1x128x128xbf16> to vector<128x128xbf16>
    %c0_19 = arith.constant 0 : index
    %c0_20 = arith.constant 0 : index
    %c0_21 = arith.constant 0 : index
    %12 = vector.load %arg7[%c0_19, %c0_20, %c0_21] : memref<2x1x128xf32, #tpu.memory_space<vmem>>, vector<1x1x128xf32>
    %13 = vector.shape_cast %12 : vector<1x1x128xf32> to vector<1x128xf32>
    %c0_22 = arith.constant 0 : index
    %c0_23 = arith.constant 0 : index
    %c0_24 = arith.constant 0 : index
    %14 = vector.load %arg8[%c0_22, %c0_23, %c0_24] : memref<2x128x128xbf16, #tpu.memory_space<vmem>>, vector<1x128x128xbf16>
    %15 = vector.shape_cast %14 : vector<1x128x128xbf16> to vector<128x128xbf16>
    %c0_25 = arith.constant 0 : index
    %c0_26 = arith.constant 0 : index
    %c0_27 = arith.constant 0 : index
    %16 = vector.load %arg9[%c0_25, %c0_26, %c0_27] : memref<2x1x128xf32, #tpu.memory_space<vmem>>, vector<1x1x128xf32>
    %17 = vector.shape_cast %16 : vector<1x1x128xf32> to vector<1x128xf32>
    %18 = arith.truncf %0 : vector<32x128xf32> to vector<32x128xbf16>
    %cst = arith.constant dense<0.000000e+00> : vector<32x128xf32>
    %19 = tpu.matmul %18, %3, %cst {dimension_numbers = #tpu.dot_dimension_numbers<[1], [0], [0], [1], [0, 0, 1, 1], [], []>} : vector<32x128xbf16>, vector<128x128xbf16>, vector<32x128xf32> -> vector<32x128xf32>
    %20 = vector.broadcast %5 : vector<1x128xf32> to vector<32x128xf32>
    %21 = arith.addf %19, %20 : vector<32x128xf32>
    %22 = arith.truncf %0 : vector<32x128xf32> to vector<32x128xbf16>
    %cst_28 = arith.constant dense<0.000000e+00> : vector<32x128xf32>
    %23 = tpu.matmul %22, %7, %cst_28 {dimension_numbers = #tpu.dot_dimension_numbers<[1], [0], [0], [1], [0, 0, 1, 1], [], []>} : vector<32x128xbf16>, vector<128x128xbf16>, vector<32x128xf32> -> vector<32x128xf32>
    %24 = vector.broadcast %9 : vector<1x128xf32> to vector<32x128xf32>
    %25 = arith.addf %23, %24 : vector<32x128xf32>
    %26 = arith.truncf %0 : vector<32x128xf32> to vector<32x128xbf16>
    %cst_29 = arith.constant dense<0.000000e+00> : vector<32x128xf32>
    %27 = tpu.matmul %26, %11, %cst_29 {dimension_numbers = #tpu.dot_dimension_numbers<[1], [0], [0], [1], [0, 0, 1, 1], [], []>} : vector<32x128xbf16>, vector<128x128xbf16>, vector<32x128xf32> -> vector<32x128xf32>
    %28 = vector.broadcast %13 : vector<1x128xf32> to vector<32x128xf32>
    %29 = arith.addf %27, %28 : vector<32x128xf32>
    %cst_30 = arith.constant 0.176776692 : f32
    %30 = vector.broadcast %cst_30 : f32 to vector<32x128xf32>
    %31 = arith.mulf %21, %30 : vector<32x128xf32>
    %32 = vector.shape_cast %31 : vector<32x128xf32> to vector<2x16x128xf32>
    %33 = vector.shape_cast %25 : vector<32x128xf32> to vector<2x16x128xf32>
    %34 = vector.shape_cast %29 : vector<32x128xf32> to vector<2x16x128xf32>
    %35 = vector.extract_strided_slice %32 {offsets = [0, 0, 0], sizes = [2, 16, 32], strides = [1, 1, 1]} : vector<2x16x128xf32> to vector<2x16x32xf32>
    %36 = vector.extract_strided_slice %33 {offsets = [0, 0, 0], sizes = [2, 16, 32], strides = [1, 1, 1]} : vector<2x16x128xf32> to vector<2x16x32xf32>
    "tpu.trace_start"() <{level = 10 : i32, message = "bqd,bkd->bqk"}> : () -> ()
    %cst_31 = arith.constant dense<0.000000e+00> : vector<2x16x16xf32>
    %37 = tpu.matmul %35, %36, %cst_31 {dimension_numbers = #tpu.dot_dimension_numbers<[2], [2], [1], [1], [0, 0, 0, 1, 1, 1], [0], [0]>} : vector<2x16x32xf32>, vector<2x16x32xf32>, vector<2x16x16xf32> -> vector<2x16x16xf32>
    "tpu.trace_stop"() : () -> ()
    %38 = arith.addf %37, %1 : vector<2x16x16xf32>
    %cst_32 = arith.constant dense<0xFF800000> : vector<2x16xf32>
    %39 = vector.multi_reduction <maximumf>, %38, %cst_32 [2] : vector<2x16x16xf32> to vector<2x16xf32>
    %40 = vector.shape_cast %39 : vector<2x16xf32> to vector<2x16x1xf32>
    %cst_33 = arith.constant -1.000000e+09 : f32
    %41 = vector.broadcast %cst_33 : f32 to vector<2x16x1xf32>
    %42 = arith.maximumf %40, %41 : vector<2x16x1xf32>
    %43 = vector.broadcast %42 : vector<2x16x1xf32> to vector<2x16x16xf32>
    %44 = arith.subf %38, %43 : vector<2x16x16xf32>
    %45 = math.exp %44 : vector<2x16x16xf32>
    %cst_34 = arith.constant dense<0.000000e+00> : vector<2x16xf32>
    %46 = vector.multi_reduction <add>, %45, %cst_34 [2] : vector<2x16x16xf32> to vector<2x16xf32>
    %47 = vector.shape_cast %46 : vector<2x16xf32> to vector<2x16x1xf32>
    %48 = tpu.reciprocal %47 {approx = true} : vector<2x16x1xf32> -> vector<2x16x1xf32>
    %49 = vector.broadcast %48 : vector<2x16x1xf32> to vector<2x16x16xf32>
    %50 = arith.mulf %45, %49 : vector<2x16x16xf32>
    %51 = vector.extract_strided_slice %34 {offsets = [0, 0, 0], sizes = [2, 16, 32], strides = [1, 1, 1]} : vector<2x16x128xf32> to vector<2x16x32xf32>
    "tpu.trace_start"() <{level = 10 : i32, message = "bqk,bkd->bqd"}> : () -> ()
    %cst_35 = arith.constant dense<0.000000e+00> : vector<2x16x32xf32>
    %52 = tpu.matmul %50, %51, %cst_35 {dimension_numbers = #tpu.dot_dimension_numbers<[2], [1], [1], [2], [0, 0, 0, 1, 1, 2], [0], [0]>} : vector<2x16x16xf32>, vector<2x16x32xf32>, vector<2x16x32xf32> -> vector<2x16x32xf32>
    "tpu.trace_stop"() : () -> ()
    %53 = vector.extract_strided_slice %32 {offsets = [0, 0, 32], sizes = [2, 16, 32], strides = [1, 1, 1]} : vector<2x16x128xf32> to vector<2x16x32xf32>
    %54 = vector.extract_strided_slice %33 {offsets = [0, 0, 32], sizes = [2, 16, 32], strides = [1, 1, 1]} : vector<2x16x128xf32> to vector<2x16x32xf32>
    "tpu.trace_start"() <{level = 10 : i32, message = "bqd,bkd->bqk"}> : () -> ()
    %cst_36 = arith.constant dense<0.000000e+00> : vector<2x16x16xf32>
    %55 = tpu.matmul %53, %54, %cst_36 {dimension_numbers = #tpu.dot_dimension_numbers<[2], [2], [1], [1], [0, 0, 0, 1, 1, 1], [0], [0]>} : vector<2x16x32xf32>, vector<2x16x32xf32>, vector<2x16x16xf32> -> vector<2x16x16xf32>
    "tpu.trace_stop"() : () -> ()
    %56 = arith.addf %55, %1 : vector<2x16x16xf32>
    %cst_37 = arith.constant dense<0xFF800000> : vector<2x16xf32>
    %57 = vector.multi_reduction <maximumf>, %56, %cst_37 [2] : vector<2x16x16xf32> to vector<2x16xf32>
    %58 = vector.shape_cast %57 : vector<2x16xf32> to vector<2x16x1xf32>
    %cst_38 = arith.constant -1.000000e+09 : f32
    %59 = vector.broadcast %cst_38 : f32 to vector<2x16x1xf32>
    %60 = arith.maximumf %58, %59 : vector<2x16x1xf32>
    %61 = vector.broadcast %60 : vector<2x16x1xf32> to vector<2x16x16xf32>
    %62 = arith.subf %56, %61 : vector<2x16x16xf32>
    %63 = math.exp %62 : vector<2x16x16xf32>
    %cst_39 = arith.constant dense<0.000000e+00> : vector<2x16xf32>
    %64 = vector.multi_reduction <add>, %63, %cst_39 [2] : vector<2x16x16xf32> to vector<2x16xf32>
    %65 = vector.shape_cast %64 : vector<2x16xf32> to vector<2x16x1xf32>
    %66 = tpu.reciprocal %65 {approx = true} : vector<2x16x1xf32> -> vector<2x16x1xf32>
    %67 = vector.broadcast %66 : vector<2x16x1xf32> to vector<2x16x16xf32>
    %68 = arith.mulf %63, %67 : vector<2x16x16xf32>
    %69 = vector.extract_strided_slice %34 {offsets = [0, 0, 32], sizes = [2, 16, 32], strides = [1, 1, 1]} : vector<2x16x128xf32> to vector<2x16x32xf32>
    "tpu.trace_start"() <{level = 10 : i32, message = "bqk,bkd->bqd"}> : () -> ()
    %cst_40 = arith.constant dense<0.000000e+00> : vector<2x16x32xf32>
    %70 = tpu.matmul %68, %69, %cst_40 {dimension_numbers = #tpu.dot_dimension_numbers<[2], [1], [1], [2], [0, 0, 0, 1, 1, 2], [0], [0]>} : vector<2x16x16xf32>, vector<2x16x32xf32>, vector<2x16x32xf32> -> vector<2x16x32xf32>
    "tpu.trace_stop"() : () -> ()
    %71 = vector.extract_strided_slice %32 {offsets = [0, 0, 64], sizes = [2, 16, 32], strides = [1, 1, 1]} : vector<2x16x128xf32> to vector<2x16x32xf32>
    %72 = vector.extract_strided_slice %33 {offsets = [0, 0, 64], sizes = [2, 16, 32], strides = [1, 1, 1]} : vector<2x16x128xf32> to vector<2x16x32xf32>
    "tpu.trace_start"() <{level = 10 : i32, message = "bqd,bkd->bqk"}> : () -> ()
    %cst_41 = arith.constant dense<0.000000e+00> : vector<2x16x16xf32>
    %73 = tpu.matmul %71, %72, %cst_41 {dimension_numbers = #tpu.dot_dimension_numbers<[2], [2], [1], [1], [0, 0, 0, 1, 1, 1], [0], [0]>} : vector<2x16x32xf32>, vector<2x16x32xf32>, vector<2x16x16xf32> -> vector<2x16x16xf32>
    "tpu.trace_stop"() : () -> ()
    %74 = arith.addf %73, %1 : vector<2x16x16xf32>
    %cst_42 = arith.constant dense<0xFF800000> : vector<2x16xf32>
    %75 = vector.multi_reduction <maximumf>, %74, %cst_42 [2] : vector<2x16x16xf32> to vector<2x16xf32>
    %76 = vector.shape_cast %75 : vector<2x16xf32> to vector<2x16x1xf32>
    %cst_43 = arith.constant -1.000000e+09 : f32
    %77 = vector.broadcast %cst_43 : f32 to vector<2x16x1xf32>
    %78 = arith.maximumf %76, %77 : vector<2x16x1xf32>
    %79 = vector.broadcast %78 : vector<2x16x1xf32> to vector<2x16x16xf32>
    %80 = arith.subf %74, %79 : vector<2x16x16xf32>
    %81 = math.exp %80 : vector<2x16x16xf32>
    %cst_44 = arith.constant dense<0.000000e+00> : vector<2x16xf32>
    %82 = vector.multi_reduction <add>, %81, %cst_44 [2] : vector<2x16x16xf32> to vector<2x16xf32>
    %83 = vector.shape_cast %82 : vector<2x16xf32> to vector<2x16x1xf32>
    %84 = tpu.reciprocal %83 {approx = true} : vector<2x16x1xf32> -> vector<2x16x1xf32>
    %85 = vector.broadcast %84 : vector<2x16x1xf32> to vector<2x16x16xf32>
    %86 = arith.mulf %81, %85 : vector<2x16x16xf32>
    %87 = vector.extract_strided_slice %34 {offsets = [0, 0, 64], sizes = [2, 16, 32], strides = [1, 1, 1]} : vector<2x16x128xf32> to vector<2x16x32xf32>
    "tpu.trace_start"() <{level = 10 : i32, message = "bqk,bkd->bqd"}> : () -> ()
    %cst_45 = arith.constant dense<0.000000e+00> : vector<2x16x32xf32>
    %88 = tpu.matmul %86, %87, %cst_45 {dimension_numbers = #tpu.dot_dimension_numbers<[2], [1], [1], [2], [0, 0, 0, 1, 1, 2], [0], [0]>} : vector<2x16x16xf32>, vector<2x16x32xf32>, vector<2x16x32xf32> -> vector<2x16x32xf32>
    "tpu.trace_stop"() : () -> ()
    %89 = vector.extract_strided_slice %32 {offsets = [0, 0, 96], sizes = [2, 16, 32], strides = [1, 1, 1]} : vector<2x16x128xf32> to vector<2x16x32xf32>
    %90 = vector.extract_strided_slice %33 {offsets = [0, 0, 96], sizes = [2, 16, 32], strides = [1, 1, 1]} : vector<2x16x128xf32> to vector<2x16x32xf32>
    "tpu.trace_start"() <{level = 10 : i32, message = "bqd,bkd->bqk"}> : () -> ()
    %cst_46 = arith.constant dense<0.000000e+00> : vector<2x16x16xf32>
    %91 = tpu.matmul %89, %90, %cst_46 {dimension_numbers = #tpu.dot_dimension_numbers<[2], [2], [1], [1], [0, 0, 0, 1, 1, 1], [0], [0]>} : vector<2x16x32xf32>, vector<2x16x32xf32>, vector<2x16x16xf32> -> vector<2x16x16xf32>
    "tpu.trace_stop"() : () -> ()
    %92 = arith.addf %91, %1 : vector<2x16x16xf32>
    %cst_47 = arith.constant dense<0xFF800000> : vector<2x16xf32>
    %93 = vector.multi_reduction <maximumf>, %92, %cst_47 [2] : vector<2x16x16xf32> to vector<2x16xf32>
    %94 = vector.shape_cast %93 : vector<2x16xf32> to vector<2x16x1xf32>
    %cst_48 = arith.constant -1.000000e+09 : f32
    %95 = vector.broadcast %cst_48 : f32 to vector<2x16x1xf32>
    %96 = arith.maximumf %94, %95 : vector<2x16x1xf32>
    %97 = vector.broadcast %96 : vector<2x16x1xf32> to vector<2x16x16xf32>
    %98 = arith.subf %92, %97 : vector<2x16x16xf32>
    %99 = math.exp %98 : vector<2x16x16xf32>
    %cst_49 = arith.constant dense<0.000000e+00> : vector<2x16xf32>
    %100 = vector.multi_reduction <add>, %99, %cst_49 [2] : vector<2x16x16xf32> to vector<2x16xf32>
    %101 = vector.shape_cast %100 : vector<2x16xf32> to vector<2x16x1xf32>
    %102 = tpu.reciprocal %101 {approx = true} : vector<2x16x1xf32> -> vector<2x16x1xf32>
    %103 = vector.broadcast %102 : vector<2x16x1xf32> to vector<2x16x16xf32>
    %104 = arith.mulf %99, %103 : vector<2x16x16xf32>
    %105 = vector.extract_strided_slice %34 {offsets = [0, 0, 96], sizes = [2, 16, 32], strides = [1, 1, 1]} : vector<2x16x128xf32> to vector<2x16x32xf32>
    "tpu.trace_start"() <{level = 10 : i32, message = "bqk,bkd->bqd"}> : () -> ()
    %cst_50 = arith.constant dense<0.000000e+00> : vector<2x16x32xf32>
    %106 = tpu.matmul %104, %105, %cst_50 {dimension_numbers = #tpu.dot_dimension_numbers<[2], [1], [1], [2], [0, 0, 0, 1, 1, 2], [0], [0]>} : vector<2x16x16xf32>, vector<2x16x32xf32>, vector<2x16x32xf32> -> vector<2x16x32xf32>
    "tpu.trace_stop"() : () -> ()
    %107 = tpu.concatenate %52, %70, %88, %106 in 2 : vector<2x16x32xf32>, vector<2x16x32xf32>, vector<2x16x32xf32>, vector<2x16x32xf32> -> vector<2x16x128xf32>
    %108 = vector.shape_cast %107 : vector<2x16x128xf32> to vector<32x128xf32>
    %109 = arith.truncf %108 : vector<32x128xf32> to vector<32x128xbf16>
    %cst_51 = arith.constant dense<0.000000e+00> : vector<32x128xf32>
    %110 = tpu.matmul %109, %15, %cst_51 {dimension_numbers = #tpu.dot_dimension_numbers<[1], [0], [0], [1], [0, 0, 1, 1], [], []>} : vector<32x128xbf16>, vector<128x128xbf16>, vector<32x128xf32> -> vector<32x128xf32>
    %111 = vector.broadcast %17 : vector<1x128xf32> to vector<32x128xf32>
    %112 = arith.addf %110, %111 : vector<32x128xf32>
    %113 = arith.addf %0, %112 : vector<32x128xf32>
    %c0_52 = arith.constant 0 : index
    %c0_53 = arith.constant 0 : index
    %c0_54 = arith.constant 0 : index
    %114 = vector.load %arg10[%c0_52, %c0_53, %c0_54] : memref<2x1x128xf32, #tpu.memory_space<vmem>>, vector<1x1x128xf32>
    %115 = vector.shape_cast %114 : vector<1x1x128xf32> to vector<1x128xf32>
    %c0_55 = arith.constant 0 : index
    %c0_56 = arith.constant 0 : index
    %c0_57 = arith.constant 0 : index
    %116 = vector.load %arg11[%c0_55, %c0_56, %c0_57] : memref<2x1x128xf32, #tpu.memory_space<vmem>>, vector<1x1x128xf32>
    %117 = vector.shape_cast %116 : vector<1x1x128xf32> to vector<1x128xf32>
    %cst_58 = arith.constant dense<0.000000e+00> : vector<32xf32>
    %118 = vector.multi_reduction <add>, %113, %cst_58 [1] : vector<32x128xf32> to vector<32xf32>
    %119 = vector.shape_cast %118 : vector<32xf32> to vector<32x1xf32>
    %cst_59 = arith.constant 1.280000e+02 : f32
    %120 = vector.broadcast %cst_59 : f32 to vector<32x1xf32>
    %121 = arith.divf %119, %120 : vector<32x1xf32>
    %122 = vector.broadcast %121 : vector<32x1xf32> to vector<32x128xf32>
    %123 = arith.subf %113, %122 : vector<32x128xf32>
    %124 = arith.mulf %123, %123 : vector<32x128xf32>
    %cst_60 = arith.constant dense<0.000000e+00> : vector<32xf32>
    %125 = vector.multi_reduction <add>, %124, %cst_60 [1] : vector<32x128xf32> to vector<32xf32>
    %126 = vector.shape_cast %125 : vector<32xf32> to vector<32x1xf32>
    %cst_61 = arith.constant 1.280000e+02 : f32
    %127 = vector.broadcast %cst_61 : f32 to vector<32x1xf32>
    %128 = arith.divf %126, %127 : vector<32x1xf32>
    %129 = vector.broadcast %121 : vector<32x1xf32> to vector<32x128xf32>
    %130 = arith.subf %113, %129 : vector<32x128xf32>
    %cst_62 = arith.constant 9.99999974E-6 : f32
    %131 = vector.broadcast %cst_62 : f32 to vector<32x1xf32>
    %132 = arith.addf %128, %131 : vector<32x1xf32>
    %133 = math.rsqrt %132 : vector<32x1xf32>
    %134 = vector.broadcast %133 : vector<32x1xf32> to vector<32x128xf32>
    %135 = arith.mulf %130, %134 : vector<32x128xf32>
    %136 = vector.broadcast %115 : vector<1x128xf32> to vector<32x128xf32>
    %137 = arith.mulf %135, %136 : vector<32x128xf32>
    %138 = vector.broadcast %117 : vector<1x128xf32> to vector<32x128xf32>
    %139 = arith.addf %137, %138 : vector<32x128xf32>
    %c0_63 = arith.constant 0 : index
    %c0_64 = arith.constant 0 : index
    %c0_65 = arith.constant 0 : index
    %140 = vector.load %arg12[%c0_63, %c0_64, %c0_65] : memref<2x128x256xbf16, #tpu.memory_space<vmem>>, vector<1x128x256xbf16>
    %141 = vector.shape_cast %140 : vector<1x128x256xbf16> to vector<128x256xbf16>
    %c0_66 = arith.constant 0 : index
    %c0_67 = arith.constant 0 : index
    %c0_68 = arith.constant 0 : index
    %142 = vector.load %arg13[%c0_66, %c0_67, %c0_68] : memref<2x1x256xf32, #tpu.memory_space<vmem>>, vector<1x1x256xf32>
    %143 = vector.shape_cast %142 : vector<1x1x256xf32> to vector<1x256xf32>
    %c0_69 = arith.constant 0 : index
    %c0_70 = arith.constant 0 : index
    %c0_71 = arith.constant 0 : index
    %144 = vector.load %arg14[%c0_69, %c0_70, %c0_71] : memref<2x256x128xbf16, #tpu.memory_space<vmem>>, vector<1x256x128xbf16>
    %145 = vector.shape_cast %144 : vector<1x256x128xbf16> to vector<256x128xbf16>
    %c0_72 = arith.constant 0 : index
    %c0_73 = arith.constant 0 : index
    %c0_74 = arith.constant 0 : index
    %146 = vector.load %arg15[%c0_72, %c0_73, %c0_74] : memref<2x1x128xf32, #tpu.memory_space<vmem>>, vector<1x1x128xf32>
    %147 = vector.shape_cast %146 : vector<1x1x128xf32> to vector<1x128xf32>
    %148 = arith.truncf %139 : vector<32x128xf32> to vector<32x128xbf16>
    %cst_75 = arith.constant dense<0.000000e+00> : vector<32x256xf32>
    %149 = tpu.matmul %148, %141, %cst_75 {dimension_numbers = #tpu.dot_dimension_numbers<[1], [0], [0], [1], [0, 0, 1, 1], [], []>} : vector<32x128xbf16>, vector<128x256xbf16>, vector<32x256xf32> -> vector<32x256xf32>
    %150 = vector.broadcast %143 : vector<1x256xf32> to vector<32x256xf32>
    %151 = arith.addf %149, %150 : vector<32x256xf32>
    %cst_76 = arith.constant 0.000000e+00 : f32
    %152 = vector.broadcast %cst_76 : f32 to vector<32x256xf32>
    %153 = arith.maximumf %151, %152 : vector<32x256xf32>
    %154 = arith.truncf %153 : vector<32x256xf32> to vector<32x256xbf16>
    %cst_77 = arith.constant dense<0.000000e+00> : vector<32x128xf32>
    %155 = tpu.matmul %154, %145, %cst_77 {dimension_numbers = #tpu.dot_dimension_numbers<[1], [0], [0], [1], [0, 0, 1, 1], [], []>} : vector<32x256xbf16>, vector<256x128xbf16>, vector<32x128xf32> -> vector<32x128xf32>
    %156 = vector.broadcast %147 : vector<1x128xf32> to vector<32x128xf32>
    %157 = arith.addf %155, %156 : vector<32x128xf32>
    %158 = arith.addf %139, %157 : vector<32x128xf32>
    %c0_78 = arith.constant 0 : index
    %c0_79 = arith.constant 0 : index
    %c0_80 = arith.constant 0 : index
    %159 = vector.load %arg16[%c0_78, %c0_79, %c0_80] : memref<2x1x128xf32, #tpu.memory_space<vmem>>, vector<1x1x128xf32>
    %160 = vector.shape_cast %159 : vector<1x1x128xf32> to vector<1x128xf32>
    %c0_81 = arith.constant 0 : index
    %c0_82 = arith.constant 0 : index
    %c0_83 = arith.constant 0 : index
    %161 = vector.load %arg17[%c0_81, %c0_82, %c0_83] : memref<2x1x128xf32, #tpu.memory_space<vmem>>, vector<1x1x128xf32>
    %162 = vector.shape_cast %161 : vector<1x1x128xf32> to vector<1x128xf32>
    %cst_84 = arith.constant dense<0.000000e+00> : vector<32xf32>
    %163 = vector.multi_reduction <add>, %158, %cst_84 [1] : vector<32x128xf32> to vector<32xf32>
    %164 = vector.shape_cast %163 : vector<32xf32> to vector<32x1xf32>
    %cst_85 = arith.constant 1.280000e+02 : f32
    %165 = vector.broadcast %cst_85 : f32 to vector<32x1xf32>
    %166 = arith.divf %164, %165 : vector<32x1xf32>
    %167 = vector.broadcast %166 : vector<32x1xf32> to vector<32x128xf32>
    %168 = arith.subf %158, %167 : vector<32x128xf32>
    %169 = arith.mulf %168, %168 : vector<32x128xf32>
    %cst_86 = arith.constant dense<0.000000e+00> : vector<32xf32>
    %170 = vector.multi_reduction <add>, %169, %cst_86 [1] : vector<32x128xf32> to vector<32xf32>
    %171 = vector.shape_cast %170 : vector<32xf32> to vector<32x1xf32>
    %cst_87 = arith.constant 1.280000e+02 : f32
    %172 = vector.broadcast %cst_87 : f32 to vector<32x1xf32>
    %173 = arith.divf %171, %172 : vector<32x1xf32>
    %174 = vector.broadcast %166 : vector<32x1xf32> to vector<32x128xf32>
    %175 = arith.subf %158, %174 : vector<32x128xf32>
    %cst_88 = arith.constant 9.99999974E-6 : f32
    %176 = vector.broadcast %cst_88 : f32 to vector<32x1xf32>
    %177 = arith.addf %173, %176 : vector<32x1xf32>
    %178 = math.rsqrt %177 : vector<32x1xf32>
    %179 = vector.broadcast %178 : vector<32x1xf32> to vector<32x128xf32>
    %180 = arith.mulf %175, %179 : vector<32x128xf32>
    %181 = vector.broadcast %160 : vector<1x128xf32> to vector<32x128xf32>
    %182 = arith.mulf %180, %181 : vector<32x128xf32>
    %183 = vector.broadcast %162 : vector<1x128xf32> to vector<32x128xf32>
    %184 = arith.addf %182, %183 : vector<32x128xf32>
    %c1 = arith.constant 1 : index
    %c0_89 = arith.constant 0 : index
    %c0_90 = arith.constant 0 : index
    %185 = vector.load %arg2[%c1, %c0_89, %c0_90] : memref<2x128x128xbf16, #tpu.memory_space<vmem>>, vector<1x128x128xbf16>
    %186 = vector.shape_cast %185 : vector<1x128x128xbf16> to vector<128x128xbf16>
    %c1_91 = arith.constant 1 : index
    %c0_92 = arith.constant 0 : index
    %c0_93 = arith.constant 0 : index
    %187 = vector.load %arg3[%c1_91, %c0_92, %c0_93] : memref<2x1x128xf32, #tpu.memory_space<vmem>>, vector<1x1x128xf32>
    %188 = vector.shape_cast %187 : vector<1x1x128xf32> to vector<1x128xf32>
    %c1_94 = arith.constant 1 : index
    %c0_95 = arith.constant 0 : index
    %c0_96 = arith.constant 0 : index
    %189 = vector.load %arg4[%c1_94, %c0_95, %c0_96] : memref<2x128x128xbf16, #tpu.memory_space<vmem>>, vector<1x128x128xbf16>
    %190 = vector.shape_cast %189 : vector<1x128x128xbf16> to vector<128x128xbf16>
    %c1_97 = arith.constant 1 : index
    %c0_98 = arith.constant 0 : index
    %c0_99 = arith.constant 0 : index
    %191 = vector.load %arg5[%c1_97, %c0_98, %c0_99] : memref<2x1x128xf32, #tpu.memory_space<vmem>>, vector<1x1x128xf32>
    %192 = vector.shape_cast %191 : vector<1x1x128xf32> to vector<1x128xf32>
    %c1_100 = arith.constant 1 : index
    %c0_101 = arith.constant 0 : index
    %c0_102 = arith.constant 0 : index
    %193 = vector.load %arg6[%c1_100, %c0_101, %c0_102] : memref<2x128x128xbf16, #tpu.memory_space<vmem>>, vector<1x128x128xbf16>
    %194 = vector.shape_cast %193 : vector<1x128x128xbf16> to vector<128x128xbf16>
    %c1_103 = arith.constant 1 : index
    %c0_104 = arith.constant 0 : index
    %c0_105 = arith.constant 0 : index
    %195 = vector.load %arg7[%c1_103, %c0_104, %c0_105] : memref<2x1x128xf32, #tpu.memory_space<vmem>>, vector<1x1x128xf32>
    %196 = vector.shape_cast %195 : vector<1x1x128xf32> to vector<1x128xf32>
    %c1_106 = arith.constant 1 : index
    %c0_107 = arith.constant 0 : index
    %c0_108 = arith.constant 0 : index
    %197 = vector.load %arg8[%c1_106, %c0_107, %c0_108] : memref<2x128x128xbf16, #tpu.memory_space<vmem>>, vector<1x128x128xbf16>
    %198 = vector.shape_cast %197 : vector<1x128x128xbf16> to vector<128x128xbf16>
    %c1_109 = arith.constant 1 : index
    %c0_110 = arith.constant 0 : index
    %c0_111 = arith.constant 0 : index
    %199 = vector.load %arg9[%c1_109, %c0_110, %c0_111] : memref<2x1x128xf32, #tpu.memory_space<vmem>>, vector<1x1x128xf32>
    %200 = vector.shape_cast %199 : vector<1x1x128xf32> to vector<1x128xf32>
    %201 = arith.truncf %184 : vector<32x128xf32> to vector<32x128xbf16>
    %cst_112 = arith.constant dense<0.000000e+00> : vector<32x128xf32>
    %202 = tpu.matmul %201, %186, %cst_112 {dimension_numbers = #tpu.dot_dimension_numbers<[1], [0], [0], [1], [0, 0, 1, 1], [], []>} : vector<32x128xbf16>, vector<128x128xbf16>, vector<32x128xf32> -> vector<32x128xf32>
    %203 = vector.broadcast %188 : vector<1x128xf32> to vector<32x128xf32>
    %204 = arith.addf %202, %203 : vector<32x128xf32>
    %205 = arith.truncf %184 : vector<32x128xf32> to vector<32x128xbf16>
    %cst_113 = arith.constant dense<0.000000e+00> : vector<32x128xf32>
    %206 = tpu.matmul %205, %190, %cst_113 {dimension_numbers = #tpu.dot_dimension_numbers<[1], [0], [0], [1], [0, 0, 1, 1], [], []>} : vector<32x128xbf16>, vector<128x128xbf16>, vector<32x128xf32> -> vector<32x128xf32>
    %207 = vector.broadcast %192 : vector<1x128xf32> to vector<32x128xf32>
    %208 = arith.addf %206, %207 : vector<32x128xf32>
    %209 = arith.truncf %184 : vector<32x128xf32> to vector<32x128xbf16>
    %cst_114 = arith.constant dense<0.000000e+00> : vector<32x128xf32>
    %210 = tpu.matmul %209, %194, %cst_114 {dimension_numbers = #tpu.dot_dimension_numbers<[1], [0], [0], [1], [0, 0, 1, 1], [], []>} : vector<32x128xbf16>, vector<128x128xbf16>, vector<32x128xf32> -> vector<32x128xf32>
    %211 = vector.broadcast %196 : vector<1x128xf32> to vector<32x128xf32>
    %212 = arith.addf %210, %211 : vector<32x128xf32>
    %cst_115 = arith.constant 0.176776692 : f32
    %213 = vector.broadcast %cst_115 : f32 to vector<32x128xf32>
    %214 = arith.mulf %204, %213 : vector<32x128xf32>
    %215 = vector.shape_cast %214 : vector<32x128xf32> to vector<2x16x128xf32>
    %216 = vector.shape_cast %208 : vector<32x128xf32> to vector<2x16x128xf32>
    %217 = vector.shape_cast %212 : vector<32x128xf32> to vector<2x16x128xf32>
    %218 = vector.extract_strided_slice %215 {offsets = [0, 0, 0], sizes = [2, 16, 32], strides = [1, 1, 1]} : vector<2x16x128xf32> to vector<2x16x32xf32>
    %219 = vector.extract_strided_slice %216 {offsets = [0, 0, 0], sizes = [2, 16, 32], strides = [1, 1, 1]} : vector<2x16x128xf32> to vector<2x16x32xf32>
    "tpu.trace_start"() <{level = 10 : i32, message = "bqd,bkd->bqk"}> : () -> ()
    %cst_116 = arith.constant dense<0.000000e+00> : vector<2x16x16xf32>
    %220 = tpu.matmul %218, %219, %cst_116 {dimension_numbers = #tpu.dot_dimension_numbers<[2], [2], [1], [1], [0, 0, 0, 1, 1, 1], [0], [0]>} : vector<2x16x32xf32>, vector<2x16x32xf32>, vector<2x16x16xf32> -> vector<2x16x16xf32>
    "tpu.trace_stop"() : () -> ()
    %221 = arith.addf %220, %1 : vector<2x16x16xf32>
    %cst_117 = arith.constant dense<0xFF800000> : vector<2x16xf32>
    %222 = vector.multi_reduction <maximumf>, %221, %cst_117 [2] : vector<2x16x16xf32> to vector<2x16xf32>
    %223 = vector.shape_cast %222 : vector<2x16xf32> to vector<2x16x1xf32>
    %cst_118 = arith.constant -1.000000e+09 : f32
    %224 = vector.broadcast %cst_118 : f32 to vector<2x16x1xf32>
    %225 = arith.maximumf %223, %224 : vector<2x16x1xf32>
    %226 = vector.broadcast %225 : vector<2x16x1xf32> to vector<2x16x16xf32>
    %227 = arith.subf %221, %226 : vector<2x16x16xf32>
    %228 = math.exp %227 : vector<2x16x16xf32>
    %cst_119 = arith.constant dense<0.000000e+00> : vector<2x16xf32>
    %229 = vector.multi_reduction <add>, %228, %cst_119 [2] : vector<2x16x16xf32> to vector<2x16xf32>
    %230 = vector.shape_cast %229 : vector<2x16xf32> to vector<2x16x1xf32>
    %231 = tpu.reciprocal %230 {approx = true} : vector<2x16x1xf32> -> vector<2x16x1xf32>
    %232 = vector.broadcast %231 : vector<2x16x1xf32> to vector<2x16x16xf32>
    %233 = arith.mulf %228, %232 : vector<2x16x16xf32>
    %234 = vector.extract_strided_slice %217 {offsets = [0, 0, 0], sizes = [2, 16, 32], strides = [1, 1, 1]} : vector<2x16x128xf32> to vector<2x16x32xf32>
    "tpu.trace_start"() <{level = 10 : i32, message = "bqk,bkd->bqd"}> : () -> ()
    %cst_120 = arith.constant dense<0.000000e+00> : vector<2x16x32xf32>
    %235 = tpu.matmul %233, %234, %cst_120 {dimension_numbers = #tpu.dot_dimension_numbers<[2], [1], [1], [2], [0, 0, 0, 1, 1, 2], [0], [0]>} : vector<2x16x16xf32>, vector<2x16x32xf32>, vector<2x16x32xf32> -> vector<2x16x32xf32>
    "tpu.trace_stop"() : () -> ()
    %236 = vector.extract_strided_slice %215 {offsets = [0, 0, 32], sizes = [2, 16, 32], strides = [1, 1, 1]} : vector<2x16x128xf32> to vector<2x16x32xf32>
    %237 = vector.extract_strided_slice %216 {offsets = [0, 0, 32], sizes = [2, 16, 32], strides = [1, 1, 1]} : vector<2x16x128xf32> to vector<2x16x32xf32>
    "tpu.trace_start"() <{level = 10 : i32, message = "bqd,bkd->bqk"}> : () -> ()
    %cst_121 = arith.constant dense<0.000000e+00> : vector<2x16x16xf32>
    %238 = tpu.matmul %236, %237, %cst_121 {dimension_numbers = #tpu.dot_dimension_numbers<[2], [2], [1], [1], [0, 0, 0, 1, 1, 1], [0], [0]>} : vector<2x16x32xf32>, vector<2x16x32xf32>, vector<2x16x16xf32> -> vector<2x16x16xf32>
    "tpu.trace_stop"() : () -> ()
    %239 = arith.addf %238, %1 : vector<2x16x16xf32>
    %cst_122 = arith.constant dense<0xFF800000> : vector<2x16xf32>
    %240 = vector.multi_reduction <maximumf>, %239, %cst_122 [2] : vector<2x16x16xf32> to vector<2x16xf32>
    %241 = vector.shape_cast %240 : vector<2x16xf32> to vector<2x16x1xf32>
    %cst_123 = arith.constant -1.000000e+09 : f32
    %242 = vector.broadcast %cst_123 : f32 to vector<2x16x1xf32>
    %243 = arith.maximumf %241, %242 : vector<2x16x1xf32>
    %244 = vector.broadcast %243 : vector<2x16x1xf32> to vector<2x16x16xf32>
    %245 = arith.subf %239, %244 : vector<2x16x16xf32>
    %246 = math.exp %245 : vector<2x16x16xf32>
    %cst_124 = arith.constant dense<0.000000e+00> : vector<2x16xf32>
    %247 = vector.multi_reduction <add>, %246, %cst_124 [2] : vector<2x16x16xf32> to vector<2x16xf32>
    %248 = vector.shape_cast %247 : vector<2x16xf32> to vector<2x16x1xf32>
    %249 = tpu.reciprocal %248 {approx = true} : vector<2x16x1xf32> -> vector<2x16x1xf32>
    %250 = vector.broadcast %249 : vector<2x16x1xf32> to vector<2x16x16xf32>
    %251 = arith.mulf %246, %250 : vector<2x16x16xf32>
    %252 = vector.extract_strided_slice %217 {offsets = [0, 0, 32], sizes = [2, 16, 32], strides = [1, 1, 1]} : vector<2x16x128xf32> to vector<2x16x32xf32>
    "tpu.trace_start"() <{level = 10 : i32, message = "bqk,bkd->bqd"}> : () -> ()
    %cst_125 = arith.constant dense<0.000000e+00> : vector<2x16x32xf32>
    %253 = tpu.matmul %251, %252, %cst_125 {dimension_numbers = #tpu.dot_dimension_numbers<[2], [1], [1], [2], [0, 0, 0, 1, 1, 2], [0], [0]>} : vector<2x16x16xf32>, vector<2x16x32xf32>, vector<2x16x32xf32> -> vector<2x16x32xf32>
    "tpu.trace_stop"() : () -> ()
    %254 = vector.extract_strided_slice %215 {offsets = [0, 0, 64], sizes = [2, 16, 32], strides = [1, 1, 1]} : vector<2x16x128xf32> to vector<2x16x32xf32>
    %255 = vector.extract_strided_slice %216 {offsets = [0, 0, 64], sizes = [2, 16, 32], strides = [1, 1, 1]} : vector<2x16x128xf32> to vector<2x16x32xf32>
    "tpu.trace_start"() <{level = 10 : i32, message = "bqd,bkd->bqk"}> : () -> ()
    %cst_126 = arith.constant dense<0.000000e+00> : vector<2x16x16xf32>
    %256 = tpu.matmul %254, %255, %cst_126 {dimension_numbers = #tpu.dot_dimension_numbers<[2], [2], [1], [1], [0, 0, 0, 1, 1, 1], [0], [0]>} : vector<2x16x32xf32>, vector<2x16x32xf32>, vector<2x16x16xf32> -> vector<2x16x16xf32>
    "tpu.trace_stop"() : () -> ()
    %257 = arith.addf %256, %1 : vector<2x16x16xf32>
    %cst_127 = arith.constant dense<0xFF800000> : vector<2x16xf32>
    %258 = vector.multi_reduction <maximumf>, %257, %cst_127 [2] : vector<2x16x16xf32> to vector<2x16xf32>
    %259 = vector.shape_cast %258 : vector<2x16xf32> to vector<2x16x1xf32>
    %cst_128 = arith.constant -1.000000e+09 : f32
    %260 = vector.broadcast %cst_128 : f32 to vector<2x16x1xf32>
    %261 = arith.maximumf %259, %260 : vector<2x16x1xf32>
    %262 = vector.broadcast %261 : vector<2x16x1xf32> to vector<2x16x16xf32>
    %263 = arith.subf %257, %262 : vector<2x16x16xf32>
    %264 = math.exp %263 : vector<2x16x16xf32>
    %cst_129 = arith.constant dense<0.000000e+00> : vector<2x16xf32>
    %265 = vector.multi_reduction <add>, %264, %cst_129 [2] : vector<2x16x16xf32> to vector<2x16xf32>
    %266 = vector.shape_cast %265 : vector<2x16xf32> to vector<2x16x1xf32>
    %267 = tpu.reciprocal %266 {approx = true} : vector<2x16x1xf32> -> vector<2x16x1xf32>
    %268 = vector.broadcast %267 : vector<2x16x1xf32> to vector<2x16x16xf32>
    %269 = arith.mulf %264, %268 : vector<2x16x16xf32>
    %270 = vector.extract_strided_slice %217 {offsets = [0, 0, 64], sizes = [2, 16, 32], strides = [1, 1, 1]} : vector<2x16x128xf32> to vector<2x16x32xf32>
    "tpu.trace_start"() <{level = 10 : i32, message = "bqk,bkd->bqd"}> : () -> ()
    %cst_130 = arith.constant dense<0.000000e+00> : vector<2x16x32xf32>
    %271 = tpu.matmul %269, %270, %cst_130 {dimension_numbers = #tpu.dot_dimension_numbers<[2], [1], [1], [2], [0, 0, 0, 1, 1, 2], [0], [0]>} : vector<2x16x16xf32>, vector<2x16x32xf32>, vector<2x16x32xf32> -> vector<2x16x32xf32>
    "tpu.trace_stop"() : () -> ()
    %272 = vector.extract_strided_slice %215 {offsets = [0, 0, 96], sizes = [2, 16, 32], strides = [1, 1, 1]} : vector<2x16x128xf32> to vector<2x16x32xf32>
    %273 = vector.extract_strided_slice %216 {offsets = [0, 0, 96], sizes = [2, 16, 32], strides = [1, 1, 1]} : vector<2x16x128xf32> to vector<2x16x32xf32>
    "tpu.trace_start"() <{level = 10 : i32, message = "bqd,bkd->bqk"}> : () -> ()
    %cst_131 = arith.constant dense<0.000000e+00> : vector<2x16x16xf32>
    %274 = tpu.matmul %272, %273, %cst_131 {dimension_numbers = #tpu.dot_dimension_numbers<[2], [2], [1], [1], [0, 0, 0, 1, 1, 1], [0], [0]>} : vector<2x16x32xf32>, vector<2x16x32xf32>, vector<2x16x16xf32> -> vector<2x16x16xf32>
    "tpu.trace_stop"() : () -> ()
    %275 = arith.addf %274, %1 : vector<2x16x16xf32>
    %cst_132 = arith.constant dense<0xFF800000> : vector<2x16xf32>
    %276 = vector.multi_reduction <maximumf>, %275, %cst_132 [2] : vector<2x16x16xf32> to vector<2x16xf32>
    %277 = vector.shape_cast %276 : vector<2x16xf32> to vector<2x16x1xf32>
    %cst_133 = arith.constant -1.000000e+09 : f32
    %278 = vector.broadcast %cst_133 : f32 to vector<2x16x1xf32>
    %279 = arith.maximumf %277, %278 : vector<2x16x1xf32>
    %280 = vector.broadcast %279 : vector<2x16x1xf32> to vector<2x16x16xf32>
    %281 = arith.subf %275, %280 : vector<2x16x16xf32>
    %282 = math.exp %281 : vector<2x16x16xf32>
    %cst_134 = arith.constant dense<0.000000e+00> : vector<2x16xf32>
    %283 = vector.multi_reduction <add>, %282, %cst_134 [2] : vector<2x16x16xf32> to vector<2x16xf32>
    %284 = vector.shape_cast %283 : vector<2x16xf32> to vector<2x16x1xf32>
    %285 = tpu.reciprocal %284 {approx = true} : vector<2x16x1xf32> -> vector<2x16x1xf32>
    %286 = vector.broadcast %285 : vector<2x16x1xf32> to vector<2x16x16xf32>
    %287 = arith.mulf %282, %286 : vector<2x16x16xf32>
    %288 = vector.extract_strided_slice %217 {offsets = [0, 0, 96], sizes = [2, 16, 32], strides = [1, 1, 1]} : vector<2x16x128xf32> to vector<2x16x32xf32>
    "tpu.trace_start"() <{level = 10 : i32, message = "bqk,bkd->bqd"}> : () -> ()
    %cst_135 = arith.constant dense<0.000000e+00> : vector<2x16x32xf32>
    %289 = tpu.matmul %287, %288, %cst_135 {dimension_numbers = #tpu.dot_dimension_numbers<[2], [1], [1], [2], [0, 0, 0, 1, 1, 2], [0], [0]>} : vector<2x16x16xf32>, vector<2x16x32xf32>, vector<2x16x32xf32> -> vector<2x16x32xf32>
    "tpu.trace_stop"() : () -> ()
    %290 = tpu.concatenate %235, %253, %271, %289 in 2 : vector<2x16x32xf32>, vector<2x16x32xf32>, vector<2x16x32xf32>, vector<2x16x32xf32> -> vector<2x16x128xf32>
    %291 = vector.shape_cast %290 : vector<2x16x128xf32> to vector<32x128xf32>
    %292 = arith.truncf %291 : vector<32x128xf32> to vector<32x128xbf16>
    %cst_136 = arith.constant dense<0.000000e+00> : vector<32x128xf32>
    %293 = tpu.matmul %292, %198, %cst_136 {dimension_numbers = #tpu.dot_dimension_numbers<[1], [0], [0], [1], [0, 0, 1, 1], [], []>} : vector<32x128xbf16>, vector<128x128xbf16>, vector<32x128xf32> -> vector<32x128xf32>
    %294 = vector.broadcast %200 : vector<1x128xf32> to vector<32x128xf32>
    %295 = arith.addf %293, %294 : vector<32x128xf32>
    %296 = arith.addf %184, %295 : vector<32x128xf32>
    %c1_137 = arith.constant 1 : index
    %c0_138 = arith.constant 0 : index
    %c0_139 = arith.constant 0 : index
    %297 = vector.load %arg10[%c1_137, %c0_138, %c0_139] : memref<2x1x128xf32, #tpu.memory_space<vmem>>, vector<1x1x128xf32>
    %298 = vector.shape_cast %297 : vector<1x1x128xf32> to vector<1x128xf32>
    %c1_140 = arith.constant 1 : index
    %c0_141 = arith.constant 0 : index
    %c0_142 = arith.constant 0 : index
    %299 = vector.load %arg11[%c1_140, %c0_141, %c0_142] : memref<2x1x128xf32, #tpu.memory_space<vmem>>, vector<1x1x128xf32>
    %300 = vector.shape_cast %299 : vector<1x1x128xf32> to vector<1x128xf32>
    %cst_143 = arith.constant dense<0.000000e+00> : vector<32xf32>
    %301 = vector.multi_reduction <add>, %296, %cst_143 [1] : vector<32x128xf32> to vector<32xf32>
    %302 = vector.shape_cast %301 : vector<32xf32> to vector<32x1xf32>
    %cst_144 = arith.constant 1.280000e+02 : f32
    %303 = vector.broadcast %cst_144 : f32 to vector<32x1xf32>
    %304 = arith.divf %302, %303 : vector<32x1xf32>
    %305 = vector.broadcast %304 : vector<32x1xf32> to vector<32x128xf32>
    %306 = arith.subf %296, %305 : vector<32x128xf32>
    %307 = arith.mulf %306, %306 : vector<32x128xf32>
    %cst_145 = arith.constant dense<0.000000e+00> : vector<32xf32>
    %308 = vector.multi_reduction <add>, %307, %cst_145 [1] : vector<32x128xf32> to vector<32xf32>
    %309 = vector.shape_cast %308 : vector<32xf32> to vector<32x1xf32>
    %cst_146 = arith.constant 1.280000e+02 : f32
    %310 = vector.broadcast %cst_146 : f32 to vector<32x1xf32>
    %311 = arith.divf %309, %310 : vector<32x1xf32>
    %312 = vector.broadcast %304 : vector<32x1xf32> to vector<32x128xf32>
    %313 = arith.subf %296, %312 : vector<32x128xf32>
    %cst_147 = arith.constant 9.99999974E-6 : f32
    %314 = vector.broadcast %cst_147 : f32 to vector<32x1xf32>
    %315 = arith.addf %311, %314 : vector<32x1xf32>
    %316 = math.rsqrt %315 : vector<32x1xf32>
    %317 = vector.broadcast %316 : vector<32x1xf32> to vector<32x128xf32>
    %318 = arith.mulf %313, %317 : vector<32x128xf32>
    %319 = vector.broadcast %298 : vector<1x128xf32> to vector<32x128xf32>
    %320 = arith.mulf %318, %319 : vector<32x128xf32>
    %321 = vector.broadcast %300 : vector<1x128xf32> to vector<32x128xf32>
    %322 = arith.addf %320, %321 : vector<32x128xf32>
    %c1_148 = arith.constant 1 : index
    %c0_149 = arith.constant 0 : index
    %c0_150 = arith.constant 0 : index
    %323 = vector.load %arg12[%c1_148, %c0_149, %c0_150] : memref<2x128x256xbf16, #tpu.memory_space<vmem>>, vector<1x128x256xbf16>
    %324 = vector.shape_cast %323 : vector<1x128x256xbf16> to vector<128x256xbf16>
    %c1_151 = arith.constant 1 : index
    %c0_152 = arith.constant 0 : index
    %c0_153 = arith.constant 0 : index
    %325 = vector.load %arg13[%c1_151, %c0_152, %c0_153] : memref<2x1x256xf32, #tpu.memory_space<vmem>>, vector<1x1x256xf32>
    %326 = vector.shape_cast %325 : vector<1x1x256xf32> to vector<1x256xf32>
    %c1_154 = arith.constant 1 : index
    %c0_155 = arith.constant 0 : index
    %c0_156 = arith.constant 0 : index
    %327 = vector.load %arg14[%c1_154, %c0_155, %c0_156] : memref<2x256x128xbf16, #tpu.memory_space<vmem>>, vector<1x256x128xbf16>
    %328 = vector.shape_cast %327 : vector<1x256x128xbf16> to vector<256x128xbf16>
    %c1_157 = arith.constant 1 : index
    %c0_158 = arith.constant 0 : index
    %c0_159 = arith.constant 0 : index
    %329 = vector.load %arg15[%c1_157, %c0_158, %c0_159] : memref<2x1x128xf32, #tpu.memory_space<vmem>>, vector<1x1x128xf32>
    %330 = vector.shape_cast %329 : vector<1x1x128xf32> to vector<1x128xf32>
    %331 = arith.truncf %322 : vector<32x128xf32> to vector<32x128xbf16>
    %cst_160 = arith.constant dense<0.000000e+00> : vector<32x256xf32>
    %332 = tpu.matmul %331, %324, %cst_160 {dimension_numbers = #tpu.dot_dimension_numbers<[1], [0], [0], [1], [0, 0, 1, 1], [], []>} : vector<32x128xbf16>, vector<128x256xbf16>, vector<32x256xf32> -> vector<32x256xf32>
    %333 = vector.broadcast %326 : vector<1x256xf32> to vector<32x256xf32>
    %334 = arith.addf %332, %333 : vector<32x256xf32>
    %cst_161 = arith.constant 0.000000e+00 : f32
    %335 = vector.broadcast %cst_161 : f32 to vector<32x256xf32>
    %336 = arith.maximumf %334, %335 : vector<32x256xf32>
    %337 = arith.truncf %336 : vector<32x256xf32> to vector<32x256xbf16>
    %cst_162 = arith.constant dense<0.000000e+00> : vector<32x128xf32>
    %338 = tpu.matmul %337, %328, %cst_162 {dimension_numbers = #tpu.dot_dimension_numbers<[1], [0], [0], [1], [0, 0, 1, 1], [], []>} : vector<32x256xbf16>, vector<256x128xbf16>, vector<32x128xf32> -> vector<32x128xf32>
    %339 = vector.broadcast %330 : vector<1x128xf32> to vector<32x128xf32>
    %340 = arith.addf %338, %339 : vector<32x128xf32>
    %341 = arith.addf %322, %340 : vector<32x128xf32>
    %c1_163 = arith.constant 1 : index
    %c0_164 = arith.constant 0 : index
    %c0_165 = arith.constant 0 : index
    %342 = vector.load %arg16[%c1_163, %c0_164, %c0_165] : memref<2x1x128xf32, #tpu.memory_space<vmem>>, vector<1x1x128xf32>
    %343 = vector.shape_cast %342 : vector<1x1x128xf32> to vector<1x128xf32>
    %c1_166 = arith.constant 1 : index
    %c0_167 = arith.constant 0 : index
    %c0_168 = arith.constant 0 : index
    %344 = vector.load %arg17[%c1_166, %c0_167, %c0_168] : memref<2x1x128xf32, #tpu.memory_space<vmem>>, vector<1x1x128xf32>
    %345 = vector.shape_cast %344 : vector<1x1x128xf32> to vector<1x128xf32>
    %cst_169 = arith.constant dense<0.000000e+00> : vector<32xf32>
    %346 = vector.multi_reduction <add>, %341, %cst_169 [1] : vector<32x128xf32> to vector<32xf32>
    %347 = vector.shape_cast %346 : vector<32xf32> to vector<32x1xf32>
    %cst_170 = arith.constant 1.280000e+02 : f32
    %348 = vector.broadcast %cst_170 : f32 to vector<32x1xf32>
    %349 = arith.divf %347, %348 : vector<32x1xf32>
    %350 = vector.broadcast %349 : vector<32x1xf32> to vector<32x128xf32>
    %351 = arith.subf %341, %350 : vector<32x128xf32>
    %352 = arith.mulf %351, %351 : vector<32x128xf32>
    %cst_171 = arith.constant dense<0.000000e+00> : vector<32xf32>
    %353 = vector.multi_reduction <add>, %352, %cst_171 [1] : vector<32x128xf32> to vector<32xf32>
    %354 = vector.shape_cast %353 : vector<32xf32> to vector<32x1xf32>
    %cst_172 = arith.constant 1.280000e+02 : f32
    %355 = vector.broadcast %cst_172 : f32 to vector<32x1xf32>
    %356 = arith.divf %354, %355 : vector<32x1xf32>
    %357 = vector.broadcast %349 : vector<32x1xf32> to vector<32x128xf32>
    %358 = arith.subf %341, %357 : vector<32x128xf32>
    %cst_173 = arith.constant 9.99999974E-6 : f32
    %359 = vector.broadcast %cst_173 : f32 to vector<32x1xf32>
    %360 = arith.addf %356, %359 : vector<32x1xf32>
    %361 = math.rsqrt %360 : vector<32x1xf32>
    %362 = vector.broadcast %361 : vector<32x1xf32> to vector<32x128xf32>
    %363 = arith.mulf %358, %362 : vector<32x128xf32>
    %364 = vector.broadcast %343 : vector<1x128xf32> to vector<32x128xf32>
    %365 = arith.mulf %363, %364 : vector<32x128xf32>
    %366 = vector.broadcast %345 : vector<1x128xf32> to vector<32x128xf32>
    %367 = arith.addf %365, %366 : vector<32x128xf32>
    %c0_174 = arith.constant 0 : index
    %c0_175 = arith.constant 0 : index
    %368 = vector.load %arg18[%c0_174, %c0_175] : memref<32x128xf32, #tpu.memory_space<vmem>>, vector<32x128xf32>
    tpu.vector_store %arg18[%c0_174, %c0_175], %367 {strides = array<i32>} : memref<32x128xf32, #tpu.memory_space<vmem>>, vector<32x128xf32>,
    return
  }
}

module attributes {stable_mosaic.version = 11 : i64} {
  func.func @kernel(%arg0: memref<32x128xf32, #tpu.memory_space<vmem>>, %arg1: memref<32x128xf32, #tpu.memory_space<vmem>>, %arg2: memref<2x16x16xf32, #tpu.memory_space<vmem>>, %arg3: memref<2x16x16xf32, #tpu.memory_space<vmem>>, %arg4: memref<2x128x128xbf16, #tpu.memory_space<vmem>>, %arg5: memref<2x1x128xf32, #tpu.memory_space<vmem>>, %arg6: memref<2x128x128xbf16, #tpu.memory_space<vmem>>, %arg7: memref<2x1x128xf32, #tpu.memory_space<vmem>>, %arg8: memref<2x128x128xbf16, #tpu.memory_space<vmem>>, %arg9: memref<2x1x128xf32, #tpu.memory_space<vmem>>, %arg10: memref<2x128x128xbf16, #tpu.memory_space<vmem>>, %arg11: memref<2x1x128xf32, #tpu.memory_space<vmem>>, %arg12: memref<2x1x128xf32, #tpu.memory_space<vmem>>, %arg13: memref<2x1x128xf32, #tpu.memory_space<vmem>>, %arg14: memref<2x128x128xbf16, #tpu.memory_space<vmem>>, %arg15: memref<2x1x128xf32, #tpu.memory_space<vmem>>, %arg16: memref<2x128x128xbf16, #tpu.memory_space<vmem>>, %arg17: memref<2x1x128xf32, #tpu.memory_space<vmem>>, %arg18: memref<2x128x128xbf16, #tpu.memory_space<vmem>>, %arg19: memref<2x1x128xf32, #tpu.memory_space<vmem>>, %arg20: memref<2x128x128xbf16, #tpu.memory_space<vmem>>, %arg21: memref<2x1x128xf32, #tpu.memory_space<vmem>>, %arg22: memref<2x1x128xf32, #tpu.memory_space<vmem>>, %arg23: memref<2x1x128xf32, #tpu.memory_space<vmem>>, %arg24: memref<2x128x256xbf16, #tpu.memory_space<vmem>>, %arg25: memref<2x1x256xf32, #tpu.memory_space<vmem>>, %arg26: memref<2x256x128xbf16, #tpu.memory_space<vmem>>, %arg27: memref<2x1x128xf32, #tpu.memory_space<vmem>>, %arg28: memref<2x1x128xf32, #tpu.memory_space<vmem>>, %arg29: memref<2x1x128xf32, #tpu.memory_space<vmem>>, %arg30: memref<128x128xbf16, #tpu.memory_space<vmem>>, %arg31: memref<1x128xf32, #tpu.memory_space<vmem>>, %arg32: memref<32x128xf32, #tpu.memory_space<vmem>>) attributes {dimension_semantics = [], scalar_prefetch = 0 : i64, scratch_operands = 0 : i64, tpu.core_type = #tpu.core_type<tc>} {
    %c0 = arith.constant 0 : index
    %c0_0 = arith.constant 0 : index
    %0 = vector.load %arg0[%c0, %c0_0] : memref<32x128xf32, #tpu.memory_space<vmem>>, vector<32x128xf32>
    %c0_1 = arith.constant 0 : index
    %c0_2 = arith.constant 0 : index
    %1 = vector.load %arg1[%c0_1, %c0_2] : memref<32x128xf32, #tpu.memory_space<vmem>>, vector<32x128xf32>
    %c0_3 = arith.constant 0 : index
    %c0_4 = arith.constant 0 : index
    %c0_5 = arith.constant 0 : index
    %2 = vector.load %arg2[%c0_3, %c0_4, %c0_5] : memref<2x16x16xf32, #tpu.memory_space<vmem>>, vector<2x16x16xf32>
    %c0_6 = arith.constant 0 : index
    %c0_7 = arith.constant 0 : index
    %c0_8 = arith.constant 0 : index
    %3 = vector.load %arg3[%c0_6, %c0_7, %c0_8] : memref<2x16x16xf32, #tpu.memory_space<vmem>>, vector<2x16x16xf32>
    %c0_9 = arith.constant 0 : index
    %c0_10 = arith.constant 0 : index
    %c0_11 = arith.constant 0 : index
    %4 = vector.load %arg4[%c0_9, %c0_10, %c0_11] : memref<2x128x128xbf16, #tpu.memory_space<vmem>>, vector<1x128x128xbf16>
    %5 = vector.shape_cast %4 : vector<1x128x128xbf16> to vector<128x128xbf16>
    %c0_12 = arith.constant 0 : index
    %c0_13 = arith.constant 0 : index
    %c0_14 = arith.constant 0 : index
    %6 = vector.load %arg5[%c0_12, %c0_13, %c0_14] : memref<2x1x128xf32, #tpu.memory_space<vmem>>, vector<1x1x128xf32>
    %7 = vector.shape_cast %6 : vector<1x1x128xf32> to vector<1x128xf32>
    %c0_15 = arith.constant 0 : index
    %c0_16 = arith.constant 0 : index
    %c0_17 = arith.constant 0 : index
    %8 = vector.load %arg6[%c0_15, %c0_16, %c0_17] : memref<2x128x128xbf16, #tpu.memory_space<vmem>>, vector<1x128x128xbf16>
    %9 = vector.shape_cast %8 : vector<1x128x128xbf16> to vector<128x128xbf16>
    %c0_18 = arith.constant 0 : index
    %c0_19 = arith.constant 0 : index
    %c0_20 = arith.constant 0 : index
    %10 = vector.load %arg7[%c0_18, %c0_19, %c0_20] : memref<2x1x128xf32, #tpu.memory_space<vmem>>, vector<1x1x128xf32>
    %11 = vector.shape_cast %10 : vector<1x1x128xf32> to vector<1x128xf32>
    %c0_21 = arith.constant 0 : index
    %c0_22 = arith.constant 0 : index
    %c0_23 = arith.constant 0 : index
    %12 = vector.load %arg8[%c0_21, %c0_22, %c0_23] : memref<2x128x128xbf16, #tpu.memory_space<vmem>>, vector<1x128x128xbf16>
    %13 = vector.shape_cast %12 : vector<1x128x128xbf16> to vector<128x128xbf16>
    %c0_24 = arith.constant 0 : index
    %c0_25 = arith.constant 0 : index
    %c0_26 = arith.constant 0 : index
    %14 = vector.load %arg9[%c0_24, %c0_25, %c0_26] : memref<2x1x128xf32, #tpu.memory_space<vmem>>, vector<1x1x128xf32>
    %15 = vector.shape_cast %14 : vector<1x1x128xf32> to vector<1x128xf32>
    %c0_27 = arith.constant 0 : index
    %c0_28 = arith.constant 0 : index
    %c0_29 = arith.constant 0 : index
    %16 = vector.load %arg10[%c0_27, %c0_28, %c0_29] : memref<2x128x128xbf16, #tpu.memory_space<vmem>>, vector<1x128x128xbf16>
    %17 = vector.shape_cast %16 : vector<1x128x128xbf16> to vector<128x128xbf16>
    %c0_30 = arith.constant 0 : index
    %c0_31 = arith.constant 0 : index
    %c0_32 = arith.constant 0 : index
    %18 = vector.load %arg11[%c0_30, %c0_31, %c0_32] : memref<2x1x128xf32, #tpu.memory_space<vmem>>, vector<1x1x128xf32>
    %19 = vector.shape_cast %18 : vector<1x1x128xf32> to vector<1x128xf32>
    %20 = arith.truncf %0 : vector<32x128xf32> to vector<32x128xbf16>
    %cst = arith.constant dense<0.000000e+00> : vector<32x128xf32>
    %21 = tpu.matmul %20, %5, %cst {dimension_numbers = #tpu.dot_dimension_numbers<[1], [0], [0], [1], [0, 0, 1, 1], [], []>} : vector<32x128xbf16>, vector<128x128xbf16>, vector<32x128xf32> -> vector<32x128xf32>
    %22 = vector.broadcast %7 : vector<1x128xf32> to vector<32x128xf32>
    %23 = arith.addf %21, %22 : vector<32x128xf32>
    %24 = arith.truncf %0 : vector<32x128xf32> to vector<32x128xbf16>
    %cst_33 = arith.constant dense<0.000000e+00> : vector<32x128xf32>
    %25 = tpu.matmul %24, %9, %cst_33 {dimension_numbers = #tpu.dot_dimension_numbers<[1], [0], [0], [1], [0, 0, 1, 1], [], []>} : vector<32x128xbf16>, vector<128x128xbf16>, vector<32x128xf32> -> vector<32x128xf32>
    %26 = vector.broadcast %11 : vector<1x128xf32> to vector<32x128xf32>
    %27 = arith.addf %25, %26 : vector<32x128xf32>
    %28 = arith.truncf %0 : vector<32x128xf32> to vector<32x128xbf16>
    %cst_34 = arith.constant dense<0.000000e+00> : vector<32x128xf32>
    %29 = tpu.matmul %28, %13, %cst_34 {dimension_numbers = #tpu.dot_dimension_numbers<[1], [0], [0], [1], [0, 0, 1, 1], [], []>} : vector<32x128xbf16>, vector<128x128xbf16>, vector<32x128xf32> -> vector<32x128xf32>
    %30 = vector.broadcast %15 : vector<1x128xf32> to vector<32x128xf32>
    %31 = arith.addf %29, %30 : vector<32x128xf32>
    %cst_35 = arith.constant 0.176776692 : f32
    %32 = vector.broadcast %cst_35 : f32 to vector<32x128xf32>
    %33 = arith.mulf %23, %32 : vector<32x128xf32>
    %34 = vector.shape_cast %33 : vector<32x128xf32> to vector<2x16x128xf32>
    %35 = vector.shape_cast %27 : vector<32x128xf32> to vector<2x16x128xf32>
    %36 = vector.shape_cast %31 : vector<32x128xf32> to vector<2x16x128xf32>
    %37 = vector.extract_strided_slice %34 {offsets = [0, 0, 0], sizes = [2, 16, 32], strides = [1, 1, 1]} : vector<2x16x128xf32> to vector<2x16x32xf32>
    %38 = vector.extract_strided_slice %35 {offsets = [0, 0, 0], sizes = [2, 16, 32], strides = [1, 1, 1]} : vector<2x16x128xf32> to vector<2x16x32xf32>
    "tpu.trace_start"() <{level = 10 : i32, message = "bqd,bkd->bqk"}> : () -> ()
    %cst_36 = arith.constant dense<0.000000e+00> : vector<2x16x16xf32>
    %39 = tpu.matmul %37, %38, %cst_36 {dimension_numbers = #tpu.dot_dimension_numbers<[2], [2], [1], [1], [0, 0, 0, 1, 1, 1], [0], [0]>} : vector<2x16x32xf32>, vector<2x16x32xf32>, vector<2x16x16xf32> -> vector<2x16x16xf32>
    "tpu.trace_stop"() : () -> ()
    %40 = arith.addf %39, %2 : vector<2x16x16xf32>
    %cst_37 = arith.constant dense<0xFF800000> : vector<2x16xf32>
    %41 = vector.multi_reduction <maximumf>, %40, %cst_37 [2] : vector<2x16x16xf32> to vector<2x16xf32>
    %42 = vector.shape_cast %41 : vector<2x16xf32> to vector<2x16x1xf32>
    %cst_38 = arith.constant -1.000000e+09 : f32
    %43 = vector.broadcast %cst_38 : f32 to vector<2x16x1xf32>
    %44 = arith.maximumf %42, %43 : vector<2x16x1xf32>
    %45 = vector.broadcast %44 : vector<2x16x1xf32> to vector<2x16x16xf32>
    %46 = arith.subf %40, %45 : vector<2x16x16xf32>
    %47 = math.exp %46 : vector<2x16x16xf32>
    %cst_39 = arith.constant dense<0.000000e+00> : vector<2x16xf32>
    %48 = vector.multi_reduction <add>, %47, %cst_39 [2] : vector<2x16x16xf32> to vector<2x16xf32>
    %49 = vector.shape_cast %48 : vector<2x16xf32> to vector<2x16x1xf32>
    %50 = tpu.reciprocal %49 {approx = true} : vector<2x16x1xf32> -> vector<2x16x1xf32>
    %51 = vector.broadcast %50 : vector<2x16x1xf32> to vector<2x16x16xf32>
    %52 = arith.mulf %47, %51 : vector<2x16x16xf32>
    %53 = vector.extract_strided_slice %36 {offsets = [0, 0, 0], sizes = [2, 16, 32], strides = [1, 1, 1]} : vector<2x16x128xf32> to vector<2x16x32xf32>
    "tpu.trace_start"() <{level = 10 : i32, message = "bqk,bkd->bqd"}> : () -> ()
    %cst_40 = arith.constant dense<0.000000e+00> : vector<2x16x32xf32>
    %54 = tpu.matmul %52, %53, %cst_40 {dimension_numbers = #tpu.dot_dimension_numbers<[2], [1], [1], [2], [0, 0, 0, 1, 1, 2], [0], [0]>} : vector<2x16x16xf32>, vector<2x16x32xf32>, vector<2x16x32xf32> -> vector<2x16x32xf32>
    "tpu.trace_stop"() : () -> ()
    %55 = vector.extract_strided_slice %34 {offsets = [0, 0, 32], sizes = [2, 16, 32], strides = [1, 1, 1]} : vector<2x16x128xf32> to vector<2x16x32xf32>
    %56 = vector.extract_strided_slice %35 {offsets = [0, 0, 32], sizes = [2, 16, 32], strides = [1, 1, 1]} : vector<2x16x128xf32> to vector<2x16x32xf32>
    "tpu.trace_start"() <{level = 10 : i32, message = "bqd,bkd->bqk"}> : () -> ()
    %cst_41 = arith.constant dense<0.000000e+00> : vector<2x16x16xf32>
    %57 = tpu.matmul %55, %56, %cst_41 {dimension_numbers = #tpu.dot_dimension_numbers<[2], [2], [1], [1], [0, 0, 0, 1, 1, 1], [0], [0]>} : vector<2x16x32xf32>, vector<2x16x32xf32>, vector<2x16x16xf32> -> vector<2x16x16xf32>
    "tpu.trace_stop"() : () -> ()
    %58 = arith.addf %57, %2 : vector<2x16x16xf32>
    %cst_42 = arith.constant dense<0xFF800000> : vector<2x16xf32>
    %59 = vector.multi_reduction <maximumf>, %58, %cst_42 [2] : vector<2x16x16xf32> to vector<2x16xf32>
    %60 = vector.shape_cast %59 : vector<2x16xf32> to vector<2x16x1xf32>
    %cst_43 = arith.constant -1.000000e+09 : f32
    %61 = vector.broadcast %cst_43 : f32 to vector<2x16x1xf32>
    %62 = arith.maximumf %60, %61 : vector<2x16x1xf32>
    %63 = vector.broadcast %62 : vector<2x16x1xf32> to vector<2x16x16xf32>
    %64 = arith.subf %58, %63 : vector<2x16x16xf32>
    %65 = math.exp %64 : vector<2x16x16xf32>
    %cst_44 = arith.constant dense<0.000000e+00> : vector<2x16xf32>
    %66 = vector.multi_reduction <add>, %65, %cst_44 [2] : vector<2x16x16xf32> to vector<2x16xf32>
    %67 = vector.shape_cast %66 : vector<2x16xf32> to vector<2x16x1xf32>
    %68 = tpu.reciprocal %67 {approx = true} : vector<2x16x1xf32> -> vector<2x16x1xf32>
    %69 = vector.broadcast %68 : vector<2x16x1xf32> to vector<2x16x16xf32>
    %70 = arith.mulf %65, %69 : vector<2x16x16xf32>
    %71 = vector.extract_strided_slice %36 {offsets = [0, 0, 32], sizes = [2, 16, 32], strides = [1, 1, 1]} : vector<2x16x128xf32> to vector<2x16x32xf32>
    "tpu.trace_start"() <{level = 10 : i32, message = "bqk,bkd->bqd"}> : () -> ()
    %cst_45 = arith.constant dense<0.000000e+00> : vector<2x16x32xf32>
    %72 = tpu.matmul %70, %71, %cst_45 {dimension_numbers = #tpu.dot_dimension_numbers<[2], [1], [1], [2], [0, 0, 0, 1, 1, 2], [0], [0]>} : vector<2x16x16xf32>, vector<2x16x32xf32>, vector<2x16x32xf32> -> vector<2x16x32xf32>
    "tpu.trace_stop"() : () -> ()
    %73 = vector.extract_strided_slice %34 {offsets = [0, 0, 64], sizes = [2, 16, 32], strides = [1, 1, 1]} : vector<2x16x128xf32> to vector<2x16x32xf32>
    %74 = vector.extract_strided_slice %35 {offsets = [0, 0, 64], sizes = [2, 16, 32], strides = [1, 1, 1]} : vector<2x16x128xf32> to vector<2x16x32xf32>
    "tpu.trace_start"() <{level = 10 : i32, message = "bqd,bkd->bqk"}> : () -> ()
    %cst_46 = arith.constant dense<0.000000e+00> : vector<2x16x16xf32>
    %75 = tpu.matmul %73, %74, %cst_46 {dimension_numbers = #tpu.dot_dimension_numbers<[2], [2], [1], [1], [0, 0, 0, 1, 1, 1], [0], [0]>} : vector<2x16x32xf32>, vector<2x16x32xf32>, vector<2x16x16xf32> -> vector<2x16x16xf32>
    "tpu.trace_stop"() : () -> ()
    %76 = arith.addf %75, %2 : vector<2x16x16xf32>
    %cst_47 = arith.constant dense<0xFF800000> : vector<2x16xf32>
    %77 = vector.multi_reduction <maximumf>, %76, %cst_47 [2] : vector<2x16x16xf32> to vector<2x16xf32>
    %78 = vector.shape_cast %77 : vector<2x16xf32> to vector<2x16x1xf32>
    %cst_48 = arith.constant -1.000000e+09 : f32
    %79 = vector.broadcast %cst_48 : f32 to vector<2x16x1xf32>
    %80 = arith.maximumf %78, %79 : vector<2x16x1xf32>
    %81 = vector.broadcast %80 : vector<2x16x1xf32> to vector<2x16x16xf32>
    %82 = arith.subf %76, %81 : vector<2x16x16xf32>
    %83 = math.exp %82 : vector<2x16x16xf32>
    %cst_49 = arith.constant dense<0.000000e+00> : vector<2x16xf32>
    %84 = vector.multi_reduction <add>, %83, %cst_49 [2] : vector<2x16x16xf32> to vector<2x16xf32>
    %85 = vector.shape_cast %84 : vector<2x16xf32> to vector<2x16x1xf32>
    %86 = tpu.reciprocal %85 {approx = true} : vector<2x16x1xf32> -> vector<2x16x1xf32>
    %87 = vector.broadcast %86 : vector<2x16x1xf32> to vector<2x16x16xf32>
    %88 = arith.mulf %83, %87 : vector<2x16x16xf32>
    %89 = vector.extract_strided_slice %36 {offsets = [0, 0, 64], sizes = [2, 16, 32], strides = [1, 1, 1]} : vector<2x16x128xf32> to vector<2x16x32xf32>
    "tpu.trace_start"() <{level = 10 : i32, message = "bqk,bkd->bqd"}> : () -> ()
    %cst_50 = arith.constant dense<0.000000e+00> : vector<2x16x32xf32>
    %90 = tpu.matmul %88, %89, %cst_50 {dimension_numbers = #tpu.dot_dimension_numbers<[2], [1], [1], [2], [0, 0, 0, 1, 1, 2], [0], [0]>} : vector<2x16x16xf32>, vector<2x16x32xf32>, vector<2x16x32xf32> -> vector<2x16x32xf32>
    "tpu.trace_stop"() : () -> ()
    %91 = vector.extract_strided_slice %34 {offsets = [0, 0, 96], sizes = [2, 16, 32], strides = [1, 1, 1]} : vector<2x16x128xf32> to vector<2x16x32xf32>
    %92 = vector.extract_strided_slice %35 {offsets = [0, 0, 96], sizes = [2, 16, 32], strides = [1, 1, 1]} : vector<2x16x128xf32> to vector<2x16x32xf32>
    "tpu.trace_start"() <{level = 10 : i32, message = "bqd,bkd->bqk"}> : () -> ()
    %cst_51 = arith.constant dense<0.000000e+00> : vector<2x16x16xf32>
    %93 = tpu.matmul %91, %92, %cst_51 {dimension_numbers = #tpu.dot_dimension_numbers<[2], [2], [1], [1], [0, 0, 0, 1, 1, 1], [0], [0]>} : vector<2x16x32xf32>, vector<2x16x32xf32>, vector<2x16x16xf32> -> vector<2x16x16xf32>
    "tpu.trace_stop"() : () -> ()
    %94 = arith.addf %93, %2 : vector<2x16x16xf32>
    %cst_52 = arith.constant dense<0xFF800000> : vector<2x16xf32>
    %95 = vector.multi_reduction <maximumf>, %94, %cst_52 [2] : vector<2x16x16xf32> to vector<2x16xf32>
    %96 = vector.shape_cast %95 : vector<2x16xf32> to vector<2x16x1xf32>
    %cst_53 = arith.constant -1.000000e+09 : f32
    %97 = vector.broadcast %cst_53 : f32 to vector<2x16x1xf32>
    %98 = arith.maximumf %96, %97 : vector<2x16x1xf32>
    %99 = vector.broadcast %98 : vector<2x16x1xf32> to vector<2x16x16xf32>
    %100 = arith.subf %94, %99 : vector<2x16x16xf32>
    %101 = math.exp %100 : vector<2x16x16xf32>
    %cst_54 = arith.constant dense<0.000000e+00> : vector<2x16xf32>
    %102 = vector.multi_reduction <add>, %101, %cst_54 [2] : vector<2x16x16xf32> to vector<2x16xf32>
    %103 = vector.shape_cast %102 : vector<2x16xf32> to vector<2x16x1xf32>
    %104 = tpu.reciprocal %103 {approx = true} : vector<2x16x1xf32> -> vector<2x16x1xf32>
    %105 = vector.broadcast %104 : vector<2x16x1xf32> to vector<2x16x16xf32>
    %106 = arith.mulf %101, %105 : vector<2x16x16xf32>
    %107 = vector.extract_strided_slice %36 {offsets = [0, 0, 96], sizes = [2, 16, 32], strides = [1, 1, 1]} : vector<2x16x128xf32> to vector<2x16x32xf32>
    "tpu.trace_start"() <{level = 10 : i32, message = "bqk,bkd->bqd"}> : () -> ()
    %cst_55 = arith.constant dense<0.000000e+00> : vector<2x16x32xf32>
    %108 = tpu.matmul %106, %107, %cst_55 {dimension_numbers = #tpu.dot_dimension_numbers<[2], [1], [1], [2], [0, 0, 0, 1, 1, 2], [0], [0]>} : vector<2x16x16xf32>, vector<2x16x32xf32>, vector<2x16x32xf32> -> vector<2x16x32xf32>
    "tpu.trace_stop"() : () -> ()
    %109 = tpu.concatenate %54, %72, %90, %108 in 2 : vector<2x16x32xf32>, vector<2x16x32xf32>, vector<2x16x32xf32>, vector<2x16x32xf32> -> vector<2x16x128xf32>
    %110 = vector.shape_cast %109 : vector<2x16x128xf32> to vector<32x128xf32>
    %111 = arith.truncf %110 : vector<32x128xf32> to vector<32x128xbf16>
    %cst_56 = arith.constant dense<0.000000e+00> : vector<32x128xf32>
    %112 = tpu.matmul %111, %17, %cst_56 {dimension_numbers = #tpu.dot_dimension_numbers<[1], [0], [0], [1], [0, 0, 1, 1], [], []>} : vector<32x128xbf16>, vector<128x128xbf16>, vector<32x128xf32> -> vector<32x128xf32>
    %113 = vector.broadcast %19 : vector<1x128xf32> to vector<32x128xf32>
    %114 = arith.addf %112, %113 : vector<32x128xf32>
    %115 = arith.addf %0, %114 : vector<32x128xf32>
    %c0_57 = arith.constant 0 : index
    %c0_58 = arith.constant 0 : index
    %c0_59 = arith.constant 0 : index
    %116 = vector.load %arg12[%c0_57, %c0_58, %c0_59] : memref<2x1x128xf32, #tpu.memory_space<vmem>>, vector<1x1x128xf32>
    %117 = vector.shape_cast %116 : vector<1x1x128xf32> to vector<1x128xf32>
    %c0_60 = arith.constant 0 : index
    %c0_61 = arith.constant 0 : index
    %c0_62 = arith.constant 0 : index
    %118 = vector.load %arg13[%c0_60, %c0_61, %c0_62] : memref<2x1x128xf32, #tpu.memory_space<vmem>>, vector<1x1x128xf32>
    %119 = vector.shape_cast %118 : vector<1x1x128xf32> to vector<1x128xf32>
    %cst_63 = arith.constant dense<0.000000e+00> : vector<32xf32>
    %120 = vector.multi_reduction <add>, %115, %cst_63 [1] : vector<32x128xf32> to vector<32xf32>
    %121 = vector.shape_cast %120 : vector<32xf32> to vector<32x1xf32>
    %cst_64 = arith.constant 1.280000e+02 : f32
    %122 = vector.broadcast %cst_64 : f32 to vector<32x1xf32>
    %123 = arith.divf %121, %122 : vector<32x1xf32>
    %124 = vector.broadcast %123 : vector<32x1xf32> to vector<32x128xf32>
    %125 = arith.subf %115, %124 : vector<32x128xf32>
    %126 = arith.mulf %125, %125 : vector<32x128xf32>
    %cst_65 = arith.constant dense<0.000000e+00> : vector<32xf32>
    %127 = vector.multi_reduction <add>, %126, %cst_65 [1] : vector<32x128xf32> to vector<32xf32>
    %128 = vector.shape_cast %127 : vector<32xf32> to vector<32x1xf32>
    %cst_66 = arith.constant 1.280000e+02 : f32
    %129 = vector.broadcast %cst_66 : f32 to vector<32x1xf32>
    %130 = arith.divf %128, %129 : vector<32x1xf32>
    %131 = vector.broadcast %123 : vector<32x1xf32> to vector<32x128xf32>
    %132 = arith.subf %115, %131 : vector<32x128xf32>
    %cst_67 = arith.constant 9.99999974E-6 : f32
    %133 = vector.broadcast %cst_67 : f32 to vector<32x1xf32>
    %134 = arith.addf %130, %133 : vector<32x1xf32>
    %135 = math.rsqrt %134 : vector<32x1xf32>
    %136 = vector.broadcast %135 : vector<32x1xf32> to vector<32x128xf32>
    %137 = arith.mulf %132, %136 : vector<32x128xf32>
    %138 = vector.broadcast %117 : vector<1x128xf32> to vector<32x128xf32>
    %139 = arith.mulf %137, %138 : vector<32x128xf32>
    %140 = vector.broadcast %119 : vector<1x128xf32> to vector<32x128xf32>
    %141 = arith.addf %139, %140 : vector<32x128xf32>
    %c0_68 = arith.constant 0 : index
    %c0_69 = arith.constant 0 : index
    %c0_70 = arith.constant 0 : index
    %142 = vector.load %arg14[%c0_68, %c0_69, %c0_70] : memref<2x128x128xbf16, #tpu.memory_space<vmem>>, vector<1x128x128xbf16>
    %143 = vector.shape_cast %142 : vector<1x128x128xbf16> to vector<128x128xbf16>
    %c0_71 = arith.constant 0 : index
    %c0_72 = arith.constant 0 : index
    %c0_73 = arith.constant 0 : index
    %144 = vector.load %arg15[%c0_71, %c0_72, %c0_73] : memref<2x1x128xf32, #tpu.memory_space<vmem>>, vector<1x1x128xf32>
    %145 = vector.shape_cast %144 : vector<1x1x128xf32> to vector<1x128xf32>
    %c0_74 = arith.constant 0 : index
    %c0_75 = arith.constant 0 : index
    %c0_76 = arith.constant 0 : index
    %146 = vector.load %arg16[%c0_74, %c0_75, %c0_76] : memref<2x128x128xbf16, #tpu.memory_space<vmem>>, vector<1x128x128xbf16>
    %147 = vector.shape_cast %146 : vector<1x128x128xbf16> to vector<128x128xbf16>
    %c0_77 = arith.constant 0 : index
    %c0_78 = arith.constant 0 : index
    %c0_79 = arith.constant 0 : index
    %148 = vector.load %arg17[%c0_77, %c0_78, %c0_79] : memref<2x1x128xf32, #tpu.memory_space<vmem>>, vector<1x1x128xf32>
    %149 = vector.shape_cast %148 : vector<1x1x128xf32> to vector<1x128xf32>
    %c0_80 = arith.constant 0 : index
    %c0_81 = arith.constant 0 : index
    %c0_82 = arith.constant 0 : index
    %150 = vector.load %arg18[%c0_80, %c0_81, %c0_82] : memref<2x128x128xbf16, #tpu.memory_space<vmem>>, vector<1x128x128xbf16>
    %151 = vector.shape_cast %150 : vector<1x128x128xbf16> to vector<128x128xbf16>
    %c0_83 = arith.constant 0 : index
    %c0_84 = arith.constant 0 : index
    %c0_85 = arith.constant 0 : index
    %152 = vector.load %arg19[%c0_83, %c0_84, %c0_85] : memref<2x1x128xf32, #tpu.memory_space<vmem>>, vector<1x1x128xf32>
    %153 = vector.shape_cast %152 : vector<1x1x128xf32> to vector<1x128xf32>
    %c0_86 = arith.constant 0 : index
    %c0_87 = arith.constant 0 : index
    %c0_88 = arith.constant 0 : index
    %154 = vector.load %arg20[%c0_86, %c0_87, %c0_88] : memref<2x128x128xbf16, #tpu.memory_space<vmem>>, vector<1x128x128xbf16>
    %155 = vector.shape_cast %154 : vector<1x128x128xbf16> to vector<128x128xbf16>
    %c0_89 = arith.constant 0 : index
    %c0_90 = arith.constant 0 : index
    %c0_91 = arith.constant 0 : index
    %156 = vector.load %arg21[%c0_89, %c0_90, %c0_91] : memref<2x1x128xf32, #tpu.memory_space<vmem>>, vector<1x1x128xf32>
    %157 = vector.shape_cast %156 : vector<1x1x128xf32> to vector<1x128xf32>
    %158 = arith.truncf %141 : vector<32x128xf32> to vector<32x128xbf16>
    %cst_92 = arith.constant dense<0.000000e+00> : vector<32x128xf32>
    %159 = tpu.matmul %158, %143, %cst_92 {dimension_numbers = #tpu.dot_dimension_numbers<[1], [0], [0], [1], [0, 0, 1, 1], [], []>} : vector<32x128xbf16>, vector<128x128xbf16>, vector<32x128xf32> -> vector<32x128xf32>
    %160 = vector.broadcast %145 : vector<1x128xf32> to vector<32x128xf32>
    %161 = arith.addf %159, %160 : vector<32x128xf32>
    %162 = arith.truncf %1 : vector<32x128xf32> to vector<32x128xbf16>
    %cst_93 = arith.constant dense<0.000000e+00> : vector<32x128xf32>
    %163 = tpu.matmul %162, %147, %cst_93 {dimension_numbers = #tpu.dot_dimension_numbers<[1], [0], [0], [1], [0, 0, 1, 1], [], []>} : vector<32x128xbf16>, vector<128x128xbf16>, vector<32x128xf32> -> vector<32x128xf32>
    %164 = vector.broadcast %149 : vector<1x128xf32> to vector<32x128xf32>
    %165 = arith.addf %163, %164 : vector<32x128xf32>
    %166 = arith.truncf %1 : vector<32x128xf32> to vector<32x128xbf16>
    %cst_94 = arith.constant dense<0.000000e+00> : vector<32x128xf32>
    %167 = tpu.matmul %166, %151, %cst_94 {dimension_numbers = #tpu.dot_dimension_numbers<[1], [0], [0], [1], [0, 0, 1, 1], [], []>} : vector<32x128xbf16>, vector<128x128xbf16>, vector<32x128xf32> -> vector<32x128xf32>
    %168 = vector.broadcast %153 : vector<1x128xf32> to vector<32x128xf32>
    %169 = arith.addf %167, %168 : vector<32x128xf32>
    %cst_95 = arith.constant 0.176776692 : f32
    %170 = vector.broadcast %cst_95 : f32 to vector<32x128xf32>
    %171 = arith.mulf %161, %170 : vector<32x128xf32>
    %172 = vector.shape_cast %171 : vector<32x128xf32> to vector<2x16x128xf32>
    %173 = vector.shape_cast %165 : vector<32x128xf32> to vector<2x16x128xf32>
    %174 = vector.shape_cast %169 : vector<32x128xf32> to vector<2x16x128xf32>
    %175 = vector.extract_strided_slice %172 {offsets = [0, 0, 0], sizes = [2, 16, 32], strides = [1, 1, 1]} : vector<2x16x128xf32> to vector<2x16x32xf32>
    %176 = vector.extract_strided_slice %173 {offsets = [0, 0, 0], sizes = [2, 16, 32], strides = [1, 1, 1]} : vector<2x16x128xf32> to vector<2x16x32xf32>
    "tpu.trace_start"() <{level = 10 : i32, message = "bqd,bkd->bqk"}> : () -> ()
    %cst_96 = arith.constant dense<0.000000e+00> : vector<2x16x16xf32>
    %177 = tpu.matmul %175, %176, %cst_96 {dimension_numbers = #tpu.dot_dimension_numbers<[2], [2], [1], [1], [0, 0, 0, 1, 1, 1], [0], [0]>} : vector<2x16x32xf32>, vector<2x16x32xf32>, vector<2x16x16xf32> -> vector<2x16x16xf32>
    "tpu.trace_stop"() : () -> ()
    %178 = arith.addf %177, %3 : vector<2x16x16xf32>
    %cst_97 = arith.constant dense<0xFF800000> : vector<2x16xf32>
    %179 = vector.multi_reduction <maximumf>, %178, %cst_97 [2] : vector<2x16x16xf32> to vector<2x16xf32>
    %180 = vector.shape_cast %179 : vector<2x16xf32> to vector<2x16x1xf32>
    %cst_98 = arith.constant -1.000000e+09 : f32
    %181 = vector.broadcast %cst_98 : f32 to vector<2x16x1xf32>
    %182 = arith.maximumf %180, %181 : vector<2x16x1xf32>
    %183 = vector.broadcast %182 : vector<2x16x1xf32> to vector<2x16x16xf32>
    %184 = arith.subf %178, %183 : vector<2x16x16xf32>
    %185 = math.exp %184 : vector<2x16x16xf32>
    %cst_99 = arith.constant dense<0.000000e+00> : vector<2x16xf32>
    %186 = vector.multi_reduction <add>, %185, %cst_99 [2] : vector<2x16x16xf32> to vector<2x16xf32>
    %187 = vector.shape_cast %186 : vector<2x16xf32> to vector<2x16x1xf32>
    %188 = tpu.reciprocal %187 {approx = true} : vector<2x16x1xf32> -> vector<2x16x1xf32>
    %189 = vector.broadcast %188 : vector<2x16x1xf32> to vector<2x16x16xf32>
    %190 = arith.mulf %185, %189 : vector<2x16x16xf32>
    %191 = vector.extract_strided_slice %174 {offsets = [0, 0, 0], sizes = [2, 16, 32], strides = [1, 1, 1]} : vector<2x16x128xf32> to vector<2x16x32xf32>
    "tpu.trace_start"() <{level = 10 : i32, message = "bqk,bkd->bqd"}> : () -> ()
    %cst_100 = arith.constant dense<0.000000e+00> : vector<2x16x32xf32>
    %192 = tpu.matmul %190, %191, %cst_100 {dimension_numbers = #tpu.dot_dimension_numbers<[2], [1], [1], [2], [0, 0, 0, 1, 1, 2], [0], [0]>} : vector<2x16x16xf32>, vector<2x16x32xf32>, vector<2x16x32xf32> -> vector<2x16x32xf32>
    "tpu.trace_stop"() : () -> ()
    %193 = vector.extract_strided_slice %172 {offsets = [0, 0, 32], sizes = [2, 16, 32], strides = [1, 1, 1]} : vector<2x16x128xf32> to vector<2x16x32xf32>
    %194 = vector.extract_strided_slice %173 {offsets = [0, 0, 32], sizes = [2, 16, 32], strides = [1, 1, 1]} : vector<2x16x128xf32> to vector<2x16x32xf32>
    "tpu.trace_start"() <{level = 10 : i32, message = "bqd,bkd->bqk"}> : () -> ()
    %cst_101 = arith.constant dense<0.000000e+00> : vector<2x16x16xf32>
    %195 = tpu.matmul %193, %194, %cst_101 {dimension_numbers = #tpu.dot_dimension_numbers<[2], [2], [1], [1], [0, 0, 0, 1, 1, 1], [0], [0]>} : vector<2x16x32xf32>, vector<2x16x32xf32>, vector<2x16x16xf32> -> vector<2x16x16xf32>
    "tpu.trace_stop"() : () -> ()
    %196 = arith.addf %195, %3 : vector<2x16x16xf32>
    %cst_102 = arith.constant dense<0xFF800000> : vector<2x16xf32>
    %197 = vector.multi_reduction <maximumf>, %196, %cst_102 [2] : vector<2x16x16xf32> to vector<2x16xf32>
    %198 = vector.shape_cast %197 : vector<2x16xf32> to vector<2x16x1xf32>
    %cst_103 = arith.constant -1.000000e+09 : f32
    %199 = vector.broadcast %cst_103 : f32 to vector<2x16x1xf32>
    %200 = arith.maximumf %198, %199 : vector<2x16x1xf32>
    %201 = vector.broadcast %200 : vector<2x16x1xf32> to vector<2x16x16xf32>
    %202 = arith.subf %196, %201 : vector<2x16x16xf32>
    %203 = math.exp %202 : vector<2x16x16xf32>
    %cst_104 = arith.constant dense<0.000000e+00> : vector<2x16xf32>
    %204 = vector.multi_reduction <add>, %203, %cst_104 [2] : vector<2x16x16xf32> to vector<2x16xf32>
    %205 = vector.shape_cast %204 : vector<2x16xf32> to vector<2x16x1xf32>
    %206 = tpu.reciprocal %205 {approx = true} : vector<2x16x1xf32> -> vector<2x16x1xf32>
    %207 = vector.broadcast %206 : vector<2x16x1xf32> to vector<2x16x16xf32>
    %208 = arith.mulf %203, %207 : vector<2x16x16xf32>
    %209 = vector.extract_strided_slice %174 {offsets = [0, 0, 32], sizes = [2, 16, 32], strides = [1, 1, 1]} : vector<2x16x128xf32> to vector<2x16x32xf32>
    "tpu.trace_start"() <{level = 10 : i32, message = "bqk,bkd->bqd"}> : () -> ()
    %cst_105 = arith.constant dense<0.000000e+00> : vector<2x16x32xf32>
    %210 = tpu.matmul %208, %209, %cst_105 {dimension_numbers = #tpu.dot_dimension_numbers<[2], [1], [1], [2], [0, 0, 0, 1, 1, 2], [0], [0]>} : vector<2x16x16xf32>, vector<2x16x32xf32>, vector<2x16x32xf32> -> vector<2x16x32xf32>
    "tpu.trace_stop"() : () -> ()
    %211 = vector.extract_strided_slice %172 {offsets = [0, 0, 64], sizes = [2, 16, 32], strides = [1, 1, 1]} : vector<2x16x128xf32> to vector<2x16x32xf32>
    %212 = vector.extract_strided_slice %173 {offsets = [0, 0, 64], sizes = [2, 16, 32], strides = [1, 1, 1]} : vector<2x16x128xf32> to vector<2x16x32xf32>
    "tpu.trace_start"() <{level = 10 : i32, message = "bqd,bkd->bqk"}> : () -> ()
    %cst_106 = arith.constant dense<0.000000e+00> : vector<2x16x16xf32>
    %213 = tpu.matmul %211, %212, %cst_106 {dimension_numbers = #tpu.dot_dimension_numbers<[2], [2], [1], [1], [0, 0, 0, 1, 1, 1], [0], [0]>} : vector<2x16x32xf32>, vector<2x16x32xf32>, vector<2x16x16xf32> -> vector<2x16x16xf32>
    "tpu.trace_stop"() : () -> ()
    %214 = arith.addf %213, %3 : vector<2x16x16xf32>
    %cst_107 = arith.constant dense<0xFF800000> : vector<2x16xf32>
    %215 = vector.multi_reduction <maximumf>, %214, %cst_107 [2] : vector<2x16x16xf32> to vector<2x16xf32>
    %216 = vector.shape_cast %215 : vector<2x16xf32> to vector<2x16x1xf32>
    %cst_108 = arith.constant -1.000000e+09 : f32
    %217 = vector.broadcast %cst_108 : f32 to vector<2x16x1xf32>
    %218 = arith.maximumf %216, %217 : vector<2x16x1xf32>
    %219 = vector.broadcast %218 : vector<2x16x1xf32> to vector<2x16x16xf32>
    %220 = arith.subf %214, %219 : vector<2x16x16xf32>
    %221 = math.exp %220 : vector<2x16x16xf32>
    %cst_109 = arith.constant dense<0.000000e+00> : vector<2x16xf32>
    %222 = vector.multi_reduction <add>, %221, %cst_109 [2] : vector<2x16x16xf32> to vector<2x16xf32>
    %223 = vector.shape_cast %222 : vector<2x16xf32> to vector<2x16x1xf32>
    %224 = tpu.reciprocal %223 {approx = true} : vector<2x16x1xf32> -> vector<2x16x1xf32>
    %225 = vector.broadcast %224 : vector<2x16x1xf32> to vector<2x16x16xf32>
    %226 = arith.mulf %221, %225 : vector<2x16x16xf32>
    %227 = vector.extract_strided_slice %174 {offsets = [0, 0, 64], sizes = [2, 16, 32], strides = [1, 1, 1]} : vector<2x16x128xf32> to vector<2x16x32xf32>
    "tpu.trace_start"() <{level = 10 : i32, message = "bqk,bkd->bqd"}> : () -> ()
    %cst_110 = arith.constant dense<0.000000e+00> : vector<2x16x32xf32>
    %228 = tpu.matmul %226, %227, %cst_110 {dimension_numbers = #tpu.dot_dimension_numbers<[2], [1], [1], [2], [0, 0, 0, 1, 1, 2], [0], [0]>} : vector<2x16x16xf32>, vector<2x16x32xf32>, vector<2x16x32xf32> -> vector<2x16x32xf32>
    "tpu.trace_stop"() : () -> ()
    %229 = vector.extract_strided_slice %172 {offsets = [0, 0, 96], sizes = [2, 16, 32], strides = [1, 1, 1]} : vector<2x16x128xf32> to vector<2x16x32xf32>
    %230 = vector.extract_strided_slice %173 {offsets = [0, 0, 96], sizes = [2, 16, 32], strides = [1, 1, 1]} : vector<2x16x128xf32> to vector<2x16x32xf32>
    "tpu.trace_start"() <{level = 10 : i32, message = "bqd,bkd->bqk"}> : () -> ()
    %cst_111 = arith.constant dense<0.000000e+00> : vector<2x16x16xf32>
    %231 = tpu.matmul %229, %230, %cst_111 {dimension_numbers = #tpu.dot_dimension_numbers<[2], [2], [1], [1], [0, 0, 0, 1, 1, 1], [0], [0]>} : vector<2x16x32xf32>, vector<2x16x32xf32>, vector<2x16x16xf32> -> vector<2x16x16xf32>
    "tpu.trace_stop"() : () -> ()
    %232 = arith.addf %231, %3 : vector<2x16x16xf32>
    %cst_112 = arith.constant dense<0xFF800000> : vector<2x16xf32>
    %233 = vector.multi_reduction <maximumf>, %232, %cst_112 [2] : vector<2x16x16xf32> to vector<2x16xf32>
    %234 = vector.shape_cast %233 : vector<2x16xf32> to vector<2x16x1xf32>
    %cst_113 = arith.constant -1.000000e+09 : f32
    %235 = vector.broadcast %cst_113 : f32 to vector<2x16x1xf32>
    %236 = arith.maximumf %234, %235 : vector<2x16x1xf32>
    %237 = vector.broadcast %236 : vector<2x16x1xf32> to vector<2x16x16xf32>
    %238 = arith.subf %232, %237 : vector<2x16x16xf32>
    %239 = math.exp %238 : vector<2x16x16xf32>
    %cst_114 = arith.constant dense<0.000000e+00> : vector<2x16xf32>
    %240 = vector.multi_reduction <add>, %239, %cst_114 [2] : vector<2x16x16xf32> to vector<2x16xf32>
    %241 = vector.shape_cast %240 : vector<2x16xf32> to vector<2x16x1xf32>
    %242 = tpu.reciprocal %241 {approx = true} : vector<2x16x1xf32> -> vector<2x16x1xf32>
    %243 = vector.broadcast %242 : vector<2x16x1xf32> to vector<2x16x16xf32>
    %244 = arith.mulf %239, %243 : vector<2x16x16xf32>
    %245 = vector.extract_strided_slice %174 {offsets = [0, 0, 96], sizes = [2, 16, 32], strides = [1, 1, 1]} : vector<2x16x128xf32> to vector<2x16x32xf32>
    "tpu.trace_start"() <{level = 10 : i32, message = "bqk,bkd->bqd"}> : () -> ()
    %cst_115 = arith.constant dense<0.000000e+00> : vector<2x16x32xf32>
    %246 = tpu.matmul %244, %245, %cst_115 {dimension_numbers = #tpu.dot_dimension_numbers<[2], [1], [1], [2], [0, 0, 0, 1, 1, 2], [0], [0]>} : vector<2x16x16xf32>, vector<2x16x32xf32>, vector<2x16x32xf32> -> vector<2x16x32xf32>
    "tpu.trace_stop"() : () -> ()
    %247 = tpu.concatenate %192, %210, %228, %246 in 2 : vector<2x16x32xf32>, vector<2x16x32xf32>, vector<2x16x32xf32>, vector<2x16x32xf32> -> vector<2x16x128xf32>
    %248 = vector.shape_cast %247 : vector<2x16x128xf32> to vector<32x128xf32>
    %249 = arith.truncf %248 : vector<32x128xf32> to vector<32x128xbf16>
    %cst_116 = arith.constant dense<0.000000e+00> : vector<32x128xf32>
    %250 = tpu.matmul %249, %155, %cst_116 {dimension_numbers = #tpu.dot_dimension_numbers<[1], [0], [0], [1], [0, 0, 1, 1], [], []>} : vector<32x128xbf16>, vector<128x128xbf16>, vector<32x128xf32> -> vector<32x128xf32>
    %251 = vector.broadcast %157 : vector<1x128xf32> to vector<32x128xf32>
    %252 = arith.addf %250, %251 : vector<32x128xf32>
    %253 = arith.addf %141, %252 : vector<32x128xf32>
    %c0_117 = arith.constant 0 : index
    %c0_118 = arith.constant 0 : index
    %c0_119 = arith.constant 0 : index
    %254 = vector.load %arg22[%c0_117, %c0_118, %c0_119] : memref<2x1x128xf32, #tpu.memory_space<vmem>>, vector<1x1x128xf32>
    %255 = vector.shape_cast %254 : vector<1x1x128xf32> to vector<1x128xf32>
    %c0_120 = arith.constant 0 : index
    %c0_121 = arith.constant 0 : index
    %c0_122 = arith.constant 0 : index
    %256 = vector.load %arg23[%c0_120, %c0_121, %c0_122] : memref<2x1x128xf32, #tpu.memory_space<vmem>>, vector<1x1x128xf32>
    %257 = vector.shape_cast %256 : vector<1x1x128xf32> to vector<1x128xf32>
    %cst_123 = arith.constant dense<0.000000e+00> : vector<32xf32>
    %258 = vector.multi_reduction <add>, %253, %cst_123 [1] : vector<32x128xf32> to vector<32xf32>
    %259 = vector.shape_cast %258 : vector<32xf32> to vector<32x1xf32>
    %cst_124 = arith.constant 1.280000e+02 : f32
    %260 = vector.broadcast %cst_124 : f32 to vector<32x1xf32>
    %261 = arith.divf %259, %260 : vector<32x1xf32>
    %262 = vector.broadcast %261 : vector<32x1xf32> to vector<32x128xf32>
    %263 = arith.subf %253, %262 : vector<32x128xf32>
    %264 = arith.mulf %263, %263 : vector<32x128xf32>
    %cst_125 = arith.constant dense<0.000000e+00> : vector<32xf32>
    %265 = vector.multi_reduction <add>, %264, %cst_125 [1] : vector<32x128xf32> to vector<32xf32>
    %266 = vector.shape_cast %265 : vector<32xf32> to vector<32x1xf32>
    %cst_126 = arith.constant 1.280000e+02 : f32
    %267 = vector.broadcast %cst_126 : f32 to vector<32x1xf32>
    %268 = arith.divf %266, %267 : vector<32x1xf32>
    %269 = vector.broadcast %261 : vector<32x1xf32> to vector<32x128xf32>
    %270 = arith.subf %253, %269 : vector<32x128xf32>
    %cst_127 = arith.constant 9.99999974E-6 : f32
    %271 = vector.broadcast %cst_127 : f32 to vector<32x1xf32>
    %272 = arith.addf %268, %271 : vector<32x1xf32>
    %273 = math.rsqrt %272 : vector<32x1xf32>
    %274 = vector.broadcast %273 : vector<32x1xf32> to vector<32x128xf32>
    %275 = arith.mulf %270, %274 : vector<32x128xf32>
    %276 = vector.broadcast %255 : vector<1x128xf32> to vector<32x128xf32>
    %277 = arith.mulf %275, %276 : vector<32x128xf32>
    %278 = vector.broadcast %257 : vector<1x128xf32> to vector<32x128xf32>
    %279 = arith.addf %277, %278 : vector<32x128xf32>
    %c0_128 = arith.constant 0 : index
    %c0_129 = arith.constant 0 : index
    %c0_130 = arith.constant 0 : index
    %280 = vector.load %arg24[%c0_128, %c0_129, %c0_130] : memref<2x128x256xbf16, #tpu.memory_space<vmem>>, vector<1x128x256xbf16>
    %281 = vector.shape_cast %280 : vector<1x128x256xbf16> to vector<128x256xbf16>
    %c0_131 = arith.constant 0 : index
    %c0_132 = arith.constant 0 : index
    %c0_133 = arith.constant 0 : index
    %282 = vector.load %arg25[%c0_131, %c0_132, %c0_133] : memref<2x1x256xf32, #tpu.memory_space<vmem>>, vector<1x1x256xf32>
    %283 = vector.shape_cast %282 : vector<1x1x256xf32> to vector<1x256xf32>
    %c0_134 = arith.constant 0 : index
    %c0_135 = arith.constant 0 : index
    %c0_136 = arith.constant 0 : index
    %284 = vector.load %arg26[%c0_134, %c0_135, %c0_136] : memref<2x256x128xbf16, #tpu.memory_space<vmem>>, vector<1x256x128xbf16>
    %285 = vector.shape_cast %284 : vector<1x256x128xbf16> to vector<256x128xbf16>
    %c0_137 = arith.constant 0 : index
    %c0_138 = arith.constant 0 : index
    %c0_139 = arith.constant 0 : index
    %286 = vector.load %arg27[%c0_137, %c0_138, %c0_139] : memref<2x1x128xf32, #tpu.memory_space<vmem>>, vector<1x1x128xf32>
    %287 = vector.shape_cast %286 : vector<1x1x128xf32> to vector<1x128xf32>
    %288 = arith.truncf %279 : vector<32x128xf32> to vector<32x128xbf16>
    %cst_140 = arith.constant dense<0.000000e+00> : vector<32x256xf32>
    %289 = tpu.matmul %288, %281, %cst_140 {dimension_numbers = #tpu.dot_dimension_numbers<[1], [0], [0], [1], [0, 0, 1, 1], [], []>} : vector<32x128xbf16>, vector<128x256xbf16>, vector<32x256xf32> -> vector<32x256xf32>
    %290 = vector.broadcast %283 : vector<1x256xf32> to vector<32x256xf32>
    %291 = arith.addf %289, %290 : vector<32x256xf32>
    %cst_141 = arith.constant 0.000000e+00 : f32
    %292 = vector.broadcast %cst_141 : f32 to vector<32x256xf32>
    %293 = arith.maximumf %291, %292 : vector<32x256xf32>
    %294 = arith.truncf %293 : vector<32x256xf32> to vector<32x256xbf16>
    %cst_142 = arith.constant dense<0.000000e+00> : vector<32x128xf32>
    %295 = tpu.matmul %294, %285, %cst_142 {dimension_numbers = #tpu.dot_dimension_numbers<[1], [0], [0], [1], [0, 0, 1, 1], [], []>} : vector<32x256xbf16>, vector<256x128xbf16>, vector<32x128xf32> -> vector<32x128xf32>
    %296 = vector.broadcast %287 : vector<1x128xf32> to vector<32x128xf32>
    %297 = arith.addf %295, %296 : vector<32x128xf32>
    %298 = arith.addf %279, %297 : vector<32x128xf32>
    %c0_143 = arith.constant 0 : index
    %c0_144 = arith.constant 0 : index
    %c0_145 = arith.constant 0 : index
    %299 = vector.load %arg28[%c0_143, %c0_144, %c0_145] : memref<2x1x128xf32, #tpu.memory_space<vmem>>, vector<1x1x128xf32>
    %300 = vector.shape_cast %299 : vector<1x1x128xf32> to vector<1x128xf32>
    %c0_146 = arith.constant 0 : index
    %c0_147 = arith.constant 0 : index
    %c0_148 = arith.constant 0 : index
    %301 = vector.load %arg29[%c0_146, %c0_147, %c0_148] : memref<2x1x128xf32, #tpu.memory_space<vmem>>, vector<1x1x128xf32>
    %302 = vector.shape_cast %301 : vector<1x1x128xf32> to vector<1x128xf32>
    %cst_149 = arith.constant dense<0.000000e+00> : vector<32xf32>
    %303 = vector.multi_reduction <add>, %298, %cst_149 [1] : vector<32x128xf32> to vector<32xf32>
    %304 = vector.shape_cast %303 : vector<32xf32> to vector<32x1xf32>
    %cst_150 = arith.constant 1.280000e+02 : f32
    %305 = vector.broadcast %cst_150 : f32 to vector<32x1xf32>
    %306 = arith.divf %304, %305 : vector<32x1xf32>
    %307 = vector.broadcast %306 : vector<32x1xf32> to vector<32x128xf32>
    %308 = arith.subf %298, %307 : vector<32x128xf32>
    %309 = arith.mulf %308, %308 : vector<32x128xf32>
    %cst_151 = arith.constant dense<0.000000e+00> : vector<32xf32>
    %310 = vector.multi_reduction <add>, %309, %cst_151 [1] : vector<32x128xf32> to vector<32xf32>
    %311 = vector.shape_cast %310 : vector<32xf32> to vector<32x1xf32>
    %cst_152 = arith.constant 1.280000e+02 : f32
    %312 = vector.broadcast %cst_152 : f32 to vector<32x1xf32>
    %313 = arith.divf %311, %312 : vector<32x1xf32>
    %314 = vector.broadcast %306 : vector<32x1xf32> to vector<32x128xf32>
    %315 = arith.subf %298, %314 : vector<32x128xf32>
    %cst_153 = arith.constant 9.99999974E-6 : f32
    %316 = vector.broadcast %cst_153 : f32 to vector<32x1xf32>
    %317 = arith.addf %313, %316 : vector<32x1xf32>
    %318 = math.rsqrt %317 : vector<32x1xf32>
    %319 = vector.broadcast %318 : vector<32x1xf32> to vector<32x128xf32>
    %320 = arith.mulf %315, %319 : vector<32x128xf32>
    %321 = vector.broadcast %300 : vector<1x128xf32> to vector<32x128xf32>
    %322 = arith.mulf %320, %321 : vector<32x128xf32>
    %323 = vector.broadcast %302 : vector<1x128xf32> to vector<32x128xf32>
    %324 = arith.addf %322, %323 : vector<32x128xf32>
    %c1 = arith.constant 1 : index
    %c0_154 = arith.constant 0 : index
    %c0_155 = arith.constant 0 : index
    %325 = vector.load %arg4[%c1, %c0_154, %c0_155] : memref<2x128x128xbf16, #tpu.memory_space<vmem>>, vector<1x128x128xbf16>
    %326 = vector.shape_cast %325 : vector<1x128x128xbf16> to vector<128x128xbf16>
    %c1_156 = arith.constant 1 : index
    %c0_157 = arith.constant 0 : index
    %c0_158 = arith.constant 0 : index
    %327 = vector.load %arg5[%c1_156, %c0_157, %c0_158] : memref<2x1x128xf32, #tpu.memory_space<vmem>>, vector<1x1x128xf32>
    %328 = vector.shape_cast %327 : vector<1x1x128xf32> to vector<1x128xf32>
    %c1_159 = arith.constant 1 : index
    %c0_160 = arith.constant 0 : index
    %c0_161 = arith.constant 0 : index
    %329 = vector.load %arg6[%c1_159, %c0_160, %c0_161] : memref<2x128x128xbf16, #tpu.memory_space<vmem>>, vector<1x128x128xbf16>
    %330 = vector.shape_cast %329 : vector<1x128x128xbf16> to vector<128x128xbf16>
    %c1_162 = arith.constant 1 : index
    %c0_163 = arith.constant 0 : index
    %c0_164 = arith.constant 0 : index
    %331 = vector.load %arg7[%c1_162, %c0_163, %c0_164] : memref<2x1x128xf32, #tpu.memory_space<vmem>>, vector<1x1x128xf32>
    %332 = vector.shape_cast %331 : vector<1x1x128xf32> to vector<1x128xf32>
    %c1_165 = arith.constant 1 : index
    %c0_166 = arith.constant 0 : index
    %c0_167 = arith.constant 0 : index
    %333 = vector.load %arg8[%c1_165, %c0_166, %c0_167] : memref<2x128x128xbf16, #tpu.memory_space<vmem>>, vector<1x128x128xbf16>
    %334 = vector.shape_cast %333 : vector<1x128x128xbf16> to vector<128x128xbf16>
    %c1_168 = arith.constant 1 : index
    %c0_169 = arith.constant 0 : index
    %c0_170 = arith.constant 0 : index
    %335 = vector.load %arg9[%c1_168, %c0_169, %c0_170] : memref<2x1x128xf32, #tpu.memory_space<vmem>>, vector<1x1x128xf32>
    %336 = vector.shape_cast %335 : vector<1x1x128xf32> to vector<1x128xf32>
    %c1_171 = arith.constant 1 : index
    %c0_172 = arith.constant 0 : index
    %c0_173 = arith.constant 0 : index
    %337 = vector.load %arg10[%c1_171, %c0_172, %c0_173] : memref<2x128x128xbf16, #tpu.memory_space<vmem>>, vector<1x128x128xbf16>
    %338 = vector.shape_cast %337 : vector<1x128x128xbf16> to vector<128x128xbf16>
    %c1_174 = arith.constant 1 : index
    %c0_175 = arith.constant 0 : index
    %c0_176 = arith.constant 0 : index
    %339 = vector.load %arg11[%c1_174, %c0_175, %c0_176] : memref<2x1x128xf32, #tpu.memory_space<vmem>>, vector<1x1x128xf32>
    %340 = vector.shape_cast %339 : vector<1x1x128xf32> to vector<1x128xf32>
    %341 = arith.truncf %324 : vector<32x128xf32> to vector<32x128xbf16>
    %cst_177 = arith.constant dense<0.000000e+00> : vector<32x128xf32>
    %342 = tpu.matmul %341, %326, %cst_177 {dimension_numbers = #tpu.dot_dimension_numbers<[1], [0], [0], [1], [0, 0, 1, 1], [], []>} : vector<32x128xbf16>, vector<128x128xbf16>, vector<32x128xf32> -> vector<32x128xf32>
    %343 = vector.broadcast %328 : vector<1x128xf32> to vector<32x128xf32>
    %344 = arith.addf %342, %343 : vector<32x128xf32>
    %345 = arith.truncf %324 : vector<32x128xf32> to vector<32x128xbf16>
    %cst_178 = arith.constant dense<0.000000e+00> : vector<32x128xf32>
    %346 = tpu.matmul %345, %330, %cst_178 {dimension_numbers = #tpu.dot_dimension_numbers<[1], [0], [0], [1], [0, 0, 1, 1], [], []>} : vector<32x128xbf16>, vector<128x128xbf16>, vector<32x128xf32> -> vector<32x128xf32>
    %347 = vector.broadcast %332 : vector<1x128xf32> to vector<32x128xf32>
    %348 = arith.addf %346, %347 : vector<32x128xf32>
    %349 = arith.truncf %324 : vector<32x128xf32> to vector<32x128xbf16>
    %cst_179 = arith.constant dense<0.000000e+00> : vector<32x128xf32>
    %350 = tpu.matmul %349, %334, %cst_179 {dimension_numbers = #tpu.dot_dimension_numbers<[1], [0], [0], [1], [0, 0, 1, 1], [], []>} : vector<32x128xbf16>, vector<128x128xbf16>, vector<32x128xf32> -> vector<32x128xf32>
    %351 = vector.broadcast %336 : vector<1x128xf32> to vector<32x128xf32>
    %352 = arith.addf %350, %351 : vector<32x128xf32>
    %cst_180 = arith.constant 0.176776692 : f32
    %353 = vector.broadcast %cst_180 : f32 to vector<32x128xf32>
    %354 = arith.mulf %344, %353 : vector<32x128xf32>
    %355 = vector.shape_cast %354 : vector<32x128xf32> to vector<2x16x128xf32>
    %356 = vector.shape_cast %348 : vector<32x128xf32> to vector<2x16x128xf32>
    %357 = vector.shape_cast %352 : vector<32x128xf32> to vector<2x16x128xf32>
    %358 = vector.extract_strided_slice %355 {offsets = [0, 0, 0], sizes = [2, 16, 32], strides = [1, 1, 1]} : vector<2x16x128xf32> to vector<2x16x32xf32>
    %359 = vector.extract_strided_slice %356 {offsets = [0, 0, 0], sizes = [2, 16, 32], strides = [1, 1, 1]} : vector<2x16x128xf32> to vector<2x16x32xf32>
    "tpu.trace_start"() <{level = 10 : i32, message = "bqd,bkd->bqk"}> : () -> ()
    %cst_181 = arith.constant dense<0.000000e+00> : vector<2x16x16xf32>
    %360 = tpu.matmul %358, %359, %cst_181 {dimension_numbers = #tpu.dot_dimension_numbers<[2], [2], [1], [1], [0, 0, 0, 1, 1, 1], [0], [0]>} : vector<2x16x32xf32>, vector<2x16x32xf32>, vector<2x16x16xf32> -> vector<2x16x16xf32>
    "tpu.trace_stop"() : () -> ()
    %361 = arith.addf %360, %2 : vector<2x16x16xf32>
    %cst_182 = arith.constant dense<0xFF800000> : vector<2x16xf32>
    %362 = vector.multi_reduction <maximumf>, %361, %cst_182 [2] : vector<2x16x16xf32> to vector<2x16xf32>
    %363 = vector.shape_cast %362 : vector<2x16xf32> to vector<2x16x1xf32>
    %cst_183 = arith.constant -1.000000e+09 : f32
    %364 = vector.broadcast %cst_183 : f32 to vector<2x16x1xf32>
    %365 = arith.maximumf %363, %364 : vector<2x16x1xf32>
    %366 = vector.broadcast %365 : vector<2x16x1xf32> to vector<2x16x16xf32>
    %367 = arith.subf %361, %366 : vector<2x16x16xf32>
    %368 = math.exp %367 : vector<2x16x16xf32>
    %cst_184 = arith.constant dense<0.000000e+00> : vector<2x16xf32>
    %369 = vector.multi_reduction <add>, %368, %cst_184 [2] : vector<2x16x16xf32> to vector<2x16xf32>
    %370 = vector.shape_cast %369 : vector<2x16xf32> to vector<2x16x1xf32>
    %371 = tpu.reciprocal %370 {approx = true} : vector<2x16x1xf32> -> vector<2x16x1xf32>
    %372 = vector.broadcast %371 : vector<2x16x1xf32> to vector<2x16x16xf32>
    %373 = arith.mulf %368, %372 : vector<2x16x16xf32>
    %374 = vector.extract_strided_slice %357 {offsets = [0, 0, 0], sizes = [2, 16, 32], strides = [1, 1, 1]} : vector<2x16x128xf32> to vector<2x16x32xf32>
    "tpu.trace_start"() <{level = 10 : i32, message = "bqk,bkd->bqd"}> : () -> ()
    %cst_185 = arith.constant dense<0.000000e+00> : vector<2x16x32xf32>
    %375 = tpu.matmul %373, %374, %cst_185 {dimension_numbers = #tpu.dot_dimension_numbers<[2], [1], [1], [2], [0, 0, 0, 1, 1, 2], [0], [0]>} : vector<2x16x16xf32>, vector<2x16x32xf32>, vector<2x16x32xf32> -> vector<2x16x32xf32>
    "tpu.trace_stop"() : () -> ()
    %376 = vector.extract_strided_slice %355 {offsets = [0, 0, 32], sizes = [2, 16, 32], strides = [1, 1, 1]} : vector<2x16x128xf32> to vector<2x16x32xf32>
    %377 = vector.extract_strided_slice %356 {offsets = [0, 0, 32], sizes = [2, 16, 32], strides = [1, 1, 1]} : vector<2x16x128xf32> to vector<2x16x32xf32>
    "tpu.trace_start"() <{level = 10 : i32, message = "bqd,bkd->bqk"}> : () -> ()
    %cst_186 = arith.constant dense<0.000000e+00> : vector<2x16x16xf32>
    %378 = tpu.matmul %376, %377, %cst_186 {dimension_numbers = #tpu.dot_dimension_numbers<[2], [2], [1], [1], [0, 0, 0, 1, 1, 1], [0], [0]>} : vector<2x16x32xf32>, vector<2x16x32xf32>, vector<2x16x16xf32> -> vector<2x16x16xf32>
    "tpu.trace_stop"() : () -> ()
    %379 = arith.addf %378, %2 : vector<2x16x16xf32>
    %cst_187 = arith.constant dense<0xFF800000> : vector<2x16xf32>
    %380 = vector.multi_reduction <maximumf>, %379, %cst_187 [2] : vector<2x16x16xf32> to vector<2x16xf32>
    %381 = vector.shape_cast %380 : vector<2x16xf32> to vector<2x16x1xf32>
    %cst_188 = arith.constant -1.000000e+09 : f32
    %382 = vector.broadcast %cst_188 : f32 to vector<2x16x1xf32>
    %383 = arith.maximumf %381, %382 : vector<2x16x1xf32>
    %384 = vector.broadcast %383 : vector<2x16x1xf32> to vector<2x16x16xf32>
    %385 = arith.subf %379, %384 : vector<2x16x16xf32>
    %386 = math.exp %385 : vector<2x16x16xf32>
    %cst_189 = arith.constant dense<0.000000e+00> : vector<2x16xf32>
    %387 = vector.multi_reduction <add>, %386, %cst_189 [2] : vector<2x16x16xf32> to vector<2x16xf32>
    %388 = vector.shape_cast %387 : vector<2x16xf32> to vector<2x16x1xf32>
    %389 = tpu.reciprocal %388 {approx = true} : vector<2x16x1xf32> -> vector<2x16x1xf32>
    %390 = vector.broadcast %389 : vector<2x16x1xf32> to vector<2x16x16xf32>
    %391 = arith.mulf %386, %390 : vector<2x16x16xf32>
    %392 = vector.extract_strided_slice %357 {offsets = [0, 0, 32], sizes = [2, 16, 32], strides = [1, 1, 1]} : vector<2x16x128xf32> to vector<2x16x32xf32>
    "tpu.trace_start"() <{level = 10 : i32, message = "bqk,bkd->bqd"}> : () -> ()
    %cst_190 = arith.constant dense<0.000000e+00> : vector<2x16x32xf32>
    %393 = tpu.matmul %391, %392, %cst_190 {dimension_numbers = #tpu.dot_dimension_numbers<[2], [1], [1], [2], [0, 0, 0, 1, 1, 2], [0], [0]>} : vector<2x16x16xf32>, vector<2x16x32xf32>, vector<2x16x32xf32> -> vector<2x16x32xf32>
    "tpu.trace_stop"() : () -> ()
    %394 = vector.extract_strided_slice %355 {offsets = [0, 0, 64], sizes = [2, 16, 32], strides = [1, 1, 1]} : vector<2x16x128xf32> to vector<2x16x32xf32>
    %395 = vector.extract_strided_slice %356 {offsets = [0, 0, 64], sizes = [2, 16, 32], strides = [1, 1, 1]} : vector<2x16x128xf32> to vector<2x16x32xf32>
    "tpu.trace_start"() <{level = 10 : i32, message = "bqd,bkd->bqk"}> : () -> ()
    %cst_191 = arith.constant dense<0.000000e+00> : vector<2x16x16xf32>
    %396 = tpu.matmul %394, %395, %cst_191 {dimension_numbers = #tpu.dot_dimension_numbers<[2], [2], [1], [1], [0, 0, 0, 1, 1, 1], [0], [0]>} : vector<2x16x32xf32>, vector<2x16x32xf32>, vector<2x16x16xf32> -> vector<2x16x16xf32>
    "tpu.trace_stop"() : () -> ()
    %397 = arith.addf %396, %2 : vector<2x16x16xf32>
    %cst_192 = arith.constant dense<0xFF800000> : vector<2x16xf32>
    %398 = vector.multi_reduction <maximumf>, %397, %cst_192 [2] : vector<2x16x16xf32> to vector<2x16xf32>
    %399 = vector.shape_cast %398 : vector<2x16xf32> to vector<2x16x1xf32>
    %cst_193 = arith.constant -1.000000e+09 : f32
    %400 = vector.broadcast %cst_193 : f32 to vector<2x16x1xf32>
    %401 = arith.maximumf %399, %400 : vector<2x16x1xf32>
    %402 = vector.broadcast %401 : vector<2x16x1xf32> to vector<2x16x16xf32>
    %403 = arith.subf %397, %402 : vector<2x16x16xf32>
    %404 = math.exp %403 : vector<2x16x16xf32>
    %cst_194 = arith.constant dense<0.000000e+00> : vector<2x16xf32>
    %405 = vector.multi_reduction <add>, %404, %cst_194 [2] : vector<2x16x16xf32> to vector<2x16xf32>
    %406 = vector.shape_cast %405 : vector<2x16xf32> to vector<2x16x1xf32>
    %407 = tpu.reciprocal %406 {approx = true} : vector<2x16x1xf32> -> vector<2x16x1xf32>
    %408 = vector.broadcast %407 : vector<2x16x1xf32> to vector<2x16x16xf32>
    %409 = arith.mulf %404, %408 : vector<2x16x16xf32>
    %410 = vector.extract_strided_slice %357 {offsets = [0, 0, 64], sizes = [2, 16, 32], strides = [1, 1, 1]} : vector<2x16x128xf32> to vector<2x16x32xf32>
    "tpu.trace_start"() <{level = 10 : i32, message = "bqk,bkd->bqd"}> : () -> ()
    %cst_195 = arith.constant dense<0.000000e+00> : vector<2x16x32xf32>
    %411 = tpu.matmul %409, %410, %cst_195 {dimension_numbers = #tpu.dot_dimension_numbers<[2], [1], [1], [2], [0, 0, 0, 1, 1, 2], [0], [0]>} : vector<2x16x16xf32>, vector<2x16x32xf32>, vector<2x16x32xf32> -> vector<2x16x32xf32>
    "tpu.trace_stop"() : () -> ()
    %412 = vector.extract_strided_slice %355 {offsets = [0, 0, 96], sizes = [2, 16, 32], strides = [1, 1, 1]} : vector<2x16x128xf32> to vector<2x16x32xf32>
    %413 = vector.extract_strided_slice %356 {offsets = [0, 0, 96], sizes = [2, 16, 32], strides = [1, 1, 1]} : vector<2x16x128xf32> to vector<2x16x32xf32>
    "tpu.trace_start"() <{level = 10 : i32, message = "bqd,bkd->bqk"}> : () -> ()
    %cst_196 = arith.constant dense<0.000000e+00> : vector<2x16x16xf32>
    %414 = tpu.matmul %412, %413, %cst_196 {dimension_numbers = #tpu.dot_dimension_numbers<[2], [2], [1], [1], [0, 0, 0, 1, 1, 1], [0], [0]>} : vector<2x16x32xf32>, vector<2x16x32xf32>, vector<2x16x16xf32> -> vector<2x16x16xf32>
    "tpu.trace_stop"() : () -> ()
    %415 = arith.addf %414, %2 : vector<2x16x16xf32>
    %cst_197 = arith.constant dense<0xFF800000> : vector<2x16xf32>
    %416 = vector.multi_reduction <maximumf>, %415, %cst_197 [2] : vector<2x16x16xf32> to vector<2x16xf32>
    %417 = vector.shape_cast %416 : vector<2x16xf32> to vector<2x16x1xf32>
    %cst_198 = arith.constant -1.000000e+09 : f32
    %418 = vector.broadcast %cst_198 : f32 to vector<2x16x1xf32>
    %419 = arith.maximumf %417, %418 : vector<2x16x1xf32>
    %420 = vector.broadcast %419 : vector<2x16x1xf32> to vector<2x16x16xf32>
    %421 = arith.subf %415, %420 : vector<2x16x16xf32>
    %422 = math.exp %421 : vector<2x16x16xf32>
    %cst_199 = arith.constant dense<0.000000e+00> : vector<2x16xf32>
    %423 = vector.multi_reduction <add>, %422, %cst_199 [2] : vector<2x16x16xf32> to vector<2x16xf32>
    %424 = vector.shape_cast %423 : vector<2x16xf32> to vector<2x16x1xf32>
    %425 = tpu.reciprocal %424 {approx = true} : vector<2x16x1xf32> -> vector<2x16x1xf32>
    %426 = vector.broadcast %425 : vector<2x16x1xf32> to vector<2x16x16xf32>
    %427 = arith.mulf %422, %426 : vector<2x16x16xf32>
    %428 = vector.extract_strided_slice %357 {offsets = [0, 0, 96], sizes = [2, 16, 32], strides = [1, 1, 1]} : vector<2x16x128xf32> to vector<2x16x32xf32>
    "tpu.trace_start"() <{level = 10 : i32, message = "bqk,bkd->bqd"}> : () -> ()
    %cst_200 = arith.constant dense<0.000000e+00> : vector<2x16x32xf32>
    %429 = tpu.matmul %427, %428, %cst_200 {dimension_numbers = #tpu.dot_dimension_numbers<[2], [1], [1], [2], [0, 0, 0, 1, 1, 2], [0], [0]>} : vector<2x16x16xf32>, vector<2x16x32xf32>, vector<2x16x32xf32> -> vector<2x16x32xf32>
    "tpu.trace_stop"() : () -> ()
    %430 = tpu.concatenate %375, %393, %411, %429 in 2 : vector<2x16x32xf32>, vector<2x16x32xf32>, vector<2x16x32xf32>, vector<2x16x32xf32> -> vector<2x16x128xf32>
    %431 = vector.shape_cast %430 : vector<2x16x128xf32> to vector<32x128xf32>
    %432 = arith.truncf %431 : vector<32x128xf32> to vector<32x128xbf16>
    %cst_201 = arith.constant dense<0.000000e+00> : vector<32x128xf32>
    %433 = tpu.matmul %432, %338, %cst_201 {dimension_numbers = #tpu.dot_dimension_numbers<[1], [0], [0], [1], [0, 0, 1, 1], [], []>} : vector<32x128xbf16>, vector<128x128xbf16>, vector<32x128xf32> -> vector<32x128xf32>
    %434 = vector.broadcast %340 : vector<1x128xf32> to vector<32x128xf32>
    %435 = arith.addf %433, %434 : vector<32x128xf32>
    %436 = arith.addf %324, %435 : vector<32x128xf32>
    %c1_202 = arith.constant 1 : index
    %c0_203 = arith.constant 0 : index
    %c0_204 = arith.constant 0 : index
    %437 = vector.load %arg12[%c1_202, %c0_203, %c0_204] : memref<2x1x128xf32, #tpu.memory_space<vmem>>, vector<1x1x128xf32>
    %438 = vector.shape_cast %437 : vector<1x1x128xf32> to vector<1x128xf32>
    %c1_205 = arith.constant 1 : index
    %c0_206 = arith.constant 0 : index
    %c0_207 = arith.constant 0 : index
    %439 = vector.load %arg13[%c1_205, %c0_206, %c0_207] : memref<2x1x128xf32, #tpu.memory_space<vmem>>, vector<1x1x128xf32>
    %440 = vector.shape_cast %439 : vector<1x1x128xf32> to vector<1x128xf32>
    %cst_208 = arith.constant dense<0.000000e+00> : vector<32xf32>
    %441 = vector.multi_reduction <add>, %436, %cst_208 [1] : vector<32x128xf32> to vector<32xf32>
    %442 = vector.shape_cast %441 : vector<32xf32> to vector<32x1xf32>
    %cst_209 = arith.constant 1.280000e+02 : f32
    %443 = vector.broadcast %cst_209 : f32 to vector<32x1xf32>
    %444 = arith.divf %442, %443 : vector<32x1xf32>
    %445 = vector.broadcast %444 : vector<32x1xf32> to vector<32x128xf32>
    %446 = arith.subf %436, %445 : vector<32x128xf32>
    %447 = arith.mulf %446, %446 : vector<32x128xf32>
    %cst_210 = arith.constant dense<0.000000e+00> : vector<32xf32>
    %448 = vector.multi_reduction <add>, %447, %cst_210 [1] : vector<32x128xf32> to vector<32xf32>
    %449 = vector.shape_cast %448 : vector<32xf32> to vector<32x1xf32>
    %cst_211 = arith.constant 1.280000e+02 : f32
    %450 = vector.broadcast %cst_211 : f32 to vector<32x1xf32>
    %451 = arith.divf %449, %450 : vector<32x1xf32>
    %452 = vector.broadcast %444 : vector<32x1xf32> to vector<32x128xf32>
    %453 = arith.subf %436, %452 : vector<32x128xf32>
    %cst_212 = arith.constant 9.99999974E-6 : f32
    %454 = vector.broadcast %cst_212 : f32 to vector<32x1xf32>
    %455 = arith.addf %451, %454 : vector<32x1xf32>
    %456 = math.rsqrt %455 : vector<32x1xf32>
    %457 = vector.broadcast %456 : vector<32x1xf32> to vector<32x128xf32>
    %458 = arith.mulf %453, %457 : vector<32x128xf32>
    %459 = vector.broadcast %438 : vector<1x128xf32> to vector<32x128xf32>
    %460 = arith.mulf %458, %459 : vector<32x128xf32>
    %461 = vector.broadcast %440 : vector<1x128xf32> to vector<32x128xf32>
    %462 = arith.addf %460, %461 : vector<32x128xf32>
    %c1_213 = arith.constant 1 : index
    %c0_214 = arith.constant 0 : index
    %c0_215 = arith.constant 0 : index
    %463 = vector.load %arg14[%c1_213, %c0_214, %c0_215] : memref<2x128x128xbf16, #tpu.memory_space<vmem>>, vector<1x128x128xbf16>
    %464 = vector.shape_cast %463 : vector<1x128x128xbf16> to vector<128x128xbf16>
    %c1_216 = arith.constant 1 : index
    %c0_217 = arith.constant 0 : index
    %c0_218 = arith.constant 0 : index
    %465 = vector.load %arg15[%c1_216, %c0_217, %c0_218] : memref<2x1x128xf32, #tpu.memory_space<vmem>>, vector<1x1x128xf32>
    %466 = vector.shape_cast %465 : vector<1x1x128xf32> to vector<1x128xf32>
    %c1_219 = arith.constant 1 : index
    %c0_220 = arith.constant 0 : index
    %c0_221 = arith.constant 0 : index
    %467 = vector.load %arg16[%c1_219, %c0_220, %c0_221] : memref<2x128x128xbf16, #tpu.memory_space<vmem>>, vector<1x128x128xbf16>
    %468 = vector.shape_cast %467 : vector<1x128x128xbf16> to vector<128x128xbf16>
    %c1_222 = arith.constant 1 : index
    %c0_223 = arith.constant 0 : index
    %c0_224 = arith.constant 0 : index
    %469 = vector.load %arg17[%c1_222, %c0_223, %c0_224] : memref<2x1x128xf32, #tpu.memory_space<vmem>>, vector<1x1x128xf32>
    %470 = vector.shape_cast %469 : vector<1x1x128xf32> to vector<1x128xf32>
    %c1_225 = arith.constant 1 : index
    %c0_226 = arith.constant 0 : index
    %c0_227 = arith.constant 0 : index
    %471 = vector.load %arg18[%c1_225, %c0_226, %c0_227] : memref<2x128x128xbf16, #tpu.memory_space<vmem>>, vector<1x128x128xbf16>
    %472 = vector.shape_cast %471 : vector<1x128x128xbf16> to vector<128x128xbf16>
    %c1_228 = arith.constant 1 : index
    %c0_229 = arith.constant 0 : index
    %c0_230 = arith.constant 0 : index
    %473 = vector.load %arg19[%c1_228, %c0_229, %c0_230] : memref<2x1x128xf32, #tpu.memory_space<vmem>>, vector<1x1x128xf32>
    %474 = vector.shape_cast %473 : vector<1x1x128xf32> to vector<1x128xf32>
    %c1_231 = arith.constant 1 : index
    %c0_232 = arith.constant 0 : index
    %c0_233 = arith.constant 0 : index
    %475 = vector.load %arg20[%c1_231, %c0_232, %c0_233] : memref<2x128x128xbf16, #tpu.memory_space<vmem>>, vector<1x128x128xbf16>
    %476 = vector.shape_cast %475 : vector<1x128x128xbf16> to vector<128x128xbf16>
    %c1_234 = arith.constant 1 : index
    %c0_235 = arith.constant 0 : index
    %c0_236 = arith.constant 0 : index
    %477 = vector.load %arg21[%c1_234, %c0_235, %c0_236] : memref<2x1x128xf32, #tpu.memory_space<vmem>>, vector<1x1x128xf32>
    %478 = vector.shape_cast %477 : vector<1x1x128xf32> to vector<1x128xf32>
    %479 = arith.truncf %462 : vector<32x128xf32> to vector<32x128xbf16>
    %cst_237 = arith.constant dense<0.000000e+00> : vector<32x128xf32>
    %480 = tpu.matmul %479, %464, %cst_237 {dimension_numbers = #tpu.dot_dimension_numbers<[1], [0], [0], [1], [0, 0, 1, 1], [], []>} : vector<32x128xbf16>, vector<128x128xbf16>, vector<32x128xf32> -> vector<32x128xf32>
    %481 = vector.broadcast %466 : vector<1x128xf32> to vector<32x128xf32>
    %482 = arith.addf %480, %481 : vector<32x128xf32>
    %483 = arith.truncf %1 : vector<32x128xf32> to vector<32x128xbf16>
    %cst_238 = arith.constant dense<0.000000e+00> : vector<32x128xf32>
    %484 = tpu.matmul %483, %468, %cst_238 {dimension_numbers = #tpu.dot_dimension_numbers<[1], [0], [0], [1], [0, 0, 1, 1], [], []>} : vector<32x128xbf16>, vector<128x128xbf16>, vector<32x128xf32> -> vector<32x128xf32>
    %485 = vector.broadcast %470 : vector<1x128xf32> to vector<32x128xf32>
    %486 = arith.addf %484, %485 : vector<32x128xf32>
    %487 = arith.truncf %1 : vector<32x128xf32> to vector<32x128xbf16>
    %cst_239 = arith.constant dense<0.000000e+00> : vector<32x128xf32>
    %488 = tpu.matmul %487, %472, %cst_239 {dimension_numbers = #tpu.dot_dimension_numbers<[1], [0], [0], [1], [0, 0, 1, 1], [], []>} : vector<32x128xbf16>, vector<128x128xbf16>, vector<32x128xf32> -> vector<32x128xf32>
    %489 = vector.broadcast %474 : vector<1x128xf32> to vector<32x128xf32>
    %490 = arith.addf %488, %489 : vector<32x128xf32>
    %cst_240 = arith.constant 0.176776692 : f32
    %491 = vector.broadcast %cst_240 : f32 to vector<32x128xf32>
    %492 = arith.mulf %482, %491 : vector<32x128xf32>
    %493 = vector.shape_cast %492 : vector<32x128xf32> to vector<2x16x128xf32>
    %494 = vector.shape_cast %486 : vector<32x128xf32> to vector<2x16x128xf32>
    %495 = vector.shape_cast %490 : vector<32x128xf32> to vector<2x16x128xf32>
    %496 = vector.extract_strided_slice %493 {offsets = [0, 0, 0], sizes = [2, 16, 32], strides = [1, 1, 1]} : vector<2x16x128xf32> to vector<2x16x32xf32>
    %497 = vector.extract_strided_slice %494 {offsets = [0, 0, 0], sizes = [2, 16, 32], strides = [1, 1, 1]} : vector<2x16x128xf32> to vector<2x16x32xf32>
    "tpu.trace_start"() <{level = 10 : i32, message = "bqd,bkd->bqk"}> : () -> ()
    %cst_241 = arith.constant dense<0.000000e+00> : vector<2x16x16xf32>
    %498 = tpu.matmul %496, %497, %cst_241 {dimension_numbers = #tpu.dot_dimension_numbers<[2], [2], [1], [1], [0, 0, 0, 1, 1, 1], [0], [0]>} : vector<2x16x32xf32>, vector<2x16x32xf32>, vector<2x16x16xf32> -> vector<2x16x16xf32>
    "tpu.trace_stop"() : () -> ()
    %499 = arith.addf %498, %3 : vector<2x16x16xf32>
    %cst_242 = arith.constant dense<0xFF800000> : vector<2x16xf32>
    %500 = vector.multi_reduction <maximumf>, %499, %cst_242 [2] : vector<2x16x16xf32> to vector<2x16xf32>
    %501 = vector.shape_cast %500 : vector<2x16xf32> to vector<2x16x1xf32>
    %cst_243 = arith.constant -1.000000e+09 : f32
    %502 = vector.broadcast %cst_243 : f32 to vector<2x16x1xf32>
    %503 = arith.maximumf %501, %502 : vector<2x16x1xf32>
    %504 = vector.broadcast %503 : vector<2x16x1xf32> to vector<2x16x16xf32>
    %505 = arith.subf %499, %504 : vector<2x16x16xf32>
    %506 = math.exp %505 : vector<2x16x16xf32>
    %cst_244 = arith.constant dense<0.000000e+00> : vector<2x16xf32>
    %507 = vector.multi_reduction <add>, %506, %cst_244 [2] : vector<2x16x16xf32> to vector<2x16xf32>
    %508 = vector.shape_cast %507 : vector<2x16xf32> to vector<2x16x1xf32>
    %509 = tpu.reciprocal %508 {approx = true} : vector<2x16x1xf32> -> vector<2x16x1xf32>
    %510 = vector.broadcast %509 : vector<2x16x1xf32> to vector<2x16x16xf32>
    %511 = arith.mulf %506, %510 : vector<2x16x16xf32>
    %512 = vector.extract_strided_slice %495 {offsets = [0, 0, 0], sizes = [2, 16, 32], strides = [1, 1, 1]} : vector<2x16x128xf32> to vector<2x16x32xf32>
    "tpu.trace_start"() <{level = 10 : i32, message = "bqk,bkd->bqd"}> : () -> ()
    %cst_245 = arith.constant dense<0.000000e+00> : vector<2x16x32xf32>
    %513 = tpu.matmul %511, %512, %cst_245 {dimension_numbers = #tpu.dot_dimension_numbers<[2], [1], [1], [2], [0, 0, 0, 1, 1, 2], [0], [0]>} : vector<2x16x16xf32>, vector<2x16x32xf32>, vector<2x16x32xf32> -> vector<2x16x32xf32>
    "tpu.trace_stop"() : () -> ()
    %514 = vector.extract_strided_slice %493 {offsets = [0, 0, 32], sizes = [2, 16, 32], strides = [1, 1, 1]} : vector<2x16x128xf32> to vector<2x16x32xf32>
    %515 = vector.extract_strided_slice %494 {offsets = [0, 0, 32], sizes = [2, 16, 32], strides = [1, 1, 1]} : vector<2x16x128xf32> to vector<2x16x32xf32>
    "tpu.trace_start"() <{level = 10 : i32, message = "bqd,bkd->bqk"}> : () -> ()
    %cst_246 = arith.constant dense<0.000000e+00> : vector<2x16x16xf32>
    %516 = tpu.matmul %514, %515, %cst_246 {dimension_numbers = #tpu.dot_dimension_numbers<[2], [2], [1], [1], [0, 0, 0, 1, 1, 1], [0], [0]>} : vector<2x16x32xf32>, vector<2x16x32xf32>, vector<2x16x16xf32> -> vector<2x16x16xf32>
    "tpu.trace_stop"() : () -> ()
    %517 = arith.addf %516, %3 : vector<2x16x16xf32>
    %cst_247 = arith.constant dense<0xFF800000> : vector<2x16xf32>
    %518 = vector.multi_reduction <maximumf>, %517, %cst_247 [2] : vector<2x16x16xf32> to vector<2x16xf32>
    %519 = vector.shape_cast %518 : vector<2x16xf32> to vector<2x16x1xf32>
    %cst_248 = arith.constant -1.000000e+09 : f32
    %520 = vector.broadcast %cst_248 : f32 to vector<2x16x1xf32>
    %521 = arith.maximumf %519, %520 : vector<2x16x1xf32>
    %522 = vector.broadcast %521 : vector<2x16x1xf32> to vector<2x16x16xf32>
    %523 = arith.subf %517, %522 : vector<2x16x16xf32>
    %524 = math.exp %523 : vector<2x16x16xf32>
    %cst_249 = arith.constant dense<0.000000e+00> : vector<2x16xf32>
    %525 = vector.multi_reduction <add>, %524, %cst_249 [2] : vector<2x16x16xf32> to vector<2x16xf32>
    %526 = vector.shape_cast %525 : vector<2x16xf32> to vector<2x16x1xf32>
    %527 = tpu.reciprocal %526 {approx = true} : vector<2x16x1xf32> -> vector<2x16x1xf32>
    %528 = vector.broadcast %527 : vector<2x16x1xf32> to vector<2x16x16xf32>
    %529 = arith.mulf %524, %528 : vector<2x16x16xf32>
    %530 = vector.extract_strided_slice %495 {offsets = [0, 0, 32], sizes = [2, 16, 32], strides = [1, 1, 1]} : vector<2x16x128xf32> to vector<2x16x32xf32>
    "tpu.trace_start"() <{level = 10 : i32, message = "bqk,bkd->bqd"}> : () -> ()
    %cst_250 = arith.constant dense<0.000000e+00> : vector<2x16x32xf32>
    %531 = tpu.matmul %529, %530, %cst_250 {dimension_numbers = #tpu.dot_dimension_numbers<[2], [1], [1], [2], [0, 0, 0, 1, 1, 2], [0], [0]>} : vector<2x16x16xf32>, vector<2x16x32xf32>, vector<2x16x32xf32> -> vector<2x16x32xf32>
    "tpu.trace_stop"() : () -> ()
    %532 = vector.extract_strided_slice %493 {offsets = [0, 0, 64], sizes = [2, 16, 32], strides = [1, 1, 1]} : vector<2x16x128xf32> to vector<2x16x32xf32>
    %533 = vector.extract_strided_slice %494 {offsets = [0, 0, 64], sizes = [2, 16, 32], strides = [1, 1, 1]} : vector<2x16x128xf32> to vector<2x16x32xf32>
    "tpu.trace_start"() <{level = 10 : i32, message = "bqd,bkd->bqk"}> : () -> ()
    %cst_251 = arith.constant dense<0.000000e+00> : vector<2x16x16xf32>
    %534 = tpu.matmul %532, %533, %cst_251 {dimension_numbers = #tpu.dot_dimension_numbers<[2], [2], [1], [1], [0, 0, 0, 1, 1, 1], [0], [0]>} : vector<2x16x32xf32>, vector<2x16x32xf32>, vector<2x16x16xf32> -> vector<2x16x16xf32>
    "tpu.trace_stop"() : () -> ()
    %535 = arith.addf %534, %3 : vector<2x16x16xf32>
    %cst_252 = arith.constant dense<0xFF800000> : vector<2x16xf32>
    %536 = vector.multi_reduction <maximumf>, %535, %cst_252 [2] : vector<2x16x16xf32> to vector<2x16xf32>
    %537 = vector.shape_cast %536 : vector<2x16xf32> to vector<2x16x1xf32>
    %cst_253 = arith.constant -1.000000e+09 : f32
    %538 = vector.broadcast %cst_253 : f32 to vector<2x16x1xf32>
    %539 = arith.maximumf %537, %538 : vector<2x16x1xf32>
    %540 = vector.broadcast %539 : vector<2x16x1xf32> to vector<2x16x16xf32>
    %541 = arith.subf %535, %540 : vector<2x16x16xf32>
    %542 = math.exp %541 : vector<2x16x16xf32>
    %cst_254 = arith.constant dense<0.000000e+00> : vector<2x16xf32>
    %543 = vector.multi_reduction <add>, %542, %cst_254 [2] : vector<2x16x16xf32> to vector<2x16xf32>
    %544 = vector.shape_cast %543 : vector<2x16xf32> to vector<2x16x1xf32>
    %545 = tpu.reciprocal %544 {approx = true} : vector<2x16x1xf32> -> vector<2x16x1xf32>
    %546 = vector.broadcast %545 : vector<2x16x1xf32> to vector<2x16x16xf32>
    %547 = arith.mulf %542, %546 : vector<2x16x16xf32>
    %548 = vector.extract_strided_slice %495 {offsets = [0, 0, 64], sizes = [2, 16, 32], strides = [1, 1, 1]} : vector<2x16x128xf32> to vector<2x16x32xf32>
    "tpu.trace_start"() <{level = 10 : i32, message = "bqk,bkd->bqd"}> : () -> ()
    %cst_255 = arith.constant dense<0.000000e+00> : vector<2x16x32xf32>
    %549 = tpu.matmul %547, %548, %cst_255 {dimension_numbers = #tpu.dot_dimension_numbers<[2], [1], [1], [2], [0, 0, 0, 1, 1, 2], [0], [0]>} : vector<2x16x16xf32>, vector<2x16x32xf32>, vector<2x16x32xf32> -> vector<2x16x32xf32>
    "tpu.trace_stop"() : () -> ()
    %550 = vector.extract_strided_slice %493 {offsets = [0, 0, 96], sizes = [2, 16, 32], strides = [1, 1, 1]} : vector<2x16x128xf32> to vector<2x16x32xf32>
    %551 = vector.extract_strided_slice %494 {offsets = [0, 0, 96], sizes = [2, 16, 32], strides = [1, 1, 1]} : vector<2x16x128xf32> to vector<2x16x32xf32>
    "tpu.trace_start"() <{level = 10 : i32, message = "bqd,bkd->bqk"}> : () -> ()
    %cst_256 = arith.constant dense<0.000000e+00> : vector<2x16x16xf32>
    %552 = tpu.matmul %550, %551, %cst_256 {dimension_numbers = #tpu.dot_dimension_numbers<[2], [2], [1], [1], [0, 0, 0, 1, 1, 1], [0], [0]>} : vector<2x16x32xf32>, vector<2x16x32xf32>, vector<2x16x16xf32> -> vector<2x16x16xf32>
    "tpu.trace_stop"() : () -> ()
    %553 = arith.addf %552, %3 : vector<2x16x16xf32>
    %cst_257 = arith.constant dense<0xFF800000> : vector<2x16xf32>
    %554 = vector.multi_reduction <maximumf>, %553, %cst_257 [2] : vector<2x16x16xf32> to vector<2x16xf32>
    %555 = vector.shape_cast %554 : vector<2x16xf32> to vector<2x16x1xf32>
    %cst_258 = arith.constant -1.000000e+09 : f32
    %556 = vector.broadcast %cst_258 : f32 to vector<2x16x1xf32>
    %557 = arith.maximumf %555, %556 : vector<2x16x1xf32>
    %558 = vector.broadcast %557 : vector<2x16x1xf32> to vector<2x16x16xf32>
    %559 = arith.subf %553, %558 : vector<2x16x16xf32>
    %560 = math.exp %559 : vector<2x16x16xf32>
    %cst_259 = arith.constant dense<0.000000e+00> : vector<2x16xf32>
    %561 = vector.multi_reduction <add>, %560, %cst_259 [2] : vector<2x16x16xf32> to vector<2x16xf32>
    %562 = vector.shape_cast %561 : vector<2x16xf32> to vector<2x16x1xf32>
    %563 = tpu.reciprocal %562 {approx = true} : vector<2x16x1xf32> -> vector<2x16x1xf32>
    %564 = vector.broadcast %563 : vector<2x16x1xf32> to vector<2x16x16xf32>
    %565 = arith.mulf %560, %564 : vector<2x16x16xf32>
    %566 = vector.extract_strided_slice %495 {offsets = [0, 0, 96], sizes = [2, 16, 32], strides = [1, 1, 1]} : vector<2x16x128xf32> to vector<2x16x32xf32>
    "tpu.trace_start"() <{level = 10 : i32, message = "bqk,bkd->bqd"}> : () -> ()
    %cst_260 = arith.constant dense<0.000000e+00> : vector<2x16x32xf32>
    %567 = tpu.matmul %565, %566, %cst_260 {dimension_numbers = #tpu.dot_dimension_numbers<[2], [1], [1], [2], [0, 0, 0, 1, 1, 2], [0], [0]>} : vector<2x16x16xf32>, vector<2x16x32xf32>, vector<2x16x32xf32> -> vector<2x16x32xf32>
    "tpu.trace_stop"() : () -> ()
    %568 = tpu.concatenate %513, %531, %549, %567 in 2 : vector<2x16x32xf32>, vector<2x16x32xf32>, vector<2x16x32xf32>, vector<2x16x32xf32> -> vector<2x16x128xf32>
    %569 = vector.shape_cast %568 : vector<2x16x128xf32> to vector<32x128xf32>
    %570 = arith.truncf %569 : vector<32x128xf32> to vector<32x128xbf16>
    %cst_261 = arith.constant dense<0.000000e+00> : vector<32x128xf32>
    %571 = tpu.matmul %570, %476, %cst_261 {dimension_numbers = #tpu.dot_dimension_numbers<[1], [0], [0], [1], [0, 0, 1, 1], [], []>} : vector<32x128xbf16>, vector<128x128xbf16>, vector<32x128xf32> -> vector<32x128xf32>
    %572 = vector.broadcast %478 : vector<1x128xf32> to vector<32x128xf32>
    %573 = arith.addf %571, %572 : vector<32x128xf32>
    %574 = arith.addf %462, %573 : vector<32x128xf32>
    %c1_262 = arith.constant 1 : index
    %c0_263 = arith.constant 0 : index
    %c0_264 = arith.constant 0 : index
    %575 = vector.load %arg22[%c1_262, %c0_263, %c0_264] : memref<2x1x128xf32, #tpu.memory_space<vmem>>, vector<1x1x128xf32>
    %576 = vector.shape_cast %575 : vector<1x1x128xf32> to vector<1x128xf32>
    %c1_265 = arith.constant 1 : index
    %c0_266 = arith.constant 0 : index
    %c0_267 = arith.constant 0 : index
    %577 = vector.load %arg23[%c1_265, %c0_266, %c0_267] : memref<2x1x128xf32, #tpu.memory_space<vmem>>, vector<1x1x128xf32>
    %578 = vector.shape_cast %577 : vector<1x1x128xf32> to vector<1x128xf32>
    %cst_268 = arith.constant dense<0.000000e+00> : vector<32xf32>
    %579 = vector.multi_reduction <add>, %574, %cst_268 [1] : vector<32x128xf32> to vector<32xf32>
    %580 = vector.shape_cast %579 : vector<32xf32> to vector<32x1xf32>
    %cst_269 = arith.constant 1.280000e+02 : f32
    %581 = vector.broadcast %cst_269 : f32 to vector<32x1xf32>
    %582 = arith.divf %580, %581 : vector<32x1xf32>
    %583 = vector.broadcast %582 : vector<32x1xf32> to vector<32x128xf32>
    %584 = arith.subf %574, %583 : vector<32x128xf32>
    %585 = arith.mulf %584, %584 : vector<32x128xf32>
    %cst_270 = arith.constant dense<0.000000e+00> : vector<32xf32>
    %586 = vector.multi_reduction <add>, %585, %cst_270 [1] : vector<32x128xf32> to vector<32xf32>
    %587 = vector.shape_cast %586 : vector<32xf32> to vector<32x1xf32>
    %cst_271 = arith.constant 1.280000e+02 : f32
    %588 = vector.broadcast %cst_271 : f32 to vector<32x1xf32>
    %589 = arith.divf %587, %588 : vector<32x1xf32>
    %590 = vector.broadcast %582 : vector<32x1xf32> to vector<32x128xf32>
    %591 = arith.subf %574, %590 : vector<32x128xf32>
    %cst_272 = arith.constant 9.99999974E-6 : f32
    %592 = vector.broadcast %cst_272 : f32 to vector<32x1xf32>
    %593 = arith.addf %589, %592 : vector<32x1xf32>
    %594 = math.rsqrt %593 : vector<32x1xf32>
    %595 = vector.broadcast %594 : vector<32x1xf32> to vector<32x128xf32>
    %596 = arith.mulf %591, %595 : vector<32x128xf32>
    %597 = vector.broadcast %576 : vector<1x128xf32> to vector<32x128xf32>
    %598 = arith.mulf %596, %597 : vector<32x128xf32>
    %599 = vector.broadcast %578 : vector<1x128xf32> to vector<32x128xf32>
    %600 = arith.addf %598, %599 : vector<32x128xf32>
    %c1_273 = arith.constant 1 : index
    %c0_274 = arith.constant 0 : index
    %c0_275 = arith.constant 0 : index
    %601 = vector.load %arg24[%c1_273, %c0_274, %c0_275] : memref<2x128x256xbf16, #tpu.memory_space<vmem>>, vector<1x128x256xbf16>
    %602 = vector.shape_cast %601 : vector<1x128x256xbf16> to vector<128x256xbf16>
    %c1_276 = arith.constant 1 : index
    %c0_277 = arith.constant 0 : index
    %c0_278 = arith.constant 0 : index
    %603 = vector.load %arg25[%c1_276, %c0_277, %c0_278] : memref<2x1x256xf32, #tpu.memory_space<vmem>>, vector<1x1x256xf32>
    %604 = vector.shape_cast %603 : vector<1x1x256xf32> to vector<1x256xf32>
    %c1_279 = arith.constant 1 : index
    %c0_280 = arith.constant 0 : index
    %c0_281 = arith.constant 0 : index
    %605 = vector.load %arg26[%c1_279, %c0_280, %c0_281] : memref<2x256x128xbf16, #tpu.memory_space<vmem>>, vector<1x256x128xbf16>
    %606 = vector.shape_cast %605 : vector<1x256x128xbf16> to vector<256x128xbf16>
    %c1_282 = arith.constant 1 : index
    %c0_283 = arith.constant 0 : index
    %c0_284 = arith.constant 0 : index
    %607 = vector.load %arg27[%c1_282, %c0_283, %c0_284] : memref<2x1x128xf32, #tpu.memory_space<vmem>>, vector<1x1x128xf32>
    %608 = vector.shape_cast %607 : vector<1x1x128xf32> to vector<1x128xf32>
    %609 = arith.truncf %600 : vector<32x128xf32> to vector<32x128xbf16>
    %cst_285 = arith.constant dense<0.000000e+00> : vector<32x256xf32>
    %610 = tpu.matmul %609, %602, %cst_285 {dimension_numbers = #tpu.dot_dimension_numbers<[1], [0], [0], [1], [0, 0, 1, 1], [], []>} : vector<32x128xbf16>, vector<128x256xbf16>, vector<32x256xf32> -> vector<32x256xf32>
    %611 = vector.broadcast %604 : vector<1x256xf32> to vector<32x256xf32>
    %612 = arith.addf %610, %611 : vector<32x256xf32>
    %cst_286 = arith.constant 0.000000e+00 : f32
    %613 = vector.broadcast %cst_286 : f32 to vector<32x256xf32>
    %614 = arith.maximumf %612, %613 : vector<32x256xf32>
    %615 = arith.truncf %614 : vector<32x256xf32> to vector<32x256xbf16>
    %cst_287 = arith.constant dense<0.000000e+00> : vector<32x128xf32>
    %616 = tpu.matmul %615, %606, %cst_287 {dimension_numbers = #tpu.dot_dimension_numbers<[1], [0], [0], [1], [0, 0, 1, 1], [], []>} : vector<32x256xbf16>, vector<256x128xbf16>, vector<32x128xf32> -> vector<32x128xf32>
    %617 = vector.broadcast %608 : vector<1x128xf32> to vector<32x128xf32>
    %618 = arith.addf %616, %617 : vector<32x128xf32>
    %619 = arith.addf %600, %618 : vector<32x128xf32>
    %c1_288 = arith.constant 1 : index
    %c0_289 = arith.constant 0 : index
    %c0_290 = arith.constant 0 : index
    %620 = vector.load %arg28[%c1_288, %c0_289, %c0_290] : memref<2x1x128xf32, #tpu.memory_space<vmem>>, vector<1x1x128xf32>
    %621 = vector.shape_cast %620 : vector<1x1x128xf32> to vector<1x128xf32>
    %c1_291 = arith.constant 1 : index
    %c0_292 = arith.constant 0 : index
    %c0_293 = arith.constant 0 : index
    %622 = vector.load %arg29[%c1_291, %c0_292, %c0_293] : memref<2x1x128xf32, #tpu.memory_space<vmem>>, vector<1x1x128xf32>
    %623 = vector.shape_cast %622 : vector<1x1x128xf32> to vector<1x128xf32>
    %cst_294 = arith.constant dense<0.000000e+00> : vector<32xf32>
    %624 = vector.multi_reduction <add>, %619, %cst_294 [1] : vector<32x128xf32> to vector<32xf32>
    %625 = vector.shape_cast %624 : vector<32xf32> to vector<32x1xf32>
    %cst_295 = arith.constant 1.280000e+02 : f32
    %626 = vector.broadcast %cst_295 : f32 to vector<32x1xf32>
    %627 = arith.divf %625, %626 : vector<32x1xf32>
    %628 = vector.broadcast %627 : vector<32x1xf32> to vector<32x128xf32>
    %629 = arith.subf %619, %628 : vector<32x128xf32>
    %630 = arith.mulf %629, %629 : vector<32x128xf32>
    %cst_296 = arith.constant dense<0.000000e+00> : vector<32xf32>
    %631 = vector.multi_reduction <add>, %630, %cst_296 [1] : vector<32x128xf32> to vector<32xf32>
    %632 = vector.shape_cast %631 : vector<32xf32> to vector<32x1xf32>
    %cst_297 = arith.constant 1.280000e+02 : f32
    %633 = vector.broadcast %cst_297 : f32 to vector<32x1xf32>
    %634 = arith.divf %632, %633 : vector<32x1xf32>
    %635 = vector.broadcast %627 : vector<32x1xf32> to vector<32x128xf32>
    %636 = arith.subf %619, %635 : vector<32x128xf32>
    %cst_298 = arith.constant 9.99999974E-6 : f32
    %637 = vector.broadcast %cst_298 : f32 to vector<32x1xf32>
    %638 = arith.addf %634, %637 : vector<32x1xf32>
    %639 = math.rsqrt %638 : vector<32x1xf32>
    %640 = vector.broadcast %639 : vector<32x1xf32> to vector<32x128xf32>
    %641 = arith.mulf %636, %640 : vector<32x128xf32>
    %642 = vector.broadcast %621 : vector<1x128xf32> to vector<32x128xf32>
    %643 = arith.mulf %641, %642 : vector<32x128xf32>
    %644 = vector.broadcast %623 : vector<1x128xf32> to vector<32x128xf32>
    %645 = arith.addf %643, %644 : vector<32x128xf32>
    %646 = arith.truncf %645 : vector<32x128xf32> to vector<32x128xbf16>
    %c0_299 = arith.constant 0 : index
    %c0_300 = arith.constant 0 : index
    %647 = vector.load %arg30[%c0_299, %c0_300] : memref<128x128xbf16, #tpu.memory_space<vmem>>, vector<128x128xbf16>
    %cst_301 = arith.constant dense<0.000000e+00> : vector<32x128xf32>
    %648 = tpu.matmul %646, %647, %cst_301 {dimension_numbers = #tpu.dot_dimension_numbers<[1], [0], [0], [1], [0, 0, 1, 1], [], []>} : vector<32x128xbf16>, vector<128x128xbf16>, vector<32x128xf32> -> vector<32x128xf32>
    %c0_302 = arith.constant 0 : index
    %c0_303 = arith.constant 0 : index
    %649 = vector.load %arg31[%c0_302, %c0_303] : memref<1x128xf32, #tpu.memory_space<vmem>>, vector<1x128xf32>
    %650 = vector.broadcast %649 : vector<1x128xf32> to vector<32x128xf32>
    %651 = arith.addf %648, %650 : vector<32x128xf32>
    %c0_304 = arith.constant 0 : index
    %c0_305 = arith.constant 0 : index
    %652 = vector.load %arg32[%c0_304, %c0_305] : memref<32x128xf32, #tpu.memory_space<vmem>>, vector<32x128xf32>
    tpu.vector_store %arg32[%c0_304, %c0_305], %651 {strides = array<i32>} : memref<32x128xf32, #tpu.memory_space<vmem>>, vector<32x128xf32>,
    return
  }
}

</mosaic_0001>

<bundles_post_ra>
// kernel: _lambda_.2
= control target key start
LH: loop header
LB: loop body
LE: loop exit
PB: predicated region body
PF: predicated region fallthrough
CT: control target
= control target key end

     0   :  { %s6097_s0 = inlined_call_operand.vmem [shape: f32[32,128], index: 0, kind: input, shape index: {}]   ;;  %s6098_s1 = inlined_call_operand.vmem [shape: f32[2,16,16], index: 1, kind: input, shape index: {}]   ;;  %s6099_s2 = inlined_call_operand.vmem [shape: bf16[2,128,128], index: 2, kind: input, shape index: {}]   ;;  %s6100_s3 = inlined_call_operand.vmem [shape: f32[2,1,128], index: 3, kind: input, shape index: {}]   ;;  %s6101_s4 = inlined_call_operand.hbm [shape: bf16[2,128,128], index: 4, kind: input, shape index: {}]   ;;  %s6102_s5 = inlined_call_operand.vmem [shape: f32[2,1,128], index: 5, kind: input, shape index: {}]   ;;  %s6103_s6 = inlined_call_operand.hbm [shape: bf16[2,128,128], index: 6, kind: input, shape index: {}]   ;;  %s6104_s7 = inlined_call_operand.vmem [shape: f32[2,1,128], index: 7, kind: input, shape index: {}]   ;;  %s6105_s8 = inlined_call_operand.hbm [shape: bf16[2,128,128], index: 8, kind: input, shape index: {}]   ;;  %s6106_s9 = inlined_call_operand.vmem [shape: f32[2,1,128], index: 9, kind: input, shape index: {}]   ;;  %s6107_s10 = inlined_call_operand.vmem [shape: f32[2,1,128], index: 10, kind: input, shape index: {}]   ;;  %s6108_s11 = inlined_call_operand.vmem [shape: f32[2,1,128], index: 11, kind: input, shape index: {}]   ;;  %s6109_s12 = inlined_call_operand.vmem [shape: bf16[2,128,256], index: 12, kind: input, shape index: {}]   ;;  %s6110_s13 = inlined_call_operand.vmem [shape: f32[2,1,256], index: 13, kind: input, shape index: {}]   ;;  %s6111_s14 = inlined_call_operand.vmem [shape: bf16[2,256,128], index: 14, kind: input, shape index: {}]   ;;  %s6112_s15 = inlined_call_operand.vmem [shape: f32[2,1,128], index: 15, kind: input, shape index: {}]   ;;  %s6113_s16 = inlined_call_operand.vmem [shape: f32[2,1,128], index: 16, kind: input, shape index: {}]   ;;  %s6114_s17 = inlined_call_operand.vmem [shape: f32[2,1,128], index: 17, kind: input, shape index: {}]   ;;  %s6115_s18 = inlined_call_operand.vmem [shape: f32[32,128], index: 18, kind: output, shape index: {}]  }
   0x1   :  { %6119 = sst [smem:[#allocation9_spill]] %s6097_s0 }
   0x2   :  { %6120 = sst [smem:[#allocation10_spill]] %s6098_s1 }
   0x3   :  { %6121 = sst [smem:[#allocation11_spill]] %s6099_s2 }
   0x4   :  { %23 = vsyncpa [#allocation3], 0 }
   0x5   :  { %24 = vsyncpa [#allocation5], 0  ;;  %s52_s29 = sshll.u32 %s6103_s6, 4  ;;  %s4771_s30 = smov [#allocation4]   ;;  %s53_s29 = int_to_ptr.hbm [resolvable:$true] %s52_s29 }
   0x6   :  { %s54_s0 = sshll.u32 %s4771_s30, 4  ;;  %s37_s20 = sshll.u32 %s6101_s4, 4  ;;  %s55_s0 = int_to_ptr.vmem [resolvable:$true] %s54_s0  ;;  %s38_s20 = int_to_ptr.hbm [resolvable:$true] %s37_s20 }
   0x7   :  { %s4772_s21 = smov 64   ;;  %s4773_s22 = smov 4  }
   0x8   :  { %60 = dma.hbm_to_vmem [thread:$0]  %s53_s29, 2048, %s55_s0, [#allocation5], %s4772_s21, %s4772_s21, %s4773_s22  }
   0x9   :  { %s4774_s2 = smov [#allocation2]   ;;  %s67_s6 = sshll.u32 %s6105_s8, 4  ;;  %s68_s6 = int_to_ptr.hbm [resolvable:$true] %s67_s6 }
   0xa   :  { %s39_s23 = sshll.u32 %s4774_s2, 4  ;;  %s4775_s26 = smov [#allocation6]   ;;  %s40_s23 = int_to_ptr.vmem [resolvable:$true] %s39_s23 }
   0xb   :  { %45 = dma.hbm_to_vmem [thread:$0]  %s38_s20, 2048, %s40_s23, [#allocation3], %s4772_s21, %s4772_s21, %s4773_s22  }
   0xc   :  { %s69_s27 = sshll.u32 %s4775_s26, 4  ;;  %s70_s27 = int_to_ptr.vmem [resolvable:$true] %s69_s27 }
   0xd   :  { %75 = dma.hbm_to_vmem [thread:$0]  %s68_s6, 2048, %s70_s27, [#allocation5], %s4772_s21, %s4772_s21, %s4773_s22  }
   0xe   :  { %4767 = dma.done.wait [#allocation3], 2048  }
   0xf   :  { %4768 = vsyncadd [#allocation3], 4294965248 }
  0x10   :  { %4769 = dma.done.wait [#allocation5], 4096  }
  0x11   :  { %4770 = vsyncadd [#allocation5], 4294963200  ;;  %s6122_s29 = sld [smem:[#allocation11_spill]]  ;;  %v4264_v1 = vld [vmem:[#allocation2 + $0x38] sm:$0xff]  ;;  %v4263_v3 = vld [vmem:[#allocation2 + $0x30] sm:$0xff]  ;;  %s4776_s24 = smov 96  }
  0x12   :  { %305 = vmatpush.bf16.msra.mxu1 %v4264_v1  ;;  %v4272_v4 = vld [vmem:[#allocation4 + $0x38] sm:$0xff]  ;;  %v4271_v5 = vld [vmem:[#allocation4 + $0x30] sm:$0xff]  ;;  %v4262_v7 = vld [vmem:[#allocation2 + $0x28] sm:$0xff]  ;;  %s6123_s8 = sld [smem:[#allocation9_spill]]  ;;  %vm398_vm0 = vcmask 261120   ;;  %s4777_s4 = smov 32  }
  0x13   :  { %375 = vmatpush.bf16.msra.mxu2 %v4272_v4  ;;  %v4270_v9 = vld [vmem:[#allocation4 + $0x28] sm:$0xff]  ;;  %v4261_v10 = vld [vmem:[#allocation2 + $0x20] sm:$0xff]  ;;  %v4260_v13 = vld [vmem:[#allocation2 + $0x18] sm:$0xff]  ;;  %s6124_s0 = sld [smem:[#allocation10_spill]]  ;;  %vm469_vm1 = vcmask 130048   ;;  %vm1220_vm2 = vcmask 523264  }
  0x14   :  { %v4269_v11 = vld [vmem:[#allocation4 + $0x20] sm:$0xff]  ;;  %v4268_v14 = vld [vmem:[#allocation4 + $0x18] sm:$0xff]  ;;  %v4259_v16 = vld [vmem:[#allocation2 + $0x10] sm:$0xff]  ;;  %vm1225_vm3 = vcmask 785408  }
  0x15   :  { %v4267_v17 = vld [vmem:[#allocation4 + $0x10] sm:$0xff]  ;;  %v4258_v19 = vld [vmem:[#allocation2 + $0x8] sm:$0xff]  ;;  %v4257_v22 = vld [vmem:[#allocation2] sm:$0xff] }
  0x16   :  { %306 = vmatpush.bf16.msra.mxu1 %v4263_v3  ;;  %v4266_v20 = vld [vmem:[#allocation4 + $0x8] sm:$0xff]  ;;  %v4265_v25 = vld [vmem:[#allocation4] sm:$0xff] }
  0x17   :  { %v4256_v0 = vld [vmem:[%s6122_s29 + $0x38] sm:$0xff]  ;;  %v4255_v2 = vld [vmem:[%s6122_s29 + $0x30] sm:$0xff]  ;;  %v4254_v6 = vld [vmem:[%s6122_s29 + $0x28] sm:$0xff]  ;;  %376 = vmatpush.bf16.msra.mxu2 %v4271_v5 }
  0x18   :  { %235 = vmatpush.bf16.msra.mxu0 %v4256_v0  ;;  %v4253_v8 = vld [vmem:[%s6122_s29 + $0x20] sm:$0xff]  ;;  %v4252_v12 = vld [vmem:[%s6122_s29 + $0x18] sm:$0xff]  ;;  %v4251_v15 = vld [vmem:[%s6122_s29 + $0x10] sm:$0xff] }
  0x19   :  { %v4250_v18 = vld [vmem:[%s6122_s29 + $0x8] sm:$0xff]  ;;  %v4249_v21 = vld [vmem:[%s6122_s29] sm:$0xff]  ;;  %v108_v27 = vld [vmem:[%s6123_s8 + $0x10] sm:$0xff] }
  0x1a   :  { %307 = vmatpush.bf16.msra.mxu1 %v4262_v7  ;;  %v106_v23 = vld [vmem:[%s6123_s8] sm:$0xff]  ;;  %v107_v24 = vld [vmem:[%s6123_s8 + $0x8] sm:$0xff]  ;;  %v109_v28 = vld [vmem:[%s6123_s8 + $0x18] sm:$0xff] }
  0x1b   :  { %377 = vmatpush.bf16.msra.mxu2 %v4270_v9  ;;  %v182_v26 = vpack.c.bf16 %v107_v24, %v106_v23  ;;  %v183_v29 = vpack.c.bf16 %v109_v28, %v108_v27  ;;  %v4507_v30 = vld [vmem:[%s6100_s3] ss:$0 sm:$0xff] }
  0x1c   :  { %236 = vmatpush.bf16.msra.mxu0 %v4255_v2  ;;  %v4508_v35 = vld [vmem:[%s6102_s5] ss:$0 sm:$0xff] }
  0x1d   :  { %v4946_v44 = vld [vmem:[%s6104_s7] ss:$0 sm:$0xff] }
  0x1e   :  { %308 = vmatpush.bf16.msra.mxu1 %v4261_v10  ;;  %v5002_v4 = vld [vmem:[%s6124_s0] sm:$0xff] }
  0x1f   :  { %378 = vmatpush.bf16.msra.mxu2 %v4269_v11 }
  0x20   :  { %237 = vmatpush.bf16.msra.mxu0 %v4254_v6 }
  0x22   :  { %309 = vmatpush.bf16.msra.mxu1 %v4260_v13 }
  0x23   :  { %379 = vmatpush.bf16.msra.mxu2 %v4268_v14 }
  0x24   :  { %238 = vmatpush.bf16.msra.mxu0 %v4253_v8 }
  0x26   :  { %310 = vmatpush.bf16.msra.mxu1 %v4259_v16 }
  0x27   :  { %380 = vmatpush.bf16.msra.mxu2 %v4267_v17 }
  0x28   :  { %239 = vmatpush.bf16.msra.mxu0 %v4252_v12 }
  0x2a   :  { %311 = vmatpush.bf16.msra.mxu1 %v4258_v19 }
  0x2b   :  { %381 = vmatpush.bf16.msra.mxu2 %v4266_v20  ;;  %v5020_v20 = vld [vmem:[%s6124_s0 + $0x8] sm:$0xff] }
  0x2c   :  { %240 = vmatpush.bf16.msra.mxu0 %v4251_v15 }
  0x2e   :  { %312 = vmatpush.bf16.msra.mxu1 %v4257_v22 }
  0x2f   :  { %382 = vmatpush.bf16.msra.mxu2 %v4265_v25 }
  0x30   :  { %241 = vmatpush.bf16.msra.mxu0 %v4250_v18 }
  0x31   :  { %313 = vmatmul.bf16.vlgmr.msra.gmra.mxu1 %v182_v26 }
  0x32   :  { %383 = vmatmul.bf16.vlgmr.msra.gmra.mxu2 %v182_v26 }
  0x34   :  { %242 = vmatpush.bf16.msra.mxu0 %v4249_v21 }
  0x37   :  { %243 = vmatmul.bf16.vlgmr.msra.gmra.mxu0 %v182_v26 }
  0x41   :  { %318 = vmatmul.bf16.gmra.mxu1 %v183_v29 }
  0x42   :  { %388 = vmatmul.bf16.gmra.mxu2 %v183_v29 }
  0x47   :  { %248 = vmatmul.bf16.gmra.mxu0 %v183_v29 }
  0xae   :  { %v314_v32 = vpop.f32.mrf.mxu1 }
  0xaf   :  { %v315_v42 = vadd.f32 %v4508_v35, %v314_v32 }
  0xb4   :  { %v244_v31 = vpop.f32.mrf.mxu0 }
  0xb5   :  { %v245_v33 = vadd.f32 %v4507_v30, %v244_v31  ;;  %v384_v40 = vpop.f32.mrf.mxu2 }
  0xb6   :  { %v316_v37 = vpop.f32.mrf.mxu1  ;;  %v385_v46 = vadd.f32 %v4946_v44, %v384_v40 }
  0xb7   :  { %v4928_v34 = vmul.f32 0.17677669, %v245_v33  ;;  %v317_v39 = vadd.f32 %v4508_v35, %v316_v37 }
  0xb9   :  { %576 = vrot.lane.b32.xlu1 %v4928_v34, %s4776_s24  ;;  %782 = vrot.lane.b32.xlu2 %v317_v39, %s4772_s21 }
  0xba   :  { %582 = vrot.lane.b32.xlu0 %v317_v39, %s4776_s24  ;;  %3663 = vmatpush.xpose.msk.msra.mxu3 %vm398_vm0, %v317_v39 }
  0xbc   :  { %v246_v36 = vpop.f32.mrf.mxu0 }
  0xbd   :  { %v247_v38 = vadd.f32 %v4507_v30, %v246_v36  ;;  %v386_v45 = vpop.f32.mrf.mxu2 }
  0xbe   :  { %3664 = vmatpush.xpose.msk.msra.mxu3 %vm398_vm0, %v315_v42  ;;  %v319_v43 = vpop.f32.mrf.mxu1  ;;  %v387_v47 = vadd.f32 %v4946_v44, %v386_v45 }
  0xbf   :  { %v4935_v41 = vmul.f32 0.17677669, %v247_v38  ;;  %v320_v51 = vadd.f32 %v4508_v35, %v319_v43 }
  0xc0   :  { %v4956_v49 = vpack.i.bf16 %v385_v46, %v387_v47 }
  0xc1   :  { %578 = vrot.lane.b32.xlu1 %v4935_v41, %s4776_s24  ;;  %3665 = vmatmul.msk.f32.vlgmr.msra.gmra.mxu3 %vm398_vm0, %v4928_v34 }
  0xc2   :  { %580 = vrot.lane.b32.xlu0 %v315_v42, %s4776_s24  ;;  %776 = vrot.lane.b32.xlu2 %v4928_v34, %s4772_s21 }
  0xc4   :  { %v249_v52 = vpop.f32.mrf.mxu0 }
  0xc5   :  { %v250_v53 = vadd.f32 %v4507_v30, %v249_v52 }
  0xc6   :  { %v321_v48 = vpop.f32.mrf.mxu1 }
  0xc7   :  { %v4958_v50 = vadd.f32 %v4508_v35, %v321_v48  ;;  %v4970_v54 = vmul.f32 0.17677669, %v250_v53 }
  0xc9   :  { %780 = vrot.lane.b32.xlu1 %v315_v42, %s4772_s21  ;;  %3666 = vmatmul.msk.f32.gmra.mxu3 %vm398_vm0, %v4935_v41 }
  0xca   :  { %821 = vrot.lane.b32.xlu0 %v4958_v50, %s4772_s21  ;;  %3667 = vmatpush.xpose.msk.msrb.mxu3 %vm398_vm0, %v4958_v50 }
  0xcb   :  { %819 = vrot.lane.b32.xlu2 %v320_v51, %s4772_s21 }
  0xcc   :  { %v251_v55 = vpop.f32.mrf.mxu0 }
  0xcd   :  { %v252_v56 = vadd.f32 %v4507_v30, %v251_v55  ;;  %v5034_v30 = vld [vmem:[%s6124_s0 + $0x10] sm:$0xff] }
  0xce   :  { %3668 = vmatpush.xpose.msk.msrb.mxu3 %vm398_vm0, %v320_v51 }
  0xcf   :  { %v4977_v57 = vmul.f32 0.17677669, %v252_v56 }
  0xd1   :  { %4388 = vrot.lane.b32.xlu1 %v4956_v49, %s4776_s24  ;;  %3669 = vmatmul.msk.f32.vlgmr.msrb.gmra.mxu3 %vm398_vm0, %v4970_v54 }
  0xd2   :  { %538 = vmatpush.msra.mxu3 %v387_v47 }
  0xd3   :  { %617 = vrot.lane.b32.xlu2 %v4977_v57, %s4776_s24 }
  0xd4   :  { %539 = vmatpush.msra.mxu3 %v385_v46 }
  0xd9   :  { %619 = vrot.lane.b32.xlu1 %v320_v51, %s4776_s24  ;;  %3670 = vmatmul.msk.f32.gmra.mxu3 %vm398_vm0, %v4977_v57 }
  0xe1   :  { %615 = vrot.lane.b32.xlu1 %v4970_v54, %s4776_s24 }
  0xe9   :  { %621 = vrot.lane.b32.xlu1 %v4958_v50, %s4776_s24 }
  0xf1   :  { %778 = vrot.lane.b32.xlu1 %v4935_v41, %s4772_s21 }
  0xf9   :  { %978 = vrot.lane.b32.xlu1 %v317_v39, %s4777_s4 }
 0x101   :  { %976 = vrot.lane.b32.xlu1 %v315_v42, %s4777_s4 }
 0x109   :  { %817 = vrot.lane.b32.xlu1 %v4977_v57, %s4772_s21 }
 0x111   :  { %1015 = vrot.lane.b32.xlu1 %v320_v51, %s4777_s4 }
 0x113   :  { %v783_v58 = vpop.permute.xlu2 %782 }
 0x114   :  { %3687 = vmatpush.xpose.msk.msrb.mxu0 %vm398_vm0, %v783_v58 }
 0x11c   :  { %v777_v0 = vpop.permute.xlu2 %776 }
 0x125   :  { %v820_v17 = vpop.permute.xlu2 %819 }
 0x12b   :  { %v577_v59 = vpop.permute.xlu1 %576 }
 0x12c   :  { %v583_v60 = vpop.permute.xlu0 %582 }
 0x12d   :  { %3675 = vmatpush.xpose.msk.msrb.mxu1 %vm398_vm0, %v583_v60  ;;  %v618_v24 = vpop.permute.xlu2 %617 }
 0x133   :  { %v579_v61 = vpop.permute.xlu1 %578 }
 0x134   :  { %v581_v62 = vpop.permute.xlu0 %580 }
 0x135   :  { %3676 = vmatpush.xpose.msk.msrb.mxu1 %vm398_vm0, %v581_v62 }
 0x138   :  { %3677 = vmatmul.msk.f32.vlgmr.msrb.gmra.mxu1 %vm398_vm0, %v577_v59 }
 0x13b   :  { %v781_v63 = vpop.permute.xlu1 %780 }
 0x13c   :  { %3688 = vmatpush.xpose.msk.msrb.mxu0 %vm398_vm0, %v781_v63  ;;  %v822_v19 = vpop.permute.xlu0 %821 }
 0x13f   :  { %3689 = vmatmul.msk.f32.vlgmr.msrb.gmra.mxu0 %vm398_vm0, %v777_v0 }
 0x140   :  { %3678 = vmatmul.msk.f32.gmra.mxu1 %vm398_vm0, %v579_v61 }
 0x143   :  { %v4389_v1 = vpop.permute.xlu1 %4388 }
 0x144   :  { %v4390_v2 = vunpack.i.l.bf16 %v4389_v1  ;;  %v4391_v3 = vunpack.i.h.bf16 %v4389_v1  ;;  %v428_v5 = vpop.f32.mrf.mxu3 }
 0x145   :  { %v429_v6 = vadd.f32 %v428_v5, %v5002_v4 }
 0x146   :  { %730 = vmatpush.msrb.mxu2 %v4390_v2 }
 0x147   :  { %v470_v8 = vsel %vm469_vm1, %v429_v6, -inf }
 0x148   :  { %731 = vmatpush.msrb.mxu2 %v4391_v3  ;;  %471 = vmax.xlane.f32.xlu1 %v470_v8 }
 0x14a   :  { %4377 = vmatpush.xpose.msk.msra.mxu2 %vm398_vm0, %v783_v58 }
 0x14b   :  { %v620_v7 = vpop.permute.xlu1 %619 }
 0x14e   :  { %4378 = vmatpush.xpose.msk.msra.mxu2 %vm398_vm0, %v781_v63 }
 0x153   :  { %v616_v9 = vpop.permute.xlu1 %615 }
 0x15b   :  { %v622_v10 = vpop.permute.xlu1 %621 }
 0x15c   :  { %3679 = vmatpush.xpose.msk.msra.mxu1 %vm398_vm0, %v622_v10 }
 0x160   :  { %3680 = vmatpush.xpose.msk.msra.mxu1 %vm398_vm0, %v620_v7 }
 0x163   :  { %3681 = vmatmul.msk.f32.vlgmr.msra.gmra.mxu1 %vm398_vm0, %v616_v9  ;;  %v5011_v11 = vpop.permute.xlu1 %778 }
 0x164   :  { %3691 = vmatpush.xpose.msk.msrb.mxu1 %vm398_vm0, %v822_v19 }
 0x168   :  { %3692 = vmatpush.xpose.msk.msrb.mxu1 %vm398_vm0, %v820_v17 }
 0x16b   :  { %v979_v12 = vpop.permute.xlu1 %978  ;;  %3682 = vmatmul.msk.f32.gmra.mxu1 %vm398_vm0, %v618_v24 }
 0x16c   :  { %3699 = vmatpush.xpose.msk.msra.mxu0 %vm398_vm0, %v979_v12 }
 0x173   :  { %v977_v13 = vpop.permute.xlu1 %976 }
 0x174   :  { %3700 = vmatpush.xpose.msk.msra.mxu0 %vm398_vm0, %v977_v13 }
 0x17b   :  { %v818_v18 = vpop.permute.xlu1 %817 }
 0x183   :  { %v5027_v25 = vpop.permute.xlu1 %1015 }
 0x1b5   :  { %v609_v14 = vpop.f32.mrf.mxu1 }
 0x1b6   :  { %v610_v15 = vadd.f32 %v609_v14, %v5002_v4 }
 0x1b8   :  { %v654_v16 = vsel %vm469_vm1, %v610_v15, -inf }
 0x1b9   :  { %655 = vmax.xlane.f32.xlu2 %v654_v16 }
 0x1bb   :  { %v472_v26 = vpop.xlane.xlu1 %471 }
 0x1bc   :  { %v482_v27 = vmax.f32 %v472_v26, -1e+09  ;;  %v809_v62 = vpop.f32.mrf.mxu0 }
 0x1bd   :  { %v612_v21 = vpop.f32.mrf.mxu1  ;;  %v5067_v63 = vadd.f32 %v809_v62, %v5002_v4 }
 0x1be   :  { %v613_v22 = vadd.f32 %v612_v21, %v5020_v20  ;;  %v486_v28 = vsub.f32 %v429_v6, %v482_v27 }
 0x1bf   :  { %v854_v2 = vsel %vm469_vm1, %v5067_v63, -inf }
 0x1c0   :  { %v657_v23 = vsel %vm469_vm1, %v613_v22, -inf  ;;  %v490_v29 = vmul.f32 1.442695, %v486_v28 }
 0x1c1   :  { %658 = vmax.xlane.f32.xlu2 %v657_v23 }
 0x1c2   :  { %4525 = vpow2.f32 %v490_v29 }
 0x1c8   :  { %v4526_v35 = vpop.eup %4525 }
 0x1c9   :  { %v498_v36 = vsel %vm469_vm1, %v4526_v35, 0.0 }
 0x1d9   :  { %815 = vrot.lane.b32.xlu2 %v4970_v54, %s4772_s21 }
 0x1e0   :  { %v648_v31 = vpop.f32.mrf.mxu1 }
 0x1e1   :  { %v5037_v32 = vadd.f32 %v648_v31, %v5034_v30 }
 0x1e3   :  { %v660_v33 = vsel %vm469_vm1, %v5037_v32, -inf }
 0x1e4   :  { %661 = vmax.xlane.f32.xlu1 %v660_v33 }
 0x1e8   :  { %v651_v5 = vpop.f32.mrf.mxu1 }
 0x1ec   :  { %499 = vadd.xlane.f32.xlu1 %v498_v36  ;;  %v389_v36 = vpop.f32.mrf.mxu2 }
 0x22c   :  { %v656_v37 = vpop.xlane.xlu2 %655 }
 0x22d   :  { %v666_v38 = vmax.f32 %v656_v37, -1e+09  ;;  %v391_v37 = vpop.f32.mrf.mxu2 }
 0x22f   :  { %v670_v39 = vsub.f32 %v610_v15, %v666_v38  ;;  %v392_v38 = vadd.f32 %v4946_v44, %v391_v37 }
 0x231   :  { %v674_v40 = vmul.f32 1.442695, %v670_v39  ;;  %567 = vmatpush.msrb.mxu3 %v392_v38 }
 0x233   :  { %4527 = vpow2.f32 %v674_v40 }
 0x234   :  { %v659_v42 = vpop.xlane.xlu2 %658 }
 0x235   :  { %v667_v43 = vmax.f32 %v659_v42, -1e+09 }
 0x237   :  { %v671_v45 = vsub.f32 %v613_v22, %v667_v43 }
 0x239   :  { %v4528_v46 = vpop.eup %4527  ;;  %v676_v47 = vmul.f32 1.442695, %v671_v45 }
 0x23a   :  { %v682_v48 = vsel %vm469_vm1, %v4528_v46, 0.0 }
 0x23b   :  { %4529 = vpow2.f32 %v676_v47  ;;  %683 = vadd.xlane.f32.xlu0 %v682_v48 }
 0x23c   :  { %v816_v51 = vpop.permute.xlu2 %815 }
 0x23d   :  { %3693 = vmatmul.msk.f32.vlgmr.msrb.gmra.mxu1 %vm398_vm0, %v816_v51 }
 0x241   :  { %v4530_v52 = vpop.eup %4529 }
 0x242   :  { %v685_v53 = vsel %vm469_vm1, %v4530_v52, 0.0 }
 0x243   :  { %686 = vadd.xlane.f32.xlu2 %v685_v53 }
 0x245   :  { %3694 = vmatmul.msk.f32.gmra.mxu1 %vm398_vm0, %v818_v18 }
 0x24f   :  { %972 = vrot.lane.b32.xlu0 %v4928_v34, %s4777_s4  ;;  %v431_v34 = vpop.f32.mrf.mxu3 }
 0x257   :  { %v5048_v55 = vpop.xlane.xlu1 %661  ;;  %1017 = vrot.lane.b32.xlu0 %v4958_v50, %s4777_s4  ;;  %v463_v60 = vpop.f32.mrf.mxu3  ;;  %v432_v50 = vadd.f32 %v431_v34, %v5020_v20 }
 0x258   :  { %v5060_v61 = vadd.f32 %v463_v60, %v5034_v30 }
 0x25b   :  { %974 = vrot.lane.b32.xlu2 %v4935_v41, %s4777_s4  ;;  %v476_v41 = vsel %vm469_vm1, %v5060_v61, -inf }
 0x25f   :  { %v500_v56 = vpop.xlane.xlu1 %499  ;;  %1013 = vrot.lane.b32.xlu0 %v4977_v57, %s4777_s4  ;;  %v473_v57 = vsel %vm469_vm1, %v432_v50, -inf  ;;  %v466_v0 = vpop.f32.mrf.mxu3 }
 0x260   :  { %4531 = vrcp.f32 %v500_v56 }
 0x263   :  { %1011 = vrot.lane.b32.xlu2 %v4970_v54, %s4777_s4  ;;  %v5072_v54 = vld [vmem:[%s6124_s0 + $0x18] sm:$0xff] }
 0x264   :  { %v5075_v1 = vadd.f32 %v466_v0, %v5072_v54  ;;  %v5082_v6 = vadd.f32 %v651_v5, %v5072_v54 }
 0x266   :  { %v4532_v58 = vpop.eup %4531  ;;  %v479_v3 = vsel %vm469_vm1, %v5075_v1, -inf  ;;  %v663_v7 = vsel %vm469_vm1, %v5082_v6, -inf }
 0x267   :  { %v514_v59 = vmul.f32 %v4532_v58, %v4526_v35 }
 0x269   :  { %3671 = vmatmul.msk.f32.vlgmr.msra.gmra.mxu3 %vm469_vm1, %v514_v59 }
 0x289   :  { %477 = vmax.xlane.f32.xlu0 %v476_v41 }
 0x28c   :  { %474 = vmax.xlane.f32.xlu2 %v473_v57 }
 0x291   :  { %855 = vmax.xlane.f32.xlu0 %v854_v2 }
 0x294   :  { %480 = vmax.xlane.f32.xlu2 %v479_v3 }
 0x29c   :  { %664 = vmax.xlane.f32.xlu2 %v663_v7 }
 0x2ae   :  { %v684_v8 = vpop.xlane.xlu0 %683 }
 0x2af   :  { %4533 = vrcp.f32 %v684_v8 }
 0x2b5   :  { %v4534_v9 = vpop.eup %4533 }
 0x2b6   :  { %v687_v10 = vpop.xlane.xlu2 %686  ;;  %v698_v12 = vmul.f32 %v4534_v9, %v4528_v46 }
 0x2b7   :  { %4535 = vrcp.f32 %v687_v10 }
 0x2b8   :  { %3683 = vmatmul.msk.f32.vlgmr.msrb.gmra.mxu2 %vm469_vm1, %v698_v12 }
 0x2ba   :  { %v848_v13 = vpop.f32.mrf.mxu1 }
 0x2bb   :  { %v5088_v14 = vadd.f32 %v848_v13, %v5034_v30 }
 0x2bd   :  { %v4536_v15 = vpop.eup %4535  ;;  %v860_v16 = vsel %vm469_vm1, %v5088_v14, -inf }
 0x2be   :  { %861 = vmax.xlane.f32.xlu0 %v860_v16  ;;  %v699_v17 = vmul.f32 %v4536_v15, %v4530_v52  ;;  %v975_v23 = vpop.permute.xlu2 %974 }
 0x2c0   :  { %3684 = vmatmul.msk.f32.gmra.mxu2 %vm469_vm1, %v699_v17 }
 0x2c1   :  { %v973_v18 = vpop.permute.xlu0 %972 }
 0x2c2   :  { %v851_v19 = vpop.f32.mrf.mxu1  ;;  %3701 = vmatmul.msk.f32.vlgmr.msra.gmra.mxu0 %vm398_vm0, %v973_v18 }
 0x2c3   :  { %v5095_v21 = vadd.f32 %v851_v19, %v5072_v54 }
 0x2c5   :  { %v863_v22 = vsel %vm469_vm1, %v5095_v21, -inf }
 0x2c6   :  { %864 = vmax.xlane.f32.xlu0 %v863_v22  ;;  %v1012_v26 = vpop.permute.xlu2 %1011 }
 0x2c8   :  { %3690 = vmatmul.msk.f32.vlgmr.msra.gmra.mxu2 %vm398_vm0, %v5011_v11 }
 0x2c9   :  { %v1018_v24 = vpop.permute.xlu0 %1017 }
 0x2ca   :  { %3702 = vmatmul.msk.f32.gmra.mxu0 %vm398_vm0, %v975_v23  ;;  %3703 = vmatpush.xpose.msk.msra.mxu1 %vm398_vm0, %v1018_v24 }
 0x2ce   :  { %3704 = vmatpush.xpose.msk.msra.mxu1 %vm398_vm0, %v5027_v25  ;;  %v390_v25 = vadd.f32 %v4946_v44, %v389_v36 }
 0x2d0   :  { %568 = vmatpush.msrb.mxu3 %v390_v25  ;;  %v5113_v40 = vpack.i.bf16 %v390_v25, %v392_v38 }
 0x2d1   :  { %3705 = vmatmul.msk.f32.vlgmr.msra.gmra.mxu1 %vm398_vm0, %v1012_v26  ;;  %v1014_v27 = vpop.permute.xlu0 %1013 }
 0x2d9   :  { %3706 = vmatmul.msk.f32.gmra.mxu1 %vm398_vm0, %v1014_v27  ;;  %v668_v27 = vmax.f32 %v5048_v55, -1e+09 }
 0x2fc   :  { %v478_v39 = vpop.xlane.xlu0 %477 }
 0x2fd   :  { %v484_v42 = vmax.f32 %v478_v39, -1e+09 }
 0x2ff   :  { %v475_v28 = vpop.xlane.xlu2 %474  ;;  %v488_v46 = vsub.f32 %v5060_v61, %v484_v42 }
 0x300   :  { %v483_v29 = vmax.f32 %v475_v28, -1e+09 }
 0x301   :  { %v494_v52 = vmul.f32 1.442695, %v488_v46 }
 0x302   :  { %v487_v31 = vsub.f32 %v432_v50, %v483_v29  ;;  %v672_v29 = vsub.f32 %v5037_v32, %v668_v27 }
 0x304   :  { %v492_v33 = vmul.f32 1.442695, %v487_v31  ;;  %v856_v58 = vpop.xlane.xlu0 %855  ;;  %v678_v31 = vmul.f32 1.442695, %v672_v29 }
 0x305   :  { %v866_v59 = vmax.f32 %v856_v58, -1e+09 }
 0x306   :  { %4537 = vpow2.f32 %v492_v33 }
 0x307   :  { %v481_v47 = vpop.xlane.xlu2 %480  ;;  %4539 = vpow2.f32 %v494_v52  ;;  %v870_v41 = vsub.f32 %v5067_v63, %v866_v59 }
 0x308   :  { %v485_v51 = vmax.f32 %v481_v47, -1e+09 }
 0x30a   :  { %v489_v53 = vsub.f32 %v5075_v1, %v485_v51  ;;  %v874_v1 = vmul.f32 1.442695, %v870_v41 }
 0x30c   :  { %v5107_v11 = vpop.eup %4537  ;;  %v496_v34 = vmul.f32 1.442695, %v489_v53 }
 0x30d   :  { %v501_v35 = vsel %vm469_vm1, %v5107_v11, 0.0  ;;  %v5127_v61 = vpop.eup %4539 }
 0x30e   :  { %502 = vadd.xlane.f32.xlu1 %v501_v35  ;;  %4541 = vpow2.f32 %v496_v34  ;;  %v504_v0 = vsel %vm469_vm1, %v5127_v61, 0.0 }
 0x30f   :  { %v665_v62 = vpop.xlane.xlu2 %664  ;;  %4543 = vpow2.f32 %v874_v1 }
 0x310   :  { %v669_v2 = vmax.f32 %v665_v62, -1e+09 }
 0x312   :  { %v673_v63 = vsub.f32 %v5082_v6, %v669_v2 }
 0x314   :  { %v5137_v3 = vpop.eup %4541  ;;  %v680_v10 = vmul.f32 1.442695, %v673_v63 }
 0x315   :  { %v507_v8 = vsel %vm469_vm1, %v5137_v3, 0.0  ;;  %v5147_v13 = vpop.eup %4543 }
 0x316   :  { %4545 = vpow2.f32 %v680_v10  ;;  %v882_v6 = vsel %vm469_vm1, %v5147_v13, 0.0 }
 0x31c   :  { %v5154_v17 = vpop.eup %4545 }
 0x31d   :  { %v691_v19 = vsel %vm469_vm1, %v5154_v17, 0.0 }
 0x331   :  { %v862_v7 = vpop.xlane.xlu0 %861 }
 0x332   :  { %v868_v12 = vmax.f32 %v862_v7, -1e+09 }
 0x339   :  { %v865_v38 = vpop.xlane.xlu0 %864 }
 0x33a   :  { %v869_v39 = vmax.f32 %v865_v38, -1e+09 }
 0x33b   :  { %v5149_v15 = vpop.f32.mrf.mxu2 }
 0x33f   :  { %v1005_v43 = vpop.f32.mrf.mxu0 }
 0x340   :  { %v5116_v45 = vadd.f32 %v1005_v43, %v5002_v4  ;;  %v873_v43 = vsub.f32 %v5095_v21, %v869_v39 }
 0x342   :  { %v1050_v48 = vsel %vm469_vm1, %v5116_v45, -inf  ;;  %v880_v52 = vmul.f32 1.442695, %v873_v43 }
 0x343   :  { %1051 = vmax.xlane.f32.xlu2 %v1050_v48  ;;  %v5156_v18 = vpop.f32.mrf.mxu2 }
 0x347   :  { %v1008_v44 = vpop.f32.mrf.mxu0 }
 0x348   :  { %v5123_v56 = vadd.f32 %v1008_v44, %v5020_v20 }
 0x34a   :  { %v1053_v4 = vsel %vm469_vm1, %v5123_v56, -inf }
 0x34b   :  { %1054 = vmax.xlane.f32.xlu2 %v1053_v4  ;;  %v812_v23 = vpop.f32.mrf.mxu2 }
 0x34c   :  { %v5169_v24 = vadd.f32 %v812_v23, %v5020_v20 }
 0x34e   :  { %v1044_v60 = vpop.f32.mrf.mxu1  ;;  %v857_v26 = vsel %vm469_vm1, %v5169_v24, -inf }
 0x34f   :  { %v5130_v50 = vadd.f32 %v1044_v60, %v5034_v30 }
 0x351   :  { %v1056_v57 = vsel %vm469_vm1, %v5130_v50, -inf }
 0x352   :  { %1057 = vmax.xlane.f32.xlu0 %v1056_v57 }
 0x353   :  { %505 = vadd.xlane.f32.xlu2 %v504_v0 }
 0x356   :  { %v1047_v5 = vpop.f32.mrf.mxu1 }
 0x357   :  { %v5140_v30 = vadd.f32 %v1047_v5, %v5072_v54  ;;  %v872_v54 = vsub.f32 %v5088_v14, %v868_v12 }
 0x359   :  { %v1059_v9 = vsel %vm469_vm1, %v5140_v30, -inf  ;;  %v878_v16 = vmul.f32 1.442695, %v872_v54 }
 0x35a   :  { %508 = vadd.xlane.f32.xlu0 %v507_v8  ;;  %1060 = vmax.xlane.f32.xlu1 %v1059_v9 }
 0x35b   :  { %4547 = vpow2.f32 %v878_v16 }
 0x361   :  { %v5162_v22 = vpop.eup %4547 }
 0x362   :  { %883 = vadd.xlane.f32.xlu1 %v882_v6  ;;  %v888_v14 = vsel %vm469_vm1, %v5162_v22, 0.0 }
 0x36a   :  { %692 = vadd.xlane.f32.xlu1 %v691_v19 }
 0x36b   :  { %4398 = vrot.lane.b32.xlu2 %v4956_v49, %s4772_s21 }
 0x36e   :  { %4393 = vrot.lane.b32.xlu0 %v5113_v40, %s4776_s24 }
 0x372   :  { %889 = vadd.xlane.f32.xlu1 %v888_v14 }
 0x37a   :  { %858 = vmax.xlane.f32.xlu1 %v857_v26 }
 0x381   :  { %v503_v28 = vpop.xlane.xlu1 %502 }
 0x382   :  { %4549 = vrcp.f32 %v503_v28 }
 0x383   :  { %4551 = vpow2.f32 %v678_v31 }
 0x388   :  { %v4550_v33 = vpop.eup %4549 }
 0x389   :  { %v515_v35 = vmul.f32 %v4550_v33, %v5107_v11  ;;  %v5177_v36 = vpop.eup %4551 }
 0x38a   :  { %v688_v20 = vsel %vm469_vm1, %v5177_v36, 0.0 }
 0x38b   :  { %3672 = vmatmul.msk.f32.gmra.mxu3 %vm469_vm1, %v515_v35 }
 0x394   :  { %689 = vadd.xlane.f32.xlu2 %v688_v20 }
 0x3ac   :  { %4403 = vrot.lane.b32.xlu2 %v5113_v40, %s4772_s21 }
 0x3b6   :  { %v1052_v55 = vpop.xlane.xlu2 %1051 }
 0x3b7   :  { %v1062_v37 = vmax.f32 %v1052_v55, -1e+09 }
 0x3b9   :  { %v1066_v32 = vsub.f32 %v5116_v45, %v1062_v37 }
 0x3bb   :  { %v1070_v25 = vmul.f32 1.442695, %v1066_v32 }
 0x3bd   :  { %4553 = vpow2.f32 %v1070_v25 }
 0x3be   :  { %v5184_v11 = vpop.xlane.xlu2 %1054 }
 0x3c3   :  { %v5186_v42 = vpop.eup %4553 }
 0x3c4   :  { %v1078_v46 = vsel %vm469_vm1, %v5186_v42, 0.0 }
 0x3c5   :  { %v1058_v47 = vpop.xlane.xlu0 %1057  ;;  %1079 = vadd.xlane.f32.xlu0 %v1078_v46 }
 0x3c6   :  { %v1064_v48 = vmax.f32 %v1058_v47, -1e+09  ;;  %v506_v51 = vpop.xlane.xlu2 %505 }
 0x3c7   :  { %4555 = vrcp.f32 %v506_v51 }
 0x3c8   :  { %v1068_v45 = vsub.f32 %v5130_v50, %v1064_v48  ;;  %4557 = vpow2.f32 %v880_v52 }
 0x3ca   :  { %v1074_v44 = vmul.f32 1.442695, %v1068_v45 }
 0x3cc   :  { %4559 = vpow2.f32 %v1074_v44 }
 0x3cd   :  { %v4556_v53 = vpop.eup %4555  ;;  %v509_v58 = vpop.xlane.xlu0 %508 }
 0x3ce   :  { %v1061_v4 = vpop.xlane.xlu1 %1060  ;;  %v516_v59 = vmul.f32 %v4556_v53, %v5127_v61  ;;  %4561 = vrcp.f32 %v509_v58  ;;  %v4399_v34 = vpop.permute.xlu2 %4398 }
 0x3cf   :  { %v1065_v21 = vmax.f32 %v1061_v4, -1e+09  ;;  %v4400_v60 = vunpack.i.l.bf16 %v4399_v34  ;;  %v5195_v62 = vpop.eup %4557  ;;  %v4401_v57 = vunpack.i.h.bf16 %v4399_v34 }
 0x3d0   :  { %3673 = vmatmul.msk.f32.vlgmr.msrb.gmra.mxu3 %vm469_vm1, %v516_v59  ;;  %v891_v2 = vsel %vm469_vm1, %v5195_v62, 0.0 }
 0x3d1   :  { %v1069_v41 = vsub.f32 %v5140_v30, %v1065_v21  ;;  %928 = vmatpush.msrb.mxu2 %v4400_v60  ;;  %v541_v60 = vpop.f32.mrf.mxu3 }
 0x3d2   :  { %v5197_v50 = vpop.eup %4559 }
 0x3d3   :  { %v1076_v0 = vmul.f32 1.442695, %v1069_v41  ;;  %929 = vmatpush.msrb.mxu2 %v4401_v57  ;;  %v1084_v1 = vsel %vm469_vm1, %v5197_v50, 0.0 }
 0x3d4   :  { %v4562_v61 = vpop.eup %4561  ;;  %1085 = vadd.xlane.f32.xlu0 %v1084_v1 }
 0x3d5   :  { %4563 = vpow2.f32 %v1076_v0  ;;  %892 = vadd.xlane.f32.xlu2 %v891_v2  ;;  %v517_v30 = vmul.f32 %v4562_v61, %v5137_v3 }
 0x3d6   :  { %v884_v5 = vpop.xlane.xlu1 %883 }
 0x3d7   :  { %4565 = vrcp.f32 %v884_v5 }
 0x3d8   :  { %3674 = vmatmul.msk.f32.gmra.mxu3 %vm469_vm1, %v517_v30 }
 0x3db   :  { %v5205_v63 = vpop.eup %4563 }
 0x3dc   :  { %v1087_v7 = vsel %vm469_vm1, %v5205_v63, 0.0 }
 0x3dd   :  { %v4566_v8 = vpop.eup %4565  ;;  %1088 = vadd.xlane.f32.xlu2 %v1087_v7 }
 0x3de   :  { %v898_v9 = vmul.f32 %v4566_v8, %v5147_v13  ;;  %v693_v10 = vpop.xlane.xlu1 %692  ;;  %v4417_v13 = vpack.i.bf16 %v5156_v18, %v5149_v15 }
 0x3e0   :  { %3695 = vmatmul.msk.f32.vlgmr.msrb.gmra.mxu2 %vm469_vm1, %v898_v9  ;;  %v4394_v12 = vpop.permute.xlu0 %4393 }
 0x3e1   :  { %v4395_v54 = vunpack.i.l.bf16 %v4394_v12  ;;  %v4396_v6 = vunpack.i.h.bf16 %v4394_v12 }
 0x3e3   :  { %767 = vmatpush.msra.mxu3 %v4395_v54 }
 0x3e5   :  { %768 = vmatpush.msra.mxu3 %v4396_v6 }
 0x3e6   :  { %v890_v3 = vpop.xlane.xlu1 %889 }
 0x3e8   :  { %4413 = vrot.lane.b32.xlu0 %v5113_v40, %s4777_s4 }
 0x3ee   :  { %v859_v16 = vpop.xlane.xlu1 %858 }
 0x3ef   :  { %v867_v19 = vmax.f32 %v859_v16, -1e+09 }
 0x3f1   :  { %v871_v14 = vsub.f32 %v5169_v24, %v867_v19  ;;  %v4280_v19 = vld [vmem:[#allocation6 + $0x38] sm:$0xff] }
 0x3f2   :  { %1283 = vmatpush.bf16.msrb.mxu0 %v4280_v19 }
 0x3f3   :  { %v876_v23 = vmul.f32 1.442695, %v871_v14  ;;  %v4279_v14 = vld [vmem:[#allocation6 + $0x30] sm:$0xff] }
 0x3f5   :  { %4567 = vpow2.f32 %v876_v23  ;;  %4418 = vrot.lane.b32.xlu2 %v4417_v13, %s4777_s4  ;;  %v4278_v23 = vld [vmem:[#allocation6 + $0x28] sm:$0xff]  ;;  %v4277_v13 = vld [vmem:[#allocation6 + $0x20] sm:$0xff] }
 0x3f6   :  { %1284 = vmatpush.bf16.msrb.mxu0 %v4279_v14 }
 0x3fa   :  { %1285 = vmatpush.bf16.msrb.mxu0 %v4278_v23 }
 0x3fb   :  { %v4568_v26 = vpop.eup %4567 }
 0x3fc   :  { %v885_v27 = vsel %vm469_vm1, %v4568_v26, 0.0 }
 0x3fd   :  { %886 = vadd.xlane.f32.xlu1 %v885_v27  ;;  %v4275_v27 = vld [vmem:[#allocation6 + $0x10] sm:$0xff] }
 0x3fe   :  { %1286 = vmatpush.bf16.msrb.mxu0 %v4277_v13 }
 0x407   :  { %v690_v28 = vpop.xlane.xlu2 %689 }
 0x408   :  { %4569 = vrcp.f32 %v690_v28  ;;  %v4274_v28 = vld [vmem:[#allocation6 + $0x8] sm:$0xff] }
 0x409   :  { %4571 = vrcp.f32 %v693_v10 }
 0x40a   :  { %4573 = vrcp.f32 %v890_v3 }
 0x40e   :  { %v4570_v29 = vpop.eup %4569  ;;  %v544_v41 = vpop.f32.mrf.mxu3 }
 0x40f   :  { %v700_v40 = vmul.f32 %v4570_v29, %v5177_v36  ;;  %v4404_v31 = vpop.permute.xlu2 %4403  ;;  %v4572_v15 = vpop.eup %4571  ;;  %v1063_v36 = vmax.f32 %v5184_v11, -1e+09  ;;  %v4273_v29 = vld [vmem:[#allocation6] sm:$0xff] }
 0x410   :  { %v4405_v33 = vunpack.i.l.bf16 %v4404_v31  ;;  %v4406_v24 = vunpack.i.h.bf16 %v4404_v31  ;;  %v701_v18 = vmul.f32 %v4572_v15, %v5154_v17  ;;  %v4574_v35 = vpop.eup %4573 }
 0x411   :  { %3685 = vmatmul.msk.f32.vlgmr.msra.gmra.mxu3 %vm469_vm1, %v700_v40  ;;  %v900_v20 = vmul.f32 %v4574_v35, %v5162_v22  ;;  %v1067_v55 = vsub.f32 %v5123_v56, %v1063_v36 }
 0x412   :  { %963 = vmatpush.msrb.mxu3 %v4405_v33 }
 0x413   :  { %v1072_v37 = vmul.f32 1.442695, %v1067_v55 }
 0x414   :  { %964 = vmatpush.msrb.mxu3 %v4406_v24 }
 0x415   :  { %4575 = vpow2.f32 %v1072_v37 }
 0x416   :  { %4408 = vrot.lane.b32.xlu1 %v4956_v49, %s4777_s4 }
 0x419   :  { %3686 = vmatmul.msk.f32.gmra.mxu3 %vm469_vm1, %v701_v18 }
 0x41b   :  { %v4576_v32 = vpop.eup %4575 }
 0x41c   :  { %v1081_v25 = vsel %vm469_vm1, %v4576_v32, 0.0 }
 0x421   :  { %3697 = vmatmul.msk.f32.vlgmr.msrb.gmra.mxu3 %vm469_vm1, %v900_v20 }
 0x438   :  { %v1080_v17 = vpop.xlane.xlu0 %1079 }
 0x440   :  { %1082 = vadd.xlane.f32.xlu1 %v1081_v25 }
 0x447   :  { %v1086_v43 = vpop.xlane.xlu0 %1085 }
 0x448   :  { %v893_v49 = vpop.xlane.xlu2 %892 }
 0x449   :  { %4577 = vrcp.f32 %v893_v49 }
 0x44a   :  { %4579 = vrcp.f32 %v1086_v43 }
 0x44f   :  { %v4578_v38 = vpop.eup %4577 }
 0x450   :  { %v901_v39 = vmul.f32 %v4578_v38, %v5195_v62  ;;  %v1089_v22 = vpop.xlane.xlu2 %1088  ;;  %v4580_v46 = vpop.eup %4579 }
 0x451   :  { %4581 = vrcp.f32 %v1089_v22  ;;  %v1096_v48 = vmul.f32 %v4580_v46, %v5197_v50 }
 0x452   :  { %3698 = vmatmul.msk.f32.gmra.mxu3 %vm469_vm1, %v901_v39 }
 0x453   :  { %v5238_v62 = vpop.f32.mrf.mxu3 }
 0x457   :  { %v4582_v51 = vpop.eup %4581 }
 0x458   :  { %v1097_v52 = vmul.f32 %v4582_v51, %v5205_v63  ;;  %v4419_v31 = vpop.permute.xlu2 %4418 }
 0x459   :  { %v4421_v33 = vunpack.i.h.bf16 %v4419_v31  ;;  %v4420_v24 = vunpack.i.l.bf16 %v4419_v31 }
 0x45a   :  { %v4414_v11 = vpop.permute.xlu0 %4413 }
 0x45b   :  { %v4415_v56 = vunpack.i.l.bf16 %v4414_v11  ;;  %v4416_v47 = vunpack.i.h.bf16 %v4414_v11  ;;  %v5240_v50 = vpop.f32.mrf.mxu3  ;;  %v1217_v36 = vsel %vm398_vm0, %v544_v41, %v4421_v33  ;;  %v1216_v55 = vsel %vm398_vm0, %v541_v60, %v4420_v24  ;;  %v4687_v41 = vld [vmem:[%s6123_s8] sm:$0xff] }
 0x45d   :  { %1159 = vmatpush.msra.mxu3 %v4415_v56 }
 0x45f   :  { %1160 = vmatpush.msra.mxu3 %v4416_v47 }
 0x460   :  { %3709 = vmatmul.msk.f32.vlgmr.msra.gmra.mxu3 %vm469_vm1, %v1096_v48 }
 0x463   :  { %v931_v8 = vpop.f32.mrf.mxu2 }
 0x468   :  { %3710 = vmatmul.msk.f32.gmra.mxu3 %vm469_vm1, %v1097_v52 }
 0x470   :  { %v887_v45 = vpop.xlane.xlu1 %886 }
 0x471   :  { %4583 = vrcp.f32 %v887_v45 }
 0x472   :  { %4585 = vrcp.f32 %v1080_v17 }
 0x477   :  { %v4584_v44 = vpop.eup %4583 }
 0x478   :  { %v899_v53 = vmul.f32 %v4584_v44, %v4568_v26  ;;  %v4586_v4 = vpop.eup %4585  ;;  %v4276_v26 = vld [vmem:[#allocation6 + $0x18] sm:$0xff] }
 0x479   :  { %v1094_v34 = vmul.f32 %v4586_v4, %v5186_v42  ;;  %1287 = vmatpush.bf16.msrb.mxu0 %v4276_v26 }
 0x47a   :  { %3696 = vmatmul.msk.f32.gmra.mxu2 %vm469_vm1, %v899_v53 }
 0x47d   :  { %1288 = vmatpush.bf16.msrb.mxu0 %v4275_v27 }
 0x481   :  { %1289 = vmatpush.bf16.msrb.mxu0 %v4274_v28 }
 0x485   :  { %1290 = vmatpush.bf16.msrb.mxu0 %v4273_v29 }
 0x488   :  { %v4409_v58 = vpop.permute.xlu1 %4408 }
 0x489   :  { %v4410_v59 = vunpack.i.l.bf16 %v4409_v58  ;;  %v4411_v21 = vunpack.i.h.bf16 %v4409_v58 }
 0x48b   :  { %1124 = vmatpush.msra.mxu2 %v4410_v59 }
 0x48d   :  { %1125 = vmatpush.msra.mxu2 %v4411_v21  ;;  %v4510_v21 = vld [vmem:[%s6106_s9] ss:$0 sm:$0xff] }
 0x48e   :  { %3707 = vmatmul.msk.f32.vlgmr.msra.gmra.mxu2 %vm469_vm1, %v1094_v34 }
 0x494   :  { %v770_v61 = vpop.f32.mrf.mxu3 }
 0x49c   :  { %v773_v2 = vpop.f32.mrf.mxu3 }
 0x49d   :  { %v4432_v12 = vpack.i.bf16 %v773_v2, %v770_v61 }
 0x4a4   :  { %v966_v5 = vpop.f32.mrf.mxu3 }
 0x4b3   :  { %v1083_v57 = vpop.xlane.xlu1 %1082 }
 0x4b4   :  { %4587 = vrcp.f32 %v1083_v57 }
 0x4ba   :  { %v4588_v0 = vpop.eup %4587 }
 0x4bb   :  { %v1095_v1 = vmul.f32 %v4588_v0, %v4576_v32  ;;  %v4688_v0 = vld [vmem:[%s6123_s8 + $0x8] sm:$0xff] }
 0x4bd   :  { %3708 = vmatmul.msk.f32.gmra.mxu2 %vm469_vm1, %v1095_v1 }
 0x4d5   :  { %v969_v30 = vpop.f32.mrf.mxu3 }
 0x4d6   :  { %v4437_v54 = vpack.i.bf16 %v969_v30, %v966_v5  ;;  %v4689_v5 = vld [vmem:[%s6123_s8 + $0x10] sm:$0xff] }
 0x4e3   :  { %v1162_v42 = vpop.f32.mrf.mxu3 }
 0x4eb   :  { %v1165_v63 = vpop.f32.mrf.mxu3 }
 0x4ec   :  { %v4442_v7 = vpack.i.bf16 %v1165_v63, %v1162_v42 }
 0x4ee   :  { %4443 = vrot.lane.b32.xlu2 %v4442_v7, %s4776_s24  ;;  %v4690_v7 = vld [vmem:[%s6123_s8 + $0x18] sm:$0xff] }
 0x4fd   :  { %v934_v9 = vpop.f32.mrf.mxu2 }
 0x4fe   :  { %v4422_v10 = vpack.i.bf16 %v934_v9, %v931_v8  ;;  %v4778_v9 = vmov 128.0  }
 0x4ff   :  { %4589 = vrcp.f32 %v4778_v9 }
 0x500   :  { %4423 = vrot.lane.b32.xlu0 %v4422_v10, %s4772_s21 }
 0x505   :  { %v4590_v10 = vpop.eup %4589 }
 0x506   :  { %vm1321_vm4 = vweird.f32 %v4590_v10 }
 0x508   :  { %4433 = vrot.lane.b32.xlu0 %v4432_v12, %s4777_s4  ;;  %v1317_v12 = vmul.f32 128.0, %v4590_v10 }
 0x510   :  { %4438 = vrot.lane.b32.xlu0 %v4437_v54, %s4772_s21  ;;  %v1318_v54 = vsub.f32 1.0, %v1317_v12 }
 0x511   :  { %v1127_v6 = vpop.f32.mrf.mxu2 }
 0x540   :  { %v1130_v3 = vpop.f32.mrf.mxu2 }
 0x541   :  { %v4427_v16 = vpack.i.bf16 %v1130_v3, %v1127_v6  ;;  %v1319_v6 = vmul.f32 %v4590_v10, %v1318_v54  ;;  %v3745_v54 = vld [vmem:[%s6109_s12] sm:$0xf] }
 0x543   :  { %4428 = vrot.lane.b32.xlu1 %v4427_v16, %s4776_s24  ;;  %v1320_v3 = vadd.f32 %v4590_v10, %v1319_v6  ;;  %v4282_v6 = vld [vmem:[%s6109_s12 + $0x4] sm:$0xf0] }
 0x545   :  { %v5277_v16 = vsel %vm1321_vm4, %v4590_v10, %v1320_v3  ;;  %v4281_v3 = vld [vmem:[%s6109_s12 + $0x4] sm:$0xf] }
 0x548   :  { %v4444_v47 = vpop.permute.xlu2 %4443 }
 0x549   :  { %v4446_v44 = vunpack.i.h.bf16 %v4444_v47  ;;  %v4445_v53 = vunpack.i.l.bf16 %v4444_v47  ;;  %v4291_v47 = vld [vmem:[%s6109_s12 + $0x54] sm:$0xf] }
 0x572   :  { %v4424_v40 = vpop.permute.xlu0 %4423 }
 0x573   :  { %v4426_v18 = vunpack.i.h.bf16 %v4424_v40  ;;  %v4425_v35 = vunpack.i.l.bf16 %v4424_v40 }
 0x575   :  { %v1222_v25 = vsel %vm1220_vm2, %v1217_v36, %v4426_v18  ;;  %v1221_v49 = vsel %vm1220_vm2, %v1216_v55, %v4425_v35  ;;  %v3801_v36 = vld [vmem:[%s6109_s12 + $0x70] sm:$0xf]  ;;  %v4296_v55 = vld [vmem:[%s6109_s12 + $0x74] sm:$0xf0] }
 0x57a   :  { %v4434_v15 = vpop.permute.xlu0 %4433 }
 0x57b   :  { %v4436_v22 = vunpack.i.h.bf16 %v4434_v15  ;;  %v4435_v11 = vunpack.i.l.bf16 %v4434_v15 }
 0x57d   :  { %v1219_v48 = vsel %vm398_vm0, %v5240_v50, %v4436_v22  ;;  %v1218_v51 = vsel %vm398_vm0, %v5238_v62, %v4435_v11  ;;  %v3795_v22 = vld [vmem:[%s6109_s12 + $0x68] sm:$0xf0] }
 0x582   :  { %v4439_v43 = vpop.permute.xlu0 %4438 }
 0x583   :  { %v4441_v46 = vunpack.i.h.bf16 %v4439_v43  ;;  %v4440_v56 = vunpack.i.l.bf16 %v4439_v43 }
 0x585   :  { %v1223_v52 = vsel %vm1220_vm2, %v1218_v51, %v4440_v56  ;;  %v1224_v45 = vsel %vm1220_vm2, %v1219_v48, %v4441_v46  ;;  %v3785_v46 = vld [vmem:[%s6109_s12 + $0x50] sm:$0xf]  ;;  %v4292_v56 = vld [vmem:[%s6109_s12 + $0x54] sm:$0xf0]  ;;  %v3787_v51 = vld [vmem:[%s6109_s12 + $0x58] sm:$0xf0] }
 0x586   :  { %v1228_v58 = vsel %vm1225_vm3, %v1223_v52, %v4445_v53  ;;  %v1229_v4 = vsel %vm1225_vm3, %v1224_v45, %v4446_v44  ;;  %v3786_v48 = vor.u32 %v4292_v56, %v3785_v46  ;;  %v3790_v52 = vor.u32 %v4291_v47, %v3787_v51  ;;  %v3777_v45 = vld [vmem:[%s6109_s12 + $0x40] sm:$0xf]  ;;  %v4290_v44 = vld [vmem:[%s6109_s12 + $0x44] sm:$0xf0]  ;;  %v4289_v53 = vld [vmem:[%s6109_s12 + $0x44] sm:$0xf] }
 0x587   :  { %v1231_v59 = vpack.c.bf16 %v1229_v4, %v1228_v58  ;;  %v3778_v58 = vor.u32 %v4290_v44, %v3777_v45  ;;  %v3779_v4 = vld [vmem:[%s6109_s12 + $0x48] sm:$0xf0]  ;;  %v4303_v56 = vld [vmem:[%s6111_s14 + $0x30] sm:$0xff]  ;;  %v4511_v44 = vld [vmem:[%s6107_s10] ss:$0 sm:$0xff] }
 0x588   :  { %v4311_v47 = vld [vmem:[%s6111_s14 + $0x70] sm:$0xff] }
 0x5b5   :  { %v4429_v20 = vpop.permute.xlu1 %4428 }
 0x5b6   :  { %v4431_v37 = vunpack.i.h.bf16 %v4429_v20  ;;  %v4430_v32 = vunpack.i.l.bf16 %v4429_v20 }
 0x5b8   :  { %v1227_v17 = vsel %vm1225_vm3, %v1222_v25, %v4431_v37  ;;  %v1226_v38 = vsel %vm1225_vm3, %v1221_v49, %v4430_v32  ;;  %v4295_v37 = vld [vmem:[%s6109_s12 + $0x74] sm:$0xf]  ;;  %v3802_v32 = vor.u32 %v4296_v55, %v3801_v36  ;;  %v3803_v25 = vld [vmem:[%s6109_s12 + $0x78] sm:$0xf0] }
 0x5b9   :  { %v1230_v39 = vpack.c.bf16 %v1227_v17, %v1226_v38  ;;  %v3806_v49 = vor.u32 %v4295_v37, %v3803_v25  ;;  %v3793_v17 = vld [vmem:[%s6109_s12 + $0x60] sm:$0xf]  ;;  %v4294_v38 = vld [vmem:[%s6109_s12 + $0x64] sm:$0xf0] }
 0x5ba   :  { %1546 = vmatpush.bf16.msrb.mxu1 %v3802_v32  ;;  %v3794_v43 = vor.u32 %v4294_v38, %v3793_v17  ;;  %v4304_v38 = vld [vmem:[%s6111_s14 + $0x38] sm:$0xff] }
 0x5bb   :  { %1291 = vmatmul.bf16.vlgmr.msrb.gmra.mxu0 %v1230_v39  ;;  %1565 = vmatpush.bf16.msrb.mxu2 %v3806_v49  ;;  %v4293_v39 = vld [vmem:[%s6109_s12 + $0x64] sm:$0xf] }
 0x5bc   :  { %v3798_v11 = vor.u32 %v4293_v39, %v3795_v22  ;;  %v4312_v39 = vld [vmem:[%s6111_s14 + $0x78] sm:$0xff]  ;;  %1695 = vmatpush.bf16.msrb.mxu3 %v4304_v38 }
 0x5bd   :  { %1714 = vmatpush.bf16.msra.mxu0 %v4312_v39 }
 0x5be   :  { %1547 = vmatpush.bf16.msrb.mxu1 %v3794_v43 }
 0x5bf   :  { %1566 = vmatpush.bf16.msrb.mxu2 %v3798_v11 }
 0x5c0   :  { %1696 = vmatpush.bf16.msrb.mxu3 %v4303_v56 }
 0x5c1   :  { %1715 = vmatpush.bf16.msra.mxu0 %v4311_v47 }
 0x5c2   :  { %1548 = vmatpush.bf16.msrb.mxu1 %v3786_v48 }
 0x5c3   :  { %1567 = vmatpush.bf16.msrb.mxu2 %v3790_v52 }
 0x5c6   :  { %1549 = vmatpush.bf16.msrb.mxu1 %v3778_v58 }
 0x5cb   :  { %1296 = vmatmul.bf16.gmra.mxu0 %v1231_v59  ;;  %v3782_v59 = vor.u32 %v4289_v53, %v3779_v4  ;;  %v4302_v4 = vld [vmem:[%s6111_s14 + $0x28] sm:$0xff] }
 0x5cc   :  { %1697 = vmatpush.bf16.msrb.mxu3 %v4302_v4 }
 0x5cd   :  { %1568 = vmatpush.bf16.msrb.mxu2 %v3782_v59 }
 0x638   :  { %v1292_v34 = vpop.f32.mrf.mxu0 }
 0x639   :  { %v1293_v60 = vadd.f32 %v4510_v21, %v1292_v34  ;;  %v4288_v34 = vld [vmem:[%s6109_s12 + $0x34] sm:$0xf0] }
 0x63b   :  { %v1302_v62 = vadd.f32 %v4687_v41, %v1293_v60  ;;  %v4287_v60 = vld [vmem:[%s6109_s12 + $0x34] sm:$0xf] }
 0x63d   :  { %1308 = vadd.xlane.f32.xlu0 %v1302_v62 }
 0x640   :  { %v1294_v57 = vpop.f32.mrf.mxu0 }
 0x641   :  { %v1295_v50 = vadd.f32 %v4510_v21, %v1294_v57 }
 0x643   :  { %v1303_v1 = vadd.f32 %v4688_v0, %v1295_v50  ;;  %v3761_v50 = vld [vmem:[%s6109_s12 + $0x20] sm:$0xf]  ;;  %v4286_v0 = vld [vmem:[%s6109_s12 + $0x24] sm:$0xf0] }
 0x645   :  { %1310 = vadd.xlane.f32.xlu2 %v1303_v1 }
 0x648   :  { %v1297_v61 = vpop.f32.mrf.mxu0 }
 0x649   :  { %v1298_v2 = vadd.f32 %v4510_v21, %v1297_v61  ;;  %v3762_v61 = vor.u32 %v4286_v0, %v3761_v50  ;;  %v4301_v50 = vld [vmem:[%s6111_s14 + $0x20] sm:$0xff] }
 0x64a   :  { %1698 = vmatpush.bf16.msrb.mxu3 %v4301_v50 }
 0x64b   :  { %v1304_v30 = vadd.f32 %v4689_v5, %v1298_v2  ;;  %v3763_v2 = vld [vmem:[%s6109_s12 + $0x28] sm:$0xf0] }
 0x64d   :  { %1312 = vadd.xlane.f32.xlu1 %v1304_v30 }
 0x650   :  { %v1299_v42 = vpop.f32.mrf.mxu0 }
 0x651   :  { %v1300_v63 = vadd.f32 %v4510_v21, %v1299_v42  ;;  %v3769_v21 = vld [vmem:[%s6109_s12 + $0x30] sm:$0xf]  ;;  %v4284_v42 = vld [vmem:[%s6109_s12 + $0x14] sm:$0xf0] }
 0x652   :  { %v3770_v41 = vor.u32 %v4288_v34, %v3769_v21 }
 0x653   :  { %v1305_v8 = vadd.f32 %v4690_v7, %v1300_v63  ;;  %v4283_v63 = vld [vmem:[%s6109_s12 + $0x14] sm:$0xf] }
 0x654   :  { %1550 = vmatpush.bf16.msrb.mxu1 %v3770_v41  ;;  %v4512_v41 = vld [vmem:[%s6108_s11] ss:$0 sm:$0xff] }
 0x655   :  { %1314 = vadd.xlane.f32.xlu2 %v1305_v8 }
 0x658   :  { %1551 = vmatpush.bf16.msrb.mxu1 %v3762_v61 }
 0x6b0   :  { %v1309_v19 = vpop.xlane.xlu0 %1308 }
 0x6b1   :  { %v1323_v14 = vmul.f32 %v5277_v16, %v1309_v19 }
 0x6b3   :  { %v5280_v23 = vsub.f32 %v1302_v62, %v1323_v14  ;;  %v3771_v62 = vld [vmem:[%s6109_s12 + $0x38] sm:$0xf0]  ;;  %v3746_v14 = vor.u32 %v4282_v6, %v3745_v54 }
 0x6b4   :  { %v3774_v57 = vor.u32 %v4287_v60, %v3771_v62 }
 0x6b5   :  { %v1331_v13 = vmul.f32 %v5280_v23, %v5280_v23 }
 0x6b6   :  { %1569 = vmatpush.bf16.msrb.mxu2 %v3774_v57 }
 0x6b7   :  { %1335 = vadd.xlane.f32.xlu0 %v1331_v13  ;;  %v3747_v13 = vld [vmem:[%s6109_s12 + $0x8] sm:$0xf0] }
 0x6b8   :  { %v1311_v26 = vpop.xlane.xlu2 %1310 }
 0x6b9   :  { %v1324_v27 = vmul.f32 %v5277_v16, %v1311_v26  ;;  %v3750_v26 = vor.u32 %v4281_v3, %v3747_v13 }
 0x6bb   :  { %v5285_v28 = vsub.f32 %v1303_v1, %v1324_v27  ;;  %v4285_v1 = vld [vmem:[%s6109_s12 + $0x24] sm:$0xf] }
 0x6bc   :  { %v3766_v5 = vor.u32 %v4285_v1, %v3763_v2 }
 0x6bd   :  { %v1332_v29 = vmul.f32 %v5285_v28, %v5285_v28 }
 0x6be   :  { %1570 = vmatpush.bf16.msrb.mxu2 %v3766_v5 }
 0x6bf   :  { %1337 = vadd.xlane.f32.xlu1 %v1332_v29 }
 0x6c0   :  { %v1313_v40 = vpop.xlane.xlu1 %1312 }
 0x6c1   :  { %v1325_v31 = vmul.f32 %v5277_v16, %v1313_v40 }
 0x6c3   :  { %v5290_v33 = vsub.f32 %v1304_v30, %v1325_v31  ;;  %v3753_v30 = vld [vmem:[%s6109_s12 + $0x10] sm:$0xf] }
 0x6c4   :  { %v3754_v7 = vor.u32 %v4284_v42, %v3753_v30 }
 0x6c5   :  { %v1333_v24 = vmul.f32 %v5290_v33, %v5290_v33 }
 0x6c6   :  { %1552 = vmatpush.bf16.msrb.mxu1 %v3754_v7 }
 0x6c7   :  { %1339 = vadd.xlane.f32.xlu2 %v1333_v24 }
 0x6c8   :  { %v1315_v15 = vpop.xlane.xlu2 %1314 }
 0x6c9   :  { %v1326_v18 = vmul.f32 %v5277_v16, %v1315_v15 }
 0x6ca   :  { %1553 = vmatpush.bf16.msrb.mxu1 %v3746_v14 }
 0x6cb   :  { %v5295_v35 = vsub.f32 %v1305_v8, %v1326_v18  ;;  %v3755_v8 = vld [vmem:[%s6109_s12 + $0x18] sm:$0xf0] }
 0x6cc   :  { %v3758_v10 = vor.u32 %v4283_v63, %v3755_v8 }
 0x6cd   :  { %v1334_v20 = vmul.f32 %v5295_v35, %v5295_v35 }
 0x6ce   :  { %1571 = vmatpush.bf16.msrb.mxu2 %v3758_v10 }
 0x6cf   :  { %1341 = vadd.xlane.f32.xlu0 %v1334_v20 }
 0x6d2   :  { %1572 = vmatpush.bf16.msrb.mxu2 %v3750_v26  ;;  %v4299_v26 = vld [vmem:[%s6111_s14 + $0x10] sm:$0xff] }
 0x72a   :  { %v1336_v9 = vpop.xlane.xlu0 %1335 }
 0x72b   :  { %v1343_v12 = vmul.f32 %v1336_v9, %v5277_v16 }
 0x72d   :  { %v1347_v19 = vadd.f32 1e-05, %v1343_v12 }
 0x72f   :  { %4591 = vrsqrt.f32 %v1347_v19  ;;  %vm1357_vm6 = vweird.f32 %v1347_v19 }
 0x732   :  { %v1338_v27 = vpop.xlane.xlu1 %1337 }
 0x733   :  { %v1344_v29 = vmul.f32 %v1338_v27, %v5277_v16  ;;  %v4308_v27 = vld [vmem:[%s6111_s14 + $0x58] sm:$0xff] }
 0x735   :  { %v4592_v40 = vpop.eup %4591  ;;  %v1348_v31 = vadd.f32 1e-05, %v1344_v29  ;;  %v4298_v29 = vld [vmem:[%s6111_s14 + $0x8] sm:$0xff] }
 0x736   :  { %v1352_v24 = vmul.f32 %v4592_v40, %v1347_v19  ;;  %vm1358_vm5 = vweird.f32 %v4592_v40 }
 0x737   :  { %4593 = vrsqrt.f32 %v1348_v31  ;;  %vm1359_vm7 = vmor %vm1357_vm6, %vm1358_vm5  ;;  %vm1367_vm9 = vweird.f32 %v1348_v31 }
 0x738   :  { %v1353_v15 = vmul.f32 %v4592_v40, %v1352_v24  ;;  %v4306_v24 = vld [vmem:[%s6111_s14 + $0x48] sm:$0xff] }
 0x73a   :  { %v1354_v18 = vmul.f32 0.5, %v1353_v15  ;;  %v1340_v20 = vpop.xlane.xlu2 %1339  ;;  %v4305_v15 = vld [vmem:[%s6111_s14 + $0x40] sm:$0xff] }
 0x73b   :  { %v1345_v36 = vmul.f32 %v1340_v20, %v5277_v16 }
 0x73c   :  { %v1355_v55 = vsub.f32 1.5, %v1354_v18  ;;  %v1425_v18 = vld [vmem:[%s6110_s13] sm:$0x3] }
 0x73d   :  { %v4594_v37 = vpop.eup %4593  ;;  %v1349_v32 = vadd.f32 1e-05, %v1345_v36  ;;  %v1462_v36 = vperm.slane %v1425_v18, 0 }
 0x73e   :  { %v1356_v25 = vmul.f32 %v4592_v40, %v1355_v55  ;;  %v1362_v49 = vmul.f32 %v4594_v37, %v1348_v31  ;;  %vm1368_vm8 = vweird.f32 %v4594_v37  ;;  %v4297_v31 = vld [vmem:[%s6111_s14] sm:$0xff] }
 0x73f   :  { %4595 = vrsqrt.f32 %v1349_v32  ;;  %vm1369_vm10 = vmor %vm1367_vm9, %vm1368_vm8  ;;  %vm1377_vm12 = vweird.f32 %v1349_v32 }
 0x740   :  { %v1363_v17 = vmul.f32 %v4594_v37, %v1362_v49  ;;  %v1360_v43 = vsel %vm1359_vm7, %v4592_v40, %v1356_v25  ;;  %v4307_v40 = vld [vmem:[%s6111_s14 + $0x50] sm:$0xff]  ;;  %v1463_v25 = vperm.slane %v1425_v18, 1 }
 0x741   :  { %v1391_v52 = vmul.f32 %v1360_v43, %v5280_v23  ;;  %v4310_v23 = vld [vmem:[%s6111_s14 + $0x68] sm:$0xff] }
 0x742   :  { %v1364_v22 = vmul.f32 0.5, %v1363_v17  ;;  %v1342_v11 = vpop.xlane.xlu0 %1341  ;;  %1716 = vmatpush.bf16.msra.mxu0 %v4310_v23 }
 0x743   :  { %v1346_v46 = vmul.f32 %v1342_v11, %v5277_v16  ;;  %v1398_v60 = vmul.f32 %v4511_v44, %v1391_v52 }
 0x744   :  { %v1365_v48 = vsub.f32 1.5, %v1364_v22 }
 0x745   :  { %v4596_v51 = vpop.eup %4595  ;;  %v1350_v45 = vadd.f32 1e-05, %v1346_v46  ;;  %v5428_v61 = vadd.f32 %v4512_v41, %v1398_v60 }
 0x746   :  { %v1366_v53 = vmul.f32 %v4594_v37, %v1365_v48  ;;  %v1372_v58 = vmul.f32 %v4596_v51, %v1349_v32  ;;  %vm1378_vm11 = vweird.f32 %v4596_v51 }
 0x747   :  { %4597 = vrsqrt.f32 %v1350_v45  ;;  %vm1379_vm13 = vmor %vm1377_vm12, %vm1378_vm11  ;;  %vm1387_vm15 = vweird.f32 %v1350_v45 }
 0x748   :  { %v1370_v59 = vsel %vm1369_vm10, %v4594_v37, %v1366_v53  ;;  %v1373_v21 = vmul.f32 %v4596_v51, %v1372_v58 }
 0x749   :  { %v1392_v34 = vmul.f32 %v1370_v59, %v5285_v28 }
 0x74a   :  { %v1374_v62 = vmul.f32 0.5, %v1373_v21 }
 0x74b   :  { %v1399_v57 = vmul.f32 %v4511_v44, %v1392_v34 }
 0x74c   :  { %v1375_v0 = vsub.f32 1.5, %v1374_v62  ;;  %v4513_v62 = vld [vmem:[%s6112_s15] ss:$0 sm:$0xff] }
 0x74d   :  { %v4598_v1 = vpop.eup %4597  ;;  %v5430_v2 = vadd.f32 %v4512_v41, %v1399_v57 }
 0x74e   :  { %v1376_v28 = vmul.f32 %v4596_v51, %v1375_v0  ;;  %v1382_v5 = vmul.f32 %v4598_v1, %v1350_v45  ;;  %vm1388_vm14 = vweird.f32 %v4598_v1 }
 0x74f   :  { %v1459_v30 = vpack.c.bf16 %v5430_v2, %v5428_v61  ;;  %vm1389_vm4 = vmor %vm1387_vm15, %vm1388_vm14 }
 0x750   :  { %v1383_v42 = vmul.f32 %v4598_v1, %v1382_v5  ;;  %v1380_v7 = vsel %vm1379_vm13, %v4596_v51, %v1376_v28 }
 0x751   :  { %1554 = vmatmul.bf16.vlgmr.msrb.gmra.mxu1 %v1459_v30  ;;  %1573 = vmatmul.bf16.vlgmr.msrb.gmra.mxu2 %v1459_v30  ;;  %v1393_v9 = vmul.f32 %v1380_v7, %v5290_v33  ;;  %v4300_v33 = vld [vmem:[%s6111_s14 + $0x18] sm:$0xff] }
 0x752   :  { %v1384_v63 = vmul.f32 0.5, %v1383_v42  ;;  %1699 = vmatpush.bf16.msrb.mxu3 %v4300_v33 }
 0x753   :  { %v1400_v6 = vmul.f32 %v4511_v44, %v1393_v9 }
 0x754   :  { %v1385_v8 = vsub.f32 1.5, %v1384_v63 }
 0x755   :  { %v5436_v19 = vadd.f32 %v4512_v41, %v1400_v6 }
 0x756   :  { %v1386_v10 = vmul.f32 %v4598_v1, %v1385_v8  ;;  %1700 = vmatpush.bf16.msrb.mxu3 %v4299_v26 }
 0x758   :  { %v1390_v12 = vsel %vm1389_vm4, %v4598_v1, %v1386_v10 }
 0x759   :  { %v1394_v54 = vmul.f32 %v1390_v12, %v5295_v35  ;;  %v4309_v35 = vld [vmem:[%s6111_s14 + $0x60] sm:$0xff] }
 0x75a   :  { %1717 = vmatpush.bf16.msra.mxu0 %v4309_v35  ;;  %1701 = vmatpush.bf16.msrb.mxu3 %v4298_v29 }
 0x75b   :  { %v1401_v3 = vmul.f32 %v4511_v44, %v1394_v54 }
 0x75d   :  { %v5438_v14 = vadd.f32 %v4512_v41, %v1401_v3 }
 0x75e   :  { %1718 = vmatpush.bf16.msra.mxu0 %v4308_v27  ;;  %1702 = vmatpush.bf16.msrb.mxu3 %v4297_v31 }
 0x75f   :  { %v1460_v13 = vpack.c.bf16 %v5438_v14, %v5436_v19 }
 0x761   :  { %1559 = vmatmul.bf16.gmra.mxu1 %v1460_v13  ;;  %1578 = vmatmul.bf16.gmra.mxu2 %v1460_v13 }
 0x762   :  { %1719 = vmatpush.bf16.msra.mxu0 %v4307_v40 }
 0x766   :  { %1720 = vmatpush.bf16.msra.mxu0 %v4306_v24 }
 0x76a   :  { %1721 = vmatpush.bf16.msra.mxu0 %v4305_v15 }
 0x7ce   :  { %v1555_v20 = vpop.f32.mrf.mxu1 }
 0x7cf   :  { %v1556_v37 = vadd.f32 %v1555_v20, %v1462_v36 }
 0x7d1   :  { %v1584_v17 = vmax.f32 %v1556_v37, 0.0 }
 0x7d4   :  { %v1574_v55 = vpop.f32.mrf.mxu2 }
 0x7d5   :  { %v1575_v39 = vadd.f32 %v1574_v55, %v1463_v25 }
 0x7d6   :  { %v1557_v32 = vpop.f32.mrf.mxu1 }
 0x7d7   :  { %v1558_v49 = vadd.f32 %v1557_v32, %v1462_v36  ;;  %v1585_v56 = vmax.f32 %v1575_v39, 0.0  ;;  %v4320_v32 = vld [vmem:[%s6122_s29 + $0x78] sm:$0xff]  ;;  %v4335_v39 = vld [vmem:[#allocation4 + $0x70] sm:$0xff] }
 0x7d8   :  { %1962 = vmatpush.bf16.msra.mxu1 %v4320_v32 }
 0x7d9   :  { %v1586_v38 = vmax.f32 %v1558_v49, 0.0  ;;  %v4336_v49 = vld [vmem:[#allocation4 + $0x78] sm:$0xff] }
 0x7da   :  { %2102 = vmatpush.bf16.msra.mxu3 %v4336_v49 }
 0x7db   :  { %v1592_v43 = vpack.c.bf16 %v1586_v38, %v1584_v17  ;;  %v4319_v17 = vld [vmem:[%s6122_s29 + $0x70] sm:$0xff] }
 0x7dc   :  { %v1576_v22 = vpop.f32.mrf.mxu2  ;;  %v4327_v38 = vld [vmem:[#allocation2 + $0x70] sm:$0xff]  ;;  %1963 = vmatpush.bf16.msra.mxu1 %v4319_v17 }
 0x7dd   :  { %v1577_v11 = vadd.f32 %v1576_v22, %v1463_v25  ;;  %1703 = vmatmul.bf16.vlgmr.msrb.gmra.mxu3 %v1592_v43  ;;  %v4318_v43 = vld [vmem:[%s6122_s29 + $0x68] sm:$0xff] }
 0x7de   :  { %v1560_v46 = vpop.f32.mrf.mxu1  ;;  %2103 = vmatpush.bf16.msra.mxu3 %v4335_v39  ;;  %v4326_v22 = vld [vmem:[#allocation2 + $0x68] sm:$0xff] }
 0x7df   :  { %v1587_v47 = vmax.f32 %v1577_v11, 0.0  ;;  %v1561_v52 = vadd.f32 %v1560_v46, %v1462_v36  ;;  %v4334_v11 = vld [vmem:[#allocation4 + $0x68] sm:$0xff]  ;;  %v4317_v46 = vld [vmem:[%s6122_s29 + $0x60] sm:$0xff] }
 0x7e0   :  { %1964 = vmatpush.bf16.msra.mxu1 %v4318_v43 }
 0x7e1   :  { %v1593_v48 = vpack.c.bf16 %v1587_v47, %v1585_v56  ;;  %v1588_v53 = vmax.f32 %v1561_v52, 0.0  ;;  %v4325_v56 = vld [vmem:[#allocation2 + $0x60] sm:$0xff]  ;;  %v4332_v52 = vld [vmem:[#allocation4 + $0x58] sm:$0xff] }
 0x7e2   :  { %2104 = vmatpush.bf16.msra.mxu3 %v4334_v11  ;;  %v4333_v47 = vld [vmem:[#allocation4 + $0x60] sm:$0xff] }
 0x7e3   :  { %1722 = vmatmul.bf16.vlgmr.msra.gmra.mxu0 %v1593_v48  ;;  %v4316_v48 = vld [vmem:[%s6122_s29 + $0x58] sm:$0xff] }
 0x7e4   :  { %v1579_v51 = vpop.f32.mrf.mxu2  ;;  %1965 = vmatpush.bf16.msra.mxu1 %v4317_v46 }
 0x7e5   :  { %v1580_v4 = vadd.f32 %v1579_v51, %v1463_v25  ;;  %v4324_v51 = vld [vmem:[#allocation2 + $0x58] sm:$0xff] }
 0x7e6   :  { %v1562_v45 = vpop.f32.mrf.mxu1  ;;  %2105 = vmatpush.bf16.msra.mxu3 %v4333_v47 }
 0x7e7   :  { %v1563_v44 = vadd.f32 %v1562_v45, %v1462_v36  ;;  %v1589_v34 = vmax.f32 %v1580_v4, 0.0  ;;  %v4315_v45 = vld [vmem:[%s6122_s29 + $0x50] sm:$0xff]  ;;  %v4322_v4 = vld [vmem:[#allocation2 + $0x48] sm:$0xff] }
 0x7e8   :  { %1966 = vmatpush.bf16.msra.mxu1 %v4316_v48 }
 0x7e9   :  { %v1590_v58 = vmax.f32 %v1563_v44, 0.0  ;;  %v4323_v44 = vld [vmem:[#allocation2 + $0x50] sm:$0xff] }
 0x7ea   :  { %2106 = vmatpush.bf16.msra.mxu3 %v4332_v52 }
 0x7eb   :  { %v1594_v23 = vpack.c.bf16 %v1590_v58, %v1588_v53  ;;  %v4331_v53 = vld [vmem:[#allocation4 + $0x50] sm:$0xff]  ;;  %v4314_v58 = vld [vmem:[%s6122_s29 + $0x48] sm:$0xff] }
 0x7ec   :  { %v1581_v59 = vpop.f32.mrf.mxu2  ;;  %1967 = vmatpush.bf16.msra.mxu1 %v4315_v45 }
 0x7ed   :  { %v1582_v21 = vadd.f32 %v1581_v59, %v1463_v25  ;;  %1708 = vmatmul.bf16.gmra.mxu3 %v1594_v23  ;;  %v4328_v25 = vld [vmem:[#allocation2 + $0x78] sm:$0xff]  ;;  %v4330_v23 = vld [vmem:[#allocation4 + $0x48] sm:$0xff] }
 0x7ee   :  { %2032 = vmatpush.bf16.msra.mxu2 %v4328_v25  ;;  %2107 = vmatpush.bf16.msra.mxu3 %v4331_v53 }
 0x7ef   :  { %v1591_v60 = vmax.f32 %v1582_v21, 0.0 }
 0x7f0   :  { %1968 = vmatpush.bf16.msra.mxu1 %v4314_v58 }
 0x7f1   :  { %v1595_v41 = vpack.c.bf16 %v1591_v60, %v1589_v34  ;;  %v4313_v60 = vld [vmem:[%s6122_s29 + $0x40] sm:$0xff] }
 0x7f2   :  { %2033 = vmatpush.bf16.msra.mxu2 %v4327_v38  ;;  %2108 = vmatpush.bf16.msra.mxu3 %v4330_v23 }
 0x7f3   :  { %1727 = vmatmul.bf16.gmra.mxu0 %v1595_v41  ;;  %v4321_v41 = vld [vmem:[#allocation2 + $0x40] sm:$0xff] }
 0x7f4   :  { %1969 = vmatpush.bf16.msra.mxu1 %v4313_v60 }
 0x7f6   :  { %2034 = vmatpush.bf16.msra.mxu2 %v4326_v22 }
 0x7fa   :  { %2035 = vmatpush.bf16.msra.mxu2 %v4325_v56 }
 0x7fe   :  { %2036 = vmatpush.bf16.msra.mxu2 %v4324_v51 }
 0x802   :  { %2037 = vmatpush.bf16.msra.mxu2 %v4323_v44 }
 0x806   :  { %2038 = vmatpush.bf16.msra.mxu2 %v4322_v4 }
 0x80a   :  { %2039 = vmatpush.bf16.msra.mxu2 %v4321_v41 }
 0x860   :  { %v1704_v57 = vpop.f32.mrf.mxu3  ;;  %v1723_v50 = vpop.f32.mrf.mxu0 }
 0x861   :  { %v1705_v0 = vadd.f32 %v4513_v62, %v1704_v57 }
 0x863   :  { %v1724_v1 = vadd.f32 %v1723_v50, %v1705_v0 }
 0x865   :  { %v1733_v28 = vadd.f32 %v1724_v1, %v5428_v61 }
 0x867   :  { %1739 = vadd.xlane.f32.xlu1 %v1733_v28 }
 0x868   :  { %v1706_v5 = vpop.f32.mrf.mxu3  ;;  %v1725_v30 = vpop.f32.mrf.mxu0 }
 0x869   :  { %v1707_v42 = vadd.f32 %v4513_v62, %v1706_v5 }
 0x86b   :  { %v1726_v63 = vadd.f32 %v1725_v30, %v1707_v42 }
 0x86d   :  { %v1734_v7 = vadd.f32 %v1726_v63, %v5430_v2 }
 0x86f   :  { %1741 = vadd.xlane.f32.xlu2 %v1734_v7 }
 0x870   :  { %v1709_v8 = vpop.f32.mrf.mxu3  ;;  %v1728_v9 = vpop.f32.mrf.mxu0 }
 0x871   :  { %v1710_v10 = vadd.f32 %v4513_v62, %v1709_v8 }
 0x873   :  { %v1729_v12 = vadd.f32 %v1728_v9, %v1710_v10 }
 0x875   :  { %v1735_v54 = vadd.f32 %v1729_v12, %v5436_v19 }
 0x877   :  { %1743 = vadd.xlane.f32.xlu0 %v1735_v54 }
 0x878   :  { %v1711_v6 = vpop.f32.mrf.mxu3  ;;  %v1730_v13 = vpop.f32.mrf.mxu0 }
 0x879   :  { %v1712_v3 = vadd.f32 %v4513_v62, %v1711_v6  ;;  %v4329_v62 = vld [vmem:[#allocation4 + $0x40] sm:$0xff] }
 0x87a   :  { %2109 = vmatpush.bf16.msra.mxu3 %v4329_v62 }
 0x87b   :  { %v1731_v33 = vadd.f32 %v1730_v13, %v1712_v3 }
 0x87d   :  { %v1736_v61 = vadd.f32 %v1731_v33, %v5438_v14 }
 0x87f   :  { %1745 = vadd.xlane.f32.xlu1 %v1736_v61 }
 0x8da   :  { %v1740_v35 = vpop.xlane.xlu1 %1739 }
 0x8db   :  { %v1747_v26 = vmul.f32 %v1740_v35, %v5277_v16 }
 0x8dd   :  { %v5480_v27 = vsub.f32 %v1733_v28, %v1747_v26 }
 0x8df   :  { %v1755_v2 = vmul.f32 %v5480_v27, %v5480_v27 }
 0x8e1   :  { %1759 = vadd.xlane.f32.xlu2 %v1755_v2 }
 0x8e2   :  { %v1742_v29 = vpop.xlane.xlu2 %1741 }
 0x8e3   :  { %v1748_v19 = vmul.f32 %v1742_v29, %v5277_v16  ;;  %v4514_v29 = vld [vmem:[%s6113_s16] ss:$0 sm:$0xff] }
 0x8e5   :  { %v5485_v40 = vsub.f32 %v1734_v7, %v1748_v19 }
 0x8e7   :  { %v1756_v31 = vmul.f32 %v5485_v40, %v5485_v40 }
 0x8e9   :  { %1761 = vadd.xlane.f32.xlu0 %v1756_v31 }
 0x8ea   :  { %v1744_v14 = vpop.xlane.xlu0 %1743 }
 0x8eb   :  { %v1749_v24 = vmul.f32 %v1744_v14, %v5277_v16 }
 0x8ed   :  { %v5490_v15 = vsub.f32 %v1735_v54, %v1749_v24 }
 0x8ef   :  { %v1757_v18 = vmul.f32 %v5490_v15, %v5490_v15 }
 0x8f1   :  { %1763 = vadd.xlane.f32.xlu1 %v1757_v18 }
 0x8f2   :  { %v1746_v20 = vpop.xlane.xlu1 %1745 }
 0x8f3   :  { %v1750_v36 = vmul.f32 %v1746_v20, %v5277_v16 }
 0x8f5   :  { %v5495_v55 = vsub.f32 %v1736_v61, %v1750_v36  ;;  %v4515_v36 = vld [vmem:[%s6114_s17] ss:$0 sm:$0xff] }
 0x8f7   :  { %v1758_v37 = vmul.f32 %v5495_v55, %v5495_v55 }
 0x8f9   :  { %1765 = vadd.xlane.f32.xlu2 %v1758_v37 }
 0x954   :  { %v1760_v59 = vpop.xlane.xlu2 %1759 }
 0x955   :  { %v1767_v21 = vmul.f32 %v1760_v59, %v5277_v16 }
 0x957   :  { %v1771_v34 = vadd.f32 1e-05, %v1767_v21 }
 0x959   :  { %4599 = vrsqrt.f32 %v1771_v34  ;;  %vm1781_vm6 = vweird.f32 %v1771_v34 }
 0x95c   :  { %v1762_v57 = vpop.xlane.xlu0 %1761 }
 0x95d   :  { %v1768_v50 = vmul.f32 %v1762_v57, %v5277_v16 }
 0x95f   :  { %v4600_v0 = vpop.eup %4599  ;;  %v1772_v1 = vadd.f32 1e-05, %v1768_v50  ;;  %v4518_v50 = vld [vmem:[%s6104_s7 + $0x1] ss:$0 sm:$0xff] }
 0x960   :  { %v1776_v28 = vmul.f32 %v4600_v0, %v1771_v34  ;;  %vm1782_vm5 = vweird.f32 %v4600_v0 }
 0x961   :  { %4601 = vrsqrt.f32 %v1772_v1  ;;  %vm1783_vm7 = vmor %vm1781_vm6, %vm1782_vm5  ;;  %vm1791_vm9 = vweird.f32 %v1772_v1 }
 0x962   :  { %v1777_v5 = vmul.f32 %v4600_v0, %v1776_v28 }
 0x964   :  { %v1778_v30 = vmul.f32 0.5, %v1777_v5  ;;  %v1764_v42 = vpop.xlane.xlu1 %1763 }
 0x965   :  { %v1769_v63 = vmul.f32 %v1764_v42, %v5277_v16 }
 0x966   :  { %v1779_v7 = vsub.f32 1.5, %v1778_v30 }
 0x967   :  { %v4602_v8 = vpop.eup %4601  ;;  %v1773_v9 = vadd.f32 1e-05, %v1769_v63 }
 0x968   :  { %v1780_v10 = vmul.f32 %v4600_v0, %v1779_v7  ;;  %v1786_v12 = vmul.f32 %v4602_v8, %v1772_v1  ;;  %vm1792_vm8 = vweird.f32 %v4602_v8 }
 0x969   :  { %4603 = vrsqrt.f32 %v1773_v9  ;;  %vm1793_vm10 = vmor %vm1791_vm9, %vm1792_vm8  ;;  %vm1801_vm12 = vweird.f32 %v1773_v9 }
 0x96a   :  { %v1787_v54 = vmul.f32 %v4602_v8, %v1786_v12  ;;  %v1784_v6 = vsel %vm1783_vm7, %v4600_v0, %v1780_v10 }
 0x96b   :  { %v1815_v26 = vmul.f32 %v1784_v6, %v5480_v27 }
 0x96c   :  { %v1788_v3 = vmul.f32 0.5, %v1787_v54  ;;  %v1766_v13 = vpop.xlane.xlu2 %1765 }
 0x96d   :  { %v1770_v33 = vmul.f32 %v1766_v13, %v5277_v16  ;;  %v1822_v20 = vmul.f32 %v4514_v29, %v1815_v26 }
 0x96e   :  { %v1789_v61 = vsub.f32 1.5, %v1788_v3 }
 0x96f   :  { %v4604_v35 = vpop.eup %4603  ;;  %v1774_v2 = vadd.f32 1e-05, %v1770_v33  ;;  %v5535_v49 = vadd.f32 %v4515_v36, %v1822_v20 }
 0x970   :  { %v1790_v19 = vmul.f32 %v4602_v8, %v1789_v61  ;;  %v1796_v31 = vmul.f32 %v4604_v35, %v1773_v9  ;;  %vm1802_vm11 = vweird.f32 %v4604_v35 }
 0x971   :  { %4605 = vrsqrt.f32 %v1774_v2  ;;  %vm1803_vm13 = vmor %vm1801_vm12, %vm1802_vm11  ;;  %vm1811_vm15 = vweird.f32 %v1774_v2 }
 0x972   :  { %v1794_v14 = vsel %vm1793_vm10, %v4602_v8, %v1790_v19  ;;  %v1797_v24 = vmul.f32 %v4604_v35, %v1796_v31 }
 0x973   :  { %v1816_v18 = vmul.f32 %v1794_v14, %v5485_v40 }
 0x974   :  { %v1798_v27 = vmul.f32 0.5, %v1797_v24 }
 0x975   :  { %v1823_v37 = vmul.f32 %v4514_v29, %v1816_v18 }
 0x976   :  { %v1799_v32 = vsub.f32 1.5, %v1798_v27 }
 0x977   :  { %v4606_v25 = vpop.eup %4605  ;;  %v5537_v17 = vadd.f32 %v4515_v36, %v1823_v37 }
 0x978   :  { %v1800_v38 = vmul.f32 %v4604_v35, %v1799_v32  ;;  %v1806_v39 = vmul.f32 %v4606_v25, %v1774_v2  ;;  %vm1812_vm14 = vweird.f32 %v4606_v25 }
 0x979   :  { %v1909_v43 = vpack.c.bf16 %v5537_v17, %v5535_v49  ;;  %vm1813_vm4 = vmor %vm1811_vm15, %vm1812_vm14 }
 0x97a   :  { %v1807_v40 = vmul.f32 %v4606_v25, %v1806_v39  ;;  %v1804_v22 = vsel %vm1803_vm13, %v4604_v35, %v1800_v38 }
 0x97b   :  { %1970 = vmatmul.bf16.vlgmr.msra.gmra.mxu1 %v1909_v43  ;;  %2040 = vmatmul.bf16.vlgmr.msra.gmra.mxu2 %v1909_v43  ;;  %v1817_v56 = vmul.f32 %v1804_v22, %v5490_v15  ;;  %v4516_v15 = vld [vmem:[%s6100_s3 + $0x1] ss:$0 sm:$0xff] }
 0x97c   :  { %v1808_v11 = vmul.f32 0.5, %v1807_v40  ;;  %2110 = vmatmul.bf16.vlgmr.msra.gmra.mxu3 %v1909_v43  ;;  %v5608_v40 = vld [vmem:[%s6124_s0] sm:$0xff] }
 0x97d   :  { %v1824_v52 = vmul.f32 %v4514_v29, %v1817_v56 }
 0x97e   :  { %v1809_v46 = vsub.f32 1.5, %v1808_v11 }
 0x97f   :  { %v5543_v44 = vadd.f32 %v4515_v36, %v1824_v52  ;;  %v5619_v52 = vld [vmem:[%s6124_s0 + $0x8] sm:$0xff] }
 0x980   :  { %v1810_v47 = vmul.f32 %v4606_v25, %v1809_v46 }
 0x982   :  { %v1814_v48 = vsel %vm1813_vm4, %v4606_v25, %v1810_v47 }
 0x983   :  { %v1818_v51 = vmul.f32 %v1814_v48, %v5495_v55  ;;  %v4517_v55 = vld [vmem:[%s6102_s5 + $0x1] ss:$0 sm:$0xff] }
 0x985   :  { %v1825_v45 = vmul.f32 %v4514_v29, %v1818_v51 }
 0x987   :  { %v5545_v53 = vadd.f32 %v4515_v36, %v1825_v45 }
 0x989   :  { %v1910_v58 = vpack.c.bf16 %v5545_v53, %v5543_v44 }
 0x98b   :  { %1975 = vmatmul.bf16.gmra.mxu1 %v1910_v58  ;;  %2045 = vmatmul.bf16.gmra.mxu2 %v1910_v58 }
 0x98c   :  { %2115 = vmatmul.bf16.gmra.mxu3 %v1910_v58 }
 0x9f8   :  { %v1971_v4 = vpop.f32.mrf.mxu1 }
 0x9f9   :  { %v1972_v23 = vadd.f32 %v4516_v15, %v1971_v4 }
 0x9fb   :  { %v2121_v59 = vmul.f32 0.17677669, %v1972_v23 }
 0x9fd   :  { %2301 = vrot.lane.b32.xlu2 %v2121_v59, %s4776_s24 }
 0x9fe   :  { %v2041_v21 = vpop.f32.mrf.mxu2 }
 0x9ff   :  { %v2042_v34 = vadd.f32 %v4517_v55, %v2041_v21  ;;  %v2111_v60 = vpop.f32.mrf.mxu3 }
 0xa00   :  { %v1973_v41 = vpop.f32.mrf.mxu1  ;;  %v2112_v5 = vadd.f32 %v4518_v50, %v2111_v60 }
 0xa01   :  { %v1974_v62 = vadd.f32 %v4516_v15, %v1973_v41  ;;  %2305 = vrot.lane.b32.xlu1 %v2042_v34, %s4776_s24 }
 0xa03   :  { %v2122_v57 = vmul.f32 0.17677669, %v1974_v62 }
 0xa05   :  { %2303 = vrot.lane.b32.xlu0 %v2122_v57, %s4776_s24  ;;  %2501 = vrot.lane.b32.xlu2 %v2121_v59, %s4772_s21 }
 0xa06   :  { %v2043_v0 = vpop.f32.mrf.mxu2 }
 0xa07   :  { %v2044_v1 = vadd.f32 %v4517_v55, %v2043_v0  ;;  %v2113_v28 = vpop.f32.mrf.mxu3 }
 0xa08   :  { %v2114_v30 = vadd.f32 %v4518_v50, %v2113_v28  ;;  %v1976_v42 = vpop.f32.mrf.mxu1 }
 0xa09   :  { %3987 = vmatpush.xpose.msk.msrb.mxu0 %vm398_vm0, %v2044_v1  ;;  %2507 = vrot.lane.b32.xlu1 %v2044_v1, %s4772_s21  ;;  %v1977_v7 = vadd.f32 %v4516_v15, %v1976_v42 }
 0xa0a   :  { %2263 = vmatpush.msrb.mxu2 %v2114_v30  ;;  %v5564_v63 = vpack.i.bf16 %v2112_v5, %v2114_v30 }
 0xa0b   :  { %v2123_v9 = vmul.f32 0.17677669, %v1977_v7 }
 0xa0c   :  { %2264 = vmatpush.msrb.mxu2 %v2112_v5 }
 0xa0d   :  { %3988 = vmatpush.xpose.msk.msrb.mxu0 %vm398_vm0, %v2042_v34  ;;  %2307 = vrot.lane.b32.xlu0 %v2044_v1, %s4776_s24 }
 0xa0e   :  { %v2046_v8 = vpop.f32.mrf.mxu2 }
 0xa0f   :  { %v2047_v10 = vadd.f32 %v4517_v55, %v2046_v8  ;;  %v2116_v12 = vpop.f32.mrf.mxu3 }
 0xa10   :  { %3989 = vmatmul.msk.f32.vlgmr.msrb.gmra.mxu0 %vm398_vm0, %v2121_v59  ;;  %v2117_v13 = vadd.f32 %v4518_v50, %v2116_v12  ;;  %v1978_v35 = vpop.f32.mrf.mxu1 }
 0xa11   :  { %2340 = vrot.lane.b32.xlu1 %v2123_v9, %s4776_s24  ;;  %2344 = vrot.lane.b32.xlu2 %v2047_v10, %s4776_s24  ;;  %v1979_v26 = vadd.f32 %v4516_v15, %v1978_v35 }
 0xa13   :  { %v2124_v2 = vmul.f32 0.17677669, %v1979_v26 }
 0xa15   :  { %2505 = vrot.lane.b32.xlu0 %v2042_v34, %s4772_s21 }
 0xa16   :  { %v2048_v54 = vpop.f32.mrf.mxu2 }
 0xa17   :  { %v2049_v6 = vadd.f32 %v4517_v55, %v2048_v54  ;;  %v2118_v3 = vpop.f32.mrf.mxu3  ;;  %v5629_v55 = vld [vmem:[%s6124_s0 + $0x10] sm:$0xff] }
 0xa18   :  { %v2119_v33 = vadd.f32 %v4518_v50, %v2118_v3  ;;  %3990 = vmatmul.msk.f32.gmra.mxu0 %vm398_vm0, %v2122_v57 }
 0xa19   :  { %3991 = vmatpush.xpose.msk.msrb.mxu1 %vm398_vm0, %v2049_v6  ;;  %2503 = vrot.lane.b32.xlu1 %v2122_v57, %s4772_s21 }
 0xa1a   :  { %2292 = vmatpush.msrb.mxu3 %v2119_v33  ;;  %2546 = vrot.lane.b32.xlu2 %v2049_v6, %s4772_s21  ;;  %v5576_v61 = vpack.i.bf16 %v2117_v13, %v2119_v33 }
 0xa1c   :  { %2293 = vmatpush.msrb.mxu3 %v2117_v13 }
 0xa1d   :  { %3992 = vmatpush.xpose.msk.msrb.mxu1 %vm398_vm0, %v2047_v10  ;;  %2346 = vrot.lane.b32.xlu0 %v2049_v6, %s4776_s24 }
 0xa20   :  { %3993 = vmatmul.msk.f32.vlgmr.msrb.gmra.mxu1 %vm398_vm0, %v2123_v9 }
 0xa21   :  { %2544 = vrot.lane.b32.xlu1 %v2047_v10, %s4772_s21 }
 0xa22   :  { %2701 = vrot.lane.b32.xlu2 %v2042_v34, %s4777_s4 }
 0xa25   :  { %2342 = vrot.lane.b32.xlu0 %v2124_v2, %s4776_s24 }
 0xa28   :  { %3994 = vmatmul.msk.f32.gmra.mxu1 %vm398_vm0, %v2124_v2 }
 0xa29   :  { %2697 = vrot.lane.b32.xlu1 %v2121_v59, %s4777_s4 }
 0xa2a   :  { %2542 = vrot.lane.b32.xlu2 %v2124_v2, %s4772_s21 }
 0xa2d   :  { %2703 = vrot.lane.b32.xlu0 %v2044_v1, %s4777_s4 }
 0xa31   :  { %2742 = vrot.lane.b32.xlu1 %v2049_v6, %s4777_s4 }
 0xa32   :  { %2740 = vrot.lane.b32.xlu2 %v2047_v10, %s4777_s4 }
 0xa35   :  { %2540 = vrot.lane.b32.xlu0 %v2123_v9, %s4772_s21 }
 0xa39   :  { %2738 = vrot.lane.b32.xlu1 %v2124_v2, %s4777_s4 }
 0xa3a   :  { %4458 = vrot.lane.b32.xlu2 %v5576_v61, %s4776_s24 }
 0xa3d   :  { %2699 = vrot.lane.b32.xlu0 %v2122_v57, %s4777_s4  ;;  %v5641_v57 = vld [vmem:[%s6124_s0 + $0x18] sm:$0xff] }
 0xa41   :  { %4448 = vrot.lane.b32.xlu1 %v5564_v63, %s4776_s24 }
 0xa45   :  { %2736 = vrot.lane.b32.xlu0 %v2123_v9, %s4777_s4 }
 0xa4d   :  { %4453 = vrot.lane.b32.xlu0 %v5564_v63, %s4772_s21 }
 0xa57   :  { %v2302_v29 = vpop.permute.xlu2 %2301 }
 0xa5f   :  { %v2502_v19 = vpop.permute.xlu2 %2501 }
 0xa6b   :  { %v2345_v31 = vpop.permute.xlu2 %2344 }
 0xa73   :  { %v2306_v14 = vpop.permute.xlu1 %2305 }
 0xa74   :  { %v2547_v24 = vpop.permute.xlu2 %2546 }
 0xa77   :  { %v2304_v18 = vpop.permute.xlu0 %2303 }
 0xa7b   :  { %v2508_v20 = vpop.permute.xlu1 %2507 }
 0xa7c   :  { %v2702_v36 = vpop.permute.xlu2 %2701 }
 0xa7f   :  { %v2308_v27 = vpop.permute.xlu0 %2307 }
 0xa80   :  { %3999 = vmatpush.xpose.msk.msra.mxu0 %vm398_vm0, %v2308_v27 }
 0xa83   :  { %v2341_v37 = vpop.permute.xlu1 %2340 }
 0xa84   :  { %v2543_v32 = vpop.permute.xlu2 %2542  ;;  %4000 = vmatpush.xpose.msk.msra.mxu0 %vm398_vm0, %v2306_v14 }
 0xa87   :  { %v2506_v25 = vpop.permute.xlu0 %2505  ;;  %4001 = vmatmul.msk.f32.vlgmr.msra.gmra.mxu0 %vm398_vm0, %v2302_v29 }
 0xa88   :  { %4011 = vmatpush.xpose.msk.msrb.mxu0 %vm398_vm0, %v2508_v20 }
 0xa8b   :  { %v2504_v38 = vpop.permute.xlu1 %2503 }
 0xa8c   :  { %4012 = vmatpush.xpose.msk.msrb.mxu0 %vm398_vm0, %v2506_v25  ;;  %v2741_v39 = vpop.permute.xlu2 %2740 }
 0xa8d   :  { %v2154_v43 = vpop.f32.mrf.mxu0 }
 0xa8e   :  { %v2155_v22 = vadd.f32 %v5608_v40, %v2154_v43 }
 0xa8f   :  { %v2347_v11 = vpop.permute.xlu0 %2346  ;;  %4002 = vmatmul.msk.f32.gmra.mxu0 %vm398_vm0, %v2304_v18 }
 0xa90   :  { %4003 = vmatpush.xpose.msk.msra.mxu1 %vm398_vm0, %v2347_v11  ;;  %v2195_v46 = vsel %vm469_vm1, %v2155_v22, -inf }
 0xa91   :  { %2196 = vmax.xlane.f32.xlu2 %v2195_v46 }
 0xa93   :  { %v2545_v56 = vpop.permute.xlu1 %2544 }
 0xa94   :  { %v4459_v47 = vpop.permute.xlu2 %4458  ;;  %4004 = vmatpush.xpose.msk.msra.mxu1 %vm398_vm0, %v2345_v31 }
 0xa95   :  { %v4460_v48 = vunpack.i.l.bf16 %v4459_v47  ;;  %v2157_v51 = vpop.f32.mrf.mxu0  ;;  %v4461_v58 = vunpack.i.h.bf16 %v4459_v47 }
 0xa96   :  { %v2158_v45 = vadd.f32 %v5619_v52, %v2157_v51 }
 0xa97   :  { %2492 = vmatpush.msra.mxu3 %v4460_v48  ;;  %v2343_v15 = vpop.permute.xlu0 %2342  ;;  %4005 = vmatmul.msk.f32.vlgmr.msra.gmra.mxu1 %vm398_vm0, %v2341_v37 }
 0xa98   :  { %4015 = vmatpush.xpose.msk.msrb.mxu1 %vm398_vm0, %v2547_v24  ;;  %4013 = vmatmul.msk.f32.vlgmr.msrb.gmra.mxu0 %vm398_vm0, %v2502_v19  ;;  %v2198_v4 = vsel %vm469_vm1, %v2158_v45, -inf }
 0xa99   :  { %2493 = vmatpush.msra.mxu3 %v4461_v58  ;;  %2199 = vmax.xlane.f32.xlu0 %v2198_v4 }
 0xa9b   :  { %v2698_v23 = vpop.permute.xlu1 %2697 }
 0xa9c   :  { %4016 = vmatpush.xpose.msk.msrb.mxu1 %vm398_vm0, %v2545_v56 }
 0xa9d   :  { %v2189_v59 = vpop.f32.mrf.mxu1 }
 0xa9e   :  { %v2190_v21 = vadd.f32 %v5629_v55, %v2189_v59 }
 0xa9f   :  { %v2704_v34 = vpop.permute.xlu0 %2703  ;;  %4006 = vmatmul.msk.f32.gmra.mxu1 %vm398_vm0, %v2343_v15 }
 0xaa0   :  { %4014 = vmatmul.msk.f32.gmra.mxu0 %vm398_vm0, %v2504_v38  ;;  %v2201_v60 = vsel %vm469_vm1, %v2190_v21, -inf }
 0xaa1   :  { %4023 = vmatpush.xpose.msk.msra.mxu0 %vm398_vm0, %v2704_v34  ;;  %2202 = vmax.xlane.f32.xlu1 %v2201_v60 }
 0xaa3   :  { %v2743_v41 = vpop.permute.xlu1 %2742 }
 0xaa4   :  { %4027 = vmatpush.xpose.msk.msra.mxu1 %vm398_vm0, %v2743_v41 }
 0xaa5   :  { %4024 = vmatpush.xpose.msk.msra.mxu0 %vm398_vm0, %v2702_v36  ;;  %v2192_v62 = vpop.f32.mrf.mxu1 }
 0xaa6   :  { %v2193_v50 = vadd.f32 %v5641_v57, %v2192_v62 }
 0xaa7   :  { %v2541_v0 = vpop.permute.xlu0 %2540 }
 0xaa8   :  { %4025 = vmatmul.msk.f32.vlgmr.msra.gmra.mxu0 %vm398_vm0, %v2698_v23  ;;  %4017 = vmatmul.msk.f32.vlgmr.msrb.gmra.mxu1 %vm398_vm0, %v2541_v0  ;;  %v2204_v1 = vsel %vm469_vm1, %v2193_v50, -inf }
 0xaa9   :  { %4028 = vmatpush.xpose.msk.msra.mxu1 %vm398_vm0, %v2741_v39  ;;  %2205 = vmax.xlane.f32.xlu0 %v2204_v1 }
 0xaab   :  { %v2739_v28 = vpop.permute.xlu1 %2738 }
 0xaaf   :  { %v2700_v5 = vpop.permute.xlu0 %2699 }
 0xab0   :  { %4018 = vmatmul.msk.f32.gmra.mxu1 %vm398_vm0, %v2543_v32  ;;  %4026 = vmatmul.msk.f32.gmra.mxu0 %vm398_vm0, %v2700_v5 }
 0xab3   :  { %v4449_v30 = vpop.permute.xlu1 %4448 }
 0xab4   :  { %v4450_v42 = vunpack.i.l.bf16 %v4449_v30  ;;  %v4451_v7 = vunpack.i.h.bf16 %v4449_v30 }
 0xab6   :  { %2455 = vmatpush.msra.mxu2 %v4450_v42 }
 0xab7   :  { %v2737_v8 = vpop.permute.xlu0 %2736 }
 0xab8   :  { %2456 = vmatpush.msra.mxu2 %v4451_v7  ;;  %4029 = vmatmul.msk.f32.vlgmr.msra.gmra.mxu1 %vm398_vm0, %v2737_v8 }
 0xabf   :  { %v5652_v12 = vpop.permute.xlu0 %4453 }
 0xac0   :  { %4030 = vmatmul.msk.f32.gmra.mxu1 %vm398_vm0, %v2739_v28 }
 0xb04   :  { %v2334_v9 = vpop.f32.mrf.mxu0  ;;  %v2197_v10 = vpop.xlane.xlu2 %2196 }
 0xb05   :  { %v5655_v54 = vadd.f32 %v5608_v40, %v2334_v9  ;;  %v2207_v6 = vmax.f32 %v2197_v10, -1e+09 }
 0xb07   :  { %v2211_v3 = vsub.f32 %v2155_v22, %v2207_v6  ;;  %v2379_v13 = vsel %vm469_vm1, %v5655_v54, -inf }
 0xb08   :  { %2380 = vmax.xlane.f32.xlu2 %v2379_v13 }
 0xb09   :  { %v2215_v33 = vmul.f32 1.442695, %v2211_v3 }
 0xb0b   :  { %4607 = vpow2.f32 %v2215_v33 }
 0xb0c   :  { %v2337_v35 = vpop.f32.mrf.mxu0  ;;  %v2200_v2 = vpop.xlane.xlu0 %2199 }
 0xb0d   :  { %v5660_v26 = vadd.f32 %v5619_v52, %v2337_v35  ;;  %v2208_v29 = vmax.f32 %v2200_v2, -1e+09 }
 0xb0f   :  { %v2382_v19 = vsel %vm469_vm1, %v5660_v26, -inf  ;;  %v2212_v14 = vsub.f32 %v2158_v45, %v2208_v29 }
 0xb10   :  { %2383 = vmax.xlane.f32.xlu1 %v2382_v19 }
 0xb11   :  { %v5664_v31 = vpop.eup %4607  ;;  %v2217_v36 = vmul.f32 1.442695, %v2212_v14 }
 0xb12   :  { %v2223_v24 = vsel %vm469_vm1, %v5664_v31, 0.0 }
 0xb13   :  { %2224 = vadd.xlane.f32.xlu2 %v2223_v24  ;;  %4609 = vpow2.f32 %v2217_v36 }
 0xb14   :  { %v2203_v18 = vpop.xlane.xlu1 %2202  ;;  %v2373_v20 = vpop.f32.mrf.mxu1 }
 0xb15   :  { %v2209_v27 = vmax.f32 %v2203_v18, -1e+09  ;;  %v2534_v37 = vpop.f32.mrf.mxu0  ;;  %v5669_v32 = vadd.f32 %v5629_v55, %v2373_v20 }
 0xb16   :  { %v5672_v25 = vadd.f32 %v5608_v40, %v2534_v37 }
 0xb17   :  { %v2213_v38 = vsub.f32 %v2190_v21, %v2209_v27  ;;  %v2385_v22 = vsel %vm469_vm1, %v5669_v32, -inf }
 0xb18   :  { %v2579_v39 = vsel %vm469_vm1, %v5672_v25, -inf }
 0xb19   :  { %2580 = vmax.xlane.f32.xlu0 %v2579_v39  ;;  %v2219_v43 = vmul.f32 1.442695, %v2213_v38  ;;  %v5681_v51 = vpop.eup %4609 }
 0xb1a   :  { %v2226_v15 = vsel %vm469_vm1, %v5681_v51, 0.0 }
 0xb1b   :  { %2386 = vmax.xlane.f32.xlu2 %v2385_v22  ;;  %4611 = vpow2.f32 %v2219_v43  ;;  %v4455_v43 = vunpack.i.l.bf16 %v5652_v12 }
 0xb1c   :  { %v2376_v11 = vpop.f32.mrf.mxu1  ;;  %v2206_v46 = vpop.xlane.xlu0 %2205 }
 0xb1d   :  { %v5679_v56 = vadd.f32 %v5641_v57, %v2376_v11  ;;  %v2537_v47 = vpop.f32.mrf.mxu0  ;;  %v2210_v48 = vmax.f32 %v2206_v46, -1e+09  ;;  %v4456_v46 = vunpack.i.h.bf16 %v5652_v12 }
 0xb1e   :  { %v5690_v21 = vadd.f32 %v5619_v52, %v2537_v47 }
 0xb1f   :  { %v2388_v45 = vsel %vm469_vm1, %v5679_v56, -inf  ;;  %v2214_v58 = vsub.f32 %v2193_v50, %v2210_v48 }
 0xb20   :  { %2389 = vmax.xlane.f32.xlu1 %v2388_v45  ;;  %v2582_v50 = vsel %vm469_vm1, %v5690_v21, -inf }
 0xb21   :  { %v5687_v4 = vpop.eup %4611  ;;  %v2221_v23 = vmul.f32 1.442695, %v2214_v58 }
 0xb22   :  { %v2229_v41 = vsel %vm469_vm1, %v5687_v4, 0.0 }
 0xb23   :  { %2227 = vadd.xlane.f32.xlu2 %v2226_v15  ;;  %4613 = vpow2.f32 %v2221_v23 }
 0xb25   :  { %v2573_v59 = vpop.f32.mrf.mxu1  ;;  %v2730_v34 = vpop.f32.mrf.mxu0 }
 0xb26   :  { %v5693_v60 = vadd.f32 %v5629_v55, %v2573_v59  ;;  %v5702_v0 = vadd.f32 %v5608_v40, %v2730_v34 }
 0xb28   :  { %2230 = vadd.xlane.f32.xlu1 %v2229_v41  ;;  %v2585_v62 = vsel %vm469_vm1, %v5693_v60, -inf  ;;  %v2775_v30 = vsel %vm469_vm1, %v5702_v0, -inf }
 0xb29   :  { %2586 = vmax.xlane.f32.xlu0 %v2585_v62  ;;  %v5707_v5 = vpop.eup %4613 }
 0xb2a   :  { %v2232_v40 = vsel %vm469_vm1, %v5707_v5, 0.0 }
 0xb2b   :  { %2583 = vmax.xlane.f32.xlu2 %v2582_v50 }
 0xb2d   :  { %v2576_v1 = vpop.f32.mrf.mxu1  ;;  %v2733_v42 = vpop.f32.mrf.mxu0 }
 0xb2e   :  { %v5705_v28 = vadd.f32 %v5641_v57, %v2576_v1  ;;  %v5716_v8 = vadd.f32 %v5619_v52, %v2733_v42 }
 0xb30   :  { %2776 = vmax.xlane.f32.xlu1 %v2775_v30  ;;  %v2588_v7 = vsel %vm469_vm1, %v5705_v28, -inf  ;;  %v2778_v6 = vsel %vm469_vm1, %v5716_v8, -inf }
 0xb31   :  { %2589 = vmax.xlane.f32.xlu0 %v2588_v7 }
 0xb33   :  { %2233 = vadd.xlane.f32.xlu2 %v2232_v40 }
 0xb35   :  { %v2769_v9 = vpop.f32.mrf.mxu1 }
 0xb36   :  { %v5719_v10 = vadd.f32 %v5629_v55, %v2769_v9 }
 0xb38   :  { %2779 = vmax.xlane.f32.xlu1 %v2778_v6  ;;  %v2781_v3 = vsel %vm469_vm1, %v5719_v10, -inf }
 0xb39   :  { %2782 = vmax.xlane.f32.xlu0 %v2781_v3 }
 0xb3d   :  { %v2772_v13 = vpop.f32.mrf.mxu1 }
 0xb3e   :  { %v5726_v33 = vadd.f32 %v5641_v57, %v2772_v13 }
 0xb40   :  { %v2784_v52 = vsel %vm469_vm1, %v5726_v33, -inf }
 0xb41   :  { %2785 = vmax.xlane.f32.xlu0 %v2784_v52 }
 0xb7b   :  { %v2381_v35 = vpop.xlane.xlu2 %2380 }
 0xb7c   :  { %v2391_v2 = vmax.f32 %v2381_v35, -1e+09 }
 0xb7e   :  { %v2395_v55 = vsub.f32 %v5655_v54, %v2391_v2 }
 0xb80   :  { %v2399_v29 = vmul.f32 1.442695, %v2395_v55 }
 0xb82   :  { %4615 = vpow2.f32 %v2399_v29 }
 0xb83   :  { %v2384_v19 = vpop.xlane.xlu1 %2383 }
 0xb84   :  { %v2392_v14 = vmax.f32 %v2384_v19, -1e+09 }
 0xb86   :  { %v2396_v24 = vsub.f32 %v5660_v26, %v2392_v14  ;;  %v2225_v18 = vpop.xlane.xlu2 %2224 }
 0xb87   :  { %4617 = vrcp.f32 %v2225_v18 }
 0xb88   :  { %v5732_v20 = vpop.eup %4615  ;;  %v2401_v57 = vmul.f32 1.442695, %v2396_v24 }
 0xb89   :  { %v2407_v36 = vsel %vm469_vm1, %v5732_v20, 0.0 }
 0xb8a   :  { %4619 = vpow2.f32 %v2401_v57  ;;  %2408 = vadd.xlane.f32.xlu2 %v2407_v36 }
 0xb8c   :  { %v2581_v27 = vpop.xlane.xlu0 %2580 }
 0xb8d   :  { %v4618_v37 = vpop.eup %4617  ;;  %v2591_v38 = vmax.f32 %v2581_v27, -1e+09 }
 0xb8e   :  { %v2239_v54 = vmul.f32 %v4618_v37, %v5664_v31  ;;  %v2387_v39 = vpop.xlane.xlu2 %2386 }
 0xb8f   :  { %v2595_v26 = vsub.f32 %v5672_v25, %v2591_v38  ;;  %v2393_v22 = vmax.f32 %v2387_v39, -1e+09 }
 0xb90   :  { %v5739_v11 = vpop.eup %4619  ;;  %3995 = vmatmul.msk.f32.vlgmr.msrb.gmra.mxu2 %vm469_vm1, %v2239_v54 }
 0xb91   :  { %v2599_v47 = vmul.f32 1.442695, %v2595_v26  ;;  %v2397_v48 = vsub.f32 %v5669_v32, %v2393_v22  ;;  %2653 = vmatpush.msrb.mxu2 %v4455_v43  ;;  %v2410_v45 = vsel %vm469_vm1, %v5739_v11, 0.0 }
 0xb92   :  { %2411 = vadd.xlane.f32.xlu0 %v2410_v45 }
 0xb93   :  { %4621 = vpow2.f32 %v2599_v47  ;;  %v2403_v31 = vmul.f32 1.442695, %v2397_v48  ;;  %2654 = vmatpush.msrb.mxu2 %v4456_v46  ;;  %v2390_v58 = vpop.xlane.xlu1 %2389 }
 0xb94   :  { %v2394_v25 = vmax.f32 %v2390_v58, -1e+09 }
 0xb95   :  { %4623 = vpow2.f32 %v2403_v31 }
 0xb96   :  { %v2398_v15 = vsub.f32 %v5679_v56, %v2394_v25  ;;  %v2228_v23 = vpop.xlane.xlu2 %2227 }
 0xb97   :  { %4625 = vrcp.f32 %v2228_v23 }
 0xb98   :  { %v2405_v59 = vmul.f32 1.442695, %v2398_v15 }
 0xb99   :  { %v5747_v12 = vpop.eup %4621 }
 0xb9a   :  { %4627 = vpow2.f32 %v2405_v59  ;;  %v2607_v32 = vsel %vm469_vm1, %v5747_v12, 0.0 }
 0xb9b   :  { %v5751_v34 = vpop.eup %4623  ;;  %2608 = vadd.xlane.f32.xlu0 %v2607_v32  ;;  %v2231_v41 = vpop.xlane.xlu1 %2230 }
 0xb9c   :  { %4629 = vrcp.f32 %v2231_v41  ;;  %v2587_v62 = vpop.xlane.xlu0 %2586  ;;  %v2413_v50 = vsel %vm469_vm1, %v5751_v34, 0.0 }
 0xb9d   :  { %v4626_v1 = vpop.eup %4625  ;;  %v2593_v56 = vmax.f32 %v2587_v62, -1e+09  ;;  %2414 = vadd.xlane.f32.xlu2 %v2413_v50 }
 0xb9e   :  { %v2584_v30 = vpop.xlane.xlu2 %2583  ;;  %v2240_v42 = vmul.f32 %v4626_v1, %v5681_v51 }
 0xb9f   :  { %v2597_v7 = vsub.f32 %v5693_v60, %v2593_v56  ;;  %v2592_v40 = vmax.f32 %v2584_v30, -1e+09 }
 0xba0   :  { %v5757_v9 = vpop.eup %4627  ;;  %3996 = vmatmul.msk.f32.gmra.mxu2 %vm469_vm1, %v2240_v42 }
 0xba1   :  { %v2603_v6 = vmul.f32 1.442695, %v2597_v7  ;;  %v2596_v3 = vsub.f32 %v5690_v21, %v2592_v40  ;;  %v2416_v13 = vsel %vm469_vm1, %v5757_v9, 0.0 }
 0xba2   :  { %v4630_v52 = vpop.eup %4629  ;;  %2417 = vadd.xlane.f32.xlu1 %v2416_v13 }
 0xba3   :  { %v2241_v35 = vmul.f32 %v4630_v52, %v5687_v4  ;;  %4631 = vpow2.f32 %v2603_v6  ;;  %v2601_v2 = vmul.f32 1.442695, %v2596_v3  ;;  %v2777_v51 = vpop.xlane.xlu1 %2776 }
 0xba4   :  { %v2787_v55 = vmax.f32 %v2777_v51, -1e+09  ;;  %v2590_v60 = vpop.xlane.xlu0 %2589 }
 0xba5   :  { %4633 = vpow2.f32 %v2601_v2  ;;  %v2594_v29 = vmax.f32 %v2590_v60, -1e+09  ;;  %3997 = vmatmul.msk.f32.vlgmr.msrb.gmra.mxu3 %vm469_vm1, %v2241_v35 }
 0xba6   :  { %v2791_v19 = vsub.f32 %v5702_v0, %v2787_v55  ;;  %v2234_v14 = vpop.xlane.xlu2 %2233 }
 0xba7   :  { %v2598_v21 = vsub.f32 %v5705_v28, %v2594_v29  ;;  %4635 = vrcp.f32 %v2234_v14 }
 0xba8   :  { %v2795_v24 = vmul.f32 1.442695, %v2791_v19 }
 0xba9   :  { %v5767_v18 = vpop.eup %4631  ;;  %v2605_v57 = vmul.f32 1.442695, %v2598_v21 }
 0xbaa   :  { %4637 = vpow2.f32 %v2795_v24  ;;  %v2613_v4 = vsel %vm469_vm1, %v5767_v18, 0.0 }
 0xbab   :  { %v5771_v36 = vpop.eup %4633  ;;  %4639 = vpow2.f32 %v2605_v57  ;;  %v2780_v27 = vpop.xlane.xlu1 %2779  ;;  %2614 = vadd.xlane.f32.xlu0 %v2613_v4 }
 0xbac   :  { %v2788_v37 = vmax.f32 %v2780_v27, -1e+09  ;;  %v2610_v0 = vsel %vm469_vm1, %v5771_v36, 0.0 }
 0xbad   :  { %v4636_v38 = vpop.eup %4635  ;;  %2611 = vadd.xlane.f32.xlu2 %v2610_v0 }
 0xbae   :  { %v2792_v28 = vsub.f32 %v5716_v8, %v2788_v37  ;;  %v2242_v54 = vmul.f32 %v4636_v38, %v5707_v5  ;;  %v2783_v8 = vpop.xlane.xlu0 %2782 }
 0xbaf   :  { %v2789_v58 = vmax.f32 %v2783_v8, -1e+09 }
 0xbb0   :  { %v5777_v39 = vpop.eup %4637  ;;  %v2797_v43 = vmul.f32 1.442695, %v2792_v28  ;;  %3998 = vmatmul.msk.f32.gmra.mxu3 %vm469_vm1, %v2242_v54 }
 0xbb1   :  { %v5780_v26 = vpop.eup %4639  ;;  %v2803_v22 = vsel %vm469_vm1, %v5777_v39, 0.0  ;;  %v2793_v15 = vsub.f32 %v5719_v10, %v2789_v58 }
 0xbb2   :  { %4641 = vpow2.f32 %v2797_v43  ;;  %2804 = vadd.xlane.f32.xlu1 %v2803_v22  ;;  %v2616_v46 = vsel %vm469_vm1, %v5780_v26, 0.0 }
 0xbb3   :  { %2617 = vadd.xlane.f32.xlu0 %v2616_v46  ;;  %v2799_v23 = vmul.f32 1.442695, %v2793_v15 }
 0xbb6   :  { %v2786_v48 = vpop.xlane.xlu0 %2785 }
 0xbb7   :  { %v2790_v45 = vmax.f32 %v2786_v48, -1e+09 }
 0xbb8   :  { %v5786_v47 = vpop.eup %4641 }
 0xbb9   :  { %v2806_v5 = vsel %vm469_vm1, %v5786_v47, 0.0  ;;  %v2794_v31 = vsub.f32 %v5726_v33, %v2790_v45 }
 0xbbb   :  { %2807 = vadd.xlane.f32.xlu0 %v2806_v5  ;;  %v2801_v25 = vmul.f32 1.442695, %v2794_v31 }
 0xbbd   :  { %4643 = vpow2.f32 %v2801_v25 }
 0xbbe   :  { %4645 = vpow2.f32 %v2799_v23 }
 0xbc3   :  { %v5798_v59 = vpop.eup %4643 }
 0xbc4   :  { %v5802_v32 = vpop.eup %4645 }
 0xbc5   :  { %4468 = vrot.lane.b32.xlu2 %v5564_v63, %s4777_s4  ;;  %v2812_v63 = vsel %vm469_vm1, %v5798_v59, 0.0 }
 0xbcb   :  { %4463 = vrot.lane.b32.xlu1 %v5576_v61, %s4772_s21 }
 0xbcf   :  { %4473 = vrot.lane.b32.xlu0 %v5576_v61, %s4777_s4  ;;  %v2809_v61 = vsel %vm469_vm1, %v5802_v32, 0.0 }
 0xbee   :  { %2813 = vadd.xlane.f32.xlu2 %v2812_v63 }
 0xbf5   :  { %2810 = vadd.xlane.f32.xlu1 %v2809_v61 }
 0xbfd   :  { %v2409_v33 = vpop.xlane.xlu2 %2408 }
 0xbfe   :  { %4647 = vrcp.f32 %v2409_v33 }
 0xc04   :  { %v4648_v41 = vpop.eup %4647 }
 0xc05   :  { %v2423_v10 = vmul.f32 %v4648_v41, %v5732_v20  ;;  %v2412_v62 = vpop.xlane.xlu0 %2411 }
 0xc06   :  { %4649 = vrcp.f32 %v2412_v62 }
 0xc07   :  { %4007 = vmatmul.msk.f32.vlgmr.msra.gmra.mxu2 %vm469_vm1, %v2423_v10 }
 0xc0c   :  { %v4650_v50 = vpop.eup %4649 }
 0xc0d   :  { %v2424_v1 = vmul.f32 %v4650_v50, %v5739_v11 }
 0xc0e   :  { %v2609_v56 = vpop.xlane.xlu0 %2608 }
 0xc0f   :  { %4651 = vrcp.f32 %v2609_v56  ;;  %4008 = vmatmul.msk.f32.gmra.mxu2 %vm469_vm1, %v2424_v1  ;;  %v4344_v1 = vld [vmem:[#allocation6 + $0x78] sm:$0xff] }
 0xc10   :  { %v2415_v30 = vpop.xlane.xlu2 %2414  ;;  %3006 = vmatpush.bf16.msrb.mxu0 %v4344_v1 }
 0xc11   :  { %4653 = vrcp.f32 %v2415_v30  ;;  %v4343_v30 = vld [vmem:[#allocation6 + $0x70] sm:$0xff] }
 0xc13   :  { %v2266_v5 = vpop.f32.mrf.mxu2 }
 0xc14   :  { %3007 = vmatpush.bf16.msrb.mxu0 %v4343_v30 }
 0xc15   :  { %v4652_v42 = vpop.eup %4651  ;;  %v2418_v7 = vpop.xlane.xlu1 %2417 }
 0xc16   :  { %v2623_v40 = vmul.f32 %v4652_v42, %v5747_v12  ;;  %4655 = vrcp.f32 %v2418_v7 }
 0xc17   :  { %v4654_v6 = vpop.eup %4653 }
 0xc18   :  { %v2425_v20 = vmul.f32 %v4654_v6, %v5751_v34  ;;  %4019 = vmatmul.msk.f32.vlgmr.msrb.gmra.mxu2 %vm469_vm1, %v2623_v40  ;;  %v4342_v40 = vld [vmem:[#allocation6 + $0x68] sm:$0xff]  ;;  %v4341_v6 = vld [vmem:[#allocation6 + $0x60] sm:$0xff] }
 0xc19   :  { %3008 = vmatpush.bf16.msrb.mxu0 %v4342_v40 }
 0xc1a   :  { %4009 = vmatmul.msk.f32.vlgmr.msra.gmra.mxu3 %vm469_vm1, %v2425_v20  ;;  %v4340_v20 = vld [vmem:[#allocation6 + $0x58] sm:$0xff] }
 0xc1c   :  { %v4656_v3 = vpop.eup %4655 }
 0xc1d   :  { %v2426_v52 = vmul.f32 %v4656_v3, %v5757_v9  ;;  %3009 = vmatpush.bf16.msrb.mxu0 %v4341_v6  ;;  %v4339_v3 = vld [vmem:[#allocation6 + $0x50] sm:$0xff] }
 0xc1e   :  { %v2615_v11 = vpop.xlane.xlu0 %2614 }
 0xc20   :  { %v2612_v13 = vpop.xlane.xlu2 %2611 }
 0xc21   :  { %4657 = vrcp.f32 %v2612_v13  ;;  %3010 = vmatpush.bf16.msrb.mxu0 %v4340_v20  ;;  %v4337_v13 = vld [vmem:[#allocation6 + $0x40] sm:$0xff] }
 0xc22   :  { %4010 = vmatmul.msk.f32.gmra.mxu3 %vm469_vm1, %v2426_v52 }
 0xc23   :  { %v2269_v8 = vpop.f32.mrf.mxu2 }
 0xc25   :  { %v2805_v35 = vpop.xlane.xlu1 %2804  ;;  %3011 = vmatpush.bf16.msrb.mxu0 %v4339_v3 }
 0xc26   :  { %v2618_v2 = vpop.xlane.xlu0 %2617  ;;  %4659 = vrcp.f32 %v2805_v35 }
 0xc27   :  { %v4658_v51 = vpop.eup %4657 }
 0xc28   :  { %v4469_v12 = vpop.permute.xlu2 %4468  ;;  %v2624_v55 = vmul.f32 %v4658_v51, %v5771_v36 }
 0xc29   :  { %v4470_v34 = vunpack.i.l.bf16 %v4469_v12  ;;  %v4471_v60 = vunpack.i.h.bf16 %v4469_v12 }
 0xc2a   :  { %4020 = vmatmul.msk.f32.gmra.mxu2 %vm469_vm1, %v2624_v55 }
 0xc2b   :  { %2849 = vmatpush.msra.mxu2 %v4470_v34 }
 0xc2c   :  { %v4660_v29 = vpop.eup %4659 }
 0xc2d   :  { %2850 = vmatpush.msra.mxu2 %v4471_v60  ;;  %v2819_v9 = vmul.f32 %v4660_v29, %v5777_v39 }
 0xc2e   :  { %v2808_v19 = vpop.xlane.xlu0 %2807 }
 0xc2f   :  { %4661 = vrcp.f32 %v2808_v19 }
 0xc30   :  { %4663 = vrcp.f32 %v2615_v11  ;;  %v4338_v11 = vld [vmem:[#allocation6 + $0x48] sm:$0xff] }
 0xc31   :  { %4665 = vrcp.f32 %v2618_v2  ;;  %3012 = vmatpush.bf16.msrb.mxu0 %v4338_v11  ;;  %v4177_v11 = vld [vmem:[%s6109_s12 + $0xf0] sm:$0xf] }
 0xc32   :  { %4031 = vmatmul.msk.f32.vlgmr.msra.gmra.mxu2 %vm469_vm1, %v2819_v9 }
 0xc35   :  { %v4662_v14 = vpop.eup %4661  ;;  %3013 = vmatpush.bf16.msrb.mxu0 %v4337_v13  ;;  %v4360_v13 = vld [vmem:[%s6109_s12 + $0xf4] sm:$0xf0] }
 0xc36   :  { %v2820_v21 = vmul.f32 %v4662_v14, %v5786_v47  ;;  %v4664_v57 = vpop.eup %4663 }
 0xc37   :  { %v2625_v27 = vmul.f32 %v4664_v57, %v5767_v18  ;;  %v4666_v28 = vpop.eup %4665 }
 0xc38   :  { %v2626_v54 = vmul.f32 %v4666_v28, %v5780_v26  ;;  %v5830_v26 = vpop.f32.mrf.mxu3 }
 0xc3a   :  { %4032 = vmatmul.msk.f32.gmra.mxu2 %vm469_vm1, %v2820_v21 }
 0xc3d   :  { %v4464_v24 = vpop.permute.xlu1 %4463 }
 0xc3e   :  { %v4465_v4 = vunpack.i.l.bf16 %v4464_v24  ;;  %v4466_v36 = vunpack.i.h.bf16 %v4464_v24 }
 0xc40   :  { %2688 = vmatpush.msrb.mxu3 %v4465_v4  ;;  %v5832_v58 = vpop.f32.mrf.mxu3 }
 0xc41   :  { %v4474_v37 = vpop.permute.xlu0 %4473 }
 0xc42   :  { %v4475_v0 = vunpack.i.l.bf16 %v4474_v37  ;;  %2689 = vmatpush.msrb.mxu3 %v4466_v36  ;;  %v4476_v38 = vunpack.i.h.bf16 %v4474_v37 }
 0xc43   :  { %4021 = vmatmul.msk.f32.vlgmr.msrb.gmra.mxu3 %vm469_vm1, %v2625_v27 }
 0xc44   :  { %2884 = vmatpush.msra.mxu3 %v4475_v0 }
 0xc46   :  { %2885 = vmatpush.msra.mxu3 %v4476_v38 }
 0xc4b   :  { %4022 = vmatmul.msk.f32.gmra.mxu3 %vm469_vm1, %v2626_v54 }
 0xc61   :  { %v2814_v43 = vpop.xlane.xlu2 %2813 }
 0xc68   :  { %v2811_v39 = vpop.xlane.xlu1 %2810 }
 0xc69   :  { %4667 = vrcp.f32 %v2811_v39 }
 0xc6a   :  { %4669 = vrcp.f32 %v2814_v43 }
 0xc6f   :  { %v4668_v22 = vpop.eup %4667 }
 0xc70   :  { %v2821_v18 = vmul.f32 %v4668_v22, %v5802_v32  ;;  %v4670_v46 = vpop.eup %4669 }
 0xc71   :  { %v2822_v47 = vmul.f32 %v4670_v46, %v5798_v59 }
 0xc72   :  { %4033 = vmatmul.msk.f32.vlgmr.msra.gmra.mxu3 %vm469_vm1, %v2821_v18 }
 0xc7a   :  { %4034 = vmatmul.msk.f32.gmra.mxu3 %vm469_vm1, %v2822_v47 }
 0xc8a   :  { %v2458_v48 = vpop.f32.mrf.mxu2 }
 0xc92   :  { %v2461_v45 = vpop.f32.mrf.mxu2 }
 0xc93   :  { %v4477_v31 = vpack.i.bf16 %v2461_v45, %v2458_v48  ;;  %v4519_v45 = vld [vmem:[%s6106_s9 + $0x1] ss:$0 sm:$0xff] }
 0xc95   :  { %4478 = vrot.lane.b32.xlu0 %v4477_v31, %s4777_s4 }
 0xc9b   :  { %v2656_v15 = vpop.f32.mrf.mxu2 }
 0xc9d   :  { %v2495_v25 = vpop.f32.mrf.mxu3 }
 0xca5   :  { %v2498_v23 = vpop.f32.mrf.mxu3 }
 0xca6   :  { %v4492_v63 = vpack.i.bf16 %v2498_v23, %v2495_v25 }
 0xca8   :  { %4493 = vrot.lane.b32.xlu1 %v4492_v63, %s4777_s4 }
 0xcad   :  { %v2659_v59 = vpop.f32.mrf.mxu2 }
 0xcae   :  { %v4482_v32 = vpack.i.bf16 %v2659_v59, %v2656_v15 }
 0xcb0   :  { %4483 = vrot.lane.b32.xlu0 %v4482_v32, %s4772_s21 }
 0xcb5   :  { %v2852_v61 = vpop.f32.mrf.mxu2 }
 0xcbd   :  { %v2855_v33 = vpop.f32.mrf.mxu2 }
 0xcbe   :  { %v4487_v41 = vpack.i.bf16 %v2855_v33, %v2852_v61 }
 0xcc0   :  { %4488 = vrot.lane.b32.xlu0 %v4487_v41, %s4776_s24 }
 0xcc6   :  { %v2691_v10 = vpop.f32.mrf.mxu3 }
 0xcce   :  { %v2694_v62 = vpop.f32.mrf.mxu3 }
 0xccf   :  { %v4497_v50 = vpack.i.bf16 %v2694_v62, %v2691_v10 }
 0xcd1   :  { %4498 = vrot.lane.b32.xlu0 %v4497_v50, %s4772_s21 }
 0xcf5   :  { %v2887_v56 = vpop.f32.mrf.mxu3 }
 0xcfd   :  { %v2890_v42 = vpop.f32.mrf.mxu3 }
 0xcfe   :  { %v4502_v7 = vpack.i.bf16 %v2890_v42, %v2887_v56 }
 0xd00   :  { %4503 = vrot.lane.b32.xlu2 %v4502_v7, %s4776_s24 }
 0xd07   :  { %v4479_v52 = vpop.permute.xlu0 %4478 }
 0xd08   :  { %v4481_v2 = vunpack.i.h.bf16 %v4479_v52  ;;  %v4480_v51 = vunpack.i.l.bf16 %v4479_v52  ;;  %v4359_v52 = vld [vmem:[%s6109_s12 + $0xf4] sm:$0xf] }
 0xd0a   :  { %v2942_v60 = vsel %vm398_vm0, %v2269_v8, %v4481_v2  ;;  %v2941_v29 = vsel %vm398_vm0, %v2266_v5, %v4480_v51  ;;  %v4179_v2 = vld [vmem:[%s6109_s12 + $0xf8] sm:$0xf0] }
 0xd0b   :  { %v4182_v51 = vor.u32 %v4359_v52, %v4179_v2 }
 0xd0d   :  { %3287 = vmatpush.bf16.msrb.mxu2 %v4182_v51 }
 0xd1a   :  { %v4494_v36 = vpop.permute.xlu1 %4493 }
 0xd1b   :  { %v4496_v37 = vunpack.i.h.bf16 %v4494_v36  ;;  %v4495_v0 = vunpack.i.l.bf16 %v4494_v36  ;;  %v4153_v36 = vld [vmem:[%s6109_s12 + $0xc0] sm:$0xf] }
 0xd1d   :  { %v2944_v39 = vsel %vm398_vm0, %v5832_v58, %v4496_v37  ;;  %v2943_v43 = vsel %vm398_vm0, %v5830_v26, %v4495_v0  ;;  %v4353_v37 = vld [vmem:[%s6109_s12 + $0xc4] sm:$0xf] }
 0xd22   :  { %v4484_v35 = vpop.permute.xlu0 %4483 }
 0xd23   :  { %v4486_v12 = vunpack.i.h.bf16 %v4484_v35  ;;  %v4485_v55 = vunpack.i.l.bf16 %v4484_v35  ;;  %v4178_v35 = vor.u32 %v4360_v13, %v4177_v11 }
 0xd25   :  { %v2946_v14 = vsel %vm1220_vm2, %v2942_v60, %v4486_v12  ;;  %v2945_v21 = vsel %vm1220_vm2, %v2941_v29, %v4485_v55  ;;  %3268 = vmatpush.bf16.msrb.mxu1 %v4178_v35  ;;  %v4169_v12 = vld [vmem:[%s6109_s12 + $0xe0] sm:$0xf]  ;;  %v4358_v55 = vld [vmem:[%s6109_s12 + $0xe4] sm:$0xf0]  ;;  %v4171_v29 = vld [vmem:[%s6109_s12 + $0xe8] sm:$0xf0] }
 0xd26   :  { %v4170_v60 = vor.u32 %v4358_v55, %v4169_v12  ;;  %v4520_v55 = vld [vmem:[%s6107_s10 + $0x1] ss:$0 sm:$0xff] }
 0xd29   :  { %3269 = vmatpush.bf16.msrb.mxu1 %v4170_v60 }
 0xd32   :  { %v4489_v34 = vpop.permute.xlu0 %4488 }
 0xd33   :  { %v4491_v19 = vunpack.i.h.bf16 %v4489_v34  ;;  %v4490_v9 = vunpack.i.l.bf16 %v4489_v34  ;;  %v4357_v34 = vld [vmem:[%s6109_s12 + $0xe4] sm:$0xf] }
 0xd35   :  { %v2950_v24 = vsel %vm1225_vm3, %v2946_v14, %v4491_v19  ;;  %v2949_v57 = vsel %vm1225_vm3, %v2945_v21, %v4490_v9  ;;  %v4174_v19 = vor.u32 %v4357_v34, %v4171_v29  ;;  %v4161_v9 = vld [vmem:[%s6109_s12 + $0xd0] sm:$0xf]  ;;  %v4356_v14 = vld [vmem:[%s6109_s12 + $0xd4] sm:$0xf0]  ;;  %v4355_v21 = vld [vmem:[%s6109_s12 + $0xd4] sm:$0xf] }
 0xd36   :  { %v2953_v4 = vpack.c.bf16 %v2950_v24, %v2949_v57  ;;  %v4162_v24 = vor.u32 %v4356_v14, %v4161_v9  ;;  %v4163_v57 = vld [vmem:[%s6109_s12 + $0xd8] sm:$0xf0] }
 0xd37   :  { %3288 = vmatpush.bf16.msrb.mxu2 %v4174_v19  ;;  %v4521_v19 = vld [vmem:[%s6108_s11 + $0x1] ss:$0 sm:$0xff] }
 0xd38   :  { %3014 = vmatmul.bf16.vlgmr.msrb.gmra.mxu0 %v2953_v4  ;;  %v4166_v4 = vor.u32 %v4355_v21, %v4163_v57  ;;  %3270 = vmatpush.bf16.msrb.mxu1 %v4162_v24 }
 0xd3b   :  { %3289 = vmatpush.bf16.msrb.mxu2 %v4166_v4 }
 0xd43   :  { %v4499_v27 = vpop.permute.xlu0 %4498 }
 0xd44   :  { %v4501_v38 = vunpack.i.h.bf16 %v4499_v27  ;;  %v4500_v28 = vunpack.i.l.bf16 %v4499_v27  ;;  %v4354_v27 = vld [vmem:[%s6109_s12 + $0xc4] sm:$0xf0] }
 0xd45   :  { %v4154_v0 = vor.u32 %v4354_v27, %v4153_v36 }
 0xd46   :  { %v2948_v46 = vsel %vm1220_vm2, %v2944_v39, %v4501_v38  ;;  %v2947_v47 = vsel %vm1220_vm2, %v2943_v43, %v4500_v28  ;;  %v4155_v38 = vld [vmem:[%s6109_s12 + $0xc8] sm:$0xf0]  ;;  %v4352_v39 = vld [vmem:[%s6109_s12 + $0xb4] sm:$0xf0]  ;;  %v4351_v43 = vld [vmem:[%s6109_s12 + $0xb4] sm:$0xf] }
 0xd47   :  { %v4158_v28 = vor.u32 %v4353_v37, %v4155_v38  ;;  %3271 = vmatpush.bf16.msrb.mxu1 %v4154_v0  ;;  %v4368_v37 = vld [vmem:[%s6111_s14 + $0xb8] sm:$0xff] }
 0xd48   :  { %3417 = vmatpush.bf16.msrb.mxu3 %v4368_v37 }
 0xd49   :  { %3290 = vmatpush.bf16.msrb.mxu2 %v4158_v28  ;;  %v4367_v28 = vld [vmem:[%s6111_s14 + $0xb0] sm:$0xff] }
 0xd4c   :  { %3418 = vmatpush.bf16.msrb.mxu3 %v4367_v28 }
 0xd5a   :  { %v4504_v54 = vpop.permute.xlu2 %4503 }
 0xd5b   :  { %v4506_v22 = vunpack.i.h.bf16 %v4504_v54  ;;  %v4505_v18 = vunpack.i.l.bf16 %v4504_v54  ;;  %v4145_v54 = vld [vmem:[%s6109_s12 + $0xb0] sm:$0xf] }
 0xd5d   :  { %v2951_v5 = vsel %vm1225_vm3, %v2947_v47, %v4505_v18  ;;  %v2952_v8 = vsel %vm1225_vm3, %v2948_v46, %v4506_v22  ;;  %v4146_v22 = vor.u32 %v4352_v39, %v4145_v54  ;;  %v4147_v18 = vld [vmem:[%s6109_s12 + $0xb8] sm:$0xf0]  ;;  %v4137_v47 = vld [vmem:[%s6109_s12 + $0xa0] sm:$0xf]  ;;  %v4375_v54 = vld [vmem:[%s6111_s14 + $0xf0] sm:$0xff] }
 0xd5e   :  { %v2954_v48 = vpack.c.bf16 %v2952_v8, %v2951_v5  ;;  %v4150_v46 = vor.u32 %v4351_v43, %v4147_v18  ;;  %v4350_v5 = vld [vmem:[%s6109_s12 + $0xa4] sm:$0xf0]  ;;  %v4349_v8 = vld [vmem:[%s6109_s12 + $0xa4] sm:$0xf] }
 0xd5f   :  { %3272 = vmatpush.bf16.msrb.mxu1 %v4146_v22  ;;  %v4366_v18 = vld [vmem:[%s6111_s14 + $0xa8] sm:$0xff] }
 0xd60   :  { %3019 = vmatmul.bf16.gmra.mxu0 %v2954_v48  ;;  %3291 = vmatpush.bf16.msrb.mxu2 %v4150_v46  ;;  %v4138_v48 = vor.u32 %v4350_v5, %v4137_v47  ;;  %v4374_v46 = vld [vmem:[%s6111_s14 + $0xe8] sm:$0xff] }
 0xd61   :  { %3419 = vmatpush.bf16.msrb.mxu3 %v4366_v18 }
 0xd63   :  { %3273 = vmatpush.bf16.msrb.mxu1 %v4138_v48 }
 0xdb5   :  { %v3015_v31 = vpop.f32.mrf.mxu0 }
 0xdb6   :  { %v3016_v58 = vadd.f32 %v4519_v45, %v3015_v31 }
 0xdb8   :  { %v3025_v26 = vadd.f32 %v3016_v58, %v5535_v49  ;;  %v4129_v58 = vld [vmem:[%s6109_s12 + $0x90] sm:$0xf] }
 0xdba   :  { %3033 = vadd.xlane.f32.xlu0 %v3025_v26 }
 0xdbd   :  { %v3017_v25 = vpop.f32.mrf.mxu0 }
 0xdbe   :  { %v3018_v15 = vadd.f32 %v4519_v45, %v3017_v25  ;;  %v4347_v25 = vld [vmem:[%s6109_s12 + $0x94] sm:$0xf] }
 0xdc0   :  { %v3026_v23 = vadd.f32 %v3018_v15, %v5537_v17 }
 0xdc2   :  { %3035 = vadd.xlane.f32.xlu1 %v3026_v23 }
 0xddd   :  { %v3020_v63 = vpop.f32.mrf.mxu0 }
 0xdde   :  { %v3021_v59 = vadd.f32 %v4519_v45, %v3020_v63 }
 0xde0   :  { %v3027_v32 = vadd.f32 %v3021_v59, %v5543_v44 }
 0xde2   :  { %3037 = vadd.xlane.f32.xlu2 %v3027_v32 }
 0xde5   :  { %v3022_v61 = vpop.f32.mrf.mxu0 }
 0xde6   :  { %v3023_v33 = vadd.f32 %v4519_v45, %v3022_v61  ;;  %v4139_v45 = vld [vmem:[%s6109_s12 + $0xa8] sm:$0xf0]  ;;  %v4121_v61 = vld [vmem:[%s6109_s12 + $0x80] sm:$0xf] }
 0xde7   :  { %v4142_v31 = vor.u32 %v4349_v8, %v4139_v45  ;;  %v4365_v8 = vld [vmem:[%s6111_s14 + $0xa0] sm:$0xff] }
 0xde8   :  { %v3028_v41 = vadd.f32 %v3023_v33, %v5545_v53  ;;  %v4346_v33 = vld [vmem:[%s6109_s12 + $0x84] sm:$0xf0]  ;;  %3420 = vmatpush.bf16.msrb.mxu3 %v4365_v8 }
 0xde9   :  { %3292 = vmatpush.bf16.msrb.mxu2 %v4142_v31 }
 0xdea   :  { %3039 = vadd.xlane.f32.xlu0 %v3028_v41 }
 0xe2d   :  { %v3034_v10 = vpop.xlane.xlu0 %3033 }
 0xe2e   :  { %v3041_v62 = vmul.f32 %v3034_v10, %v5277_v16 }
 0xe30   :  { %v5862_v49 = vsub.f32 %v3025_v26, %v3041_v62  ;;  %v4348_v26 = vld [vmem:[%s6109_s12 + $0x94] sm:$0xf0]  ;;  %v4122_v62 = vor.u32 %v4346_v33, %v4121_v61 }
 0xe31   :  { %v4130_v15 = vor.u32 %v4348_v26, %v4129_v58 }
 0xe32   :  { %v3049_v50 = vmul.f32 %v5862_v49, %v5862_v49 }
 0xe33   :  { %3274 = vmatpush.bf16.msrb.mxu1 %v4130_v15 }
 0xe34   :  { %3053 = vadd.xlane.f32.xlu0 %v3049_v50  ;;  %v4123_v50 = vld [vmem:[%s6109_s12 + $0x88] sm:$0xf0] }
 0xe35   :  { %v3036_v17 = vpop.xlane.xlu1 %3035 }
 0xe36   :  { %v3042_v1 = vmul.f32 %v3036_v17, %v5277_v16 }
 0xe37   :  { %3275 = vmatpush.bf16.msrb.mxu1 %v4122_v62 }
 0xe38   :  { %v5867_v56 = vsub.f32 %v3026_v23, %v3042_v1  ;;  %v4131_v23 = vld [vmem:[%s6109_s12 + $0x98] sm:$0xf0] }
 0xe39   :  { %v4134_v59 = vor.u32 %v4347_v25, %v4131_v23 }
 0xe3a   :  { %v3050_v44 = vmul.f32 %v5867_v56, %v5867_v56 }
 0xe3b   :  { %3293 = vmatpush.bf16.msrb.mxu2 %v4134_v59 }
 0xe3c   :  { %3055 = vadd.xlane.f32.xlu1 %v3050_v44 }
 0xe55   :  { %v3038_v53 = vpop.xlane.xlu2 %3037 }
 0xe56   :  { %v3043_v30 = vmul.f32 %v3038_v53, %v5277_v16 }
 0xe58   :  { %v5872_v42 = vsub.f32 %v3027_v32, %v3043_v30 }
 0xe5a   :  { %v3051_v7 = vmul.f32 %v5872_v42, %v5872_v42 }
 0xe5c   :  { %3057 = vadd.xlane.f32.xlu0 %v3051_v7 }
 0xe5d   :  { %v3040_v40 = vpop.xlane.xlu0 %3039 }
 0xe5e   :  { %v3044_v6 = vmul.f32 %v3040_v40, %v5277_v16 }
 0xe60   :  { %v5877_v20 = vsub.f32 %v3028_v41, %v3044_v6  ;;  %v4345_v41 = vld [vmem:[%s6109_s12 + $0x84] sm:$0xf] }
 0xe61   :  { %v4126_v17 = vor.u32 %v4345_v41, %v4123_v50 }
 0xe62   :  { %v3052_v3 = vmul.f32 %v5877_v20, %v5877_v20 }
 0xe63   :  { %3294 = vmatpush.bf16.msrb.mxu2 %v4126_v17  ;;  %v4363_v17 = vld [vmem:[%s6111_s14 + $0x90] sm:$0xff] }
 0xe64   :  { %3059 = vadd.xlane.f32.xlu2 %v3052_v3 }
 0xea7   :  { %v3054_v63 = vpop.xlane.xlu0 %3053 }
 0xea8   :  { %v3061_v32 = vmul.f32 %v3054_v63, %v5277_v16 }
 0xeaa   :  { %v3065_v10 = vadd.f32 1e-05, %v3061_v32 }
 0xeac   :  { %4671 = vrsqrt.f32 %v3065_v10  ;;  %vm3075_vm1 = vweird.f32 %v3065_v10 }
 0xeaf   :  { %v3056_v1 = vpop.xlane.xlu1 %3055 }
 0xeb0   :  { %v3062_v44 = vmul.f32 %v3056_v1, %v5277_v16  ;;  %v4372_v1 = vld [vmem:[%s6111_s14 + $0xd8] sm:$0xff] }
 0xeb2   :  { %v4672_v53 = vpop.eup %4671  ;;  %v3066_v30 = vadd.f32 1e-05, %v3062_v44  ;;  %v4362_v44 = vld [vmem:[%s6111_s14 + $0x88] sm:$0xff] }
 0xeb3   :  { %v3070_v7 = vmul.f32 %v4672_v53, %v3065_v10  ;;  %vm3076_vm0 = vweird.f32 %v4672_v53 }
 0xeb4   :  { %4673 = vrsqrt.f32 %v3066_v30  ;;  %vm3077_vm2 = vmor %vm3075_vm1, %vm3076_vm0  ;;  %vm3085_vm5 = vweird.f32 %v3066_v30 }
 0xeb5   :  { %v3071_v40 = vmul.f32 %v4672_v53, %v3070_v7  ;;  %v4370_v7 = vld [vmem:[%s6111_s14 + $0xc8] sm:$0xff] }
 0xeb7   :  { %v3072_v6 = vmul.f32 0.5, %v3071_v40  ;;  %v4369_v40 = vld [vmem:[%s6111_s14 + $0xc0] sm:$0xff] }
 0xeb9   :  { %v3073_v3 = vsub.f32 1.5, %v3072_v6  ;;  %v4085_v6 = vld [vmem:[%s6110_s13 + $0x2] sm:$0x3] }
 0xeba   :  { %v4674_v11 = vpop.eup %4673 }
 0xebb   :  { %v3074_v13 = vmul.f32 %v4672_v53, %v3073_v3  ;;  %v3080_v52 = vmul.f32 %v4674_v11, %v3066_v30  ;;  %vm3086_vm3 = vweird.f32 %v4674_v11  ;;  %v4361_v30 = vld [vmem:[%s6111_s14 + $0x80] sm:$0xff] }
 0xebc   :  { %vm3087_vm6 = vmor %vm3085_vm5, %vm3086_vm3 }
 0xebd   :  { %v3081_v35 = vmul.f32 %v4674_v11, %v3080_v52  ;;  %v3078_v2 = vsel %vm3077_vm2, %v4672_v53, %v3074_v13  ;;  %v4371_v53 = vld [vmem:[%s6111_s14 + $0xd0] sm:$0xff] }
 0xebe   :  { %v3109_v34 = vmul.f32 %v3078_v2, %v5862_v49  ;;  %v3185_v2 = vperm.slane %v4085_v6, 1 }
 0xebf   :  { %v3082_v51 = vmul.f32 0.5, %v3081_v35 }
 0xec0   :  { %v3116_v9 = vmul.f32 %v4520_v55, %v3109_v34 }
 0xec1   :  { %v3083_v12 = vsub.f32 1.5, %v3082_v51 }
 0xec2   :  { %v5987_v24 = vadd.f32 %v4521_v19, %v3116_v9 }
 0xec3   :  { %v3084_v60 = vmul.f32 %v4674_v11, %v3083_v12 }
 0xec5   :  { %v3088_v29 = vsel %vm3087_vm6, %v4674_v11, %v3084_v60  ;;  %v3184_v11 = vperm.slane %v4085_v6, 0 }
 0xec6   :  { %v3110_v14 = vmul.f32 %v3088_v29, %v5867_v56  ;;  %v4376_v56 = vld [vmem:[%s6111_s14 + $0xf8] sm:$0xff] }
 0xec7   :  { %3436 = vmatpush.bf16.msra.mxu0 %v4376_v56 }
 0xec8   :  { %v3117_v21 = vmul.f32 %v4520_v55, %v3110_v14 }
 0xeca   :  { %v5989_v57 = vadd.f32 %v4521_v19, %v3117_v21 }
 0xecb   :  { %3437 = vmatpush.bf16.msra.mxu0 %v4375_v54 }
 0xecc   :  { %v3181_v4 = vpack.c.bf16 %v5989_v57, %v5987_v24 }
 0xece   :  { %3276 = vmatmul.bf16.vlgmr.msrb.gmra.mxu1 %v3181_v4  ;;  %3295 = vmatmul.bf16.vlgmr.msrb.gmra.mxu2 %v3181_v4 }
 0xecf   :  { %v3058_v49 = vpop.xlane.xlu0 %3057  ;;  %3438 = vmatpush.bf16.msra.mxu0 %v4374_v46  ;;  %v4522_v46 = vld [vmem:[%s6112_s15 + $0x1] ss:$0 sm:$0xff] }
 0xed0   :  { %v3063_v36 = vmul.f32 %v3058_v49, %v5277_v16 }
 0xed2   :  { %v3067_v27 = vadd.f32 1e-05, %v3063_v36 }
 0xed4   :  { %4675 = vrsqrt.f32 %v3067_v27  ;;  %vm3095_vm8 = vweird.f32 %v3067_v27 }
 0xed7   :  { %v3060_v0 = vpop.xlane.xlu2 %3059 }
 0xed8   :  { %v3064_v38 = vmul.f32 %v3060_v0, %v5277_v16 }
 0xeda   :  { %v4676_v39 = vpop.eup %4675  ;;  %v3068_v43 = vadd.f32 1e-05, %v3064_v38 }
 0xedb   :  { %v3090_v22 = vmul.f32 %v4676_v39, %v3067_v27  ;;  %vm3096_vm7 = vweird.f32 %v4676_v39 }
 0xedc   :  { %4677 = vrsqrt.f32 %v3068_v43  ;;  %vm3097_vm9 = vmor %vm3095_vm8, %vm3096_vm7  ;;  %vm3105_vm11 = vweird.f32 %v3068_v43 }
 0xedd   :  { %v3091_v47 = vmul.f32 %v4676_v39, %v3090_v22 }
 0xedf   :  { %v3092_v5 = vmul.f32 0.5, %v3091_v47 }
 0xee1   :  { %v3093_v48 = vsub.f32 1.5, %v3092_v5 }
 0xee2   :  { %v4678_v45 = vpop.eup %4677 }
 0xee3   :  { %v3094_v31 = vmul.f32 %v4676_v39, %v3093_v48  ;;  %v3100_v58 = vmul.f32 %v4678_v45, %v3068_v43  ;;  %vm3106_vm10 = vweird.f32 %v4678_v45 }
 0xee4   :  { %vm3107_vm12 = vmor %vm3105_vm11, %vm3106_vm10 }
 0xee5   :  { %v3101_v26 = vmul.f32 %v4678_v45, %v3100_v58  ;;  %v3098_v25 = vsel %vm3097_vm9, %v4676_v39, %v3094_v31 }
 0xee6   :  { %v3111_v63 = vmul.f32 %v3098_v25, %v5872_v42  ;;  %v4364_v42 = vld [vmem:[%s6111_s14 + $0x98] sm:$0xff] }
 0xee7   :  { %v3102_v15 = vmul.f32 0.5, %v3101_v26  ;;  %3421 = vmatpush.bf16.msrb.mxu3 %v4364_v42 }
 0xee8   :  { %v3118_v33 = vmul.f32 %v4520_v55, %v3111_v63 }
 0xee9   :  { %v3103_v23 = vsub.f32 1.5, %v3102_v15 }
 0xeea   :  { %v6018_v10 = vadd.f32 %v4521_v19, %v3118_v33 }
 0xeeb   :  { %v3104_v59 = vmul.f32 %v4678_v45, %v3103_v23  ;;  %3422 = vmatpush.bf16.msrb.mxu3 %v4363_v17 }
 0xeed   :  { %v3108_v32 = vsel %vm3107_vm12, %v4678_v45, %v3104_v59 }
 0xeee   :  { %v3112_v61 = vmul.f32 %v3108_v32, %v5877_v20  ;;  %v4373_v20 = vld [vmem:[%s6111_s14 + $0xe0] sm:$0xff] }
 0xeef   :  { %3439 = vmatpush.bf16.msra.mxu0 %v4373_v20  ;;  %3423 = vmatpush.bf16.msrb.mxu3 %v4362_v44 }
 0xef0   :  { %v3119_v41 = vmul.f32 %v4520_v55, %v3112_v61 }
 0xef2   :  { %v6020_v62 = vadd.f32 %v4521_v19, %v3119_v41 }
 0xef3   :  { %3440 = vmatpush.bf16.msra.mxu0 %v4372_v1  ;;  %3424 = vmatpush.bf16.msrb.mxu3 %v4361_v30 }
 0xef4   :  { %v3182_v50 = vpack.c.bf16 %v6020_v62, %v6018_v10 }
 0xef6   :  { %3281 = vmatmul.bf16.gmra.mxu1 %v3182_v50  ;;  %3300 = vmatmul.bf16.gmra.mxu2 %v3182_v50 }
 0xef7   :  { %3441 = vmatpush.bf16.msra.mxu0 %v4371_v53 }
 0xefb   :  { %3442 = vmatpush.bf16.msra.mxu0 %v4370_v7 }
 0xeff   :  { %3443 = vmatpush.bf16.msra.mxu0 %v4369_v40 }
 0xf4b   :  { %v3277_v3 = vpop.f32.mrf.mxu1 }
 0xf4c   :  { %v3278_v52 = vadd.f32 %v3277_v3, %v3184_v11 }
 0xf4e   :  { %v3306_v12 = vmax.f32 %v3278_v52, 0.0 }
 0xf51   :  { %v3296_v13 = vpop.f32.mrf.mxu2 }
 0xf52   :  { %v3297_v34 = vadd.f32 %v3296_v13, %v3185_v2 }
 0xf53   :  { %v3279_v35 = vpop.f32.mrf.mxu1 }
 0xf54   :  { %v3280_v51 = vadd.f32 %v3279_v35, %v3184_v11  ;;  %v3307_v9 = vmax.f32 %v3297_v34, 0.0 }
 0xf56   :  { %v3308_v55 = vmax.f32 %v3280_v51, 0.0 }
 0xf58   :  { %v3314_v60 = vpack.c.bf16 %v3308_v55, %v3306_v12 }
 0xf59   :  { %v3298_v29 = vpop.f32.mrf.mxu2 }
 0xf5a   :  { %v3299_v19 = vadd.f32 %v3298_v29, %v3185_v2  ;;  %3425 = vmatmul.bf16.vlgmr.msrb.gmra.mxu3 %v3314_v60 }
 0xf5c   :  { %v3309_v14 = vmax.f32 %v3299_v19, 0.0 }
 0xf5e   :  { %v3315_v21 = vpack.c.bf16 %v3309_v14, %v3307_v9 }
 0xf60   :  { %3444 = vmatmul.bf16.vlgmr.msra.gmra.mxu0 %v3315_v21 }
 0xf73   :  { %v3282_v4 = vpop.f32.mrf.mxu1 }
 0xf74   :  { %v3283_v36 = vadd.f32 %v3282_v4, %v3184_v11 }
 0xf76   :  { %v3310_v56 = vmax.f32 %v3283_v36, 0.0  ;;  %v4523_v36 = vld [vmem:[%s6113_s16 + $0x1] ss:$0 sm:$0xff] }
 0xf79   :  { %v3301_v49 = vpop.f32.mrf.mxu2 }
 0xf7a   :  { %v3302_v38 = vadd.f32 %v3301_v49, %v3185_v2 }
 0xf7b   :  { %v3284_v27 = vpop.f32.mrf.mxu1 }
 0xf7c   :  { %v3285_v37 = vadd.f32 %v3284_v27, %v3184_v11  ;;  %v3311_v43 = vmax.f32 %v3302_v38, 0.0 }
 0xf7e   :  { %v3312_v0 = vmax.f32 %v3285_v37, 0.0 }
 0xf80   :  { %v3316_v28 = vpack.c.bf16 %v3312_v0, %v3310_v56  ;;  %v4524_v56 = vld [vmem:[%s6114_s17 + $0x1] ss:$0 sm:$0xff] }
 0xf81   :  { %v3303_v54 = vpop.f32.mrf.mxu2 }
 0xf82   :  { %v3304_v39 = vadd.f32 %v3303_v54, %v3185_v2  ;;  %3430 = vmatmul.bf16.gmra.mxu3 %v3316_v28 }
 0xf84   :  { %v3313_v22 = vmax.f32 %v3304_v39, 0.0 }
 0xf86   :  { %v3317_v18 = vpack.c.bf16 %v3313_v22, %v3311_v43 }
 0xf88   :  { %3449 = vmatmul.bf16.gmra.mxu0 %v3317_v18 }
 0xfdd   :  { %v3426_v47 = vpop.f32.mrf.mxu3  ;;  %v3445_v5 = vpop.f32.mrf.mxu0 }
 0xfde   :  { %v3427_v8 = vadd.f32 %v4522_v46, %v3426_v47 }
 0xfe0   :  { %v3446_v48 = vadd.f32 %v3445_v5, %v3427_v8 }
 0xfe2   :  { %v3455_v45 = vadd.f32 %v3446_v48, %v5987_v24 }
 0xfe4   :  { %3463 = vadd.xlane.f32.xlu1 %v3455_v45 }
 0xfe5   :  { %v3428_v31 = vpop.f32.mrf.mxu3  ;;  %v3447_v26 = vpop.f32.mrf.mxu0 }
 0xfe6   :  { %v3429_v58 = vadd.f32 %v4522_v46, %v3428_v31 }
 0xfe8   :  { %v3448_v25 = vadd.f32 %v3447_v26, %v3429_v58 }
 0xfea   :  { %v3456_v15 = vadd.f32 %v3448_v25, %v5989_v57 }
 0xfec   :  { %3465 = vadd.xlane.f32.xlu0 %v3456_v15 }
0x1005   :  { %v3431_v23 = vpop.f32.mrf.mxu3  ;;  %v3450_v63 = vpop.f32.mrf.mxu0 }
0x1006   :  { %v3432_v59 = vadd.f32 %v4522_v46, %v3431_v23 }
0x1008   :  { %v3451_v32 = vadd.f32 %v3450_v63, %v3432_v59 }
0x100a   :  { %v3457_v61 = vadd.f32 %v3451_v32, %v6018_v10 }
0x100c   :  { %3467 = vadd.xlane.f32.xlu2 %v3457_v61 }
0x100d   :  { %v3433_v33 = vpop.f32.mrf.mxu3  ;;  %v3452_v50 = vpop.f32.mrf.mxu0 }
0x100e   :  { %v3434_v41 = vadd.f32 %v4522_v46, %v3433_v33 }
0x1010   :  { %v3453_v42 = vadd.f32 %v3452_v50, %v3434_v41 }
0x1012   :  { %v3458_v24 = vadd.f32 %v3453_v42, %v6020_v62 }
0x1014   :  { %3469 = vadd.xlane.f32.xlu1 %v3458_v24 }
0x1057   :  { %v3464_v20 = vpop.xlane.xlu1 %3463 }
0x1058   :  { %v3471_v17 = vmul.f32 %v3464_v20, %v5277_v16 }
0x105a   :  { %v3475_v1 = vsub.f32 %v3455_v45, %v3471_v17 }
0x105c   :  { %v3479_v57 = vmul.f32 %v3475_v1, %v3475_v1 }
0x105e   :  { %3483 = vadd.xlane.f32.xlu0 %v3479_v57 }
0x105f   :  { %v3466_v44 = vpop.xlane.xlu0 %3465 }
0x1060   :  { %v3472_v53 = vmul.f32 %v3466_v44, %v5277_v16 }
0x1062   :  { %v3476_v30 = vsub.f32 %v3456_v15, %v3472_v53 }
0x1064   :  { %v3480_v7 = vmul.f32 %v3476_v30, %v3476_v30 }
0x1066   :  { %3485 = vadd.xlane.f32.xlu2 %v3480_v7 }
0x107f   :  { %v3468_v10 = vpop.xlane.xlu2 %3467 }
0x1080   :  { %v3473_v40 = vmul.f32 %v3468_v10, %v5277_v16 }
0x1082   :  { %v6064_v6 = vsub.f32 %v3457_v61, %v3473_v40 }
0x1084   :  { %v3481_v62 = vmul.f32 %v6064_v6, %v6064_v6 }
0x1086   :  { %3487 = vadd.xlane.f32.xlu1 %v3481_v62 }
0x1087   :  { %v3470_v3 = vpop.xlane.xlu1 %3469 }
0x1088   :  { %v3474_v11 = vmul.f32 %v3470_v3, %v5277_v16 }
0x108a   :  { %v6069_v13 = vsub.f32 %v3458_v24, %v3474_v11 }
0x108c   :  { %v3482_v52 = vmul.f32 %v6069_v13, %v6069_v13 }
0x108e   :  { %3489 = vadd.xlane.f32.xlu0 %v3482_v52 }
0x10d1   :  { %v3484_v35 = vpop.xlane.xlu0 %3483 }
0x10d2   :  { %v3491_v2 = vmul.f32 %v3484_v35, %v5277_v16 }
0x10d4   :  { %v3495_v51 = vadd.f32 1e-05, %v3491_v2 }
0x10d6   :  { %4679 = vrsqrt.f32 %v3495_v51  ;;  %vm3505_vm14 = vweird.f32 %v3495_v51 }
0x10d9   :  { %v3486_v12 = vpop.xlane.xlu2 %3485 }
0x10da   :  { %v3492_v55 = vmul.f32 %v3486_v12, %v5277_v16 }
0x10dc   :  { %v4680_v34 = vpop.eup %4679  ;;  %v3496_v60 = vadd.f32 1e-05, %v3492_v55 }
0x10dd   :  { %v3500_v29 = vmul.f32 %v4680_v34, %v3495_v51  ;;  %vm3506_vm13 = vweird.f32 %v4680_v34 }
0x10de   :  { %4681 = vrsqrt.f32 %v3496_v60  ;;  %vm3507_vm15 = vmor %vm3505_vm14, %vm3506_vm13  ;;  %vm3515_vm0 = vweird.f32 %v3496_v60 }
0x10df   :  { %v3501_v19 = vmul.f32 %v4680_v34, %v3500_v29 }
0x10e1   :  { %v3502_v9 = vmul.f32 0.5, %v3501_v19 }
0x10e3   :  { %v3503_v14 = vsub.f32 1.5, %v3502_v9 }
0x10e4   :  { %v4682_v21 = vpop.eup %4681 }
0x10e5   :  { %v3504_v4 = vmul.f32 %v4680_v34, %v3503_v14  ;;  %v3510_v49 = vmul.f32 %v4682_v21, %v3496_v60  ;;  %vm3516_vm4 = vweird.f32 %v4682_v21 }
0x10e6   :  { %vm3517_vm1 = vmor %vm3515_vm0, %vm3516_vm4 }
0x10e7   :  { %v3508_v27 = vsel %vm3507_vm15, %v4680_v34, %v3504_v4  ;;  %v3511_v37 = vmul.f32 %v4682_v21, %v3510_v49 }
0x10e8   :  { %v3539_v0 = vmul.f32 %v3508_v27, %v3475_v1 }
0x10e9   :  { %v3512_v38 = vmul.f32 0.5, %v3511_v37 }
0x10ea   :  { %v3546_v28 = vmul.f32 %v4523_v36, %v3539_v0 }
0x10eb   :  { %v3513_v54 = vsub.f32 1.5, %v3512_v38 }
0x10ec   :  { %v3553_v39 = vadd.f32 %v4524_v56, %v3546_v28 }
0x10ed   :  { %v3514_v43 = vmul.f32 %v4682_v21, %v3513_v54 }
0x10ee   :  { %3557 = vst [vmem:[%s6115_s18] sm:$0xff] %v3553_v39 }
0x10ef   :  { %v3518_v22 = vsel %vm3517_vm1, %v4682_v21, %v3514_v43 }
0x10f0   :  { %v3540_v18 = vmul.f32 %v3518_v22, %v3476_v30 }
0x10f2   :  { %v3547_v46 = vmul.f32 %v4523_v36, %v3540_v18 }
0x10f4   :  { %v3554_v47 = vadd.f32 %v4524_v56, %v3547_v46 }
0x10f6   :  { %3558 = vst [vmem:[%s6115_s18 + $0x8] sm:$0xff] %v3554_v47 }
0x10f9   :  { %v3488_v5 = vpop.xlane.xlu1 %3487 }
0x10fa   :  { %v3493_v8 = vmul.f32 %v3488_v5, %v5277_v16 }
0x10fc   :  { %v3497_v48 = vadd.f32 1e-05, %v3493_v8 }
0x10fe   :  { %4683 = vrsqrt.f32 %v3497_v48  ;;  %vm3525_vm3 = vweird.f32 %v3497_v48 }
0x1101   :  { %v3490_v45 = vpop.xlane.xlu0 %3489 }
0x1102   :  { %v3494_v31 = vmul.f32 %v3490_v45, %v5277_v16 }
0x1104   :  { %v4684_v58 = vpop.eup %4683  ;;  %v3498_v26 = vadd.f32 1e-05, %v3494_v31 }
0x1105   :  { %v3520_v25 = vmul.f32 %v4684_v58, %v3497_v48  ;;  %vm3526_vm2 = vweird.f32 %v4684_v58 }
0x1106   :  { %4685 = vrsqrt.f32 %v3498_v26  ;;  %vm3527_vm5 = vmor %vm3525_vm3, %vm3526_vm2  ;;  %vm3535_vm7 = vweird.f32 %v3498_v26 }
0x1107   :  { %v3521_v15 = vmul.f32 %v4684_v58, %v3520_v25 }
0x1109   :  { %v3522_v23 = vmul.f32 0.5, %v3521_v15 }
0x110b   :  { %v3523_v63 = vsub.f32 1.5, %v3522_v23 }
0x110c   :  { %v4686_v59 = vpop.eup %4685 }
0x110d   :  { %v3524_v32 = vmul.f32 %v4684_v58, %v3523_v63  ;;  %v3530_v61 = vmul.f32 %v4686_v59, %v3498_v26  ;;  %vm3536_vm6 = vweird.f32 %v4686_v59 }
0x110e   :  { %vm3537_vm8 = vmor %vm3535_vm7, %vm3536_vm6 }
0x110f   :  { %v3528_v33 = vsel %vm3527_vm5, %v4684_v58, %v3524_v32  ;;  %v3531_v41 = vmul.f32 %v4686_v59, %v3530_v61 }
0x1110   :  { %v3541_v50 = vmul.f32 %v3528_v33, %v6064_v6 }
0x1111   :  { %v3532_v42 = vmul.f32 0.5, %v3531_v41 }
0x1112   :  { %v3548_v24 = vmul.f32 %v4523_v36, %v3541_v50 }
0x1113   :  { %v3533_v16 = vsub.f32 1.5, %v3532_v42 }
0x1114   :  { %v3555_v20 = vadd.f32 %v4524_v56, %v3548_v24 }
0x1115   :  { %v3534_v17 = vmul.f32 %v4686_v59, %v3533_v16 }
0x1116   :  { %3559 = vst [vmem:[%s6115_s18 + $0x10] sm:$0xff] %v3555_v20 }
0x1117   :  { %v3538_v1 = vsel %vm3537_vm8, %v4686_v59, %v3534_v17 }
0x1118   :  { %v3542_v57 = vmul.f32 %v3538_v1, %v6069_v13 }
0x111a   :  { %v3549_v44 = vmul.f32 %v4523_v36, %v3542_v57 }
0x111c   :  { %v3556_v53 = vadd.f32 %v4524_v56, %v3549_v44 }
0x111e   :  { %3560 = vst [vmem:[%s6115_s18 + $0x18] sm:$0xff] %v3556_v53 }
0x111f   :  { %3565 = vsyncpa [#allocation3], 1 }
0x1120   :  { %3566 = vsyncpa [#allocation5], 1 }

// kernel: _lambda_.3
= control target key start
LH: loop header
LB: loop body
LE: loop exit
PB: predicated region body
PF: predicated region fallthrough
CT: control target
= control target key end

     0   :  { %s8568_s6 = smov 1   ;;  %s8569_s10 = smov 2   ;;  %s10484_s0 = inlined_call_operand.smem [shape: u32[33], index: -1, kind: input, shape index: {}] }
   0x1   :  { %s8624_s5 = sld [smem:[%s10484_s0]]   ;;  %s8570_s14 = smov 3  }
   0x2   :  { %s8629_s9 = sld [smem:[%s10484_s0 + %s8568_s6]]   ;;  %s8571_s18 = smov 4  }
   0x3   :  { %s8634_s13 = sld [smem:[%s10484_s0 + %s8569_s10]]   ;;  %s8572_s22 = smov 5  }
   0x4   :  { %s8639_s17 = sld [smem:[%s10484_s0 + %s8570_s14]]   ;;  %s8573_s26 = smov 6  }
   0x5   :  { %s8644_s21 = sld [smem:[%s10484_s0 + %s8571_s18]]   ;;  %s8574_s30 = smov 7  }
   0x6   :  { %s8649_s25 = sld [smem:[%s10484_s0 + %s8572_s22]]   ;;  %s8575_s4 = smov 8  }
   0x7   :  { %s8654_s29 = sld [smem:[%s10484_s0 + %s8573_s26]]   ;;  %s8576_s10 = smov 9  }
   0x8   :  { %10500 = sst [smem:[#allocation23_spill]] %s8629_s9  ;;  %s8577_s15 = smov 10  }
   0x9   :  { %s8659_s3 = sld [smem:[%s10484_s0 + %s8574_s30]]   ;;  %s8578_s20 = smov 11  }
   0xa   :  { %10501 = sst [smem:[#allocation24_spill]] %s8639_s17  ;;  %s8579_s26 = smov 12  }
   0xb   :  { %s8664_s8 = sld [smem:[%s10484_s0 + %s8575_s4]]   ;;  %s8580_s1 = smov 13  }
   0xc   :  { %s8669_s14 = sld [smem:[%s10484_s0 + %s8576_s10]]   ;;  %s8581_s7 = smov 14  }
   0xd   :  { %s8674_s19 = sld [smem:[%s10484_s0 + %s8577_s15]]   ;;  %s8582_s15 = smov 15  }
   0xe   :  { %s8679_s24 = sld [smem:[%s10484_s0 + %s8578_s20]]   ;;  %s8583_s22 = smov 16  }
   0xf   :  { %s8684_s30 = sld [smem:[%s10484_s0 + %s8579_s26]]   ;;  %s8584_s28 = smov 17  }
  0x10   :  { %s8689_s6 = sld [smem:[%s10484_s0 + %s8580_s1]]  }
  0x11   :  { %s8694_s12 = sld [smem:[%s10484_s0 + %s8581_s7]]   ;;  %s8585_s7 = smov 18  }
  0x12   :  { %s8699_s20 = sld [smem:[%s10484_s0 + %s8582_s15]]   ;;  %s8586_s15 = smov 19  }
  0x13   :  { %s8704_s27 = sld [smem:[%s10484_s0 + %s8583_s22]]   ;;  %s8587_s22 = smov 20  }
  0x14   :  { %s8709_s4 = sld [smem:[%s10484_s0 + %s8584_s28]]   ;;  %s8588_s28 = smov 21  }
  0x15   :  { %10502 = sst [smem:[#allocation25_spill]] %s8684_s30 }
  0x16   :  { %10503 = sst [smem:[#allocation26_spill]] %s8689_s6 }
  0x17   :  { %s8714_s17 = sld [smem:[%s10484_s0 + %s8585_s7]]   ;;  %s8589_s7 = smov 22  }
  0x18   :  { %10504 = sst [smem:[#allocation27_spill]] %s8699_s20 }
  0x19   :  { %s8719_s20 = sld [smem:[%s10484_s0 + %s8586_s15]]   ;;  %s8590_s15 = smov 23  }
  0x1a   :  { %10505 = sst [smem:[#allocation28_spill]] %s8709_s4 }
  0x1b   :  { %s8724_s6 = sld [smem:[%s10484_s0 + %s8587_s22]]   ;;  %s8591_s22 = smov 24  }
  0x1c   :  { %s8729_s4 = sld [smem:[%s10484_s0 + %s8588_s28]]   ;;  %s8592_s28 = smov 25  }
  0x1d   :  { %s8734_s30 = sld [smem:[%s10484_s0 + %s8589_s7]]   ;;  %s8593_s7 = smov 26  }
  0x1e   :  { %s8744_s9 = sld [smem:[%s10484_s0 + %s8591_s22]]   ;;  %s8595_s22 = smov 28  }
  0x1f   :  { %10506 = sst [smem:[#allocation29_spill]] %s8719_s20 }
  0x20   :  { %s8739_s20 = sld [smem:[%s10484_s0 + %s8590_s15]]   ;;  %s8594_s15 = smov 27  }
  0x22   :  { %10507 = sst [smem:[#allocation30_spill]] %s8729_s4 }
  0x23   :  { %10508 = sst [smem:[#allocation31_spill]] %s8734_s30 }
  0x24   :  { %10510 = sst [smem:[#allocation33_spill]] %s8744_s9 }
  0x25   :  { %s8749_s4 = sld [smem:[%s10484_s0 + %s8592_s28]]   ;;  %s8596_s28 = smov 29  }
  0x26   :  { %10509 = sst [smem:[#allocation32_spill]] %s8739_s20 }
  0x27   :  { %s8754_s30 = sld [smem:[%s10484_s0 + %s8593_s7]]   ;;  %s8597_s7 = smov 30  }
  0x28   :  { %s8759_s20 = sld [smem:[%s10484_s0 + %s8594_s15]]   ;;  %s8598_s15 = smov 31  }
  0x29   :  { %s8764_s9 = sld [smem:[%s10484_s0 + %s8595_s22]]   ;;  %s8599_s22 = smov 32  }
  0x2b   :  { %10511 = sst [smem:[#allocation34_spill]] %s8749_s4 }
  0x2c   :  { %s8769_s4 = sld [smem:[%s10484_s0 + %s8596_s28]]  }
  0x2d   :  { %10512 = sst [smem:[#allocation35_spill]] %s8754_s30 }
  0x2e   :  { %10513 = sst [smem:[#allocation36_spill]] %s8759_s20 }
  0x2f   :  { %10514 = sst [smem:[#allocation37_spill]] %s8764_s9 }
  0x30   :  { %s8774_s30 = sld [smem:[%s10484_s0 + %s8597_s7]]  }
  0x31   :  { %s8779_s20 = sld [smem:[%s10484_s0 + %s8598_s15]]  }
  0x32   :  { %s8784_s9 = sld [smem:[%s10484_s0 + %s8599_s22]]  }
  0x33   :  { %70 = vsyncpa [#allocation3], 0 }
  0x34   :  { %71 = vsyncpa [#allocation6], 0 }
  0x35   :  { %72 = vsyncpa [#allocation9], 0 }
  0x36   :  { %73 = vsyncpa [#allocation12], 0 }
  0x37   :  { %74 = vsyncpa [#allocation15], 0 }
  0x38   :  { %75 = vsyncpa [#allocation4], 0  ;;  %s103_s28 = sshll.u32 %s8654_s29, 4  ;;  %s8600_s1 = smov [#allocation5]   ;;  %s104_s28 = int_to_ptr.hbm [resolvable:$true] %s103_s28 }
  0x39   :  { %s105_s2 = sshll.u32 %s8600_s1, 4  ;;  %s133_s7 = sshll.u32 %s8674_s19, 4  ;;  %s106_s2 = int_to_ptr.vmem [resolvable:$true] %s105_s2  ;;  %s134_s7 = int_to_ptr.hbm [resolvable:$true] %s133_s7 }
  0x3a   :  { %s8340_s10 = sshra.s32 %s104_s28, 4  ;;  %s8344_s11 = scalar_lea.hbm %s8654_s29, 128  ;;  %s8341_s10 = int_to_ptr.hbm [resolvable:$true] %s8340_s10 }
  0x3b   :  { %s8342_s0 = scalar_lea.hbm %s8341_s10, 128  ;;  %p8345_p1 = scmp.lt.s32.totalorder %s8341_s10, %s8654_s29 }
  0x3c   :  { %p8343_p0 = scmp.ne.s32.totalorder %s8341_s10, %s8342_s0  ;;  %p8346_p2 = scmp.lt.s32.totalorder %s8344_s11, %s8342_s0 }
  0x3e   :  { %p8347_p3 = por %p8346_p2, %p8345_p1 }
  0x40   :  { %p8348_p4 = pnand %p8347_p3, %p8343_p0 }
  0x42   :  { %8351 = shalt.err (!%p8348_p4)
}
  0x43   :  { %s8601_s15 = smov 64   ;;  %s8602_s16 = smov 4  }
  0x44   :  { %111 = dma.hbm_to_vmem [thread:$0]  %s104_s28, 2048, %s106_s2, [#allocation6], %s8601_s15, %s8601_s15, %s8602_s16  }
  0x45   :  { %s8603_s18 = smov [#allocation8]   ;;  %s167_s23 = sshll.u32 %s8704_s27, 4  ;;  %s8794_s23 = int_to_ptr.hbm [resolvable:$true] %s167_s23 }
  0x46   :  { %s135_s22 = sshll.u32 %s8603_s18, 4  ;;  %s8364_s29 = sshra.s32 %s134_s7, 4  ;;  %s136_s22 = int_to_ptr.vmem [resolvable:$true] %s135_s22  ;;  %s8365_s29 = int_to_ptr.hbm [resolvable:$true] %s8364_s29 }
  0x47   :  { %s8366_s26 = scalar_lea.hbm %s8365_s29, 128  ;;  %s8368_s1 = scalar_lea.hbm %s8674_s19, 128 }
  0x48   :  { %p8367_p5 = scmp.ne.s32.totalorder %s8365_s29, %s8366_s26  ;;  %p8369_p6 = scmp.lt.s32.totalorder %s8365_s29, %s8674_s19 }
  0x49   :  { %p8370_p7 = scmp.lt.s32.totalorder %s8368_s1, %s8366_s26 }
  0x4b   :  { %p8371_p8 = por %p8370_p7, %p8369_p6 }
  0x4d   :  { %p8372_p9 = pnand %p8371_p8, %p8367_p5 }
  0x4f   :  { %8375 = shalt.err (!%p8372_p9)
}
  0x50   :  { %141 = dma.hbm_to_vmem [thread:$0]  %s134_s7, 2048, %s136_s22, [#allocation9], %s8601_s15, %s8601_s15, %s8602_s16  }
  0x51   :  { %s88_s28 = sshll.u32 %s8644_s21, 4  ;;  %s8604_s2 = smov [#allocation11]   ;;  %s8802_s28 = int_to_ptr.hbm [resolvable:$true] %s88_s28 }
  0x52   :  { %s169_s10 = sshll.u32 %s8604_s2, 4  ;;  %s8388_s0 = sshra.s32 %s8794_s23, 4  ;;  %s170_s10 = int_to_ptr.vmem [resolvable:$true] %s169_s10  ;;  %s8389_s0 = int_to_ptr.hbm [resolvable:$true] %s8388_s0 }
  0x53   :  { %s8390_s19 = scalar_lea.hbm %s8389_s0, 128  ;;  %s8392_s11 = scalar_lea.hbm %s8704_s27, 128 }
  0x54   :  { %p8391_p10 = scmp.ne.s32.totalorder %s8389_s0, %s8390_s19  ;;  %p8393_p11 = scmp.lt.s32.totalorder %s8389_s0, %s8704_s27 }
  0x55   :  { %p8394_p12 = scmp.lt.s32.totalorder %s8392_s11, %s8390_s19 }
  0x57   :  { %p8395_p13 = por %p8394_p12, %p8393_p11 }
  0x59   :  { %p8396_p0 = pnand %p8395_p13, %p8391_p10 }
  0x5b   :  { %8399 = shalt.err (!%p8396_p0)
}
  0x5c   :  { %175 = dma.hbm_to_vmem [thread:$0]  %s8794_s23, 2048, %s170_s10, [#allocation12], %s8601_s15, %s8601_s15, %s8602_s16  }
  0x5d   :  { %s8605_s7 = smov [#allocation2]   ;;  %s118_s22 = sshll.u32 %s8664_s8, 4  ;;  %s8812_s22 = int_to_ptr.hbm [resolvable:$true] %s118_s22 }
  0x5e   :  { %s90_s18 = sshll.u32 %s8605_s7, 4  ;;  %s8412_s27 = sshra.s32 %s8802_s28, 4  ;;  %s91_s18 = int_to_ptr.vmem [resolvable:$true] %s90_s18  ;;  %s8413_s27 = int_to_ptr.hbm [resolvable:$true] %s8412_s27 }
  0x5f   :  { %s8414_s29 = scalar_lea.hbm %s8413_s27, 128  ;;  %s8416_s26 = scalar_lea.hbm %s8644_s21, 128 }
  0x60   :  { %p8415_p1 = scmp.ne.s32.totalorder %s8413_s27, %s8414_s29  ;;  %p8417_p2 = scmp.lt.s32.totalorder %s8413_s27, %s8644_s21 }
  0x61   :  { %p8418_p3 = scmp.lt.s32.totalorder %s8416_s26, %s8414_s29 }
  0x63   :  { %p8419_p4 = por %p8418_p3, %p8417_p2 }
  0x65   :  { %p8420_p5 = pnand %p8419_p4, %p8415_p1 }
  0x67   :  { %8423 = shalt.err (!%p8420_p5)
}
  0x68   :  { %96 = dma.hbm_to_vmem [thread:$0]  %s8802_s28, 2048, %s91_s18, [#allocation3], %s8601_s15, %s8601_s15, %s8602_s16  }
  0x69   :  { %s152_s23 = sshll.u32 %s8694_s12, 4  ;;  %s8606_s1 = smov [#allocation7]   ;;  %s8822_s23 = int_to_ptr.hbm [resolvable:$true] %s152_s23 }
  0x6a   :  { %s120_s2 = sshll.u32 %s8606_s1, 4  ;;  %s8436_s21 = sshra.s32 %s8812_s22, 4  ;;  %s121_s2 = int_to_ptr.vmem [resolvable:$true] %s120_s2  ;;  %s8437_s21 = int_to_ptr.hbm [resolvable:$true] %s8436_s21 }
  0x6b   :  { %s8438_s10 = scalar_lea.hbm %s8437_s21, 128  ;;  %s8440_s0 = scalar_lea.hbm %s8664_s8, 128 }
  0x6c   :  { %p8439_p6 = scmp.ne.s32.totalorder %s8437_s21, %s8438_s10  ;;  %p8441_p7 = scmp.lt.s32.totalorder %s8437_s21, %s8664_s8 }
  0x6d   :  { %p8442_p8 = scmp.lt.s32.totalorder %s8440_s0, %s8438_s10 }
  0x6f   :  { %p8443_p9 = por %p8442_p8, %p8441_p7 }
  0x71   :  { %p8444_p10 = pnand %p8443_p9, %p8439_p6 }
  0x73   :  { %8447 = shalt.err (!%p8444_p10)
}
  0x74   :  { %126 = dma.hbm_to_vmem [thread:$0]  %s8812_s22, 2048, %s121_s2, [#allocation6], %s8601_s15, %s8601_s15, %s8602_s16  }
  0x75   :  { %s8607_s28 = smov [#allocation10]   ;;  %s182_s11 = sshll.u32 %s8714_s17, 4  ;;  %s8832_s11 = int_to_ptr.hbm [resolvable:$true] %s182_s11 }
  0x76   :  { %s154_s19 = sshll.u32 %s8607_s28, 4  ;;  %s8460_s8 = sshra.s32 %s8822_s23, 4  ;;  %s155_s19 = int_to_ptr.vmem [resolvable:$true] %s154_s19  ;;  %s8461_s8 = int_to_ptr.hbm [resolvable:$true] %s8460_s8 }
  0x77   :  { %s8462_s7 = scalar_lea.hbm %s8461_s8, 128  ;;  %s8464_s18 = scalar_lea.hbm %s8694_s12, 128 }
  0x78   :  { %p8463_p11 = scmp.ne.s32.totalorder %s8461_s8, %s8462_s7  ;;  %p8465_p12 = scmp.lt.s32.totalorder %s8461_s8, %s8694_s12 }
  0x79   :  { %p8466_p13 = scmp.lt.s32.totalorder %s8464_s18, %s8462_s7 }
  0x7b   :  { %p8467_p0 = por %p8466_p13, %p8465_p12 }
  0x7d   :  { %p8468_p1 = pnand %p8467_p0, %p8463_p11 }
  0x7f   :  { %8471 = shalt.err (!%p8468_p1)
}
  0x80   :  { %160 = dma.hbm_to_vmem [thread:$0]  %s8822_s23, 2048, %s155_s19, [#allocation9], %s8601_s15, %s8601_s15, %s8602_s16  }
  0x81   :  { %s197_s22 = sshll.u32 %s8724_s6, 4  ;;  %s8608_s27 = smov [#allocation13]   ;;  %s8842_s22 = int_to_ptr.hbm [resolvable:$true] %s197_s22 }
  0x82   :  { %s184_s29 = sshll.u32 %s8608_s27, 4  ;;  %s8484_s12 = sshra.s32 %s8832_s11, 4  ;;  %s185_s29 = int_to_ptr.vmem [resolvable:$true] %s184_s29  ;;  %s8485_s12 = int_to_ptr.hbm [resolvable:$true] %s8484_s12 }
  0x83   :  { %s8486_s26 = scalar_lea.hbm %s8485_s12, 128  ;;  %s8488_s1 = scalar_lea.hbm %s8714_s17, 128 }
  0x84   :  { %p8487_p2 = scmp.ne.s32.totalorder %s8485_s12, %s8486_s26  ;;  %p8489_p3 = scmp.lt.s32.totalorder %s8485_s12, %s8714_s17 }
  0x85   :  { %p8490_p4 = scmp.lt.s32.totalorder %s8488_s1, %s8486_s26 }
  0x87   :  { %p8491_p5 = por %p8490_p4, %p8489_p3 }
  0x89   :  { %p8492_p6 = pnand %p8491_p5, %p8487_p2 }
  0x8b   :  { %8495 = shalt.err (!%p8492_p6)
}
  0x8c   :  { %190 = dma.hbm_to_vmem [thread:$0]  %s8832_s11, 2048, %s185_s29, [#allocation12], %s8601_s15, %s8601_s15, %s8602_s16  }
  0x8d   :  { %s8609_s23 = smov [#allocation14]   ;;  %s8508_s21 = sshra.s32 %s8842_s22, 4  ;;  %s8509_s21 = int_to_ptr.hbm [resolvable:$true] %s8508_s21 }
  0x8e   :  { %s199_s2 = sshll.u32 %s8609_s23, 4  ;;  %s8510_s10 = scalar_lea.hbm %s8509_s21, 128  ;;  %s200_s2 = int_to_ptr.vmem [resolvable:$true] %s199_s2 }
  0x8f   :  { %p8511_p7 = scmp.ne.s32.totalorder %s8509_s21, %s8510_s10  ;;  %s8512_s17 = scalar_lea.hbm %s8724_s6, 128 }
  0x90   :  { %p8513_p8 = scmp.lt.s32.totalorder %s8509_s21, %s8724_s6  ;;  %p8514_p9 = scmp.lt.s32.totalorder %s8512_s17, %s8510_s10 }
  0x92   :  { %p8515_p10 = por %p8514_p9, %p8513_p8 }
  0x94   :  { %p8516_p11 = pnand %p8515_p10, %p8511_p7 }
  0x96   :  { %8519 = shalt.err (!%p8516_p11)
}
  0x97   :  { %205 = dma.hbm_to_vmem [thread:$0]  %s8842_s22, 2048, %s200_s2, [#allocation15], %s8601_s15, %s8601_s15, %s8602_s16  }
  0x98   :  { %8556 = dma.done.wait [#allocation3], 2048  }
  0x99   :  { %8557 = vsyncadd [#allocation3], 4294965248 }
  0x9a   :  { %8558 = dma.done.wait [#allocation6], 4096  }
  0x9b   :  { %8559 = vsyncadd [#allocation6], 4294963200 }
  0x9c   :  { %8560 = dma.done.wait [#allocation9], 4096  }
  0x9d   :  { %8561 = vsyncadd [#allocation9], 4294963200 }
  0x9e   :  { %8562 = dma.done.wait [#allocation12], 4096  }
  0x9f   :  { %8563 = vsyncadd [#allocation12], 4294963200 }
  0xa0   :  { %8564 = dma.done.wait [#allocation15], 2048  }
  0xa1   :  { %8565 = vsyncadd [#allocation15], 4294965248  ;;  %v7510_v0 = vld [vmem:[#allocation2 + $0x38] sm:$0xff]  ;;  %v7509_v2 = vld [vmem:[#allocation2 + $0x30] sm:$0xff]  ;;  %s8610_s6 = smov 96   ;;  %vm560_vm0 = vcmask 261120  }
  0xa2   :  { %v7518_v1 = vld [vmem:[#allocation5 + $0x38] sm:$0xff]  ;;  %397 = vmatpush.bf16.msra.mxu0 %v7510_v0  ;;  %v7517_v3 = vld [vmem:[#allocation5 + $0x30] sm:$0xff]  ;;  %v7508_v4 = vld [vmem:[#allocation2 + $0x28] sm:$0xff]  ;;  %vm631_vm1 = vcmask 130048   ;;  %s8611_s16 = smov 32   ;;  %vm1382_vm2 = vcmask 523264  }
  0xa3   :  { %467 = vmatpush.bf16.msra.mxu1 %v7518_v1  ;;  %v7516_v5 = vld [vmem:[#allocation5 + $0x28] sm:$0xff]  ;;  %v7507_v6 = vld [vmem:[#allocation2 + $0x20] sm:$0xff]  ;;  %v7506_v8 = vld [vmem:[#allocation2 + $0x18] sm:$0xff]  ;;  %vm1387_vm3 = vcmask 785408   ;;  %s10516_s0 = sld [smem:[#allocation25_spill]] }
  0xa4   :  { %v7515_v7 = vld [vmem:[#allocation5 + $0x20] sm:$0xff]  ;;  %v7514_v9 = vld [vmem:[#allocation5 + $0x18] sm:$0xff]  ;;  %v7505_v10 = vld [vmem:[#allocation2 + $0x10] sm:$0xff]  ;;  %s10517_s28 = sld [smem:[#allocation26_spill]] }
  0xa5   :  { %v7513_v11 = vld [vmem:[#allocation5 + $0x10] sm:$0xff]  ;;  %v7504_v12 = vld [vmem:[#allocation2 + $0x8] sm:$0xff]  ;;  %v7503_v14 = vld [vmem:[#allocation2] sm:$0xff]  ;;  %s10518_s19 = sld [smem:[#allocation28_spill]] }
  0xa6   :  { %398 = vmatpush.bf16.msra.mxu0 %v7509_v2  ;;  %v7512_v13 = vld [vmem:[#allocation5 + $0x8] sm:$0xff]  ;;  %v7511_v15 = vld [vmem:[#allocation5] sm:$0xff]  ;;  %v262_v19 = vld [vmem:[%s8624_s5 + $0x10] sm:$0xff]  ;;  %s10519_s11 = sld [smem:[#allocation27_spill]] }
  0xa7   :  { %468 = vmatpush.bf16.msra.mxu1 %v7517_v3  ;;  %v260_v16 = vld [vmem:[%s8624_s5] sm:$0xff]  ;;  %v261_v17 = vld [vmem:[%s8624_s5 + $0x8] sm:$0xff]  ;;  %v263_v20 = vld [vmem:[%s8624_s5 + $0x18] sm:$0xff]  ;;  %s10520_s8 = sld [smem:[#allocation24_spill]] }
  0xa8   :  { %v8860_v18 = vpack.c.bf16 %v261_v17, %v260_v16  ;;  %v8866_v21 = vpack.c.bf16 %v263_v20, %v262_v19  ;;  %v7992_v22 = vld [vmem:[%s8659_s3] ss:$0 sm:$0xff]  ;;  %v8918_v48 = vld [vmem:[%s8634_s13 + $0x8] sm:$0xff]  ;;  %v8923_v52 = vld [vmem:[%s8634_s13 + $0x10] sm:$0xff]  ;;  %s10521_s7 = sld [smem:[#allocation29_spill]] }
  0xa9   :  { %v7991_v26 = vld [vmem:[%s8649_s25] ss:$0 sm:$0xff]  ;;  %v8928_v56 = vld [vmem:[%s8634_s13 + $0x18] sm:$0xff]  ;;  %v7525_v61 = vld [vmem:[#allocation7 + $0x30] sm:$0xff]  ;;  %s10522_s18 = sld [smem:[#allocation30_spill]] }
  0xaa   :  { %399 = vmatpush.bf16.msra.mxu0 %v7508_v4  ;;  %v8913_v44 = vld [vmem:[%s8634_s13] sm:$0xff]  ;;  %v7526_v60 = vld [vmem:[#allocation7 + $0x38] sm:$0xff]  ;;  %v7524_v62 = vld [vmem:[#allocation7 + $0x28] sm:$0xff]  ;;  %s10523_s22 = sld [smem:[#allocation33_spill]] }
  0xab   :  { %469 = vmatpush.bf16.msra.mxu1 %v7516_v5  ;;  %537 = vmatpush.bf16.msra.mxu2 %v7526_v60  ;;  %v7523_v63 = vld [vmem:[#allocation7 + $0x20] sm:$0xff]  ;;  %v7522_v0 = vld [vmem:[#allocation7 + $0x18] sm:$0xff]  ;;  %v7521_v1 = vld [vmem:[#allocation7 + $0x10] sm:$0xff]  ;;  %s10524_s27 = sld [smem:[#allocation31_spill]] }
  0xac   :  { %v7520_v2 = vld [vmem:[#allocation7 + $0x8] sm:$0xff]  ;;  %v7519_v3 = vld [vmem:[#allocation7] sm:$0xff]  ;;  %s10525_s29 = sld [smem:[#allocation32_spill]] }
  0xad   :  { %s10526_s12 = sld [smem:[#allocation35_spill]] }
  0xae   :  { %400 = vmatpush.bf16.msra.mxu0 %v7507_v6  ;;  %s10527_s26 = sld [smem:[#allocation34_spill]] }
  0xaf   :  { %470 = vmatpush.bf16.msra.mxu1 %v7515_v7  ;;  %538 = vmatpush.bf16.msra.mxu2 %v7525_v61  ;;  %s10528_s1 = sld [smem:[#allocation36_spill]] }
  0xb0   :  { %s10529_s23 = sld [smem:[#allocation37_spill]] }
  0xb2   :  { %401 = vmatpush.bf16.msra.mxu0 %v7506_v8 }
  0xb3   :  { %471 = vmatpush.bf16.msra.mxu1 %v7514_v9  ;;  %539 = vmatpush.bf16.msra.mxu2 %v7524_v62 }
  0xb6   :  { %402 = vmatpush.bf16.msra.mxu0 %v7505_v10 }
  0xb7   :  { %472 = vmatpush.bf16.msra.mxu1 %v7513_v11  ;;  %540 = vmatpush.bf16.msra.mxu2 %v7523_v63 }
  0xba   :  { %403 = vmatpush.bf16.msra.mxu0 %v7504_v12 }
  0xbb   :  { %473 = vmatpush.bf16.msra.mxu1 %v7512_v13  ;;  %541 = vmatpush.bf16.msra.mxu2 %v7522_v0 }
  0xbe   :  { %404 = vmatpush.bf16.msra.mxu0 %v7503_v14 }
  0xbf   :  { %474 = vmatpush.bf16.msra.mxu1 %v7511_v15  ;;  %542 = vmatpush.bf16.msra.mxu2 %v7521_v1 }
  0xc1   :  { %405 = vmatmul.bf16.vlgmr.msra.gmra.mxu0 %v8860_v18 }
  0xc2   :  { %475 = vmatmul.bf16.vlgmr.msra.gmra.mxu1 %v8860_v18 }
  0xc3   :  { %543 = vmatpush.bf16.msra.mxu2 %v7520_v2 }
  0xc7   :  { %544 = vmatpush.bf16.msra.mxu2 %v7519_v3 }
  0xca   :  { %545 = vmatmul.bf16.vlgmr.msra.gmra.mxu2 %v8860_v18 }
  0xd1   :  { %410 = vmatmul.bf16.gmra.mxu0 %v8866_v21 }
  0xd2   :  { %480 = vmatmul.bf16.gmra.mxu1 %v8866_v21 }
  0xda   :  { %550 = vmatmul.bf16.gmra.mxu2 %v8866_v21 }
 0x13e   :  { %v406_v23 = vpop.f32.mrf.mxu0 }
 0x13f   :  { %v476_v24 = vpop.f32.mrf.mxu1  ;;  %v407_v31 = vadd.f32 %v7991_v26, %v406_v23 }
 0x140   :  { %v8871_v25 = vadd.f32 %v7992_v22, %v476_v24 }
 0x141   :  { %v8884_v33 = vmul.f32 0.17677669, %v407_v31 }
 0x142   :  { %742 = vrot.lane.b32.xlu2 %v8871_v25, %s8610_s6 }
 0x146   :  { %v408_v27 = vpop.f32.mrf.mxu0 }
 0x147   :  { %v478_v28 = vpop.f32.mrf.mxu1  ;;  %v409_v29 = vadd.f32 %v7991_v26, %v408_v27 }
 0x148   :  { %v8876_v30 = vadd.f32 %v7992_v22, %v478_v28 }
 0x149   :  { %v8878_v32 = vmul.f32 0.17677669, %v409_v29 }
 0x14a   :  { %6543 = vmatpush.xpose.msk.msra.mxu3 %vm560_vm0, %v8876_v30 }
 0x14b   :  { %740 = vrot.lane.b32.xlu2 %v8878_v32, %s8610_s6 }
 0x14e   :  { %6544 = vmatpush.xpose.msk.msra.mxu3 %vm560_vm0, %v8871_v25  ;;  %v411_v36 = vpop.f32.mrf.mxu0 }
 0x14f   :  { %v481_v34 = vpop.f32.mrf.mxu1  ;;  %v412_v39 = vadd.f32 %v7991_v26, %v411_v36 }
 0x150   :  { %v8888_v35 = vadd.f32 %v7992_v22, %v481_v34 }
 0x151   :  { %6545 = vmatmul.msk.f32.vlgmr.msra.gmra.mxu3 %vm560_vm0, %v8884_v33  ;;  %v8902_v40 = vmul.f32 0.17677669, %v412_v39 }
 0x153   :  { %781 = vrot.lane.b32.xlu2 %v8888_v35, %s8610_s6 }
 0x156   :  { %v413_v41 = vpop.f32.mrf.mxu0 }
 0x157   :  { %v483_v37 = vpop.f32.mrf.mxu1  ;;  %v414_v42 = vadd.f32 %v7991_v26, %v413_v41 }
 0x158   :  { %v8894_v38 = vadd.f32 %v7992_v22, %v483_v37 }
 0x159   :  { %6546 = vmatmul.msk.f32.gmra.mxu3 %vm560_vm0, %v8878_v32  ;;  %v8908_v43 = vmul.f32 0.17677669, %v414_v42 }
 0x15a   :  { %6547 = vmatpush.xpose.msk.msrb.mxu3 %vm560_vm0, %v8894_v38 }
 0x15b   :  { %942 = vrot.lane.b32.xlu2 %v8871_v25, %s8601_s15 }
 0x15e   :  { %6548 = vmatpush.xpose.msk.msrb.mxu3 %vm560_vm0, %v8888_v35 }
 0x161   :  { %6549 = vmatmul.msk.f32.vlgmr.msrb.gmra.mxu3 %vm560_vm0, %v8902_v40 }
 0x169   :  { %6550 = vmatmul.msk.f32.gmra.mxu3 %vm560_vm0, %v8908_v43 }
 0x19c   :  { %v743_v29 = vpop.permute.xlu2 %742 }
 0x1d4   :  { %v590_v45 = vpop.f32.mrf.mxu3 }
 0x1d5   :  { %v591_v46 = vadd.f32 %v590_v45, %v8913_v44 }
 0x1d7   :  { %v632_v47 = vsel %vm631_vm1, %v591_v46, -inf }
 0x1d8   :  { %633 = vmax.xlane.f32.xlu0 %v632_v47 }
 0x1dc   :  { %v593_v49 = vpop.f32.mrf.mxu3 }
 0x1dd   :  { %v594_v50 = vadd.f32 %v593_v49, %v8918_v48 }
 0x1df   :  { %v635_v51 = vsel %vm631_vm1, %v594_v50, -inf }
 0x1e0   :  { %636 = vmax.xlane.f32.xlu0 %v635_v51 }
 0x1e4   :  { %v625_v53 = vpop.f32.mrf.mxu3 }
 0x1e5   :  { %v626_v54 = vadd.f32 %v625_v53, %v8923_v52 }
 0x1e7   :  { %v638_v55 = vsel %vm631_vm1, %v626_v54, -inf }
 0x1e8   :  { %639 = vmax.xlane.f32.xlu1 %v638_v55 }
 0x1ec   :  { %v628_v57 = vpop.f32.mrf.mxu3 }
 0x1ed   :  { %v629_v58 = vadd.f32 %v628_v57, %v8928_v56 }
 0x1ef   :  { %v641_v59 = vsel %vm631_vm1, %v629_v58, -inf }
 0x1f0   :  { %642 = vmax.xlane.f32.xlu1 %v641_v59 }
 0x1f4   :  { %738 = vrot.lane.b32.xlu0 %v8884_v33, %s8610_s6 }
 0x1fc   :  { %777 = vrot.lane.b32.xlu0 %v8902_v40, %s8610_s6 }
 0x204   :  { %779 = vrot.lane.b32.xlu0 %v8908_v43, %s8610_s6 }
 0x209   :  { %744 = vrot.lane.b32.xlu1 %v8876_v30, %s8610_s6 }
 0x20c   :  { %1140 = vrot.lane.b32.xlu0 %v8876_v30, %s8611_s16 }
 0x211   :  { %783 = vrot.lane.b32.xlu1 %v8894_v38, %s8610_s6 }
 0x219   :  { %944 = vrot.lane.b32.xlu1 %v8876_v30, %s8601_s15  ;;  %v741_v30 = vpop.permute.xlu2 %740 }
 0x221   :  { %938 = vrot.lane.b32.xlu1 %v8884_v33, %s8601_s15  ;;  %v782_v37 = vpop.permute.xlu2 %781 }
 0x229   :  { %983 = vrot.lane.b32.xlu1 %v8894_v38, %s8601_s15 }
 0x231   :  { %1138 = vrot.lane.b32.xlu1 %v8871_v25, %s8611_s16 }
 0x239   :  { %979 = vrot.lane.b32.xlu1 %v8908_v43, %s8601_s15 }
 0x241   :  { %1177 = vrot.lane.b32.xlu1 %v8888_v35, %s8611_s16 }
 0x24b   :  { %v634_v4 = vpop.xlane.xlu0 %633 }
 0x24c   :  { %v644_v5 = vmax.f32 %v634_v4, -1e+09 }
 0x24e   :  { %v648_v6 = vsub.f32 %v591_v46, %v644_v5  ;;  %v7993_v46 = vld [vmem:[%s8669_s14] ss:$0 sm:$0xff] }
 0x250   :  { %v652_v7 = vmul.f32 1.442695, %v648_v6 }
 0x252   :  { %8022 = vpow2.f32 %v652_v7 }
 0x253   :  { %v637_v8 = vpop.xlane.xlu0 %636 }
 0x254   :  { %v645_v9 = vmax.f32 %v637_v8, -1e+09 }
 0x256   :  { %v649_v10 = vsub.f32 %v594_v50, %v645_v9 }
 0x258   :  { %v8958_v11 = vpop.eup %8022  ;;  %v654_v12 = vmul.f32 1.442695, %v649_v10 }
 0x259   :  { %v660_v13 = vsel %vm631_vm1, %v8958_v11, 0.0 }
 0x25a   :  { %8024 = vpow2.f32 %v654_v12  ;;  %661 = vadd.xlane.f32.xlu2 %v660_v13 }
 0x25b   :  { %v640_v14 = vpop.xlane.xlu1 %639 }
 0x25c   :  { %v646_v15 = vmax.f32 %v640_v14, -1e+09 }
 0x25e   :  { %v650_v16 = vsub.f32 %v626_v54, %v646_v15 }
 0x260   :  { %v8962_v17 = vpop.eup %8024  ;;  %v656_v18 = vmul.f32 1.442695, %v650_v16 }
 0x261   :  { %v663_v19 = vsel %vm631_vm1, %v8962_v17, 0.0 }
 0x262   :  { %8026 = vpow2.f32 %v656_v18  ;;  %664 = vadd.xlane.f32.xlu2 %v663_v19 }
 0x263   :  { %v643_v20 = vpop.xlane.xlu1 %642 }
 0x264   :  { %v647_v21 = vmax.f32 %v643_v20, -1e+09 }
 0x266   :  { %v651_v22 = vsub.f32 %v629_v58, %v647_v21  ;;  %v739_v28 = vpop.permute.xlu0 %738 }
 0x268   :  { %v8966_v23 = vpop.eup %8026  ;;  %v658_v24 = vmul.f32 1.442695, %v651_v22 }
 0x269   :  { %v666_v25 = vsel %vm631_vm1, %v8966_v23, 0.0 }
 0x26a   :  { %8028 = vpow2.f32 %v658_v24  ;;  %667 = vadd.xlane.f32.xlu0 %v666_v25 }
 0x26e   :  { %v8976_v34 = vpop.permute.xlu0 %777 }
 0x270   :  { %v8970_v26 = vpop.eup %8028 }
 0x271   :  { %v669_v27 = vsel %vm631_vm1, %v8970_v26, 0.0 }
 0x272   :  { %670 = vadd.xlane.f32.xlu0 %v669_v27 }
 0x276   :  { %v8983_v39 = vpop.permute.xlu0 %779 }
 0x27a   :  { %940 = vrot.lane.b32.xlu2 %v8878_v32, %s8601_s15 }
 0x27b   :  { %v745_v31 = vpop.permute.xlu1 %744 }
 0x27c   :  { %6555 = vmatpush.xpose.msk.msrb.mxu2 %vm560_vm0, %v745_v31 }
 0x27e   :  { %v1141_v42 = vpop.permute.xlu0 %1140 }
 0x280   :  { %6556 = vmatpush.xpose.msk.msrb.mxu2 %vm560_vm0, %v743_v29 }
 0x282   :  { %981 = vrot.lane.b32.xlu2 %v8888_v35, %s8601_s15  ;;  %v943_v35 = vpop.permute.xlu2 %942 }
 0x283   :  { %v784_v36 = vpop.permute.xlu1 %783  ;;  %6557 = vmatmul.msk.f32.vlgmr.msrb.gmra.mxu2 %vm560_vm0, %v739_v28 }
 0x286   :  { %977 = vrot.lane.b32.xlu0 %v8902_v40, %s8601_s15 }
 0x28a   :  { %1134 = vrot.lane.b32.xlu2 %v8884_v33, %s8611_s16  ;;  %v546_v33 = vpop.f32.mrf.mxu2 }
 0x28b   :  { %v945_v41 = vpop.permute.xlu1 %944  ;;  %6558 = vmatmul.msk.f32.gmra.mxu2 %vm560_vm0, %v741_v30  ;;  %v9004_v49 = vadd.f32 %v7993_v46, %v546_v33 }
 0x28c   :  { %6567 = vmatpush.xpose.msk.msrb.mxu0 %vm560_vm0, %v945_v41 }
 0x28e   :  { %1136 = vrot.lane.b32.xlu0 %v8878_v32, %s8611_s16 }
 0x290   :  { %6568 = vmatpush.xpose.msk.msrb.mxu0 %vm560_vm0, %v943_v35 }
 0x292   :  { %1179 = vrot.lane.b32.xlu2 %v8894_v38, %s8611_s16  ;;  %v548_v47 = vpop.f32.mrf.mxu2 }
 0x293   :  { %v939_v45 = vpop.permute.xlu1 %938  ;;  %v9006_v50 = vadd.f32 %v7993_v46, %v548_v47 }
 0x294   :  { %6579 = vmatpush.xpose.msk.msra.mxu0 %vm560_vm0, %v1141_v42 }
 0x295   :  { %6569 = vmatmul.msk.f32.vlgmr.msrb.gmra.mxu0 %vm560_vm0, %v939_v45  ;;  %700 = vmatpush.msra.mxu3 %v9006_v50 }
 0x296   :  { %1173 = vrot.lane.b32.xlu0 %v8902_v40, %s8611_s16 }
 0x297   :  { %701 = vmatpush.msra.mxu3 %v9004_v49 }
 0x29a   :  { %1175 = vrot.lane.b32.xlu2 %v8908_v43, %s8611_s16  ;;  %v551_v40 = vpop.f32.mrf.mxu2 }
 0x29b   :  { %v984_v32 = vpop.permute.xlu1 %983  ;;  %v9011_v53 = vadd.f32 %v7993_v46, %v551_v40 }
 0x29c   :  { %6571 = vmatpush.xpose.msk.msrb.mxu1 %vm560_vm0, %v984_v32 }
 0x2a2   :  { %v553_v51 = vpop.f32.mrf.mxu2 }
 0x2a3   :  { %v1139_v38 = vpop.permute.xlu1 %1138  ;;  %v9013_v43 = vadd.f32 %v7993_v46, %v553_v51 }
 0x2a4   :  { %6580 = vmatpush.xpose.msk.msra.mxu0 %vm560_vm0, %v1139_v38 }
 0x2a5   :  { %729 = vmatpush.msrb.mxu3 %v9013_v43 }
 0x2a7   :  { %730 = vmatpush.msrb.mxu3 %v9011_v53 }
 0x2ab   :  { %v980_v6 = vpop.permute.xlu1 %979 }
 0x2b3   :  { %v1178_v9 = vpop.permute.xlu1 %1177 }
 0x2cd   :  { %v662_v54 = vpop.xlane.xlu2 %661 }
 0x2ce   :  { %8030 = vrcp.f32 %v662_v54 }
 0x2d4   :  { %v8031_v55 = vpop.eup %8030 }
 0x2d5   :  { %v676_v57 = vmul.f32 %v8031_v55, %v8958_v11  ;;  %v665_v58 = vpop.xlane.xlu2 %664 }
 0x2d6   :  { %8032 = vrcp.f32 %v665_v58 }
 0x2d7   :  { %6551 = vmatmul.msk.f32.vlgmr.msra.gmra.mxu3 %vm631_vm1, %v676_v57 }
 0x2d8   :  { %6559 = vmatpush.xpose.msk.msra.mxu3 %vm560_vm0, %v784_v36 }
 0x2dc   :  { %v8033_v59 = vpop.eup %8032  ;;  %6560 = vmatpush.xpose.msk.msra.mxu3 %vm560_vm0, %v782_v37 }
 0x2dd   :  { %v941_v60 = vpop.permute.xlu2 %940  ;;  %v668_v61 = vpop.xlane.xlu0 %667  ;;  %v677_v62 = vmul.f32 %v8033_v59, %v8962_v17 }
 0x2de   :  { %8034 = vrcp.f32 %v668_v61  ;;  %6570 = vmatmul.msk.f32.gmra.mxu0 %vm560_vm0, %v941_v60 }
 0x2df   :  { %6552 = vmatmul.msk.f32.gmra.mxu3 %vm631_vm1, %v677_v62 }
 0x2e4   :  { %v8035_v63 = vpop.eup %8034 }
 0x2e5   :  { %v678_v0 = vmul.f32 %v8035_v63, %v8966_v23  ;;  %v982_v1 = vpop.permute.xlu2 %981  ;;  %v671_v2 = vpop.xlane.xlu0 %670 }
 0x2e6   :  { %8036 = vrcp.f32 %v671_v2  ;;  %6572 = vmatpush.xpose.msk.msrb.mxu1 %vm560_vm0, %v982_v1 }
 0x2e7   :  { %6553 = vmatmul.msk.f32.vlgmr.msrb.gmra.mxu3 %vm631_vm1, %v678_v0 }
 0x2ec   :  { %v8037_v3 = vpop.eup %8036 }
 0x2ed   :  { %v1135_v4 = vpop.permute.xlu2 %1134  ;;  %v679_v5 = vmul.f32 %v8037_v3, %v8970_v26  ;;  %v9096_v3 = vpack.i.bf16 %v9004_v49, %v9006_v50  ;;  %v9110_v49 = vpack.i.bf16 %v9011_v53, %v9013_v43 }
 0x2ee   :  { %6581 = vmatmul.msk.f32.vlgmr.msra.gmra.mxu0 %vm560_vm0, %v1135_v4 }
 0x2ef   :  { %6554 = vmatmul.msk.f32.gmra.mxu3 %vm631_vm1, %v679_v5 }
 0x2f5   :  { %v1180_v7 = vpop.permute.xlu2 %1179 }
 0x2f6   :  { %6583 = vmatpush.xpose.msk.msra.mxu1 %vm560_vm0, %v1180_v7 }
 0x2f7   :  { %6561 = vmatmul.msk.f32.vlgmr.msra.gmra.mxu3 %vm560_vm0, %v8976_v34 }
 0x2f8   :  { %v978_v8 = vpop.permute.xlu0 %977 }
 0x2f9   :  { %6573 = vmatmul.msk.f32.vlgmr.msrb.gmra.mxu1 %vm560_vm0, %v978_v8 }
 0x2fa   :  { %6584 = vmatpush.xpose.msk.msra.mxu1 %vm560_vm0, %v1178_v9 }
 0x2fd   :  { %v1176_v17 = vpop.permute.xlu2 %1175 }
 0x2ff   :  { %6562 = vmatmul.msk.f32.gmra.mxu3 %vm560_vm0, %v8983_v39 }
 0x300   :  { %v1137_v10 = vpop.permute.xlu0 %1136 }
 0x301   :  { %6574 = vmatmul.msk.f32.gmra.mxu1 %vm560_vm0, %v980_v6  ;;  %6582 = vmatmul.msk.f32.gmra.mxu0 %vm560_vm0, %v1137_v10 }
 0x306   :  { %v771_v11 = vpop.f32.mrf.mxu2 }
 0x307   :  { %v772_v12 = vadd.f32 %v771_v11, %v8913_v44 }
 0x308   :  { %v1174_v13 = vpop.permute.xlu0 %1173 }
 0x309   :  { %6585 = vmatmul.msk.f32.vlgmr.msra.gmra.mxu1 %vm560_vm0, %v1174_v13  ;;  %v816_v14 = vsel %vm631_vm1, %v772_v12, -inf }
 0x30a   :  { %817 = vmax.xlane.f32.xlu1 %v816_v14 }
 0x30e   :  { %v774_v15 = vpop.f32.mrf.mxu2 }
 0x30f   :  { %v775_v16 = vadd.f32 %v774_v15, %v8918_v48 }
 0x311   :  { %6586 = vmatmul.msk.f32.gmra.mxu1 %vm560_vm0, %v1176_v17  ;;  %v819_v19 = vsel %vm631_vm1, %v775_v16, -inf }
 0x312   :  { %v971_v18 = vpop.f32.mrf.mxu0  ;;  %820 = vmax.xlane.f32.xlu0 %v819_v19 }
 0x313   :  { %v972_v20 = vadd.f32 %v971_v18, %v8913_v44 }
 0x315   :  { %v1016_v21 = vsel %vm631_vm1, %v972_v20, -inf }
 0x316   :  { %1017 = vmax.xlane.f32.xlu1 %v1016_v21 }
 0x35a   :  { %v9062_v36 = vpop.f32.mrf.mxu3 }
 0x35b   :  { %v974_v22 = vpop.f32.mrf.mxu0 }
 0x35c   :  { %v9048_v23 = vadd.f32 %v974_v22, %v8918_v48 }
 0x35e   :  { %v1019_v24 = vsel %vm631_vm1, %v9048_v23, -inf }
 0x35f   :  { %1020 = vmax.xlane.f32.xlu2 %v1019_v24 }
 0x362   :  { %v9077_v32 = vpop.f32.mrf.mxu3 }
 0x36a   :  { %v9086_v61 = vpop.f32.mrf.mxu3 }
 0x36b   :  { %v1167_v25 = vpop.f32.mrf.mxu0 }
 0x36c   :  { %v9053_v26 = vadd.f32 %v1167_v25, %v8913_v44 }
 0x36e   :  { %v1212_v27 = vsel %vm631_vm1, %v9053_v26, -inf }
 0x36f   :  { %1213 = vmax.xlane.f32.xlu0 %v1212_v27 }
 0x372   :  { %v9098_v4 = vpop.f32.mrf.mxu3 }
 0x376   :  { %v1010_v28 = vpop.f32.mrf.mxu1 }
 0x377   :  { %v9058_v29 = vadd.f32 %v1010_v28, %v8923_v52 }
 0x379   :  { %v1022_v30 = vsel %vm631_vm1, %v9058_v29, -inf }
 0x37a   :  { %1023 = vmax.xlane.f32.xlu1 %v1022_v30  ;;  %v810_v8 = vpop.f32.mrf.mxu3 }
 0x37b   :  { %v9113_v50 = vadd.f32 %v810_v8, %v8923_v52 }
 0x37d   :  { %v818_v39 = vpop.xlane.xlu1 %817  ;;  %v822_v9 = vsel %vm631_vm1, %v9113_v50, -inf }
 0x37e   :  { %v1013_v31 = vpop.f32.mrf.mxu1  ;;  %v1170_v34 = vpop.f32.mrf.mxu0  ;;  %v828_v46 = vmax.f32 %v818_v39, -1e+09 }
 0x37f   :  { %v9065_v37 = vadd.f32 %v1013_v31, %v8928_v56  ;;  %v9068_v44 = vadd.f32 %v1170_v34, %v8918_v48 }
 0x380   :  { %v832_v40 = vsub.f32 %v772_v12, %v828_v46 }
 0x381   :  { %v1025_v41 = vsel %vm631_vm1, %v9065_v37, -inf  ;;  %v1215_v35 = vsel %vm631_vm1, %v9068_v44, -inf }
 0x382   :  { %1026 = vmax.xlane.f32.xlu2 %v1025_v41  ;;  %1216 = vmax.xlane.f32.xlu1 %v1215_v35  ;;  %v836_v58 = vmul.f32 1.442695, %v832_v40  ;;  %v813_v22 = vpop.f32.mrf.mxu3 }
 0x383   :  { %v9133_v24 = vadd.f32 %v813_v22, %v8928_v56 }
 0x385   :  { %v821_v54 = vpop.xlane.xlu0 %820  ;;  %v825_v28 = vsel %vm631_vm1, %v9133_v24, -inf }
 0x386   :  { %v1206_v42 = vpop.f32.mrf.mxu1  ;;  %v829_v59 = vmax.f32 %v821_v54, -1e+09 }
 0x387   :  { %v9075_v45 = vadd.f32 %v1206_v42, %v8923_v52 }
 0x388   :  { %v833_v63 = vsub.f32 %v775_v16, %v829_v59 }
 0x389   :  { %v1018_v33 = vpop.xlane.xlu1 %1017  ;;  %v1218_v48 = vsel %vm631_vm1, %v9075_v45, -inf }
 0x38a   :  { %v1028_v47 = vmax.f32 %v1018_v33, -1e+09  ;;  %1219 = vmax.xlane.f32.xlu0 %v1218_v48  ;;  %v838_v1 = vmul.f32 1.442695, %v833_v63 }
 0x38c   :  { %v1032_v38 = vsub.f32 %v972_v20, %v1028_v47 }
 0x38e   :  { %v1036_v51 = vmul.f32 1.442695, %v1032_v38  ;;  %v1209_v55 = vpop.f32.mrf.mxu1 }
 0x38f   :  { %v9082_v57 = vadd.f32 %v1209_v55, %v8928_v56 }
 0x390   :  { %8038 = vpow2.f32 %v1036_v51 }
 0x391   :  { %v1221_v60 = vsel %vm631_vm1, %v9082_v57, -inf  ;;  %8040 = vpow2.f32 %v836_v58 }
 0x392   :  { %1222 = vmax.xlane.f32.xlu1 %v1221_v60  ;;  %8042 = vpow2.f32 %v838_v1 }
 0x396   :  { %v9088_v62 = vpop.eup %8038 }
 0x397   :  { %v1044_v0 = vsel %vm631_vm1, %v9088_v62, 0.0  ;;  %v9092_v2 = vpop.eup %8040 }
 0x398   :  { %1045 = vadd.xlane.f32.xlu2 %v1044_v0  ;;  %v844_v5 = vsel %vm631_vm1, %v9092_v2, 0.0  ;;  %v9104_v6 = vpop.eup %8042 }
 0x399   :  { %v847_v7 = vsel %vm631_vm1, %v9104_v6, 0.0 }
 0x39e   :  { %7752 = vrot.lane.b32.xlu0 %v9096_v3, %s8610_s6 }
 0x3a0   :  { %845 = vadd.xlane.f32.xlu2 %v844_v5 }
 0x3a8   :  { %848 = vadd.xlane.f32.xlu2 %v847_v7 }
 0x3ab   :  { %7757 = vrot.lane.b32.xlu1 %v9110_v49, %s8610_s6 }
 0x3b0   :  { %823 = vmax.xlane.f32.xlu2 %v822_v9 }
 0x3c8   :  { %7762 = vrot.lane.b32.xlu2 %v9096_v3, %s8601_s15 }
 0x3d2   :  { %v1021_v10 = vpop.xlane.xlu2 %1020 }
 0x3d3   :  { %v1029_v11 = vmax.f32 %v1021_v10, -1e+09 }
 0x3d5   :  { %v1033_v12 = vsub.f32 %v9048_v23, %v1029_v11 }
 0x3d7   :  { %v1038_v13 = vmul.f32 1.442695, %v1033_v12 }
 0x3d9   :  { %8044 = vpow2.f32 %v1038_v13 }
 0x3df   :  { %v9122_v53 = vpop.eup %8044 }
 0x3e0   :  { %v1047_v52 = vsel %vm631_vm1, %v9122_v53, 0.0 }
 0x3e1   :  { %1048 = vadd.xlane.f32.xlu1 %v1047_v52 }
 0x3e2   :  { %v1214_v43 = vpop.xlane.xlu0 %1213 }
 0x3e3   :  { %v1224_v14 = vmax.f32 %v1214_v43, -1e+09 }
 0x3e5   :  { %v1228_v15 = vsub.f32 %v9053_v26, %v1224_v14 }
 0x3e7   :  { %v1232_v16 = vmul.f32 1.442695, %v1228_v15 }
 0x3e9   :  { %8046 = vpow2.f32 %v1232_v16 }
 0x3ed   :  { %v1024_v17 = vpop.xlane.xlu1 %1023 }
 0x3ee   :  { %v1030_v18 = vmax.f32 %v1024_v17, -1e+09 }
 0x3ef   :  { %v9127_v19 = vpop.eup %8046 }
 0x3f0   :  { %v1034_v20 = vsub.f32 %v9058_v29, %v1030_v18  ;;  %v1240_v21 = vsel %vm631_vm1, %v9127_v19, 0.0 }
 0x3f1   :  { %1241 = vadd.xlane.f32.xlu0 %v1240_v21 }
 0x3f2   :  { %v1040_v23 = vmul.f32 1.442695, %v1034_v20 }
 0x3f4   :  { %8048 = vpow2.f32 %v1040_v23 }
 0x3f5   :  { %v1027_v25 = vpop.xlane.xlu2 %1026  ;;  %v9151_v47 = vpop.xlane.xlu1 %1216 }
 0x3f6   :  { %v1031_v26 = vmax.f32 %v1027_v25, -1e+09 }
 0x3f8   :  { %v1035_v27 = vsub.f32 %v9065_v37, %v1031_v26  ;;  %v1225_v26 = vmax.f32 %v9151_v47, -1e+09 }
 0x3f9   :  { %826 = vmax.xlane.f32.xlu0 %v825_v28 }
 0x3fa   :  { %v9138_v30 = vpop.eup %8048  ;;  %v1042_v29 = vmul.f32 1.442695, %v1035_v27 }
 0x3fb   :  { %v1050_v31 = vsel %vm631_vm1, %v9138_v30, 0.0 }
 0x3fc   :  { %8050 = vpow2.f32 %v1042_v29  ;;  %1051 = vadd.xlane.f32.xlu2 %v1050_v31 }
 0x3fd   :  { %v1220_v34 = vpop.xlane.xlu0 %1219 }
 0x3fe   :  { %v1226_v56 = vmax.f32 %v1220_v34, -1e+09 }
 0x400   :  { %v1230_v39 = vsub.f32 %v9075_v45, %v1226_v56 }
 0x402   :  { %v9143_v41 = vpop.eup %8050  ;;  %v1236_v35 = vmul.f32 1.442695, %v1230_v39 }
 0x403   :  { %v1053_v37 = vsel %vm631_vm1, %v9143_v41, 0.0 }
 0x404   :  { %8052 = vpow2.f32 %v1236_v35  ;;  %1054 = vadd.xlane.f32.xlu2 %v1053_v37 }
 0x405   :  { %v1223_v51 = vpop.xlane.xlu1 %1222 }
 0x406   :  { %v1227_v15 = vmax.f32 %v1223_v51, -1e+09 }
 0x40a   :  { %v9147_v42 = vpop.eup %8052 }
 0x40b   :  { %v1046_v33 = vpop.xlane.xlu2 %1045  ;;  %v1246_v46 = vsel %vm631_vm1, %v9147_v42, 0.0 }
 0x40c   :  { %1247 = vadd.xlane.f32.xlu2 %v1246_v46 }
 0x410   :  { %v7753_v48 = vpop.permute.xlu0 %7752 }
 0x411   :  { %v7754_v38 = vunpack.i.l.bf16 %v7753_v48  ;;  %v7755_v40 = vunpack.i.h.bf16 %v7753_v48 }
 0x413   :  { %v846_v45 = vpop.xlane.xlu2 %845  ;;  %892 = vmatpush.msra.mxu2 %v7754_v38 }
 0x414   :  { %8054 = vrcp.f32 %v846_v45 }
 0x415   :  { %893 = vmatpush.msra.mxu2 %v7755_v40 }
 0x41a   :  { %v8055_v54 = vpop.eup %8054 }
 0x41b   :  { %v860_v55 = vmul.f32 %v8055_v54, %v9092_v2  ;;  %v849_v58 = vpop.xlane.xlu2 %848 }
 0x41c   :  { %8056 = vrcp.f32 %v849_v58 }
 0x41d   :  { %6563 = vmatmul.msk.f32.vlgmr.msra.gmra.mxu2 %vm631_vm1, %v860_v55  ;;  %v7758_v59 = vpop.permute.xlu1 %7757  ;;  %8058 = vrcp.f32 %v1046_v33 }
 0x41e   :  { %v7759_v60 = vunpack.i.l.bf16 %v7758_v59  ;;  %v7760_v63 = vunpack.i.h.bf16 %v7758_v59 }
 0x420   :  { %929 = vmatpush.msrb.mxu3 %v7759_v60 }
 0x422   :  { %v8057_v0 = vpop.eup %8056  ;;  %930 = vmatpush.msrb.mxu3 %v7760_v63 }
 0x423   :  { %v824_v1 = vpop.xlane.xlu2 %823  ;;  %v861_v5 = vmul.f32 %v8057_v0, %v9104_v6  ;;  %v8059_v10 = vpop.eup %8058 }
 0x424   :  { %v830_v7 = vmax.f32 %v824_v1, -1e+09  ;;  %7777 = vrot.lane.b32.xlu2 %v9110_v49, %s8611_s16  ;;  %v1060_v13 = vmul.f32 %v8059_v10, %v9088_v62  ;;  %v1231_v62 = vsub.f32 %v9082_v57, %v1227_v15 }
 0x425   :  { %6564 = vmatmul.msk.f32.gmra.mxu2 %vm631_vm1, %v861_v5 }
 0x426   :  { %v834_v2 = vsub.f32 %v9113_v50, %v830_v7  ;;  %v1238_v17 = vmul.f32 1.442695, %v1231_v62  ;;  %v7533_v62 = vld [vmem:[#allocation8 + $0x30] sm:$0xff] }
 0x428   :  { %v840_v8 = vmul.f32 1.442695, %v834_v2 }
 0x42a   :  { %8060 = vpow2.f32 %v840_v8 }
 0x42b   :  { %v7763_v9 = vpop.permute.xlu2 %7762 }
 0x42c   :  { %v7764_v11 = vunpack.i.l.bf16 %v7763_v9  ;;  %v7765_v12 = vunpack.i.h.bf16 %v7763_v9 }
 0x42e   :  { %1090 = vmatpush.msrb.mxu2 %v7764_v11 }
 0x430   :  { %v8061_v52 = vpop.eup %8060  ;;  %1091 = vmatpush.msrb.mxu2 %v7765_v12 }
 0x431   :  { %6575 = vmatmul.msk.f32.vlgmr.msrb.gmra.mxu2 %vm631_vm1, %v1060_v13  ;;  %v850_v6 = vsel %vm631_vm1, %v8061_v52, 0.0 }
 0x432   :  { %851 = vadd.xlane.f32.xlu1 %v850_v6 }
 0x44b   :  { %7772 = vrot.lane.b32.xlu1 %v9096_v3, %s8611_s16 }
 0x454   :  { %v1049_v50 = vpop.xlane.xlu1 %1048 }
 0x455   :  { %8062 = vrcp.f32 %v1049_v50 }
 0x456   :  { %8064 = vpow2.f32 %v1238_v17  ;;  %v7532_v17 = vld [vmem:[#allocation8 + $0x28] sm:$0xff] }
 0x45b   :  { %v8063_v43 = vpop.eup %8062 }
 0x45c   :  { %v1061_v14 = vmul.f32 %v8063_v43, %v9122_v53  ;;  %v9169_v22 = vpop.eup %8064 }
 0x45d   :  { %v1249_v23 = vsel %vm631_vm1, %v9169_v22, 0.0 }
 0x45e   :  { %6576 = vmatmul.msk.f32.gmra.mxu2 %vm631_vm1, %v1061_v14 }
 0x464   :  { %v1242_v16 = vpop.xlane.xlu0 %1241 }
 0x46c   :  { %v827_v18 = vpop.xlane.xlu0 %826 }
 0x46d   :  { %v831_v20 = vmax.f32 %v827_v18, -1e+09 }
 0x46f   :  { %v835_v21 = vsub.f32 %v9133_v24, %v831_v20  ;;  %v1229_v24 = vsub.f32 %v9068_v44, %v1225_v26  ;;  %v1052_v45 = vpop.xlane.xlu2 %1051  ;;  %v7528_v26 = vld [vmem:[#allocation8 + $0x8] sm:$0xff] }
 0x471   :  { %v842_v3 = vmul.f32 1.442695, %v835_v21  ;;  %v1234_v34 = vmul.f32 1.442695, %v1229_v24 }
 0x473   :  { %8066 = vpow2.f32 %v842_v3 }
 0x475   :  { %1250 = vadd.xlane.f32.xlu1 %v1249_v23 }
 0x477   :  { %v1055_v51 = vpop.xlane.xlu2 %1054 }
 0x479   :  { %v8067_v53 = vpop.eup %8066 }
 0x47a   :  { %v853_v25 = vsel %vm631_vm1, %v8067_v53, 0.0 }
 0x47b   :  { %854 = vadd.xlane.f32.xlu0 %v853_v25  ;;  %v7530_v25 = vld [vmem:[#allocation8 + $0x18] sm:$0xff] }
 0x47f   :  { %v1248_v58 = vpop.xlane.xlu2 %1247 }
 0x487   :  { %v7778_v63 = vpop.permute.xlu2 %7777 }
 0x488   :  { %v7779_v5 = vunpack.i.l.bf16 %v7778_v63  ;;  %v7780_v7 = vunpack.i.h.bf16 %v7778_v63 }
 0x48f   :  { %7767 = vrot.lane.b32.xlu0 %v9110_v49, %s8601_s15 }
 0x4a0   :  { %v895_v57 = vpop.f32.mrf.mxu2 }
 0x4a5   :  { %v852_v27 = vpop.xlane.xlu1 %851 }
 0x4a6   :  { %8068 = vrcp.f32 %v852_v27  ;;  %v7527_v27 = vld [vmem:[#allocation8] sm:$0xff] }
 0x4a7   :  { %8070 = vpow2.f32 %v1234_v34 }
 0x4a8   :  { %v898_v28 = vpop.f32.mrf.mxu2  ;;  %8072 = vrcp.f32 %v1242_v16 }
 0x4a9   :  { %v7781_v29 = vpack.i.bf16 %v898_v28, %v895_v57  ;;  %v7529_v57 = vld [vmem:[#allocation8 + $0x10] sm:$0xff] }
 0x4ab   :  { %7782 = vrot.lane.b32.xlu2 %v7781_v29, %s8611_s16 }
 0x4ac   :  { %v8069_v31 = vpop.eup %8068 }
 0x4ad   :  { %v862_v56 = vmul.f32 %v8069_v31, %v8061_v52  ;;  %v8071_v39 = vpop.eup %8070 }
 0x4ae   :  { %v1243_v49 = vsel %vm631_vm1, %v8071_v39, 0.0  ;;  %v8073_v37 = vpop.eup %8072 }
 0x4af   :  { %6565 = vmatmul.msk.f32.vlgmr.msrb.gmra.mxu3 %vm631_vm1, %v862_v56  ;;  %v1256_v44 = vmul.f32 %v8073_v37, %v9127_v19 }
 0x4b4   :  { %v1093_v47 = vpop.f32.mrf.mxu2 }
 0x4b9   :  { %1244 = vadd.xlane.f32.xlu0 %v1243_v49 }
 0x4bd   :  { %v7773_v35 = vpop.permute.xlu1 %7772 }
 0x4be   :  { %v7774_v33 = vunpack.i.l.bf16 %v7773_v35  ;;  %v7775_v46 = vunpack.i.h.bf16 %v7773_v35 }
 0x4c0   :  { %1286 = vmatpush.msra.mxu2 %v7774_v33 }
 0x4c2   :  { %1287 = vmatpush.msra.mxu2 %v7775_v46 }
 0x4c3   :  { %6587 = vmatmul.msk.f32.vlgmr.msra.gmra.mxu2 %vm631_vm1, %v1256_v44 }
 0x4e1   :  { %v1096_v48 = vpop.f32.mrf.mxu2 }
 0x4e2   :  { %v7786_v38 = vpack.i.bf16 %v1096_v48, %v1093_v47 }
 0x4e4   :  { %7787 = vrot.lane.b32.xlu0 %v7786_v38, %s8601_s15 }
 0x4e8   :  { %v1251_v9 = vpop.xlane.xlu1 %1250 }
 0x4ee   :  { %v855_v40 = vpop.xlane.xlu0 %854 }
 0x4ef   :  { %8074 = vrcp.f32 %v855_v40 }
 0x4f0   :  { %8076 = vrcp.f32 %v1052_v45 }
 0x4f1   :  { %8078 = vrcp.f32 %v1055_v51 }
 0x4f2   :  { %8080 = vrcp.f32 %v1248_v58 }
 0x4f3   :  { %8082 = vrcp.f32 %v1251_v9 }
 0x4f5   :  { %v8075_v54 = vpop.eup %8074 }
 0x4f6   :  { %v863_v55 = vmul.f32 %v8075_v54, %v8067_v53  ;;  %v8077_v19 = vpop.eup %8076  ;;  %v7531_v53 = vld [vmem:[#allocation8 + $0x20] sm:$0xff] }
 0x4f7   :  { %v1062_v1 = vmul.f32 %v8077_v19, %v9138_v30  ;;  %v8079_v2 = vpop.eup %8078 }
 0x4f8   :  { %6566 = vmatmul.msk.f32.gmra.mxu3 %vm631_vm1, %v863_v55  ;;  %v1063_v8 = vmul.f32 %v8079_v2, %v9143_v41  ;;  %v8081_v10 = vpop.eup %8080 }
 0x4f9   :  { %v1258_v11 = vmul.f32 %v8081_v10, %v9147_v42  ;;  %v8083_v30 = vpop.eup %8082  ;;  %v7534_v42 = vld [vmem:[#allocation8 + $0x38] sm:$0xff] }
 0x4fa   :  { %v1259_v12 = vmul.f32 %v8083_v30, %v9169_v22  ;;  %1445 = vmatpush.bf16.msrb.mxu0 %v7534_v42  ;;  %v8329_v30 = vld [vmem:[%s8624_s5 + $0x8] sm:$0xff]  ;;  %v8612_v42 = vmov 128.0  }
 0x4fe   :  { %1446 = vmatpush.bf16.msrb.mxu0 %v7533_v62 }
 0x501   :  { %v7768_v59 = vpop.permute.xlu0 %7767 }
 0x502   :  { %v7769_v60 = vunpack.i.l.bf16 %v7768_v59  ;;  %v7770_v0 = vunpack.i.h.bf16 %v7768_v59  ;;  %1447 = vmatpush.bf16.msrb.mxu0 %v7532_v17 }
 0x504   :  { %1125 = vmatpush.msra.mxu3 %v7769_v60 }
 0x505   :  { %v7783_v24 = vpop.permute.xlu2 %7782 }
 0x506   :  { %1126 = vmatpush.msra.mxu3 %v7770_v0  ;;  %1448 = vmatpush.bf16.msrb.mxu0 %v7531_v53  ;;  %v7785_v29 = vunpack.i.h.bf16 %v7783_v24  ;;  %v7784_v31 = vunpack.i.l.bf16 %v7783_v24  ;;  %v7549_v53 = vld [vmem:[#allocation11 + $0x30] sm:$0xff] }
 0x507   :  { %6577 = vmatmul.msk.f32.vlgmr.msra.gmra.mxu3 %vm631_vm1, %v1062_v1 }
 0x508   :  { %1321 = vmatpush.msrb.mxu3 %v7779_v5  ;;  %v1379_v49 = vsel %vm560_vm0, %v9077_v32, %v7785_v29  ;;  %v1378_v35 = vsel %vm560_vm0, %v9062_v36, %v7784_v31 }
 0x50a   :  { %1322 = vmatpush.msrb.mxu3 %v7780_v7  ;;  %1449 = vmatpush.bf16.msrb.mxu0 %v7530_v25  ;;  %v7994_v7 = vld [vmem:[%s8679_s24] ss:$0 sm:$0xff] }
 0x50e   :  { %1450 = vmatpush.bf16.msrb.mxu0 %v7529_v57 }
 0x50f   :  { %6578 = vmatmul.msk.f32.gmra.mxu3 %vm631_vm1, %v1063_v8  ;;  %v8328_v8 = vld [vmem:[%s8624_s5] sm:$0xff] }
 0x512   :  { %1451 = vmatpush.bf16.msrb.mxu0 %v7528_v26  ;;  %v7548_v26 = vld [vmem:[#allocation11 + $0x28] sm:$0xff] }
 0x516   :  { %1452 = vmatpush.bf16.msrb.mxu0 %v7527_v27 }
 0x517   :  { %6589 = vmatmul.msk.f32.vlgmr.msrb.gmra.mxu3 %vm631_vm1, %v1258_v11 }
 0x51f   :  { %6590 = vmatmul.msk.f32.gmra.mxu3 %vm631_vm1, %v1259_v12 }
 0x52c   :  { %v1245_v13 = vpop.xlane.xlu0 %1244 }
 0x52d   :  { %8084 = vrcp.f32 %v1245_v13 }
 0x52e   :  { %8086 = vrcp.f32 %v8612_v42 }
 0x532   :  { %v932_v41 = vpop.f32.mrf.mxu3 }
 0x533   :  { %v8085_v52 = vpop.eup %8084 }
 0x534   :  { %v1257_v6 = vmul.f32 %v8085_v52, %v8071_v39  ;;  %v8087_v62 = vpop.eup %8086 }
 0x535   :  { %vm1483_vm4 = vweird.f32 %v8087_v62 }
 0x536   :  { %6588 = vmatmul.msk.f32.gmra.mxu2 %vm631_vm1, %v1257_v6  ;;  %v8330_v6 = vld [vmem:[%s8624_s5 + $0x10] sm:$0xff] }
 0x546   :  { %v1289_v16 = vpop.f32.mrf.mxu2 }
 0x556   :  { %v7788_v28 = vpop.permute.xlu0 %7787 }
 0x557   :  { %v7790_v34 = vunpack.i.h.bf16 %v7788_v28  ;;  %v7789_v56 = vunpack.i.l.bf16 %v7788_v28  ;;  %v7547_v28 = vld [vmem:[#allocation11 + $0x20] sm:$0xff] }
 0x559   :  { %v1384_v46 = vsel %vm1382_vm2, %v1379_v49, %v7790_v34  ;;  %v1383_v44 = vsel %vm1382_vm2, %v1378_v35, %v7789_v56  ;;  %v7546_v34 = vld [vmem:[#allocation11 + $0x18] sm:$0xff]  ;;  %v7545_v49 = vld [vmem:[#allocation11 + $0x10] sm:$0xff] }
 0x57b   :  { %v935_v50 = vpop.f32.mrf.mxu3 }
 0x57c   :  { %v7796_v22 = vpack.i.bf16 %v935_v50, %v932_v41 }
 0x58a   :  { %v1128_v43 = vpop.f32.mrf.mxu3 }
 0x592   :  { %v1131_v14 = vpop.f32.mrf.mxu3 }
 0x593   :  { %v7801_v15 = vpack.i.bf16 %v1131_v14, %v1128_v43  ;;  %v8331_v14 = vld [vmem:[%s8624_s5 + $0x18] sm:$0xff]  ;;  %s10515_s5 = sld [smem:[#allocation23_spill]] }
 0x595   :  { %7802 = vrot.lane.b32.xlu1 %v7801_v15, %s8601_s15 }
 0x59a   :  { %v1324_v21 = vpop.f32.mrf.mxu3 }
 0x5a2   :  { %v1327_v3 = vpop.f32.mrf.mxu3 }
 0x5a3   :  { %v7806_v23 = vpack.i.bf16 %v1327_v3, %v1324_v21 }
 0x5b9   :  { %v1292_v18 = vpop.f32.mrf.mxu2 }
 0x5ba   :  { %v7791_v20 = vpack.i.bf16 %v1292_v18, %v1289_v16  ;;  %v1479_v16 = vmul.f32 128.0, %v8087_v62 }
 0x5bc   :  { %7792 = vrot.lane.b32.xlu2 %v7791_v20, %s8610_s6  ;;  %v1480_v17 = vsub.f32 1.0, %v1479_v16 }
 0x5be   :  { %v1481_v18 = vmul.f32 %v8087_v62, %v1480_v17 }
 0x5c0   :  { %v1482_v20 = vadd.f32 %v8087_v62, %v1481_v18 }
 0x5c2   :  { %v9219_v21 = vsel %vm1483_vm4, %v8087_v62, %v1482_v20 }
 0x5c4   :  { %7797 = vrot.lane.b32.xlu2 %v7796_v22, %s8611_s16  ;;  %v7550_v22 = vld [vmem:[#allocation11 + $0x38] sm:$0xff] }
 0x5c5   :  { %1764 = vmatpush.bf16.msrb.mxu2 %v7550_v22 }
 0x5c9   :  { %1765 = vmatpush.bf16.msrb.mxu2 %v7549_v53 }
 0x5cc   :  { %7807 = vrot.lane.b32.xlu2 %v7806_v23, %s8610_s6 }
 0x5cd   :  { %1766 = vmatpush.bf16.msrb.mxu2 %v7548_v26 }
 0x5d1   :  { %1767 = vmatpush.bf16.msrb.mxu2 %v7547_v28  ;;  %v7996_v28 = vld [vmem:[%s10517_s28] ss:$0 sm:$0xff] }
 0x5d5   :  { %1768 = vmatpush.bf16.msrb.mxu2 %v7546_v34 }
 0x5d9   :  { %1769 = vmatpush.bf16.msrb.mxu2 %v7545_v49 }
 0x607   :  { %v7803_v32 = vpop.permute.xlu1 %7802 }
 0x608   :  { %v7805_v55 = vunpack.i.h.bf16 %v7803_v32  ;;  %v7804_v58 = vunpack.i.l.bf16 %v7803_v32  ;;  %v7542_v32 = vld [vmem:[#allocation10 + $0x38] sm:$0xff] }
 0x609   :  { %1692 = vmatpush.bf16.msrb.mxu1 %v7542_v32 }
 0x616   :  { %v7793_v39 = vpop.permute.xlu2 %7792 }
 0x617   :  { %v7795_v37 = vunpack.i.h.bf16 %v7793_v39  ;;  %v7794_v33 = vunpack.i.l.bf16 %v7793_v39 }
 0x619   :  { %v1389_v47 = vsel %vm1387_vm3, %v1384_v46, %v7795_v37  ;;  %v1388_v48 = vsel %vm1387_vm3, %v1383_v44, %v7794_v33  ;;  %v7544_v33 = vld [vmem:[#allocation11 + $0x8] sm:$0xff] }
 0x61a   :  { %v1392_v38 = vpack.c.bf16 %v1389_v47, %v1388_v48  ;;  %1770 = vmatpush.bf16.msrb.mxu2 %v7544_v33 }
 0x61c   :  { %1453 = vmatmul.bf16.vlgmr.msrb.gmra.mxu0 %v1392_v38  ;;  %v7543_v38 = vld [vmem:[#allocation11] sm:$0xff] }
 0x61e   :  { %v7798_v45 = vpop.permute.xlu2 %7797  ;;  %1771 = vmatpush.bf16.msrb.mxu2 %v7543_v38 }
 0x61f   :  { %v7800_v40 = vunpack.i.h.bf16 %v7798_v45  ;;  %v7799_v51 = vunpack.i.l.bf16 %v7798_v45  ;;  %v264_v45 = vld [vmem:[%s10515_s5] sm:$0xff] }
 0x621   :  { %v1380_v36 = vsel %vm560_vm0, %v9086_v61, %v7799_v51  ;;  %v1381_v54 = vsel %vm560_vm0, %v9098_v4, %v7800_v40  ;;  %v265_v40 = vld [vmem:[%s10515_s5 + $0x8] sm:$0xff] }
 0x622   :  { %v1385_v63 = vsel %vm1382_vm2, %v1380_v36, %v7804_v58  ;;  %v1386_v0 = vsel %vm1382_vm2, %v1381_v54, %v7805_v55  ;;  %v9243_v51 = vpack.c.bf16 %v265_v40, %v264_v45  ;;  %v7541_v36 = vld [vmem:[#allocation10 + $0x30] sm:$0xff]  ;;  %v7540_v54 = vld [vmem:[#allocation10 + $0x28] sm:$0xff]  ;;  %v7539_v55 = vld [vmem:[#allocation10 + $0x20] sm:$0xff] }
 0x623   :  { %1693 = vmatpush.bf16.msrb.mxu1 %v7541_v36  ;;  %v266_v58 = vld [vmem:[%s10515_s5 + $0x10] sm:$0xff] }
 0x624   :  { %1772 = vmatmul.bf16.vlgmr.msrb.gmra.mxu2 %v9243_v51 }
 0x626   :  { %v7808_v59 = vpop.permute.xlu2 %7807 }
 0x627   :  { %v7810_v19 = vunpack.i.h.bf16 %v7808_v59  ;;  %v7809_v60 = vunpack.i.l.bf16 %v7808_v59  ;;  %1694 = vmatpush.bf16.msrb.mxu1 %v7540_v54  ;;  %v267_v59 = vld [vmem:[%s10515_s5 + $0x18] sm:$0xff] }
 0x629   :  { %v1390_v1 = vsel %vm1387_vm3, %v1385_v63, %v7809_v60  ;;  %v1391_v5 = vsel %vm1387_vm3, %v1386_v0, %v7810_v19  ;;  %v9248_v19 = vpack.c.bf16 %v267_v59, %v266_v58  ;;  %v7538_v60 = vld [vmem:[#allocation10 + $0x18] sm:$0xff]  ;;  %v7537_v63 = vld [vmem:[#allocation10 + $0x10] sm:$0xff]  ;;  %v7536_v0 = vld [vmem:[#allocation10 + $0x8] sm:$0xff] }
 0x62a   :  { %v1393_v61 = vpack.c.bf16 %v1391_v5, %v1390_v1 }
 0x62b   :  { %1695 = vmatpush.bf16.msrb.mxu1 %v7539_v55 }
 0x62c   :  { %1458 = vmatmul.bf16.gmra.mxu0 %v1393_v61 }
 0x62f   :  { %1696 = vmatpush.bf16.msrb.mxu1 %v7538_v60 }
 0x633   :  { %1697 = vmatpush.bf16.msrb.mxu1 %v7537_v63  ;;  %v7997_v63 = vld [vmem:[%s10518_s19] ss:$0 sm:$0xff] }
 0x634   :  { %1777 = vmatmul.bf16.gmra.mxu2 %v9248_v19 }
 0x637   :  { %1698 = vmatpush.bf16.msrb.mxu1 %v7536_v0 }
 0x699   :  { %v1454_v2 = vpop.f32.mrf.mxu0 }
 0x69a   :  { %v1455_v4 = vadd.f32 %v7994_v7, %v1454_v2 }
 0x69c   :  { %v1464_v9 = vadd.f32 %v8328_v8, %v1455_v4 }
 0x69e   :  { %1470 = vadd.xlane.f32.xlu0 %v1464_v9 }
 0x6a1   :  { %v1456_v10 = vpop.f32.mrf.mxu0 }
 0x6a2   :  { %v1457_v11 = vadd.f32 %v7994_v7, %v1456_v10 }
 0x6a4   :  { %v1465_v12 = vadd.f32 %v8329_v30, %v1457_v11 }
 0x6a6   :  { %1472 = vadd.xlane.f32.xlu2 %v1465_v12 }
 0x6a7   :  { %v1773_v0 = vpop.f32.mrf.mxu2 }
 0x6a9   :  { %v1459_v13 = vpop.f32.mrf.mxu0 }
 0x6aa   :  { %v1460_v52 = vadd.f32 %v7994_v7, %v1459_v13 }
 0x6ac   :  { %v1466_v41 = vadd.f32 %v8330_v6, %v1460_v52 }
 0x6ae   :  { %1474 = vadd.xlane.f32.xlu1 %v1466_v41 }
 0x6b1   :  { %v1461_v50 = vpop.f32.mrf.mxu0 }
 0x6b2   :  { %v1462_v43 = vadd.f32 %v7994_v7, %v1461_v50  ;;  %v7535_v7 = vld [vmem:[#allocation10] sm:$0xff] }
 0x6b3   :  { %1699 = vmatpush.bf16.msrb.mxu1 %v7535_v7 }
 0x6b4   :  { %v1467_v15 = vadd.f32 %v8331_v14, %v1462_v43 }
 0x6b6   :  { %1476 = vadd.xlane.f32.xlu0 %v1467_v15 }
 0x711   :  { %v1471_v3 = vpop.xlane.xlu0 %1470 }
 0x712   :  { %v1485_v23 = vmul.f32 %v9219_v21, %v1471_v3  ;;  %v7995_v3 = vld [vmem:[%s10516_s0] ss:$0 sm:$0xff] }
 0x714   :  { %v9222_v25 = vsub.f32 %v1464_v9, %v1485_v23 }
 0x716   :  { %v1493_v57 = vmul.f32 %v9222_v25, %v9222_v25 }
 0x718   :  { %1497 = vadd.xlane.f32.xlu2 %v1493_v57 }
 0x719   :  { %v1473_v27 = vpop.xlane.xlu2 %1472 }
 0x71a   :  { %v1486_v24 = vmul.f32 %v9219_v21, %v1473_v27 }
 0x71c   :  { %v9227_v29 = vsub.f32 %v1465_v12, %v1486_v24 }
 0x71e   :  { %v1494_v31 = vmul.f32 %v9227_v29, %v9227_v29 }
 0x720   :  { %1499 = vadd.xlane.f32.xlu0 %v1494_v31 }
 0x721   :  { %v1475_v56 = vpop.xlane.xlu1 %1474 }
 0x722   :  { %v1487_v39 = vmul.f32 %v9219_v21, %v1475_v56 }
 0x724   :  { %v9232_v35 = vsub.f32 %v1466_v41, %v1487_v39 }
 0x726   :  { %v1495_v37 = vmul.f32 %v9232_v35, %v9232_v35 }
 0x728   :  { %1501 = vadd.xlane.f32.xlu2 %v1495_v37 }
 0x729   :  { %v1477_v46 = vpop.xlane.xlu0 %1476 }
 0x72a   :  { %v1488_v44 = vmul.f32 %v9219_v21, %v1477_v46 }
 0x72c   :  { %v9237_v47 = vsub.f32 %v1467_v15, %v1488_v44 }
 0x72e   :  { %v1496_v48 = vmul.f32 %v9237_v47, %v9237_v47 }
 0x730   :  { %1503 = vadd.xlane.f32.xlu0 %v1496_v48 }
 0x78b   :  { %v1498_v1 = vpop.xlane.xlu2 %1497 }
 0x78c   :  { %v1505_v5 = vmul.f32 %v1498_v1, %v9219_v21  ;;  %v1775_v1 = vpop.f32.mrf.mxu2 }
 0x78e   :  { %v1509_v61 = vadd.f32 1e-05, %v1505_v5  ;;  %v1776_v5 = vadd.f32 %v7997_v63, %v1775_v1  ;;  %v7551_v1 = vld [vmem:[#allocation13] sm:$0xff] }
 0x790   :  { %8088 = vrsqrt.f32 %v1509_v61  ;;  %vm1519_vm6 = vweird.f32 %v1509_v61  ;;  %6719 = vmatpush.xpose.msk.msra.mxu0 %vm560_vm0, %v1776_v5  ;;  %2039 = vrot.lane.b32.xlu2 %v1776_v5, %s8610_s6 }
 0x793   :  { %v1500_v2 = vpop.xlane.xlu0 %1499 }
 0x794   :  { %v1506_v4 = vmul.f32 %v1500_v2, %v9219_v21 }
 0x796   :  { %v8089_v8 = vpop.eup %8088  ;;  %v1510_v9 = vadd.f32 1e-05, %v1506_v4  ;;  %v7998_v4 = vld [vmem:[%s10519_s11] ss:$0 sm:$0xff] }
 0x797   :  { %v1514_v10 = vmul.f32 %v8089_v8, %v1509_v61  ;;  %vm1520_vm5 = vweird.f32 %v8089_v8 }
 0x798   :  { %8090 = vrsqrt.f32 %v1510_v9  ;;  %vm1521_vm7 = vmor %vm1519_vm6, %vm1520_vm5  ;;  %vm1529_vm9 = vweird.f32 %v1510_v9 }
 0x799   :  { %v1515_v11 = vmul.f32 %v8089_v8, %v1514_v10 }
 0x79b   :  { %v1516_v30 = vmul.f32 0.5, %v1515_v11  ;;  %v1502_v12 = vpop.xlane.xlu2 %1501 }
 0x79c   :  { %v1507_v13 = vmul.f32 %v1502_v12, %v9219_v21 }
 0x79d   :  { %v1517_v52 = vsub.f32 1.5, %v1516_v30 }
 0x79e   :  { %v8091_v6 = vpop.eup %8090  ;;  %v1511_v41 = vadd.f32 1e-05, %v1507_v13 }
 0x79f   :  { %v1518_v50 = vmul.f32 %v8089_v8, %v1517_v52  ;;  %v1524_v43 = vmul.f32 %v8091_v6, %v1510_v9  ;;  %vm1530_vm8 = vweird.f32 %v8091_v6 }
 0x7a0   :  { %8092 = vrsqrt.f32 %v1511_v41  ;;  %vm1531_vm10 = vmor %vm1529_vm9, %vm1530_vm8  ;;  %vm1539_vm12 = vweird.f32 %v1511_v41 }
 0x7a1   :  { %v1525_v14 = vmul.f32 %v8091_v6, %v1524_v43  ;;  %v1522_v15 = vsel %vm1521_vm7, %v8089_v8, %v1518_v50 }
 0x7a2   :  { %v1553_v20 = vmul.f32 %v1522_v15, %v9222_v25 }
 0x7a3   :  { %v1526_v42 = vmul.f32 0.5, %v1525_v14  ;;  %v1504_v62 = vpop.xlane.xlu0 %1503 }
 0x7a4   :  { %v1508_v16 = vmul.f32 %v1504_v62, %v9219_v21  ;;  %v1560_v24 = vmul.f32 %v7995_v3, %v1553_v20 }
 0x7a5   :  { %v1527_v17 = vsub.f32 1.5, %v1526_v42 }
 0x7a6   :  { %v8093_v18 = vpop.eup %8092  ;;  %v1512_v22 = vadd.f32 1e-05, %v1508_v16  ;;  %v9259_v49 = vadd.f32 %v7996_v28, %v1560_v24 }
 0x7a7   :  { %v1528_v23 = vmul.f32 %v8091_v6, %v1527_v17  ;;  %v1534_v53 = vmul.f32 %v8093_v18, %v1511_v41  ;;  %vm1540_vm11 = vweird.f32 %v8093_v18 }
 0x7a8   :  { %8094 = vrsqrt.f32 %v1512_v22  ;;  %vm1541_vm13 = vmor %vm1539_vm12, %vm1540_vm11  ;;  %vm1549_vm15 = vweird.f32 %v1512_v22 }
 0x7a9   :  { %v1532_v57 = vsel %vm1531_vm10, %v8091_v6, %v1528_v23  ;;  %v1535_v26 = vmul.f32 %v8093_v18, %v1534_v53 }
 0x7aa   :  { %v1554_v27 = vmul.f32 %v1532_v57, %v9227_v29 }
 0x7ab   :  { %v1536_v31 = vmul.f32 0.5, %v1535_v26 }
 0x7ac   :  { %v1561_v34 = vmul.f32 %v7995_v3, %v1554_v27 }
 0x7ad   :  { %v1537_v56 = vsub.f32 1.5, %v1536_v31 }
 0x7ae   :  { %v8095_v39 = vpop.eup %8094  ;;  %v9261_v25 = vadd.f32 %v7996_v28, %v1561_v34 }
 0x7af   :  { %v1538_v37 = vmul.f32 %v8093_v18, %v1537_v56  ;;  %v1544_v33 = vmul.f32 %v8095_v39, %v1512_v22  ;;  %vm1550_vm14 = vweird.f32 %v8095_v39 }
 0x7b0   :  { %v1639_v46 = vpack.c.bf16 %v9261_v25, %v9259_v49  ;;  %vm1551_vm4 = vmor %vm1549_vm15, %vm1550_vm14 }
 0x7b1   :  { %v1545_v44 = vmul.f32 %v8095_v39, %v1544_v33  ;;  %v1542_v48 = vsel %vm1541_vm13, %v8093_v18, %v1538_v37 }
 0x7b2   :  { %1700 = vmatmul.bf16.vlgmr.msrb.gmra.mxu1 %v1639_v46  ;;  %v1555_v45 = vmul.f32 %v1542_v48, %v9232_v35  ;;  %v1774_v35 = vadd.f32 %v7997_v63, %v1773_v0  ;;  %v7552_v0 = vld [vmem:[#allocation13 + $0x8] sm:$0xff] }
 0x7b3   :  { %v1546_v29 = vmul.f32 0.5, %v1545_v44 }
 0x7b4   :  { %v1562_v54 = vmul.f32 %v7995_v3, %v1555_v45  ;;  %2037 = vrot.lane.b32.xlu1 %v1774_v35, %s8610_s6  ;;  %6720 = vmatpush.xpose.msk.msra.mxu0 %vm560_vm0, %v1774_v35  ;;  %v7556_v45 = vld [vmem:[#allocation13 + $0x28] sm:$0xff] }
 0x7b5   :  { %v1547_v38 = vsub.f32 1.5, %v1546_v29  ;;  %v7558_v29 = vld [vmem:[#allocation13 + $0x38] sm:$0xff] }
 0x7b6   :  { %v9267_v58 = vadd.f32 %v7996_v28, %v1562_v54  ;;  %1834 = vmatpush.bf16.msra.mxu3 %v7558_v29 }
 0x7b7   :  { %v1548_v40 = vmul.f32 %v8095_v39, %v1547_v38  ;;  %v7557_v38 = vld [vmem:[#allocation13 + $0x30] sm:$0xff] }
 0x7b9   :  { %v1552_v32 = vsel %vm1551_vm4, %v8095_v39, %v1548_v40 }
 0x7ba   :  { %v1556_v36 = vmul.f32 %v1552_v32, %v9237_v47  ;;  %v1778_v47 = vpop.f32.mrf.mxu2  ;;  %1835 = vmatpush.bf16.msra.mxu3 %v7557_v38 }
 0x7bb   :  { %v1779_v2 = vadd.f32 %v7997_v63, %v1778_v47 }
 0x7bc   :  { %v1563_v55 = vmul.f32 %v7995_v3, %v1556_v36  ;;  %2239 = vrot.lane.b32.xlu1 %v1776_v5, %s8601_s15  ;;  %v9314_v3 = vld [vmem:[%s10520_s8] sm:$0xff] }
 0x7bd   :  { %v7555_v36 = vld [vmem:[#allocation13 + $0x20] sm:$0xff] }
 0x7be   :  { %v9269_v59 = vadd.f32 %v7996_v28, %v1563_v55  ;;  %v9326_v28 = vld [vmem:[%s10520_s8 + $0x8] sm:$0xff]  ;;  %1836 = vmatpush.bf16.msra.mxu3 %v7556_v45  ;;  %v7554_v55 = vld [vmem:[#allocation13 + $0x18] sm:$0xff] }
 0x7c0   :  { %v1640_v60 = vpack.c.bf16 %v9269_v59, %v9267_v58 }
 0x7c2   :  { %1705 = vmatmul.bf16.gmra.mxu1 %v1640_v60  ;;  %v1780_v61 = vpop.f32.mrf.mxu2  ;;  %1837 = vmatpush.bf16.msra.mxu3 %v7555_v36 }
 0x7c3   :  { %v1781_v7 = vadd.f32 %v7997_v63, %v1780_v61  ;;  %v7553_v63 = vld [vmem:[#allocation13 + $0x10] sm:$0xff] }
 0x7c5   :  { %6723 = vmatpush.xpose.msk.msra.mxu1 %vm560_vm0, %v1781_v7 }
 0x7c6   :  { %1838 = vmatpush.bf16.msra.mxu3 %v7554_v55 }
 0x7c9   :  { %6724 = vmatpush.xpose.msk.msra.mxu1 %vm560_vm0, %v1779_v2 }
 0x7ca   :  { %1839 = vmatpush.bf16.msra.mxu3 %v7553_v63 }
 0x7ce   :  { %1840 = vmatpush.bf16.msra.mxu3 %v7552_v0 }
 0x7d2   :  { %1841 = vmatpush.bf16.msra.mxu3 %v7551_v1 }
 0x7d5   :  { %1842 = vmatmul.bf16.vlgmr.msra.gmra.mxu3 %v9243_v51 }
 0x7e5   :  { %1847 = vmatmul.bf16.gmra.mxu3 %v9248_v19 }
 0x7ea   :  { %v2040_v14 = vpop.permute.xlu2 %2039 }
 0x7eb   :  { %6731 = vmatpush.xpose.msk.msrb.mxu0 %vm560_vm0, %v2040_v14 }
 0x826   :  { %v2038_v15 = vpop.permute.xlu1 %2037 }
 0x827   :  { %6732 = vmatpush.xpose.msk.msrb.mxu0 %vm560_vm0, %v2038_v15 }
 0x82e   :  { %v2240_v42 = vpop.permute.xlu1 %2239 }
 0x82f   :  { %v1701_v8 = vpop.f32.mrf.mxu1 }
 0x830   :  { %v1702_v9 = vadd.f32 %v7998_v4, %v1701_v8 }
 0x832   :  { %v1853_v10 = vmul.f32 0.17677669, %v1702_v9 }
 0x834   :  { %2033 = vrot.lane.b32.xlu0 %v1853_v10, %s8610_s6  ;;  %6721 = vmatmul.msk.f32.vlgmr.msra.gmra.mxu0 %vm560_vm0, %v1853_v10 }
 0x835   :  { %6743 = vmatpush.xpose.msk.msra.mxu0 %vm560_vm0, %v2240_v42 }
 0x837   :  { %v1703_v11 = vpop.f32.mrf.mxu1 }
 0x838   :  { %v1704_v30 = vadd.f32 %v7998_v4, %v1703_v11 }
 0x83a   :  { %v1854_v12 = vmul.f32 0.17677669, %v1704_v30 }
 0x83c   :  { %2078 = vrot.lane.b32.xlu0 %v1781_v7, %s8610_s6  ;;  %2035 = vrot.lane.b32.xlu2 %v1854_v12, %s8610_s6 }
 0x83d   :  { %2235 = vrot.lane.b32.xlu1 %v1854_v12, %s8601_s15  ;;  %6722 = vmatmul.msk.f32.gmra.mxu0 %vm560_vm0, %v1854_v12 }
 0x83f   :  { %v1706_v13 = vpop.f32.mrf.mxu1 }
 0x840   :  { %v1707_v52 = vadd.f32 %v7998_v4, %v1706_v13 }
 0x842   :  { %v1855_v6 = vmul.f32 0.17677669, %v1707_v52 }
 0x844   :  { %6725 = vmatmul.msk.f32.vlgmr.msra.gmra.mxu1 %vm560_vm0, %v1855_v6  ;;  %2076 = vrot.lane.b32.xlu2 %v1779_v2, %s8610_s6 }
 0x845   :  { %2237 = vrot.lane.b32.xlu0 %v1774_v35, %s8601_s15  ;;  %2072 = vrot.lane.b32.xlu1 %v1855_v6, %s8610_s6 }
 0x847   :  { %v1708_v41 = vpop.f32.mrf.mxu1 }
 0x848   :  { %v1709_v50 = vadd.f32 %v7998_v4, %v1708_v41 }
 0x84a   :  { %v1856_v43 = vmul.f32 0.17677669, %v1709_v50 }
 0x84c   :  { %6726 = vmatmul.msk.f32.gmra.mxu1 %vm560_vm0, %v1856_v43  ;;  %2233 = vrot.lane.b32.xlu2 %v1853_v10, %s8601_s15 }
 0x84d   :  { %2435 = vrot.lane.b32.xlu0 %v1776_v5, %s8611_s16  ;;  %2276 = vrot.lane.b32.xlu1 %v1779_v2, %s8601_s15 }
 0x854   :  { %2278 = vrot.lane.b32.xlu2 %v1781_v7, %s8601_s15 }
 0x855   :  { %2074 = vrot.lane.b32.xlu0 %v1856_v43, %s8610_s6  ;;  %2429 = vrot.lane.b32.xlu1 %v1853_v10, %s8611_s16 }
 0x85c   :  { %2433 = vrot.lane.b32.xlu2 %v1774_v35, %s8611_s16 }
 0x85d   :  { %2272 = vrot.lane.b32.xlu0 %v1855_v6, %s8601_s15  ;;  %2474 = vrot.lane.b32.xlu1 %v1781_v7, %s8611_s16 }
 0x864   :  { %2274 = vrot.lane.b32.xlu2 %v1856_v43, %s8601_s15 }
 0x865   :  { %2431 = vrot.lane.b32.xlu0 %v1854_v12, %s8611_s16  ;;  %2470 = vrot.lane.b32.xlu1 %v1856_v43, %s8611_s16 }
 0x86c   :  { %2472 = vrot.lane.b32.xlu2 %v1779_v2, %s8611_s16 }
 0x86d   :  { %2468 = vrot.lane.b32.xlu0 %v1855_v6, %s8611_s16 }
 0x896   :  { %v2036_v62 = vpop.permute.xlu2 %2035 }
 0x89e   :  { %v2077_v16 = vpop.permute.xlu2 %2076 }
 0x8a6   :  { %v2034_v17 = vpop.permute.xlu0 %2033  ;;  %v2234_v18 = vpop.permute.xlu2 %2233 }
 0x8a7   :  { %6733 = vmatmul.msk.f32.vlgmr.msrb.gmra.mxu0 %vm560_vm0, %v2034_v17 }
 0x8ae   :  { %v2079_v20 = vpop.permute.xlu0 %2078  ;;  %v2279_v57 = vpop.permute.xlu2 %2278 }
 0x8af   :  { %v2236_v22 = vpop.permute.xlu1 %2235  ;;  %6734 = vmatmul.msk.f32.gmra.mxu0 %vm560_vm0, %v2036_v62  ;;  %6735 = vmatpush.xpose.msk.msrb.mxu1 %vm560_vm0, %v2079_v20 }
 0x8b1   :  { %v1886_v23 = vpop.f32.mrf.mxu0 }
 0x8b2   :  { %v9317_v53 = vadd.f32 %v1886_v23, %v9314_v3 }
 0x8b3   :  { %6736 = vmatpush.xpose.msk.msrb.mxu1 %vm560_vm0, %v2077_v16 }
 0x8b4   :  { %v1927_v26 = vsel %vm631_vm1, %v9317_v53, -inf }
 0x8b5   :  { %1928 = vmax.xlane.f32.xlu2 %v1927_v26  ;;  %v9384_v26 = vld [vmem:[%s10520_s8 + $0x10] sm:$0xff] }
 0x8b6   :  { %v2434_v33 = vpop.permute.xlu2 %2433 }
 0x8b7   :  { %6747 = vmatpush.xpose.msk.msra.mxu1 %vm560_vm0, %v2279_v57  ;;  %v2238_v27 = vpop.permute.xlu0 %2237  ;;  %v2073_v24 = vpop.permute.xlu1 %2072 }
 0x8b8   :  { %6737 = vmatmul.msk.f32.vlgmr.msrb.gmra.mxu1 %vm560_vm0, %v2073_v24  ;;  %6744 = vmatpush.xpose.msk.msra.mxu0 %vm560_vm0, %v2238_v27 }
 0x8ba   :  { %v1889_v31 = vpop.f32.mrf.mxu0 }
 0x8bb   :  { %v9329_v34 = vadd.f32 %v1889_v31, %v9326_v28  ;;  %6745 = vmatmul.msk.f32.vlgmr.msra.gmra.mxu0 %vm560_vm0, %v2234_v18 }
 0x8bd   :  { %v1930_v56 = vsel %vm631_vm1, %v9329_v34, -inf }
 0x8be   :  { %1931 = vmax.xlane.f32.xlu0 %v1930_v56  ;;  %v2275_v48 = vpop.permute.xlu2 %2274  ;;  %v9392_v56 = vld [vmem:[%s10521_s7] ss:$0 sm:$0xff] }
 0x8bf   :  { %v2436_v39 = vpop.permute.xlu0 %2435  ;;  %v2277_v37 = vpop.permute.xlu1 %2276 }
 0x8c0   :  { %6748 = vmatpush.xpose.msk.msra.mxu1 %vm560_vm0, %v2277_v37  ;;  %6755 = vmatpush.xpose.msk.msrb.mxu0 %vm560_vm0, %v2436_v39 }
 0x8c1   :  { %v1921_v27 = vpop.f32.mrf.mxu1 }
 0x8c2   :  { %v9387_v24 = vadd.f32 %v1921_v27, %v9384_v26 }
 0x8c3   :  { %6746 = vmatmul.msk.f32.gmra.mxu0 %vm560_vm0, %v2236_v22 }
 0x8c4   :  { %6756 = vmatpush.xpose.msk.msrb.mxu0 %vm560_vm0, %v2434_v33  ;;  %v1933_v31 = vsel %vm631_vm1, %v9387_v24, -inf }
 0x8c6   :  { %v2473_v54 = vpop.permute.xlu2 %2472 }
 0x8c7   :  { %v2075_v46 = vpop.permute.xlu0 %2074  ;;  %v2430_v44 = vpop.permute.xlu1 %2429 }
 0x8c8   :  { %6738 = vmatmul.msk.f32.gmra.mxu1 %vm560_vm0, %v2075_v46 }
 0x8c9   :  { %v1924_v38 = vpop.f32.mrf.mxu1 }
 0x8cb   :  { %6757 = vmatmul.msk.f32.vlgmr.msrb.gmra.mxu0 %vm560_vm0, %v2430_v44 }
 0x8cf   :  { %v2273_v40 = vpop.permute.xlu0 %2272  ;;  %v2475_v32 = vpop.permute.xlu1 %2474 }
 0x8d0   :  { %6749 = vmatmul.msk.f32.vlgmr.msra.gmra.mxu1 %vm560_vm0, %v2273_v40 }
 0x8d1   :  { %6759 = vmatpush.xpose.msk.msrb.mxu1 %vm560_vm0, %v2475_v32 }
 0x8d5   :  { %6760 = vmatpush.xpose.msk.msrb.mxu1 %vm560_vm0, %v2473_v54 }
 0x8d7   :  { %v2432_v60 = vpop.permute.xlu0 %2431  ;;  %v2471_v5 = vpop.permute.xlu1 %2470 }
 0x8d8   :  { %6750 = vmatmul.msk.f32.gmra.mxu1 %vm560_vm0, %v2275_v48  ;;  %6758 = vmatmul.msk.f32.gmra.mxu0 %vm560_vm0, %v2432_v60 }
 0x8df   :  { %v2469_v35 = vpop.permute.xlu0 %2468 }
 0x8e0   :  { %6761 = vmatmul.msk.f32.vlgmr.msrb.gmra.mxu1 %vm560_vm0, %v2469_v35 }
 0x8e8   :  { %6762 = vmatmul.msk.f32.gmra.mxu1 %vm560_vm0, %v2471_v5 }
 0x924   :  { %v2066_v47 = vpop.f32.mrf.mxu0 }
 0x925   :  { %v2067_v61 = vadd.f32 %v2066_v47, %v9314_v3 }
 0x927   :  { %v2111_v7 = vsel %vm631_vm1, %v2067_v61, -inf }
 0x928   :  { %2112 = vmax.xlane.f32.xlu2 %v2111_v7  ;;  %v1929_v9 = vpop.xlane.xlu2 %1928 }
 0x929   :  { %v1939_v10 = vmax.f32 %v1929_v9, -1e+09  ;;  %v9419_v9 = vld [vmem:[%s10520_s8 + $0x18] sm:$0xff] }
 0x92b   :  { %v1943_v12 = vsub.f32 %v9317_v53, %v1939_v10 }
 0x92c   :  { %v2069_v2 = vpop.f32.mrf.mxu0 }
 0x92d   :  { %v2070_v4 = vadd.f32 %v2069_v2, %v9326_v28  ;;  %v1947_v6 = vmul.f32 1.442695, %v1943_v12 }
 0x92f   :  { %v2114_v8 = vsel %vm631_vm1, %v2070_v4, -inf  ;;  %8096 = vpow2.f32 %v1947_v6 }
 0x930   :  { %2115 = vmax.xlane.f32.xlu1 %v2114_v8 }
 0x931   :  { %v1932_v13 = vpop.xlane.xlu0 %1931 }
 0x932   :  { %v1940_v41 = vmax.f32 %v1932_v13, -1e+09  ;;  %v9422_v13 = vadd.f32 %v1924_v38, %v9419_v9 }
 0x934   :  { %v1944_v14 = vsub.f32 %v9329_v34, %v1940_v41  ;;  %v1843_v34 = vpop.f32.mrf.mxu3  ;;  %v1936_v6 = vsel %vm631_vm1, %v9422_v13, -inf }
 0x935   :  { %v9365_v62 = vpop.eup %8096  ;;  %v2105_v60 = vpop.f32.mrf.mxu1 }
 0x936   :  { %v1949_v42 = vmul.f32 1.442695, %v1944_v14  ;;  %v1955_v20 = vsel %vm631_vm1, %v9365_v62, 0.0  ;;  %v9405_v63 = vadd.f32 %v2105_v60, %v9384_v26 }
 0x938   :  { %v2266_v11 = vpop.f32.mrf.mxu0  ;;  %8098 = vpow2.f32 %v1949_v42  ;;  %v2117_v47 = vsel %vm631_vm1, %v9405_v63, -inf }
 0x939   :  { %v9354_v30 = vadd.f32 %v2266_v11, %v9314_v3 }
 0x93b   :  { %v2311_v52 = vsel %vm631_vm1, %v9354_v30, -inf }
 0x93c   :  { %2312 = vmax.xlane.f32.xlu0 %v2311_v52  ;;  %v1845_v39 = vpop.f32.mrf.mxu3 }
 0x93d   :  { %v1846_v37 = vadd.f32 %v9392_v56, %v1845_v39 }
 0x93e   :  { %v9374_v22 = vpop.eup %8098 }
 0x93f   :  { %v1958_v23 = vsel %vm631_vm1, %v9374_v22, 0.0  ;;  %1995 = vmatpush.msra.mxu2 %v1846_v37 }
 0x940   :  { %v2269_v50 = vpop.f32.mrf.mxu0 }
 0x941   :  { %v9360_v43 = vadd.f32 %v2269_v50, %v9326_v28 }
 0x943   :  { %v2314_v15 = vsel %vm631_vm1, %v9360_v43, -inf }
 0x944   :  { %2315 = vmax.xlane.f32.xlu2 %v2314_v15 }
 0x948   :  { %v2462_v16 = vpop.f32.mrf.mxu0 }
 0x949   :  { %v9368_v17 = vadd.f32 %v2462_v16, %v9314_v3 }
 0x94b   :  { %v2507_v18 = vsel %vm631_vm1, %v9368_v17, -inf }
 0x94c   :  { %2508 = vmax.xlane.f32.xlu1 %v2507_v18  ;;  %1956 = vadd.xlane.f32.xlu2 %v1955_v20  ;;  %v2108_v18 = vpop.f32.mrf.mxu1 }
 0x954   :  { %1959 = vadd.xlane.f32.xlu2 %v1958_v23  ;;  %v9437_v23 = vadd.f32 %v2108_v18, %v9419_v9  ;;  %v2305_v38 = vpop.f32.mrf.mxu1 }
 0x955   :  { %v2465_v53 = vpop.f32.mrf.mxu0 }
 0x956   :  { %v9379_v3 = vadd.f32 %v2465_v53, %v9326_v28  ;;  %v1844_v28 = vadd.f32 %v9392_v56, %v1843_v34 }
 0x958   :  { %v2510_v57 = vsel %vm631_vm1, %v9379_v3, -inf  ;;  %v9396_v33 = vpack.i.bf16 %v1844_v28, %v1846_v37  ;;  %1996 = vmatpush.msra.mxu2 %v1844_v28  ;;  %v1848_v28 = vpop.f32.mrf.mxu3 }
 0x959   :  { %2511 = vmax.xlane.f32.xlu1 %v2510_v57  ;;  %v2120_v57 = vsel %vm631_vm1, %v9437_v23, -inf }
 0x960   :  { %v1850_v39 = vpop.f32.mrf.mxu3 }
 0x961   :  { %1934 = vmax.xlane.f32.xlu1 %v1933_v31  ;;  %v1851_v37 = vadd.f32 %v9392_v56, %v1850_v39 }
 0x963   :  { %2024 = vmatpush.msrb.mxu3 %v1851_v37 }
 0x97a   :  { %7812 = vrot.lane.b32.xlu1 %v9396_v33, %s8610_s6 }
 0x99b   :  { %v2113_v46 = vpop.xlane.xlu2 %2112 }
 0x99c   :  { %v2123_v44 = vmax.f32 %v2113_v46, -1e+09 }
 0x99e   :  { %v2127_v29 = vsub.f32 %v2067_v61, %v2123_v44  ;;  %v1849_v44 = vadd.f32 %v9392_v56, %v1848_v28 }
 0x9a0   :  { %v2131_v48 = vmul.f32 1.442695, %v2127_v29  ;;  %2025 = vmatpush.msrb.mxu3 %v1849_v44  ;;  %v9452_v29 = vpack.i.bf16 %v1849_v44, %v1851_v37 }
 0x9a2   :  { %8100 = vpow2.f32 %v2131_v48 }
 0x9a3   :  { %v2116_v45 = vpop.xlane.xlu1 %2115 }
 0x9a4   :  { %v2124_v40 = vmax.f32 %v2116_v45, -1e+09 }
 0x9a6   :  { %v2128_v32 = vsub.f32 %v2070_v4, %v2124_v40 }
 0x9a8   :  { %v9400_v36 = vpop.eup %8100  ;;  %v2133_v54 = vmul.f32 1.442695, %v2128_v32 }
 0x9a9   :  { %v2139_v55 = vsel %vm631_vm1, %v9400_v36, 0.0 }
 0x9aa   :  { %8102 = vpow2.f32 %v2133_v54  ;;  %2140 = vadd.xlane.f32.xlu2 %v2139_v55  ;;  %v2308_v55 = vpop.f32.mrf.mxu1 }
 0x9af   :  { %v2313_v0 = vpop.xlane.xlu0 %2312 }
 0x9b0   :  { %v9407_v35 = vpop.eup %8102  ;;  %v2323_v1 = vmax.f32 %v2313_v0, -1e+09  ;;  %v9466_v0 = vadd.f32 %v2308_v55, %v9419_v9 }
 0x9b1   :  { %v2142_v5 = vsel %vm631_vm1, %v9407_v35, 0.0 }
 0x9b2   :  { %v2327_v61 = vsub.f32 %v9354_v30, %v2323_v1  ;;  %2143 = vadd.xlane.f32.xlu0 %v2142_v5  ;;  %2118 = vmax.xlane.f32.xlu2 %v2117_v47  ;;  %v2501_v1 = vpop.f32.mrf.mxu1  ;;  %v2320_v5 = vsel %vm631_vm1, %v9466_v0, -inf }
 0x9b3   :  { %v9471_v47 = vadd.f32 %v2501_v1, %v9384_v26 }
 0x9b4   :  { %v2331_v7 = vmul.f32 1.442695, %v2327_v61 }
 0x9b5   :  { %v2513_v61 = vsel %vm631_vm1, %v9471_v47, -inf }
 0x9b6   :  { %8104 = vpow2.f32 %v2331_v7 }
 0x9b7   :  { %v2316_v2 = vpop.xlane.xlu2 %2315 }
 0x9b8   :  { %v2324_v46 = vmax.f32 %v2316_v2, -1e+09 }
 0x9ba   :  { %v2504_v7 = vpop.f32.mrf.mxu1 }
 0x9bc   :  { %v9414_v4 = vpop.eup %8104 }
 0x9bd   :  { %v2339_v8 = vsel %vm631_vm1, %v9414_v4, 0.0 }
 0x9be   :  { %2340 = vadd.xlane.f32.xlu0 %v2339_v8  ;;  %v9476_v8 = vadd.f32 %v2504_v7, %v9419_v9 }
 0x9bf   :  { %v2509_v10 = vpop.xlane.xlu1 %2508  ;;  %v1957_v11 = vpop.xlane.xlu2 %1956 }
 0x9c0   :  { %v2519_v12 = vmax.f32 %v2509_v10, -1e+09  ;;  %8106 = vrcp.f32 %v1957_v11  ;;  %v2516_v10 = vsel %vm631_vm1, %v9476_v8, -inf }
 0x9c2   :  { %v2523_v30 = vsub.f32 %v9368_v17, %v2519_v12 }
 0x9c4   :  { %v2527_v52 = vmul.f32 1.442695, %v2523_v30 }
 0x9c6   :  { %v8107_v41 = vpop.eup %8106  ;;  %8108 = vpow2.f32 %v2527_v52  ;;  %1937 = vmax.xlane.f32.xlu0 %v1936_v6 }
 0x9c7   :  { %v1971_v50 = vmul.f32 %v8107_v41, %v9365_v62  ;;  %v1960_v14 = vpop.xlane.xlu2 %1959 }
 0x9c8   :  { %8110 = vrcp.f32 %v1960_v14 }
 0x9c9   :  { %6727 = vmatmul.msk.f32.vlgmr.msra.gmra.mxu2 %vm631_vm1, %v1971_v50 }
 0x9ca   :  { %7817 = vrot.lane.b32.xlu2 %v9452_v29, %s8610_s6 }
 0x9cc   :  { %v9429_v15 = vpop.eup %8108  ;;  %v9431_v42 = vpop.xlane.xlu1 %2511 }
 0x9cd   :  { %v2535_v16 = vsel %vm631_vm1, %v9429_v15, 0.0 }
 0x9ce   :  { %v8111_v17 = vpop.eup %8110  ;;  %2536 = vadd.xlane.f32.xlu1 %v2535_v16 }
 0x9cf   :  { %v1972_v20 = vmul.f32 %v8111_v17, %v9374_v22 }
 0x9d1   :  { %6728 = vmatmul.msk.f32.gmra.mxu2 %vm631_vm1, %v1972_v20 }
 0x9d4   :  { %v1935_v62 = vpop.xlane.xlu1 %1934 }
 0x9d5   :  { %v1941_v53 = vmax.f32 %v1935_v62, -1e+09 }
 0x9d6   :  { %2121 = vmax.xlane.f32.xlu1 %v2120_v57 }
 0x9d7   :  { %v1945_v27 = vsub.f32 %v9387_v24, %v1941_v53  ;;  %v2328_v24 = vsub.f32 %v9360_v43, %v2324_v46  ;;  %v9461_v43 = vadd.f32 %v2305_v38, %v9384_v26 }
 0x9d9   :  { %v1951_v31 = vmul.f32 1.442695, %v1945_v27  ;;  %v2333_v48 = vmul.f32 1.442695, %v2328_v24  ;;  %v2317_v60 = vsel %vm631_vm1, %v9461_v43, -inf }
 0x9da   :  { %7822 = vrot.lane.b32.xlu0 %v9396_v33, %s8601_s15 }
 0x9db   :  { %8112 = vpow2.f32 %v1951_v31 }
 0x9dc   :  { %8114 = vpow2.f32 %v2333_v48 }
 0x9e1   :  { %v9445_v34 = vpop.eup %8112 }
 0x9e2   :  { %v1961_v22 = vsel %vm631_vm1, %v9445_v34, 0.0  ;;  %v9456_v45 = vpop.eup %8114 }
 0x9e3   :  { %1962 = vadd.xlane.f32.xlu1 %v1961_v22  ;;  %v2342_v40 = vsel %vm631_vm1, %v9456_v45, 0.0 }
 0x9ec   :  { %v7813_v32 = vpop.permute.xlu1 %7812 }
 0x9ed   :  { %v7814_v56 = vunpack.i.l.bf16 %v7813_v32  ;;  %v7815_v54 = vunpack.i.h.bf16 %v7813_v32 }
 0x9ef   :  { %2187 = vmatpush.msrb.mxu2 %v7814_v56 }
 0x9f1   :  { %2188 = vmatpush.msrb.mxu2 %v7815_v54 }
 0xa04   :  { %2343 = vadd.xlane.f32.xlu0 %v2342_v40 }
 0xa0c   :  { %2318 = vmax.xlane.f32.xlu0 %v2317_v60 }
 0xa14   :  { %2321 = vmax.xlane.f32.xlu0 %v2320_v5 }
 0xa1c   :  { %2514 = vmax.xlane.f32.xlu0 %v2513_v61 }
 0xa1d   :  { %v2141_v2 = vpop.xlane.xlu2 %2140 }
 0xa1e   :  { %8116 = vrcp.f32 %v2141_v2 }
 0xa24   :  { %v8117_v11 = vpop.eup %8116  ;;  %2517 = vmax.xlane.f32.xlu0 %v2516_v10 }
 0xa25   :  { %v2155_v12 = vmul.f32 %v8117_v11, %v9400_v36  ;;  %v2144_v30 = vpop.xlane.xlu0 %2143  ;;  %v2119_v41 = vpop.xlane.xlu2 %2118 }
 0xa26   :  { %8118 = vrcp.f32 %v2144_v30  ;;  %v2125_v50 = vmax.f32 %v2119_v41, -1e+09 }
 0xa27   :  { %6739 = vmatmul.msk.f32.vlgmr.msrb.gmra.mxu2 %vm631_vm1, %v2155_v12 }
 0xa28   :  { %v2129_v36 = vsub.f32 %v9405_v63, %v2125_v50 }
 0xa2a   :  { %v2135_v20 = vmul.f32 1.442695, %v2129_v36 }
 0xa2c   :  { %v8119_v26 = vpop.eup %8118 }
 0xa2d   :  { %v2156_v52 = vmul.f32 %v8119_v26, %v9407_v35  ;;  %v2520_v35 = vmax.f32 %v9431_v42, -1e+09  ;;  %v7818_v44 = vpop.permute.xlu2 %7817 }
 0xa2e   :  { %v7820_v24 = vunpack.i.h.bf16 %v7818_v44  ;;  %v7819_v48 = vunpack.i.l.bf16 %v7818_v44 }
 0xa2f   :  { %6740 = vmatmul.msk.f32.gmra.mxu2 %vm631_vm1, %v2156_v52  ;;  %v2524_v53 = vsub.f32 %v9379_v3, %v2520_v35 }
 0xa30   :  { %2224 = vmatpush.msra.mxu3 %v7819_v48 }
 0xa31   :  { %v2341_v6 = vpop.xlane.xlu0 %2340  ;;  %v2529_v57 = vmul.f32 1.442695, %v2524_v53 }
 0xa32   :  { %2225 = vmatpush.msra.mxu3 %v7820_v24 }
 0xa38   :  { %7832 = vrot.lane.b32.xlu0 %v9396_v33, %s8611_s16 }
 0xa39   :  { %v1938_v9 = vpop.xlane.xlu0 %1937 }
 0xa3a   :  { %v1942_v14 = vmax.f32 %v1938_v9, -1e+09 }
 0xa3c   :  { %v1946_v16 = vsub.f32 %v9422_v13, %v1942_v14 }
 0xa3e   :  { %v1953_v17 = vmul.f32 1.442695, %v1946_v16 }
 0xa40   :  { %8120 = vpow2.f32 %v1953_v17 }
 0xa41   :  { %v9488_v18 = vpop.xlane.xlu1 %2536  ;;  %8122 = vpow2.f32 %v2135_v20 }
 0xa42   :  { %8124 = vrcp.f32 %v2341_v6 }
 0xa43   :  { %8126 = vpow2.f32 %v2529_v57 }
 0xa46   :  { %v9491_v62 = vpop.eup %8120 }
 0xa47   :  { %v1964_v33 = vsel %vm631_vm1, %v9491_v62, 0.0  ;;  %v9496_v27 = vpop.eup %8122 }
 0xa48   :  { %1965 = vadd.xlane.f32.xlu2 %v1964_v33  ;;  %v8125_v42 = vpop.eup %8124  ;;  %v2145_v3 = vsel %vm631_vm1, %v9496_v27, 0.0 }
 0xa49   :  { %v2122_v13 = vpop.xlane.xlu1 %2121  ;;  %v2355_v46 = vmul.f32 %v8125_v42, %v9414_v4 }
 0xa4a   :  { %v2126_v63 = vmax.f32 %v2122_v13, -1e+09 }
 0xa4c   :  { %v2130_v31 = vsub.f32 %v9437_v23, %v2126_v63  ;;  %v7823_v22 = vpop.permute.xlu0 %7822  ;;  %v9503_v23 = vpop.eup %8126 }
 0xa4d   :  { %v7824_v28 = vunpack.i.l.bf16 %v7823_v22  ;;  %v7825_v37 = vunpack.i.h.bf16 %v7823_v22  ;;  %v2538_v4 = vsel %vm631_vm1, %v9503_v23, 0.0  ;;  %v9528_v50 = vpop.f32.mrf.mxu2 }
 0xa4e   :  { %v2137_v39 = vmul.f32 1.442695, %v2130_v31 }
 0xa4f   :  { %2385 = vmatpush.msra.mxu2 %v7824_v28 }
 0xa50   :  { %8128 = vpow2.f32 %v2137_v39  ;;  %2146 = vadd.xlane.f32.xlu2 %v2145_v3 }
 0xa51   :  { %2386 = vmatpush.msra.mxu2 %v7825_v37 }
 0xa52   :  { %6751 = vmatmul.msk.f32.vlgmr.msra.gmra.mxu2 %vm631_vm1, %v2355_v46 }
 0xa55   :  { %v9535_v35 = vpop.f32.mrf.mxu2 }
 0xa56   :  { %v9505_v38 = vpop.eup %8128  ;;  %v1963_v40 = vpop.xlane.xlu1 %1962 }
 0xa57   :  { %8130 = vrcp.f32 %v1963_v40  ;;  %v2148_v32 = vsel %vm631_vm1, %v9505_v38, 0.0 }
 0xa58   :  { %2149 = vadd.xlane.f32.xlu1 %v2148_v32  ;;  %2539 = vadd.xlane.f32.xlu2 %v2538_v4 }
 0xa5d   :  { %v8131_v56 = vpop.eup %8130 }
 0xa5e   :  { %v1973_v54 = vmul.f32 %v8131_v56, %v9445_v34 }
 0xa60   :  { %6729 = vmatmul.msk.f32.vlgmr.msrb.gmra.mxu3 %vm631_vm1, %v1973_v54 }
 0xa71   :  { %7827 = vrot.lane.b32.xlu1 %v9452_v29, %s8601_s15 }
 0xa77   :  { %v2344_v55 = vpop.xlane.xlu0 %2343 }
 0xa78   :  { %8132 = vrcp.f32 %v2344_v55 }
 0xa7e   :  { %v8133_v60 = vpop.eup %8132 }
 0xa7f   :  { %v2319_v1 = vpop.xlane.xlu0 %2318  ;;  %v2356_v5 = vmul.f32 %v8133_v60, %v9456_v45 }
 0xa80   :  { %v2325_v61 = vmax.f32 %v2319_v1, -1e+09 }
 0xa81   :  { %6752 = vmatmul.msk.f32.gmra.mxu2 %vm631_vm1, %v2356_v5 }
 0xa82   :  { %v2329_v7 = vsub.f32 %v9461_v43, %v2325_v61 }
 0xa84   :  { %v2335_v2 = vmul.f32 1.442695, %v2329_v7 }
 0xa86   :  { %8134 = vpow2.f32 %v2335_v2 }
 0xa87   :  { %v2322_v10 = vpop.xlane.xlu0 %2321 }
 0xa88   :  { %v2326_v34 = vmax.f32 %v2322_v10, -1e+09 }
 0xa8a   :  { %v2330_v11 = vsub.f32 %v9466_v0, %v2326_v34 }
 0xa8c   :  { %v9519_v12 = vpop.eup %8134  ;;  %v2337_v30 = vmul.f32 1.442695, %v2330_v11 }
 0xa8d   :  { %v2345_v26 = vsel %vm631_vm1, %v9519_v12, 0.0 }
 0xa8e   :  { %8136 = vpow2.f32 %v2337_v30  ;;  %2346 = vadd.xlane.f32.xlu2 %v2345_v26 }
 0xa8f   :  { %v2515_v45 = vpop.xlane.xlu0 %2514 }
 0xa90   :  { %v2521_v52 = vmax.f32 %v2515_v45, -1e+09 }
 0xa92   :  { %v2525_v6 = vsub.f32 %v9471_v47, %v2521_v52 }
 0xa94   :  { %v9524_v41 = vpop.eup %8136  ;;  %v2531_v43 = vmul.f32 1.442695, %v2525_v6 }
 0xa95   :  { %v2348_v9 = vsel %vm631_vm1, %v9524_v41, 0.0 }
 0xa96   :  { %8138 = vpow2.f32 %v2531_v43  ;;  %2349 = vadd.xlane.f32.xlu2 %v2348_v9 }
 0xa97   :  { %v2518_v0 = vpop.xlane.xlu0 %2517 }
 0xa98   :  { %v2522_v14 = vmax.f32 %v2518_v0, -1e+09 }
 0xa9a   :  { %v2526_v16 = vsub.f32 %v9476_v8, %v2522_v14 }
 0xa9c   :  { %v9531_v36 = vpop.eup %8138  ;;  %v2533_v17 = vmul.f32 1.442695, %v2526_v16  ;;  %v7566_v16 = vld [vmem:[#allocation14 + $0x38] sm:$0xff] }
 0xa9d   :  { %v2541_v47 = vsel %vm631_vm1, %v9531_v36, 0.0  ;;  %2738 = vmatpush.bf16.msra.mxu0 %v7566_v16 }
 0xa9e   :  { %8140 = vpow2.f32 %v2533_v17  ;;  %2542 = vadd.xlane.f32.xlu1 %v2541_v47  ;;  %v7565_v47 = vld [vmem:[#allocation14 + $0x30] sm:$0xff] }
 0xa9f   :  { %8142 = vrcp.f32 %v9488_v18 }
 0xaa1   :  { %2739 = vmatpush.bf16.msra.mxu0 %v7565_v47 }
 0xaa4   :  { %v9537_v20 = vpop.eup %8140 }
 0xaa5   :  { %v2544_v53 = vsel %vm631_vm1, %v9537_v20, 0.0  ;;  %v8143_v13 = vpop.eup %8142 }
 0xaa6   :  { %2545 = vadd.xlane.f32.xlu0 %v2544_v53  ;;  %v2551_v31 = vmul.f32 %v8143_v13, %v9429_v15  ;;  %v7564_v53 = vld [vmem:[#allocation14 + $0x28] sm:$0xff]  ;;  %v7562_v13 = vld [vmem:[#allocation14 + $0x18] sm:$0xff] }
 0xaa7   :  { %2740 = vmatpush.bf16.msra.mxu0 %v7564_v53 }
 0xaaa   :  { %v7833_v33 = vpop.permute.xlu0 %7832  ;;  %v2190_v8 = vpop.f32.mrf.mxu2 }
 0xaab   :  { %v7834_v57 = vunpack.i.l.bf16 %v7833_v33  ;;  %v7835_v63 = vunpack.i.h.bf16 %v7833_v33  ;;  %v7563_v33 = vld [vmem:[#allocation14 + $0x20] sm:$0xff] }
 0xaac   :  { %2741 = vmatpush.bf16.msra.mxu0 %v7563_v33 }
 0xaad   :  { %2581 = vmatpush.msrb.mxu2 %v7834_v57  ;;  %v7561_v57 = vld [vmem:[#allocation14 + $0x10] sm:$0xff] }
 0xaae   :  { %7837 = vrot.lane.b32.xlu2 %v9452_v29, %s8611_s16 }
 0xaaf   :  { %2582 = vmatpush.msrb.mxu2 %v7835_v63 }
 0xab0   :  { %6763 = vmatmul.msk.f32.vlgmr.msrb.gmra.mxu2 %vm631_vm1, %v2551_v31  ;;  %2742 = vmatpush.bf16.msra.mxu0 %v7562_v13 }
 0xab2   :  { %v2193_v22 = vpop.f32.mrf.mxu2 }
 0xab3   :  { %v7841_v18 = vpack.i.bf16 %v2193_v22, %v2190_v8  ;;  %v7560_v22 = vld [vmem:[#allocation14 + $0x8] sm:$0xff] }
 0xab4   :  { %2743 = vmatpush.bf16.msra.mxu0 %v7561_v57 }
 0xab6   :  { %7842 = vrot.lane.b32.xlu2 %v7841_v18, %s8611_s16  ;;  %v7559_v18 = vld [vmem:[#allocation14] sm:$0xff] }
 0xab8   :  { %2744 = vmatpush.bf16.msra.mxu0 %v7560_v22 }
 0xabb   :  { %v1966_v42 = vpop.xlane.xlu2 %1965 }
 0xabc   :  { %8144 = vrcp.f32 %v1966_v42  ;;  %2745 = vmatpush.bf16.msra.mxu0 %v7559_v18 }
 0xac2   :  { %v8145_v28 = vpop.eup %8144 }
 0xac3   :  { %v2147_v39 = vpop.xlane.xlu2 %2146  ;;  %v1974_v37 = vmul.f32 %v8145_v28, %v9491_v62 }
 0xac4   :  { %8146 = vrcp.f32 %v2147_v39 }
 0xac5   :  { %6730 = vmatmul.msk.f32.gmra.mxu3 %vm631_vm1, %v1974_v37 }
 0xaca   :  { %v8147_v15 = vpop.eup %8146 }
 0xacb   :  { %v2157_v3 = vmul.f32 %v8147_v15, %v9496_v27  ;;  %v2150_v29 = vpop.xlane.xlu1 %2149  ;;  %v2540_v46 = vpop.xlane.xlu2 %2539 }
 0xacc   :  { %8148 = vrcp.f32 %v2150_v29 }
 0xacd   :  { %8150 = vrcp.f32 %v2540_v46  ;;  %6741 = vmatmul.msk.f32.vlgmr.msra.gmra.mxu3 %vm631_vm1, %v2157_v3 }
 0xad2   :  { %v8149_v44 = vpop.eup %8148 }
 0xad3   :  { %v8151_v24 = vpop.eup %8150  ;;  %v2158_v48 = vmul.f32 %v8149_v44, %v9505_v38 }
 0xad4   :  { %v2552_v40 = vmul.f32 %v8151_v24, %v9503_v23 }
 0xad5   :  { %6742 = vmatmul.msk.f32.gmra.mxu3 %vm631_vm1, %v2158_v48  ;;  %v2388_v27 = vpop.f32.mrf.mxu2 }
 0xad6   :  { %6764 = vmatmul.msk.f32.gmra.mxu2 %vm631_vm1, %v2552_v40 }
 0xae3   :  { %v7828_v62 = vpop.permute.xlu1 %7827  ;;  %v2027_v45 = vpop.f32.mrf.mxu3 }
 0xae4   :  { %v7829_v32 = vunpack.i.l.bf16 %v7828_v62  ;;  %v7830_v4 = vunpack.i.h.bf16 %v7828_v62 }
 0xae6   :  { %2420 = vmatpush.msrb.mxu3 %v7829_v32 }
 0xae8   :  { %2421 = vmatpush.msrb.mxu3 %v7830_v4 }
 0xb01   :  { %v2347_v56 = vpop.xlane.xlu2 %2346 }
 0xb02   :  { %8152 = vrcp.f32 %v2347_v56 }
 0xb04   :  { %v2391_v54 = vpop.f32.mrf.mxu2 }
 0xb05   :  { %v7846_v55 = vpack.i.bf16 %v2391_v54, %v2388_v27 }
 0xb07   :  { %7847 = vrot.lane.b32.xlu2 %v7846_v55, %s8601_s15 }
 0xb08   :  { %v8153_v60 = vpop.eup %8152 }
 0xb09   :  { %v2357_v38 = vmul.f32 %v8153_v60, %v9519_v12  ;;  %v2350_v23 = vpop.xlane.xlu2 %2349 }
 0xb0a   :  { %8154 = vrcp.f32 %v2350_v23 }
 0xb0b   :  { %6753 = vmatmul.msk.f32.vlgmr.msrb.gmra.mxu3 %vm631_vm1, %v2357_v38 }
 0xb10   :  { %v8155_v1 = vpop.eup %8154 }
 0xb11   :  { %v2543_v5 = vpop.xlane.xlu1 %2542  ;;  %v7838_v61 = vpop.permute.xlu2 %7837  ;;  %v2358_v7 = vmul.f32 %v8155_v1, %v9524_v41 }
 0xb12   :  { %8156 = vrcp.f32 %v2543_v5  ;;  %v7839_v2 = vunpack.i.l.bf16 %v7838_v61  ;;  %v7840_v10 = vunpack.i.h.bf16 %v7838_v61 }
 0xb13   :  { %6754 = vmatmul.msk.f32.gmra.mxu3 %vm631_vm1, %v2358_v7 }
 0xb14   :  { %2616 = vmatpush.msra.mxu3 %v7839_v2 }
 0xb16   :  { %2617 = vmatpush.msra.mxu3 %v7840_v10 }
 0xb18   :  { %v8157_v34 = vpop.eup %8156 }
 0xb19   :  { %v2553_v11 = vmul.f32 %v8157_v34, %v9531_v36  ;;  %v2546_v12 = vpop.xlane.xlu0 %2545  ;;  %v7843_v42 = vpop.permute.xlu2 %7842 }
 0xb1a   :  { %8158 = vrcp.f32 %v2546_v12  ;;  %v7845_v39 = vunpack.i.h.bf16 %v7843_v42  ;;  %v7844_v37 = vunpack.i.l.bf16 %v7843_v42  ;;  %v8000_v12 = vld [vmem:[%s10522_s18] ss:$0 sm:$0xff]  ;;  %v6857_v42 = vld [vmem:[%s10523_s22 + $0x70] sm:$0xf] }
 0xb1b   :  { %6765 = vmatmul.msk.f32.vlgmr.msra.gmra.mxu3 %vm631_vm1, %v2553_v11 }
 0xb1c   :  { %v2674_v46 = vsel %vm560_vm0, %v9535_v35, %v7845_v39  ;;  %v2673_v44 = vsel %vm560_vm0, %v9528_v50, %v7844_v37  ;;  %v7581_v39 = vld [vmem:[%s10523_s22 + $0x74] sm:$0xf] }
 0xb20   :  { %v8159_v30 = vpop.eup %8158 }
 0xb21   :  { %v2554_v26 = vmul.f32 %v8159_v30, %v9537_v20 }
 0xb23   :  { %6766 = vmatmul.msk.f32.gmra.mxu3 %vm631_vm1, %v2554_v26 }
 0xb33   :  { %v2584_v41 = vpop.f32.mrf.mxu2 }
 0xb48   :  { %v2030_v52 = vpop.f32.mrf.mxu3 }
 0xb50   :  { %v2227_v6 = vpop.f32.mrf.mxu3 }
 0xb58   :  { %v2230_v43 = vpop.f32.mrf.mxu3 }
 0xb59   :  { %v7856_v9 = vpack.i.bf16 %v2230_v43, %v2227_v6  ;;  %v2587_v0 = vpop.f32.mrf.mxu2 }
 0xb5a   :  { %v7851_v14 = vpack.i.bf16 %v2587_v0, %v2584_v41 }
 0xb5b   :  { %7857 = vrot.lane.b32.xlu2 %v7856_v9, %s8611_s16 }
 0xb5c   :  { %7852 = vrot.lane.b32.xlu1 %v7851_v14, %s8610_s6 }
 0xb61   :  { %v7848_v28 = vpop.permute.xlu2 %7847 }
 0xb62   :  { %v7850_v15 = vunpack.i.h.bf16 %v7848_v28  ;;  %v7849_v3 = vunpack.i.l.bf16 %v7848_v28  ;;  %v7582_v28 = vld [vmem:[%s10523_s22 + $0x74] sm:$0xf0] }
 0xb63   :  { %v6858_v37 = vor.u32 %v7582_v28, %v6857_v42 }
 0xb64   :  { %v2677_v40 = vsel %vm1382_vm2, %v2673_v44, %v7849_v3  ;;  %v2678_v62 = vsel %vm1382_vm2, %v2674_v46, %v7850_v15  ;;  %v6859_v15 = vld [vmem:[%s10523_s22 + $0x78] sm:$0xf0]  ;;  %v7580_v46 = vld [vmem:[%s10523_s22 + $0x64] sm:$0xf0]  ;;  %v7579_v44 = vld [vmem:[%s10523_s22 + $0x64] sm:$0xf] }
 0xb65   :  { %v6862_v3 = vor.u32 %v7581_v39, %v6859_v15  ;;  %2994 = vmatpush.bf16.msra.mxu1 %v6858_v37 }
 0xb67   :  { %3013 = vmatpush.bf16.msra.mxu2 %v6862_v3 }
 0xb8e   :  { %v2423_v36 = vpop.f32.mrf.mxu3 }
 0xb96   :  { %v2426_v17 = vpop.f32.mrf.mxu3 }
 0xb97   :  { %v7861_v20 = vpack.i.bf16 %v2426_v17, %v2423_v36 }
 0xb99   :  { %7862 = vrot.lane.b32.xlu0 %v7861_v20, %s8601_s15 }
 0xb9e   :  { %v2619_v8 = vpop.f32.mrf.mxu3 }
 0xba6   :  { %v2622_v63 = vpop.f32.mrf.mxu3 }
 0xba7   :  { %v7866_v31 = vpack.i.bf16 %v2622_v63, %v2619_v8 }
 0xba9   :  { %7867 = vrot.lane.b32.xlu2 %v7866_v31, %s8610_s6 }
 0xbb5   :  { %v7858_v56 = vpop.permute.xlu2 %7857 }
 0xbb6   :  { %v7860_v54 = vunpack.i.h.bf16 %v7858_v56  ;;  %v7859_v55 = vunpack.i.l.bf16 %v7858_v56  ;;  %v6843_v56 = vld [vmem:[%s10523_s22 + $0x58] sm:$0xf0] }
 0xbb8   :  { %v2675_v5 = vsel %vm560_vm0, %v2027_v45, %v7859_v55  ;;  %v2676_v61 = vsel %vm560_vm0, %v2030_v52, %v7860_v54  ;;  %v6833_v55 = vld [vmem:[%s10523_s22 + $0x40] sm:$0xf] }
 0xbce   :  { %v7853_v29 = vpop.permute.xlu1 %7852 }
 0xbcf   :  { %v7855_v24 = vunpack.i.h.bf16 %v7853_v29  ;;  %v7854_v48 = vunpack.i.l.bf16 %v7853_v29  ;;  %v6849_v29 = vld [vmem:[%s10523_s22 + $0x60] sm:$0xf] }
 0xbd1   :  { %v2681_v32 = vsel %vm1387_vm3, %v2677_v40, %v7854_v48  ;;  %v2682_v4 = vsel %vm1387_vm3, %v2678_v62, %v7855_v24  ;;  %v6850_v24 = vor.u32 %v7580_v46, %v6849_v29  ;;  %v6851_v48 = vld [vmem:[%s10523_s22 + $0x68] sm:$0xf0]  ;;  %v6841_v62 = vld [vmem:[%s10523_s22 + $0x50] sm:$0xf] }
 0xbd2   :  { %v2685_v27 = vpack.c.bf16 %v2682_v4, %v2681_v32  ;;  %v6854_v40 = vor.u32 %v7579_v44, %v6851_v48  ;;  %v7578_v32 = vld [vmem:[%s10523_s22 + $0x54] sm:$0xf0]  ;;  %v7577_v4 = vld [vmem:[%s10523_s22 + $0x54] sm:$0xf]  ;;  %v8001_v48 = vld [vmem:[%s10524_s27] ss:$0 sm:$0xff] }
 0xbd3   :  { %2995 = vmatpush.bf16.msra.mxu1 %v6850_v24  ;;  %v6846_v54 = vor.u32 %v7577_v4, %v6843_v56 }
 0xbd4   :  { %2746 = vmatmul.bf16.vlgmr.msra.gmra.mxu0 %v2685_v27  ;;  %3014 = vmatpush.bf16.msra.mxu2 %v6854_v40  ;;  %v6842_v27 = vor.u32 %v7578_v32, %v6841_v62 }
 0xbd7   :  { %2996 = vmatpush.bf16.msra.mxu1 %v6842_v27  ;;  %v8002_v27 = vld [vmem:[%s10525_s29] ss:$0 sm:$0xff] }
 0xbd8   :  { %3015 = vmatpush.bf16.msra.mxu2 %v6846_v54 }
 0xc03   :  { %v7868_v35 = vpop.permute.xlu2 %7867 }
 0xc04   :  { %v7870_v23 = vunpack.i.h.bf16 %v7868_v35  ;;  %v7869_v1 = vunpack.i.l.bf16 %v7868_v35  ;;  %v7576_v35 = vld [vmem:[%s10523_s22 + $0x44] sm:$0xf0] }
 0xc0b   :  { %v7863_v60 = vpop.permute.xlu0 %7862 }
 0xc0c   :  { %v7865_v38 = vunpack.i.h.bf16 %v7863_v60  ;;  %v7864_v50 = vunpack.i.l.bf16 %v7863_v60  ;;  %v7575_v60 = vld [vmem:[%s10523_s22 + $0x44] sm:$0xf] }
 0xc0e   :  { %v2679_v7 = vsel %vm1382_vm2, %v2675_v5, %v7864_v50  ;;  %v2680_v2 = vsel %vm1382_vm2, %v2676_v61, %v7865_v38  ;;  %v6834_v38 = vor.u32 %v7576_v35, %v6833_v55  ;;  %v6835_v50 = vld [vmem:[%s10523_s22 + $0x48] sm:$0xf0]  ;;  %v7574_v5 = vld [vmem:[%s10523_s22 + $0x34] sm:$0xf0]  ;;  %v7573_v61 = vld [vmem:[%s10523_s22 + $0x34] sm:$0xf] }
 0xc0f   :  { %v2683_v10 = vsel %vm1387_vm3, %v2679_v7, %v7869_v1  ;;  %v2684_v34 = vsel %vm1387_vm3, %v2680_v2, %v7870_v23  ;;  %v6838_v23 = vor.u32 %v7575_v60, %v6835_v50  ;;  %v6825_v1 = vld [vmem:[%s10523_s22 + $0x30] sm:$0xf]  ;;  %v6827_v2 = vld [vmem:[%s10523_s22 + $0x38] sm:$0xf0] }
 0xc10   :  { %v2686_v11 = vpack.c.bf16 %v2684_v34, %v2683_v10  ;;  %2997 = vmatpush.bf16.msra.mxu1 %v6834_v38  ;;  %v6826_v7 = vor.u32 %v7574_v5, %v6825_v1  ;;  %v6830_v10 = vor.u32 %v7573_v61, %v6827_v2  ;;  %v6817_v34 = vld [vmem:[%s10523_s22 + $0x20] sm:$0xf]  ;;  %v7598_v50 = vld [vmem:[%s10526_s12 + $0x78] sm:$0xff]  ;;  %v7589_v5 = vld [vmem:[%s10526_s12 + $0x30] sm:$0xff] }
 0xc11   :  { %3016 = vmatpush.bf16.msra.mxu2 %v6838_v23  ;;  %3162 = vmatpush.bf16.msrb.mxu0 %v7598_v50  ;;  %v7597_v61 = vld [vmem:[%s10526_s12 + $0x70] sm:$0xff] }
 0xc12   :  { %2751 = vmatmul.bf16.gmra.mxu0 %v2686_v11  ;;  %v7572_v11 = vld [vmem:[%s10523_s22 + $0x24] sm:$0xf0] }
 0xc14   :  { %2998 = vmatpush.bf16.msra.mxu1 %v6826_v7 }
 0xc15   :  { %3017 = vmatpush.bf16.msra.mxu2 %v6830_v10  ;;  %3163 = vmatpush.bf16.msrb.mxu0 %v7597_v61 }
 0xc51   :  { %v2747_v30 = vpop.f32.mrf.mxu0 }
 0xc52   :  { %v2748_v26 = vadd.f32 %v8000_v12, %v2747_v30  ;;  %v6818_v30 = vor.u32 %v7572_v11, %v6817_v34  ;;  %v7588_v34 = vld [vmem:[%s10526_s12 + $0x28] sm:$0xff] }
 0xc53   :  { %v7596_v11 = vld [vmem:[%s10526_s12 + $0x68] sm:$0xff] }
 0xc54   :  { %v2757_v6 = vadd.f32 %v2748_v26, %v9259_v49  ;;  %v6819_v26 = vld [vmem:[%s10523_s22 + $0x28] sm:$0xf0]  ;;  %2999 = vmatpush.bf16.msra.mxu1 %v6818_v30  ;;  %3164 = vmatpush.bf16.msrb.mxu0 %v7596_v11 }
 0xc56   :  { %2763 = vadd.xlane.f32.xlu2 %v2757_v6 }
 0xc59   :  { %v2749_v41 = vpop.f32.mrf.mxu0 }
 0xc5a   :  { %v2750_v45 = vadd.f32 %v8000_v12, %v2749_v41  ;;  %v6809_v41 = vld [vmem:[%s10523_s22 + $0x10] sm:$0xf] }
 0xc5c   :  { %v2758_v52 = vadd.f32 %v2750_v45, %v9261_v25  ;;  %v7570_v45 = vld [vmem:[%s10523_s22 + $0x14] sm:$0xf0] }
 0xc5e   :  { %2765 = vadd.xlane.f32.xlu0 %v2758_v52 }
 0xc8f   :  { %v2752_v43 = vpop.f32.mrf.mxu0 }
 0xc90   :  { %v2753_v9 = vadd.f32 %v8000_v12, %v2752_v43  ;;  %v6810_v43 = vor.u32 %v7570_v45, %v6809_v41 }
 0xc92   :  { %v2759_v0 = vadd.f32 %v2753_v9, %v9267_v58  ;;  %v6811_v9 = vld [vmem:[%s10523_s22 + $0x18] sm:$0xf0]  ;;  %3000 = vmatpush.bf16.msra.mxu1 %v6810_v43 }
 0xc94   :  { %2767 = vadd.xlane.f32.xlu1 %v2759_v0 }
 0xc97   :  { %v2754_v14 = vpop.f32.mrf.mxu0 }
 0xc98   :  { %v2755_v16 = vadd.f32 %v8000_v12, %v2754_v14  ;;  %v7571_v12 = vld [vmem:[%s10523_s22 + $0x24] sm:$0xf]  ;;  %v6801_v14 = vld [vmem:[%s10523_s22] sm:$0xf] }
 0xc9a   :  { %v2760_v36 = vadd.f32 %v2755_v16, %v9269_v59  ;;  %v7568_v16 = vld [vmem:[%s10523_s22 + $0x4] sm:$0xf0] }
 0xc9c   :  { %2769 = vadd.xlane.f32.xlu2 %v2760_v36 }
 0xcc9   :  { %v2764_v17 = vpop.xlane.xlu2 %2763 }
 0xcca   :  { %v2771_v47 = vmul.f32 %v2764_v17, %v9219_v21 }
 0xccc   :  { %v9588_v49 = vsub.f32 %v2757_v6, %v2771_v47  ;;  %v6822_v6 = vor.u32 %v7571_v12, %v6819_v26  ;;  %v6802_v47 = vor.u32 %v7568_v16, %v6801_v14  ;;  %v7587_v26 = vld [vmem:[%s10526_s12 + $0x20] sm:$0xff] }
 0xcce   :  { %v2779_v20 = vmul.f32 %v9588_v49, %v9588_v49  ;;  %3018 = vmatpush.bf16.msra.mxu2 %v6822_v6  ;;  %3001 = vmatpush.bf16.msra.mxu1 %v6802_v47 }
 0xcd0   :  { %2783 = vadd.xlane.f32.xlu2 %v2779_v20  ;;  %v6803_v20 = vld [vmem:[%s10523_s22 + $0x8] sm:$0xf0] }
 0xcd1   :  { %v2766_v25 = vpop.xlane.xlu0 %2765 }
 0xcd2   :  { %v2772_v58 = vmul.f32 %v2766_v25, %v9219_v21 }
 0xcd4   :  { %v9593_v53 = vsub.f32 %v2758_v52, %v2772_v58  ;;  %v7569_v52 = vld [vmem:[%s10523_s22 + $0x14] sm:$0xf] }
 0xcd6   :  { %v2780_v59 = vmul.f32 %v9593_v53, %v9593_v53 }
 0xcd8   :  { %2785 = vadd.xlane.f32.xlu0 %v2780_v59 }
 0xd07   :  { %v2768_v33 = vpop.xlane.xlu1 %2767 }
 0xd08   :  { %v2773_v8 = vmul.f32 %v2768_v33, %v9219_v21 }
 0xd0a   :  { %v9598_v13 = vsub.f32 %v2759_v0, %v2773_v8  ;;  %v6814_v0 = vor.u32 %v7569_v52, %v6811_v9 }
 0xd0c   :  { %v2781_v57 = vmul.f32 %v9598_v13, %v9598_v13  ;;  %3019 = vmatpush.bf16.msra.mxu2 %v6814_v0 }
 0xd0e   :  { %2787 = vadd.xlane.f32.xlu1 %v2781_v57 }
 0xd0f   :  { %v2770_v63 = vpop.xlane.xlu2 %2769 }
 0xd10   :  { %v2774_v31 = vmul.f32 %v2770_v63, %v9219_v21 }
 0xd12   :  { %v9603_v22 = vsub.f32 %v2760_v36, %v2774_v31  ;;  %v7567_v36 = vld [vmem:[%s10523_s22 + $0x4] sm:$0xf] }
 0xd13   :  { %v6806_v58 = vor.u32 %v7567_v36, %v6803_v20 }
 0xd14   :  { %v2782_v18 = vmul.f32 %v9603_v22, %v9603_v22 }
 0xd15   :  { %3020 = vmatpush.bf16.msra.mxu2 %v6806_v58 }
 0xd16   :  { %2789 = vadd.xlane.f32.xlu2 %v2782_v18 }
 0xd43   :  { %v2784_v17 = vpop.xlane.xlu2 %2783 }
 0xd44   :  { %v2791_v25 = vmul.f32 %v2784_v17, %v9219_v21 }
 0xd46   :  { %v2795_v59 = vadd.f32 1e-05, %v2791_v25 }
 0xd48   :  { %8160 = vrsqrt.f32 %v2795_v59  ;;  %vm2805_vm6 = vweird.f32 %v2795_v59 }
 0xd4b   :  { %v2786_v33 = vpop.xlane.xlu0 %2785 }
 0xd4c   :  { %v2792_v8 = vmul.f32 %v2786_v33, %v9219_v21  ;;  %v7586_v33 = vld [vmem:[%s10526_s12 + $0x18] sm:$0xff] }
 0xd4e   :  { %v8161_v57 = vpop.eup %8160  ;;  %v2796_v63 = vadd.f32 1e-05, %v2792_v8  ;;  %v7595_v8 = vld [vmem:[%s10526_s12 + $0x60] sm:$0xff] }
 0xd4f   :  { %v2800_v31 = vmul.f32 %v8161_v57, %v2795_v59  ;;  %vm2806_vm5 = vweird.f32 %v8161_v57  ;;  %3165 = vmatpush.bf16.msrb.mxu0 %v7595_v8 }
 0xd50   :  { %8162 = vrsqrt.f32 %v2796_v63  ;;  %vm2807_vm7 = vmor %vm2805_vm6, %vm2806_vm5  ;;  %vm2815_vm9 = vweird.f32 %v2796_v63 }
 0xd51   :  { %v2801_v18 = vmul.f32 %v8161_v57, %v2800_v31  ;;  %v7593_v31 = vld [vmem:[%s10526_s12 + $0x50] sm:$0xff] }
 0xd53   :  { %v2802_v42 = vmul.f32 0.5, %v2801_v18  ;;  %v7583_v18 = vld [vmem:[%s10526_s12] sm:$0xff] }
 0xd55   :  { %v2803_v28 = vsub.f32 1.5, %v2802_v42  ;;  %v7592_v42 = vld [vmem:[%s10526_s12 + $0x48] sm:$0xff] }
 0xd56   :  { %v8163_v39 = vpop.eup %8162 }
 0xd57   :  { %v2804_v37 = vmul.f32 %v8161_v57, %v2803_v28  ;;  %v2810_v15 = vmul.f32 %v8163_v39, %v2796_v63  ;;  %vm2816_vm8 = vweird.f32 %v8163_v39  ;;  %v7584_v63 = vld [vmem:[%s10526_s12 + $0x8] sm:$0xff]  ;;  %v7591_v28 = vld [vmem:[%s10526_s12 + $0x40] sm:$0xff] }
 0xd58   :  { %vm2817_vm10 = vmor %vm2815_vm9, %vm2816_vm8 }
 0xd59   :  { %v2811_v3 = vmul.f32 %v8163_v39, %v2810_v15  ;;  %v2808_v29 = vsel %vm2807_vm7, %v8161_v57, %v2804_v37  ;;  %v7594_v57 = vld [vmem:[%s10526_s12 + $0x58] sm:$0xff] }
 0xd5a   :  { %v2839_v24 = vmul.f32 %v2808_v29, %v9588_v49  ;;  %3166 = vmatpush.bf16.msrb.mxu0 %v7594_v57 }
 0xd5b   :  { %v2812_v46 = vmul.f32 0.5, %v2811_v3 }
 0xd5c   :  { %v2846_v4 = vmul.f32 %v8001_v48, %v2839_v24 }
 0xd5d   :  { %v2813_v44 = vsub.f32 1.5, %v2812_v46 }
 0xd5e   :  { %v9645_v54 = vadd.f32 %v8002_v27, %v2846_v4  ;;  %3167 = vmatpush.bf16.msrb.mxu0 %v7593_v31 }
 0xd5f   :  { %v2814_v40 = vmul.f32 %v8163_v39, %v2813_v44 }
 0xd61   :  { %v2818_v62 = vsel %vm2817_vm10, %v8163_v39, %v2814_v40  ;;  %v2873_v39 = vld [vmem:[%s10527_s26] sm:$0x3] }
 0xd62   :  { %v2840_v32 = vmul.f32 %v2818_v62, %v9593_v53  ;;  %v7590_v53 = vld [vmem:[%s10526_s12 + $0x38] sm:$0xff]  ;;  %3168 = vmatpush.bf16.msrb.mxu0 %v7592_v42  ;;  %v2910_v15 = vperm.slane %v2873_v39, 0  ;;  %v2911_v44 = vperm.slane %v2873_v39, 1 }
 0xd63   :  { %3143 = vmatpush.bf16.msrb.mxu3 %v7590_v53 }
 0xd64   :  { %v2847_v56 = vmul.f32 %v8001_v48, %v2840_v32 }
 0xd66   :  { %v9647_v55 = vadd.f32 %v8002_v27, %v2847_v56  ;;  %3169 = vmatpush.bf16.msrb.mxu0 %v7591_v28 }
 0xd67   :  { %3144 = vmatpush.bf16.msrb.mxu3 %v7589_v5 }
 0xd68   :  { %v2907_v49 = vpack.c.bf16 %v9647_v55, %v9645_v54 }
 0xd6a   :  { %3002 = vmatmul.bf16.vlgmr.msra.gmra.mxu1 %v2907_v49  ;;  %3021 = vmatmul.bf16.vlgmr.msra.gmra.mxu2 %v2907_v49 }
 0xd6b   :  { %3145 = vmatpush.bf16.msrb.mxu3 %v7588_v34 }
 0xd6f   :  { %3146 = vmatpush.bf16.msrb.mxu3 %v7587_v26 }
 0xd73   :  { %3147 = vmatpush.bf16.msrb.mxu3 %v7586_v33 }
 0xd81   :  { %v2788_v35 = vpop.xlane.xlu1 %2787 }
 0xd82   :  { %v2793_v60 = vmul.f32 %v2788_v35, %v9219_v21 }
 0xd84   :  { %v2797_v38 = vadd.f32 1e-05, %v2793_v60 }
 0xd86   :  { %8164 = vrsqrt.f32 %v2797_v38  ;;  %vm2825_vm12 = vweird.f32 %v2797_v38 }
 0xd89   :  { %v2790_v23 = vpop.xlane.xlu2 %2789 }
 0xd8a   :  { %v2794_v1 = vmul.f32 %v2790_v23, %v9219_v21 }
 0xd8c   :  { %v8165_v7 = vpop.eup %8164  ;;  %v2798_v2 = vadd.f32 1e-05, %v2794_v1 }
 0xd8d   :  { %v2820_v10 = vmul.f32 %v8165_v7, %v2797_v38  ;;  %vm2826_vm11 = vweird.f32 %v8165_v7 }
 0xd8e   :  { %8166 = vrsqrt.f32 %v2798_v2  ;;  %vm2827_vm13 = vmor %vm2825_vm12, %vm2826_vm11  ;;  %vm2835_vm15 = vweird.f32 %v2798_v2 }
 0xd8f   :  { %v2821_v12 = vmul.f32 %v8165_v7, %v2820_v10 }
 0xd91   :  { %v2822_v30 = vmul.f32 0.5, %v2821_v12 }
 0xd93   :  { %v2823_v6 = vsub.f32 1.5, %v2822_v30  ;;  %v8003_v30 = vld [vmem:[%s10528_s1] ss:$0 sm:$0xff] }
 0xd94   :  { %v8167_v41 = vpop.eup %8166 }
 0xd95   :  { %v2824_v45 = vmul.f32 %v8165_v7, %v2823_v6  ;;  %v2830_v52 = vmul.f32 %v8167_v41, %v2798_v2  ;;  %vm2836_vm14 = vweird.f32 %v8167_v41 }
 0xd96   :  { %vm2837_vm4 = vmor %vm2835_vm15, %vm2836_vm14 }
 0xd97   :  { %v2831_v43 = vmul.f32 %v8167_v41, %v2830_v52  ;;  %v2828_v0 = vsel %vm2827_vm13, %v8165_v7, %v2824_v45 }
 0xd98   :  { %v2841_v16 = vmul.f32 %v2828_v0, %v9598_v13 }
 0xd99   :  { %v2832_v9 = vmul.f32 0.5, %v2831_v43 }
 0xd9a   :  { %v2848_v20 = vmul.f32 %v8001_v48, %v2841_v16 }
 0xd9b   :  { %v2833_v14 = vsub.f32 1.5, %v2832_v9 }
 0xd9c   :  { %v9662_v58 = vadd.f32 %v8002_v27, %v2848_v20 }
 0xd9d   :  { %v2834_v36 = vmul.f32 %v8167_v41, %v2833_v14 }
 0xd9f   :  { %v2838_v17 = vsel %vm2837_vm4, %v8167_v41, %v2834_v36 }
 0xda0   :  { %v2842_v47 = vmul.f32 %v2838_v17, %v9603_v22  ;;  %v7585_v22 = vld [vmem:[%s10526_s12 + $0x10] sm:$0xff] }
 0xda1   :  { %3148 = vmatpush.bf16.msrb.mxu3 %v7585_v22 }
 0xda2   :  { %v2849_v25 = vmul.f32 %v8001_v48, %v2842_v47 }
 0xda4   :  { %v9664_v59 = vadd.f32 %v8002_v27, %v2849_v25 }
 0xda5   :  { %3149 = vmatpush.bf16.msrb.mxu3 %v7584_v63 }
 0xda6   :  { %v2908_v13 = vpack.c.bf16 %v9664_v59, %v9662_v58 }
 0xda8   :  { %3007 = vmatmul.bf16.gmra.mxu1 %v2908_v13  ;;  %3026 = vmatmul.bf16.gmra.mxu2 %v2908_v13 }
 0xda9   :  { %3150 = vmatpush.bf16.msrb.mxu3 %v7583_v18 }
 0xde7   :  { %v3003_v37 = vpop.f32.mrf.mxu1 }
 0xde8   :  { %v3004_v29 = vadd.f32 %v3003_v37, %v2910_v15 }
 0xdea   :  { %v3032_v48 = vmax.f32 %v3004_v29, 0.0 }
 0xded   :  { %v3022_v3 = vpop.f32.mrf.mxu2 }
 0xdee   :  { %v3023_v62 = vadd.f32 %v3022_v3, %v2911_v44 }
 0xdef   :  { %v3005_v46 = vpop.f32.mrf.mxu1 }
 0xdf0   :  { %v3006_v24 = vadd.f32 %v3005_v46, %v2910_v15  ;;  %v3033_v56 = vmax.f32 %v3023_v62, 0.0  ;;  %v7605_v62 = vld [vmem:[#allocation2 + $0x70] sm:$0xff] }
 0xdf2   :  { %v3034_v40 = vmax.f32 %v3006_v24, 0.0  ;;  %v7606_v24 = vld [vmem:[#allocation2 + $0x78] sm:$0xff] }
 0xdf3   :  { %3410 = vmatpush.bf16.msrb.mxu1 %v7606_v24 }
 0xdf4   :  { %v3040_v32 = vpack.c.bf16 %v3034_v40, %v3032_v48  ;;  %v7614_v48 = vld [vmem:[#allocation5 + $0x78] sm:$0xff] }
 0xdf5   :  { %v3024_v4 = vpop.f32.mrf.mxu2  ;;  %v7622_v40 = vld [vmem:[#allocation7 + $0x78] sm:$0xff]  ;;  %3480 = vmatpush.bf16.msrb.mxu2 %v7614_v48 }
 0xdf6   :  { %v3025_v27 = vadd.f32 %v3024_v4, %v2911_v44  ;;  %3151 = vmatmul.bf16.vlgmr.msrb.gmra.mxu3 %v3040_v32  ;;  %v7613_v32 = vld [vmem:[#allocation5 + $0x70] sm:$0xff] }
 0xdf7   :  { %3550 = vmatpush.bf16.msra.mxu3 %v7622_v40  ;;  %v7621_v4 = vld [vmem:[#allocation7 + $0x70] sm:$0xff]  ;;  %3411 = vmatpush.bf16.msrb.mxu1 %v7605_v62 }
 0xdf8   :  { %v3035_v49 = vmax.f32 %v3025_v27, 0.0  ;;  %v7604_v27 = vld [vmem:[#allocation2 + $0x68] sm:$0xff] }
 0xdf9   :  { %3481 = vmatpush.bf16.msrb.mxu2 %v7613_v32 }
 0xdfa   :  { %v3041_v35 = vpack.c.bf16 %v3035_v49, %v3033_v56  ;;  %v7612_v56 = vld [vmem:[#allocation5 + $0x68] sm:$0xff] }
 0xdfb   :  { %3551 = vmatpush.bf16.msra.mxu3 %v7621_v4  ;;  %v7620_v49 = vld [vmem:[#allocation7 + $0x68] sm:$0xff]  ;;  %3412 = vmatpush.bf16.msrb.mxu1 %v7604_v27 }
 0xdfc   :  { %3170 = vmatmul.bf16.vlgmr.msrb.gmra.mxu0 %v3041_v35  ;;  %v7603_v35 = vld [vmem:[#allocation2 + $0x60] sm:$0xff] }
 0xdfd   :  { %3482 = vmatpush.bf16.msrb.mxu2 %v7612_v56 }
 0xdff   :  { %3552 = vmatpush.bf16.msra.mxu3 %v7620_v49  ;;  %3413 = vmatpush.bf16.msrb.mxu1 %v7603_v35 }
 0xe25   :  { %v3008_v60 = vpop.f32.mrf.mxu1 }
 0xe26   :  { %v3009_v53 = vadd.f32 %v3008_v60, %v2910_v15  ;;  %v7611_v60 = vld [vmem:[#allocation5 + $0x60] sm:$0xff] }
 0xe27   :  { %3483 = vmatpush.bf16.msrb.mxu2 %v7611_v60 }
 0xe28   :  { %v3036_v1 = vmax.f32 %v3009_v53, 0.0  ;;  %v7602_v53 = vld [vmem:[#allocation2 + $0x58] sm:$0xff] }
 0xe29   :  { %3414 = vmatpush.bf16.msrb.mxu1 %v7602_v53 }
 0xe2b   :  { %v3027_v38 = vpop.f32.mrf.mxu2 }
 0xe2c   :  { %v3028_v61 = vadd.f32 %v3027_v38, %v2911_v44  ;;  %v7619_v38 = vld [vmem:[#allocation7 + $0x60] sm:$0xff] }
 0xe2d   :  { %v3010_v50 = vpop.f32.mrf.mxu1  ;;  %3553 = vmatpush.bf16.msra.mxu3 %v7619_v38 }
 0xe2e   :  { %v3011_v23 = vadd.f32 %v3010_v50, %v2910_v15  ;;  %v3037_v34 = vmax.f32 %v3028_v61, 0.0  ;;  %v7610_v50 = vld [vmem:[#allocation5 + $0x58] sm:$0xff]  ;;  %v7617_v61 = vld [vmem:[#allocation7 + $0x50] sm:$0xff] }
 0xe2f   :  { %3484 = vmatpush.bf16.msrb.mxu2 %v7610_v50 }
 0xe30   :  { %v3038_v5 = vmax.f32 %v3011_v23, 0.0  ;;  %v7618_v23 = vld [vmem:[#allocation7 + $0x58] sm:$0xff] }
 0xe31   :  { %3554 = vmatpush.bf16.msra.mxu3 %v7618_v23 }
 0xe32   :  { %v3042_v7 = vpack.c.bf16 %v3038_v5, %v3036_v1  ;;  %v7601_v1 = vld [vmem:[#allocation2 + $0x50] sm:$0xff] }
 0xe33   :  { %v3029_v2 = vpop.f32.mrf.mxu2  ;;  %v7609_v5 = vld [vmem:[#allocation5 + $0x50] sm:$0xff]  ;;  %3415 = vmatpush.bf16.msrb.mxu1 %v7601_v1 }
 0xe34   :  { %v3030_v10 = vadd.f32 %v3029_v2, %v2911_v44  ;;  %3156 = vmatmul.bf16.gmra.mxu3 %v3042_v7  ;;  %3485 = vmatpush.bf16.msrb.mxu2 %v7609_v5  ;;  %v7600_v7 = vld [vmem:[#allocation2 + $0x48] sm:$0xff] }
 0xe35   :  { %3555 = vmatpush.bf16.msra.mxu3 %v7617_v61  ;;  %v7608_v2 = vld [vmem:[#allocation5 + $0x48] sm:$0xff] }
 0xe36   :  { %v3039_v11 = vmax.f32 %v3030_v10, 0.0  ;;  %v7616_v10 = vld [vmem:[#allocation7 + $0x48] sm:$0xff] }
 0xe37   :  { %3416 = vmatpush.bf16.msrb.mxu1 %v7600_v7 }
 0xe38   :  { %v3043_v12 = vpack.c.bf16 %v3039_v11, %v3037_v34  ;;  %3486 = vmatpush.bf16.msrb.mxu2 %v7608_v2 }
 0xe39   :  { %3556 = vmatpush.bf16.msra.mxu3 %v7616_v10 }
 0xe3a   :  { %3175 = vmatmul.bf16.gmra.mxu0 %v3043_v12  ;;  %v7599_v12 = vld [vmem:[#allocation2 + $0x40] sm:$0xff] }
 0xe3b   :  { %3417 = vmatpush.bf16.msrb.mxu1 %v7599_v12 }
 0xe79   :  { %v3152_v26 = vpop.f32.mrf.mxu3  ;;  %v3171_v6 = vpop.f32.mrf.mxu0 }
 0xe7a   :  { %v3153_v41 = vadd.f32 %v8003_v30, %v3152_v26  ;;  %v7615_v26 = vld [vmem:[#allocation7 + $0x40] sm:$0xff] }
 0xe7b   :  { %3557 = vmatpush.bf16.msra.mxu3 %v7615_v26 }
 0xe7c   :  { %v3172_v45 = vadd.f32 %v3171_v6, %v3153_v41 }
 0xe7e   :  { %v3181_v52 = vadd.f32 %v3172_v45, %v9645_v54 }
 0xe80   :  { %3187 = vadd.xlane.f32.xlu0 %v3181_v52 }
 0xe81   :  { %v3154_v43 = vpop.f32.mrf.mxu3  ;;  %v3173_v0 = vpop.f32.mrf.mxu0 }
 0xe82   :  { %v3155_v9 = vadd.f32 %v8003_v30, %v3154_v43 }
 0xe84   :  { %v3174_v14 = vadd.f32 %v3173_v0, %v3155_v9 }
 0xe86   :  { %v3182_v16 = vadd.f32 %v3174_v14, %v9647_v55 }
 0xe88   :  { %3189 = vadd.xlane.f32.xlu1 %v3182_v16 }
 0xeb7   :  { %v3157_v36 = vpop.f32.mrf.mxu3  ;;  %v3176_v17 = vpop.f32.mrf.mxu0 }
 0xeb8   :  { %v3158_v47 = vadd.f32 %v8003_v30, %v3157_v36 }
 0xeba   :  { %v3177_v20 = vadd.f32 %v3176_v17, %v3158_v47 }
 0xebc   :  { %v3183_v25 = vadd.f32 %v3177_v20, %v9662_v58 }
 0xebe   :  { %3191 = vadd.xlane.f32.xlu2 %v3183_v25 }
 0xebf   :  { %v3159_v13 = vpop.f32.mrf.mxu3  ;;  %v3178_v8 = vpop.f32.mrf.mxu0 }
 0xec0   :  { %v3160_v33 = vadd.f32 %v8003_v30, %v3159_v13  ;;  %v7607_v30 = vld [vmem:[#allocation5 + $0x40] sm:$0xff] }
 0xec1   :  { %3487 = vmatpush.bf16.msrb.mxu2 %v7607_v30  ;;  %v8007_v30 = vld [vmem:[%s8659_s3 + $0x1] ss:$0 sm:$0xff]  ;;  %s6398_s3 = sshll.u32 %s8784_s9, 4  ;;  %s6399_s3 = int_to_ptr.hbm [resolvable:$true] %s6398_s3 }
 0xec2   :  { %v3179_v22 = vadd.f32 %v3178_v8, %v3160_v33  ;;  %v8004_v8 = vld [vmem:[%s10529_s23] ss:$0 sm:$0xff] }
 0xec4   :  { %v3184_v54 = vadd.f32 %v3179_v22, %v9664_v59 }
 0xec6   :  { %3193 = vadd.xlane.f32.xlu0 %v3184_v54 }
 0xef3   :  { %v3188_v57 = vpop.xlane.xlu0 %3187 }
 0xef4   :  { %v3195_v63 = vmul.f32 %v3188_v57, %v9219_v21 }
 0xef6   :  { %v9684_v31 = vsub.f32 %v3181_v52, %v3195_v63 }
 0xef8   :  { %v3203_v55 = vmul.f32 %v9684_v31, %v9684_v31 }
 0xefa   :  { %3207 = vadd.xlane.f32.xlu1 %v3203_v55 }
 0xefb   :  { %v3190_v18 = vpop.xlane.xlu1 %3189 }
 0xefc   :  { %v3196_v58 = vmul.f32 %v3190_v18, %v9219_v21  ;;  %v8005_v18 = vld [vmem:[%s8769_s4] ss:$0 sm:$0xff] }
 0xefe   :  { %v9689_v42 = vsub.f32 %v3182_v16, %v3196_v58 }
 0xf00   :  { %v3204_v28 = vmul.f32 %v9689_v42, %v9689_v42 }
 0xf02   :  { %3209 = vadd.xlane.f32.xlu2 %v3204_v28 }
 0xf31   :  { %v3192_v59 = vpop.xlane.xlu2 %3191 }
 0xf32   :  { %v3197_v39 = vmul.f32 %v3192_v59, %v9219_v21 }
 0xf34   :  { %v9694_v37 = vsub.f32 %v3183_v25, %v3197_v39 }
 0xf36   :  { %v3205_v15 = vmul.f32 %v9694_v37, %v9694_v37 }
 0xf38   :  { %3211 = vadd.xlane.f32.xlu0 %v3205_v15 }
 0xf39   :  { %v3194_v3 = vpop.xlane.xlu0 %3193 }
 0xf3a   :  { %v3198_v29 = vmul.f32 %v3194_v3, %v9219_v21 }
 0xf3c   :  { %v9699_v46 = vsub.f32 %v3184_v54, %v3198_v29 }
 0xf3e   :  { %v3206_v44 = vmul.f32 %v9699_v46, %v9699_v46 }
 0xf40   :  { %3213 = vadd.xlane.f32.xlu1 %v3206_v44 }
 0xf6d   :  { %v3208_v34 = vpop.xlane.xlu1 %3207 }
 0xf6e   :  { %v3215_v11 = vmul.f32 %v3208_v34, %v9219_v21 }
 0xf70   :  { %v3219_v6 = vadd.f32 1e-05, %v3215_v11 }
 0xf72   :  { %8168 = vrsqrt.f32 %v3219_v6  ;;  %vm3229_vm6 = vweird.f32 %v3219_v6 }
 0xf75   :  { %v3210_v41 = vpop.xlane.xlu2 %3209 }
 0xf76   :  { %v3216_v45 = vmul.f32 %v3210_v41, %v9219_v21 }
 0xf78   :  { %v8169_v52 = vpop.eup %8168  ;;  %v3220_v43 = vadd.f32 1e-05, %v3216_v45  ;;  %v8008_v45 = vld [vmem:[%s8669_s14 + $0x1] ss:$0 sm:$0xff]  ;;  %s8544_s14 = sshra.s32 %s6399_s3, 4  ;;  %s8545_s14 = int_to_ptr.hbm [resolvable:$true] %s8544_s14 }
 0xf79   :  { %v3224_v9 = vmul.f32 %v8169_v52, %v3219_v6  ;;  %vm3230_vm5 = vweird.f32 %v8169_v52  ;;  %p8549_p13 = scmp.lt.s32.totalorder %s8545_s14, %s8784_s9 }
 0xf7a   :  { %8170 = vrsqrt.f32 %v3220_v43  ;;  %vm3231_vm7 = vmor %vm3229_vm6, %vm3230_vm5  ;;  %vm3239_vm9 = vweird.f32 %v3220_v43 }
 0xf7b   :  { %v3225_v0 = vmul.f32 %v8169_v52, %v3224_v9 }
 0xf7d   :  { %v3226_v14 = vmul.f32 0.5, %v3225_v0 }
 0xf7f   :  { %v3227_v16 = vsub.f32 1.5, %v3226_v14 }
 0xf80   :  { %v8171_v36 = vpop.eup %8170 }
 0xf81   :  { %v3228_v17 = vmul.f32 %v8169_v52, %v3227_v16  ;;  %v3234_v47 = vmul.f32 %v8171_v36, %v3220_v43  ;;  %vm3240_vm8 = vweird.f32 %v8171_v36 }
 0xf82   :  { %vm3241_vm10 = vmor %vm3239_vm9, %vm3240_vm8 }
 0xf83   :  { %v3235_v20 = vmul.f32 %v8171_v36, %v3234_v47  ;;  %v3232_v25 = vsel %vm3231_vm7, %v8169_v52, %v3228_v17 }
 0xf84   :  { %v3263_v22 = vmul.f32 %v3232_v25, %v9684_v31 }
 0xf85   :  { %v3236_v13 = vmul.f32 0.5, %v3235_v20 }
 0xf86   :  { %v3270_v63 = vmul.f32 %v8004_v8, %v3263_v22 }
 0xf87   :  { %v3237_v33 = vsub.f32 1.5, %v3236_v13 }
 0xf88   :  { %v9709_v28 = vadd.f32 %v8005_v18, %v3270_v63 }
 0xf89   :  { %v3238_v54 = vmul.f32 %v8171_v36, %v3237_v33 }
 0xf8b   :  { %v3242_v57 = vsel %vm3241_vm10, %v8171_v36, %v3238_v54 }
 0xf8c   :  { %v3264_v55 = vmul.f32 %v3242_v57, %v9689_v42 }
 0xf8e   :  { %v3271_v58 = vmul.f32 %v8004_v8, %v3264_v55 }
 0xf90   :  { %v9711_v59 = vadd.f32 %v8005_v18, %v3271_v58 }
 0xf92   :  { %v3357_v39 = vpack.c.bf16 %v9711_v59, %v9709_v28 }
 0xf94   :  { %3418 = vmatmul.bf16.vlgmr.msrb.gmra.mxu1 %v3357_v39  ;;  %3488 = vmatmul.bf16.vlgmr.msrb.gmra.mxu2 %v3357_v39 }
 0xf95   :  { %3558 = vmatmul.bf16.vlgmr.msra.gmra.mxu3 %v3357_v39 }
 0xfab   :  { %v3212_v31 = vpop.xlane.xlu0 %3211 }
 0xfac   :  { %v3217_v15 = vmul.f32 %v3212_v31, %v9219_v21 }
 0xfae   :  { %v3221_v3 = vadd.f32 1e-05, %v3217_v15 }
 0xfb0   :  { %8172 = vrsqrt.f32 %v3221_v3  ;;  %vm3249_vm12 = vweird.f32 %v3221_v3 }
 0xfb3   :  { %v3214_v29 = vpop.xlane.xlu1 %3213 }
 0xfb4   :  { %v3218_v42 = vmul.f32 %v3214_v29, %v9219_v21 }
 0xfb6   :  { %v8173_v44 = vpop.eup %8172  ;;  %v3222_v24 = vadd.f32 1e-05, %v3218_v42 }
 0xfb7   :  { %v3244_v48 = vmul.f32 %v8173_v44, %v3221_v3  ;;  %vm3250_vm11 = vweird.f32 %v8173_v44 }
 0xfb8   :  { %8174 = vrsqrt.f32 %v3222_v24  ;;  %vm3251_vm13 = vmor %vm3249_vm12, %vm3250_vm11  ;;  %vm3259_vm15 = vweird.f32 %v3222_v24 }
 0xfb9   :  { %v3245_v40 = vmul.f32 %v8173_v44, %v3244_v48 }
 0xfbb   :  { %v3246_v62 = vmul.f32 0.5, %v3245_v40 }
 0xfbd   :  { %v3247_v32 = vsub.f32 1.5, %v3246_v62  ;;  %v9772_v62 = vld [vmem:[%s8634_s13] sm:$0xff] }
 0xfbe   :  { %v8175_v4 = vpop.eup %8174 }
 0xfbf   :  { %v3248_v27 = vmul.f32 %v8173_v44, %v3247_v32  ;;  %v3254_v56 = vmul.f32 %v8175_v4, %v3222_v24  ;;  %vm3260_vm14 = vweird.f32 %v8175_v4 }
 0xfc0   :  { %vm3261_vm4 = vmor %vm3259_vm15, %vm3260_vm14 }
 0xfc1   :  { %v3255_v49 = vmul.f32 %v8175_v4, %v3254_v56  ;;  %v3252_v35 = vsel %vm3251_vm13, %v8173_v44, %v3248_v27  ;;  %v9777_v56 = vld [vmem:[%s8634_s13 + $0x8] sm:$0xff] }
 0xfc2   :  { %v3265_v53 = vmul.f32 %v3252_v35, %v9694_v37  ;;  %v8006_v37 = vld [vmem:[%s8649_s25 + $0x1] ss:$0 sm:$0xff] }
 0xfc3   :  { %v3256_v60 = vmul.f32 0.5, %v3255_v49 }
 0xfc4   :  { %v3272_v5 = vmul.f32 %v8004_v8, %v3265_v53 }
 0xfc5   :  { %v3257_v38 = vsub.f32 1.5, %v3256_v60 }
 0xfc6   :  { %v9719_v7 = vadd.f32 %v8005_v18, %v3272_v5 }
 0xfc7   :  { %v3258_v50 = vmul.f32 %v8175_v4, %v3257_v38 }
 0xfc9   :  { %v3262_v23 = vsel %vm3261_vm4, %v8175_v4, %v3258_v50 }
 0xfca   :  { %v3266_v1 = vmul.f32 %v3262_v23, %v9699_v46 }
 0xfcc   :  { %v3273_v61 = vmul.f32 %v8004_v8, %v3266_v1 }
 0xfce   :  { %v9721_v2 = vadd.f32 %v8005_v18, %v3273_v61 }
 0xfd0   :  { %v3358_v10 = vpack.c.bf16 %v9721_v2, %v9719_v7 }
 0xfd2   :  { %3423 = vmatmul.bf16.gmra.mxu1 %v3358_v10  ;;  %3493 = vmatmul.bf16.gmra.mxu2 %v3358_v10 }
 0xfd3   :  { %3563 = vmatmul.bf16.gmra.mxu3 %v3358_v10 }
0x1011   :  { %v3419_v34 = vpop.f32.mrf.mxu1 }
0x1012   :  { %v3420_v11 = vadd.f32 %v8006_v37, %v3419_v34 }
0x1014   :  { %v3569_v12 = vmul.f32 0.17677669, %v3420_v11 }
0x1016   :  { %3749 = vrot.lane.b32.xlu1 %v3569_v12, %s8610_s6 }
0x1017   :  { %v3489_v46 = vpop.f32.mrf.mxu2 }
0x1018   :  { %v3490_v26 = vadd.f32 %v8007_v30, %v3489_v46  ;;  %v3559_v6 = vpop.f32.mrf.mxu3 }
0x1019   :  { %v3421_v41 = vpop.f32.mrf.mxu1  ;;  %v3560_v14 = vadd.f32 %v8008_v45, %v3559_v6 }
0x101a   :  { %3753 = vrot.lane.b32.xlu0 %v3490_v26, %s8610_s6  ;;  %v3422_v52 = vadd.f32 %v8006_v37, %v3421_v41 }
0x101c   :  { %v3570_v16 = vmul.f32 0.17677669, %v3422_v52 }
0x101f   :  { %v3491_v43 = vpop.f32.mrf.mxu2 }
0x1020   :  { %v3492_v9 = vadd.f32 %v8007_v30, %v3491_v43  ;;  %v3561_v0 = vpop.f32.mrf.mxu3 }
0x1021   :  { %v3562_v36 = vadd.f32 %v8008_v45, %v3561_v0 }
0x1022   :  { %3755 = vrot.lane.b32.xlu2 %v3492_v9, %s8610_s6  ;;  %7027 = vmatpush.xpose.msk.msra.mxu0 %vm560_vm0, %v3492_v9 }
0x1023   :  { %3711 = vmatpush.msra.mxu2 %v3562_v36  ;;  %3751 = vrot.lane.b32.xlu0 %v3570_v16, %s8610_s6  ;;  %v9733_v17 = vpack.i.bf16 %v3560_v14, %v3562_v36 }
0x1024   :  { %3955 = vrot.lane.b32.xlu1 %v3492_v9, %s8601_s15 }
0x1025   :  { %3712 = vmatpush.msra.mxu2 %v3560_v14 }
0x1026   :  { %7028 = vmatpush.xpose.msk.msra.mxu0 %vm560_vm0, %v3490_v26 }
0x1029   :  { %7029 = vmatmul.msk.f32.vlgmr.msra.gmra.mxu0 %vm560_vm0, %v3569_v12 }
0x102a   :  { %3953 = vrot.lane.b32.xlu2 %v3490_v26, %s8601_s15 }
0x102b   :  { %3949 = vrot.lane.b32.xlu0 %v3569_v12, %s8601_s15 }
0x1031   :  { %7030 = vmatmul.msk.f32.gmra.mxu0 %vm560_vm0, %v3570_v16 }
0x104f   :  { %v3424_v47 = vpop.f32.mrf.mxu1 }
0x1050   :  { %v3425_v20 = vadd.f32 %v8006_v37, %v3424_v47 }
0x1052   :  { %v3571_v25 = vmul.f32 0.17677669, %v3425_v20 }
0x1054   :  { %3788 = vrot.lane.b32.xlu1 %v3571_v25, %s8610_s6 }
0x1055   :  { %v3494_v13 = vpop.f32.mrf.mxu2 }
0x1056   :  { %v3495_v33 = vadd.f32 %v8007_v30, %v3494_v13  ;;  %v3564_v8 = vpop.f32.mrf.mxu3 }
0x1057   :  { %v3565_v63 = vadd.f32 %v8008_v45, %v3564_v8  ;;  %v3426_v55 = vpop.f32.mrf.mxu1 }
0x1058   :  { %3792 = vrot.lane.b32.xlu0 %v3495_v33, %s8610_s6  ;;  %v3427_v39 = vadd.f32 %v8006_v37, %v3426_v55 }
0x105a   :  { %v3572_v31 = vmul.f32 0.17677669, %v3427_v39 }
0x105c   :  { %3951 = vrot.lane.b32.xlu1 %v3570_v16, %s8601_s15 }
0x105d   :  { %v3496_v22 = vpop.f32.mrf.mxu2 }
0x105e   :  { %v3497_v54 = vadd.f32 %v8007_v30, %v3496_v22  ;;  %v3566_v57 = vpop.f32.mrf.mxu3 }
0x105f   :  { %v3567_v18 = vadd.f32 %v8008_v45, %v3566_v57 }
0x1060   :  { %3794 = vrot.lane.b32.xlu2 %v3497_v54, %s8610_s6  ;;  %7031 = vmatpush.xpose.msk.msra.mxu1 %vm560_vm0, %v3497_v54 }
0x1061   :  { %3740 = vmatpush.msrb.mxu3 %v3567_v18  ;;  %3994 = vrot.lane.b32.xlu0 %v3497_v54, %s8601_s15  ;;  %v9747_v58 = vpack.i.bf16 %v3565_v63, %v3567_v18 }
0x1063   :  { %3741 = vmatpush.msrb.mxu3 %v3565_v63 }
0x1064   :  { %7032 = vmatpush.xpose.msk.msra.mxu1 %vm560_vm0, %v3495_v33  ;;  %3992 = vrot.lane.b32.xlu1 %v3495_v33, %s8601_s15 }
0x1067   :  { %7033 = vmatmul.msk.f32.vlgmr.msra.gmra.mxu1 %vm560_vm0, %v3571_v25 }
0x1068   :  { %3790 = vrot.lane.b32.xlu2 %v3572_v31, %s8610_s6 }
0x1069   :  { %4149 = vrot.lane.b32.xlu0 %v3490_v26, %s8611_s16 }
0x106c   :  { %4145 = vrot.lane.b32.xlu1 %v3569_v12, %s8611_s16 }
0x106f   :  { %7034 = vmatmul.msk.f32.gmra.mxu1 %vm560_vm0, %v3572_v31 }
0x1070   :  { %4151 = vrot.lane.b32.xlu2 %v3492_v9, %s8611_s16 }
0x1071   :  { %3990 = vrot.lane.b32.xlu0 %v3572_v31, %s8601_s15 }
0x1074   :  { %4190 = vrot.lane.b32.xlu1 %v3497_v54, %s8611_s16 }
0x1078   :  { %3988 = vrot.lane.b32.xlu2 %v3571_v25, %s8601_s15 }
0x1079   :  { %4188 = vrot.lane.b32.xlu0 %v3495_v33, %s8611_s16 }
0x107c   :  { %v3756_v15 = vpop.permute.xlu2 %3755  ;;  %4186 = vrot.lane.b32.xlu1 %v3572_v31, %s8611_s16 }
0x107d   :  { %7039 = vmatpush.xpose.msk.msrb.mxu0 %vm560_vm0, %v3756_v15 }
0x1080   :  { %4147 = vrot.lane.b32.xlu2 %v3570_v16, %s8611_s16 }
0x1084   :  { %v3954_v24 = vpop.permute.xlu2 %3953 }
0x1088   :  { %4184 = vrot.lane.b32.xlu2 %v3571_v25, %s8611_s16  ;;  %v3750_v29 = vpop.permute.xlu1 %3749 }
0x108c   :  { %v3754_v3 = vpop.permute.xlu0 %3753 }
0x108d   :  { %7040 = vmatpush.xpose.msk.msrb.mxu0 %vm560_vm0, %v3754_v3 }
0x1090   :  { %7041 = vmatmul.msk.f32.vlgmr.msrb.gmra.mxu0 %vm560_vm0, %v3750_v29 }
0x1095   :  { %v3752_v42 = vpop.permute.xlu0 %3751 }
0x1096   :  { %v3956_v44 = vpop.permute.xlu1 %3955 }
0x1097   :  { %7051 = vmatpush.xpose.msk.msra.mxu0 %vm560_vm0, %v3956_v44 }
0x1098   :  { %7042 = vmatmul.msk.f32.gmra.mxu0 %vm560_vm0, %v3752_v42 }
0x109b   :  { %7052 = vmatpush.xpose.msk.msra.mxu0 %vm560_vm0, %v3954_v24 }
0x109d   :  { %v3950_v48 = vpop.permute.xlu0 %3949 }
0x10a0   :  { %7053 = vmatmul.msk.f32.vlgmr.msra.gmra.mxu0 %vm560_vm0, %v3950_v48 }
0x10a6   :  { %v3602_v40 = vpop.f32.mrf.mxu0 }
0x10a7   :  { %v3603_v32 = vadd.f32 %v9772_v62, %v3602_v40 }
0x10a9   :  { %v3643_v4 = vsel %vm631_vm1, %v3603_v32, -inf }
0x10aa   :  { %3644 = vmax.xlane.f32.xlu0 %v3643_v4 }
0x10ae   :  { %v3605_v27 = vpop.f32.mrf.mxu0 }
0x10af   :  { %v3606_v49 = vadd.f32 %v9777_v56, %v3605_v27 }
0x10b1   :  { %v3646_v35 = vsel %vm631_vm1, %v3606_v49, -inf }
0x10b2   :  { %3647 = vmax.xlane.f32.xlu2 %v3646_v35 }
0x10ba   :  { %v3795_v60 = vpop.permute.xlu2 %3794 }
0x10bb   :  { %7043 = vmatpush.xpose.msk.msrb.mxu1 %vm560_vm0, %v3795_v60 }
0x10c2   :  { %v3791_v38 = vpop.permute.xlu2 %3790 }
0x10c6   :  { %v3789_v53 = vpop.permute.xlu1 %3788 }
0x10ca   :  { %v3793_v50 = vpop.permute.xlu0 %3792  ;;  %v4152_v23 = vpop.permute.xlu2 %4151 }
0x10cb   :  { %7044 = vmatpush.xpose.msk.msrb.mxu1 %vm560_vm0, %v3793_v50  ;;  %7063 = vmatpush.xpose.msk.msrb.mxu0 %vm560_vm0, %v4152_v23 }
0x10ce   :  { %7045 = vmatmul.msk.f32.vlgmr.msrb.gmra.mxu1 %vm560_vm0, %v3789_v53  ;;  %v3952_v1 = vpop.permute.xlu1 %3951 }
0x10cf   :  { %7054 = vmatmul.msk.f32.gmra.mxu0 %vm560_vm0, %v3952_v1 }
0x10d2   :  { %v3989_v10 = vpop.permute.xlu2 %3988 }
0x10d3   :  { %v3995_v5 = vpop.permute.xlu0 %3994 }
0x10d4   :  { %7055 = vmatpush.xpose.msk.msra.mxu1 %vm560_vm0, %v3995_v5 }
0x10d6   :  { %7046 = vmatmul.msk.f32.gmra.mxu1 %vm560_vm0, %v3791_v38  ;;  %v3993_v61 = vpop.permute.xlu1 %3992 }
0x10d8   :  { %7056 = vmatpush.xpose.msk.msra.mxu1 %vm560_vm0, %v3993_v61 }
0x10da   :  { %v4148_v12 = vpop.permute.xlu2 %4147 }
0x10db   :  { %v4150_v37 = vpop.permute.xlu0 %4149 }
0x10dc   :  { %7064 = vmatpush.xpose.msk.msrb.mxu0 %vm560_vm0, %v4150_v37 }
0x10de   :  { %7057 = vmatmul.msk.f32.vlgmr.msra.gmra.mxu1 %vm560_vm0, %v3989_v10  ;;  %v4146_v34 = vpop.permute.xlu1 %4145 }
0x10df   :  { %7065 = vmatmul.msk.f32.vlgmr.msrb.gmra.mxu0 %vm560_vm0, %v4146_v34 }
0x10e2   :  { %v4185_v26 = vpop.permute.xlu2 %4184 }
0x10e3   :  { %v3991_v11 = vpop.permute.xlu0 %3990 }
0x10e4   :  { %v3637_v40 = vpop.f32.mrf.mxu1 }
0x10e6   :  { %7058 = vmatmul.msk.f32.gmra.mxu1 %vm560_vm0, %v3991_v11  ;;  %v4191_v30 = vpop.permute.xlu1 %4190 }
0x10e7   :  { %7066 = vmatmul.msk.f32.gmra.mxu0 %vm560_vm0, %v4148_v12  ;;  %7067 = vmatpush.xpose.msk.msrb.mxu1 %vm560_vm0, %v4191_v30 }
0x10eb   :  { %v4189_v46 = vpop.permute.xlu0 %4188 }
0x10ec   :  { %7068 = vmatpush.xpose.msk.msrb.mxu1 %vm560_vm0, %v4189_v46  ;;  %v3640_v60 = vpop.f32.mrf.mxu1 }
0x10ee   :  { %v4187_v6 = vpop.permute.xlu1 %4186 }
0x10ef   :  { %7069 = vmatmul.msk.f32.vlgmr.msrb.gmra.mxu1 %vm560_vm0, %v4185_v26 }
0x10f7   :  { %7070 = vmatmul.msk.f32.gmra.mxu1 %vm560_vm0, %v4187_v6 }
0x110d   :  { %v3782_v41 = vpop.f32.mrf.mxu0 }
0x110e   :  { %v3783_v45 = vadd.f32 %v9772_v62, %v3782_v41 }
0x1110   :  { %v3827_v52 = vsel %vm631_vm1, %v3783_v45, -inf }
0x1111   :  { %3828 = vmax.xlane.f32.xlu0 %v3827_v52 }
0x1115   :  { %v3785_v43 = vpop.f32.mrf.mxu0 }
0x1116   :  { %v3786_v9 = vadd.f32 %v9777_v56, %v3785_v43  ;;  %v8335_v43 = vld [vmem:[%s8634_s13 + $0x18] sm:$0xff] }
0x1118   :  { %v3830_v0 = vsel %vm631_vm1, %v3786_v9, -inf }
0x1119   :  { %3831 = vmax.xlane.f32.xlu1 %v3830_v0 }
0x111d   :  { %v3982_v14 = vpop.f32.mrf.mxu0  ;;  %v3645_v47 = vpop.xlane.xlu0 %3644 }
0x111e   :  { %v3983_v16 = vadd.f32 %v9772_v62, %v3982_v14  ;;  %v3655_v20 = vmax.f32 %v3645_v47, -1e+09 }
0x1120   :  { %v4027_v36 = vsel %vm631_vm1, %v3983_v16, -inf  ;;  %v3659_v25 = vsub.f32 %v3603_v32, %v3655_v20  ;;  %v8334_v32 = vld [vmem:[%s8634_s13 + $0x10] sm:$0xff]  ;;  %s8613_s13 = smov [#allocation16]  }
0x1121   :  { %4028 = vmax.xlane.f32.xlu2 %v4027_v36  ;;  %s6396_s25 = sshll.u32 %s8613_s13, 4  ;;  %s6397_s25 = int_to_ptr.vmem [resolvable:$true] %s6396_s25 }
0x1122   :  { %v3663_v33 = vmul.f32 1.442695, %v3659_v25 }
0x1124   :  { %8176 = vpow2.f32 %v3663_v33 }
0x1125   :  { %v3648_v13 = vpop.xlane.xlu2 %3647 }
0x1126   :  { %v3656_v8 = vmax.f32 %v3648_v13, -1e+09 }
0x1128   :  { %v3660_v57 = vsub.f32 %v3606_v49, %v3656_v8 }
0x112a   :  { %v3665_v55 = vmul.f32 1.442695, %v3660_v57  ;;  %v9809_v18 = vpop.eup %8176 }
0x112b   :  { %v3671_v39 = vsel %vm631_vm1, %v9809_v18, 0.0 }
0x112c   :  { %8178 = vpow2.f32 %v3665_v55 }
0x1132   :  { %v9813_v31 = vpop.eup %8178 }
0x1133   :  { %v3674_v29 = vsel %vm631_vm1, %v9813_v31, 0.0 }
0x114b   :  { %v3821_v1 = vpop.f32.mrf.mxu1 }
0x114c   :  { %v3985_v22 = vpop.f32.mrf.mxu0  ;;  %v9838_v34 = vadd.f32 %v8334_v32, %v3821_v1 }
0x114d   :  { %v9805_v54 = vadd.f32 %v9777_v56, %v3985_v22 }
0x114e   :  { %v3833_v46 = vsel %vm631_vm1, %v9838_v34, -inf }
0x114f   :  { %v4030_v63 = vsel %vm631_vm1, %v9805_v54, -inf }
0x1150   :  { %4031 = vmax.xlane.f32.xlu0 %v4030_v63 }
0x1153   :  { %v3824_v6 = vpop.f32.mrf.mxu1 }
0x1154   :  { %v9855_v14 = vadd.f32 %v8335_v43, %v3824_v6 }
0x1156   :  { %v3836_v20 = vsel %vm631_vm1, %v9855_v14, -inf }
0x1158   :  { %3672 = vadd.xlane.f32.xlu0 %v3671_v39 }
0x115b   :  { %v4021_v52 = vpop.f32.mrf.mxu1 }
0x115c   :  { %v4178_v15 = vpop.f32.mrf.mxu0 }
0x115d   :  { %v9816_v3 = vadd.f32 %v9772_v62, %v4178_v15  ;;  %v9828_v62 = vadd.f32 %v8334_v32, %v3637_v40 }
0x115f   :  { %v4223_v42 = vsel %vm631_vm1, %v9816_v3, -inf  ;;  %v3649_v4 = vsel %vm631_vm1, %v9828_v62, -inf }
0x1160   :  { %3675 = vadd.xlane.f32.xlu0 %v3674_v29  ;;  %4224 = vmax.xlane.f32.xlu1 %v4223_v42 }
0x1163   :  { %v4024_v36 = vpop.f32.mrf.mxu1 }
0x1164   :  { %v4181_v44 = vpop.f32.mrf.mxu0  ;;  %v9865_v25 = vadd.f32 %v8335_v43, %v4024_v36 }
0x1165   :  { %v9823_v24 = vadd.f32 %v9777_v56, %v4181_v44 }
0x1166   :  { %v4036_v33 = vsel %vm631_vm1, %v9865_v25, -inf }
0x1167   :  { %v4226_v48 = vsel %vm631_vm1, %v9823_v24, -inf }
0x1168   :  { %4227 = vmax.xlane.f32.xlu1 %v4226_v48 }
0x116c   :  { %v4217_v13 = vpop.f32.mrf.mxu1 }
0x116d   :  { %v9869_v8 = vadd.f32 %v8334_v32, %v4217_v13 }
0x116f   :  { %v4229_v22 = vsel %vm631_vm1, %v9869_v8, -inf }
0x1170   :  { %3650 = vmax.xlane.f32.xlu1 %v3649_v4 }
0x1174   :  { %v4220_v57 = vpop.f32.mrf.mxu1 }
0x1175   :  { %v9873_v55 = vadd.f32 %v8335_v43, %v4220_v57 }
0x1177   :  { %v4232_v39 = vsel %vm631_vm1, %v9873_v55, -inf }
0x1184   :  { %v3829_v27 = vpop.xlane.xlu0 %3828 }
0x1185   :  { %v3839_v49 = vmax.f32 %v3829_v27, -1e+09 }
0x1187   :  { %v3843_v35 = vsub.f32 %v3783_v45, %v3839_v49 }
0x1189   :  { %v3847_v38 = vmul.f32 1.442695, %v3843_v35  ;;  %7872 = vrot.lane.b32.xlu1 %v9733_v17, %s8610_s6 }
0x118b   :  { %8180 = vpow2.f32 %v3847_v38 }
0x118c   :  { %v3832_v56 = vpop.xlane.xlu1 %3831 }
0x118d   :  { %v3840_v53 = vmax.f32 %v3832_v56, -1e+09 }
0x118f   :  { %v3844_v50 = vsub.f32 %v3786_v9, %v3840_v53  ;;  %v9851_v9 = vadd.f32 %v8335_v43, %v3640_v60 }
0x1191   :  { %v9834_v23 = vpop.eup %8180  ;;  %v3849_v5 = vmul.f32 1.442695, %v3844_v50  ;;  %v3652_v0 = vsel %vm631_vm1, %v9851_v9, -inf }
0x1192   :  { %v3855_v61 = vsel %vm631_vm1, %v9834_v23, 0.0 }
0x1193   :  { %8182 = vpow2.f32 %v3849_v5  ;;  %3856 = vadd.xlane.f32.xlu0 %v3855_v61 }
0x1194   :  { %v4029_v10 = vpop.xlane.xlu2 %4028 }
0x1195   :  { %v4039_v37 = vmax.f32 %v4029_v10, -1e+09 }
0x1197   :  { %v4043_v11 = vsub.f32 %v3983_v16, %v4039_v37  ;;  %v9857_v16 = vadd.f32 %v8334_v32, %v4021_v52 }
0x1199   :  { %v9840_v12 = vpop.eup %8182  ;;  %v4047_v30 = vmul.f32 1.442695, %v4043_v11  ;;  %v4033_v47 = vsel %vm631_vm1, %v9857_v16, -inf }
0x119a   :  { %v3858_v26 = vsel %vm631_vm1, %v9840_v12, 0.0 }
0x119b   :  { %8184 = vpow2.f32 %v4047_v30  ;;  %3834 = vmax.xlane.f32.xlu0 %v3833_v46  ;;  %3859 = vadd.xlane.f32.xlu2 %v3858_v26 }
0x11a1   :  { %v9846_v41 = vpop.eup %8184 }
0x11a2   :  { %v4055_v45 = vsel %vm631_vm1, %v9846_v41, 0.0 }
0x11a3   :  { %4056 = vadd.xlane.f32.xlu2 %v4055_v45 }
0x11ab   :  { %3653 = vmax.xlane.f32.xlu2 %v3652_v0 }
0x11af   :  { %7877 = vrot.lane.b32.xlu0 %v9747_v58, %s8610_s6 }
0x11b3   :  { %4034 = vmax.xlane.f32.xlu2 %v4033_v47  ;;  %3837 = vmax.xlane.f32.xlu1 %v3836_v20 }
0x11bb   :  { %4037 = vmax.xlane.f32.xlu2 %v4036_v33 }
0x11c3   :  { %4230 = vmax.xlane.f32.xlu2 %v4229_v22  ;;  %v4032_v63 = vpop.xlane.xlu0 %4031 }
0x11c4   :  { %v4040_v45 = vmax.f32 %v4032_v63, -1e+09 }
0x11c6   :  { %v4044_v47 = vsub.f32 %v9805_v54, %v4040_v45 }
0x11c8   :  { %v4049_v33 = vmul.f32 1.442695, %v4044_v47 }
0x11cb   :  { %4233 = vmax.xlane.f32.xlu2 %v4232_v39  ;;  %v3673_v15 = vpop.xlane.xlu0 %3672 }
0x11cc   :  { %8186 = vrcp.f32 %v3673_v15 }
0x11d2   :  { %v8187_v29 = vpop.eup %8186 }
0x11d3   :  { %v3687_v42 = vmul.f32 %v8187_v29, %v9809_v18  ;;  %v3676_v44 = vpop.xlane.xlu0 %3675  ;;  %v4225_v48 = vpop.xlane.xlu1 %4224 }
0x11d4   :  { %8188 = vrcp.f32 %v3676_v44  ;;  %v4235_v49 = vmax.f32 %v4225_v48, -1e+09 }
0x11d5   :  { %7035 = vmatmul.msk.f32.vlgmr.msra.gmra.mxu2 %vm631_vm1, %v3687_v42 }
0x11d6   :  { %v4239_v60 = vsub.f32 %v9816_v3, %v4235_v49 }
0x11d8   :  { %v4243_v56 = vmul.f32 1.442695, %v4239_v60 }
0x11da   :  { %v8189_v40 = vpop.eup %8188 }
0x11db   :  { %v9879_v32 = vpop.xlane.xlu1 %4227  ;;  %v3688_v4 = vmul.f32 %v8189_v40, %v9813_v31 }
0x11dd   :  { %7036 = vmatmul.msk.f32.gmra.mxu2 %vm631_vm1, %v3688_v4  ;;  %v4236_v4 = vmax.f32 %v9879_v32, -1e+09 }
0x11e3   :  { %7882 = vrot.lane.b32.xlu2 %v9733_v17, %s8601_s15  ;;  %v3651_v27 = vpop.xlane.xlu1 %3650 }
0x11e4   :  { %v3657_v35 = vmax.f32 %v3651_v27, -1e+09 }
0x11e6   :  { %v3661_v18 = vsub.f32 %v9828_v62, %v3657_v35 }
0x11e8   :  { %v3667_v38 = vmul.f32 1.442695, %v3661_v18 }
0x11ea   :  { %8190 = vpow2.f32 %v3667_v38 }
0x11eb   :  { %8192 = vpow2.f32 %v4243_v56 }
0x11f0   :  { %v9887_v53 = vpop.eup %8190 }
0x11f1   :  { %v3677_v31 = vsel %vm631_vm1, %v9887_v53, 0.0  ;;  %v9891_v50 = vpop.eup %8192 }
0x11f2   :  { %3678 = vadd.xlane.f32.xlu1 %v3677_v31  ;;  %v4251_v1 = vsel %vm631_vm1, %v9891_v50, 0.0 }
0x11fa   :  { %4252 = vadd.xlane.f32.xlu1 %v4251_v1 }
0x11fb   :  { %v7873_v5 = vpop.permute.xlu1 %7872 }
0x11fc   :  { %v7874_v62 = vunpack.i.l.bf16 %v7873_v5  ;;  %v7875_v61 = vunpack.i.h.bf16 %v7873_v5 }
0x11fe   :  { %3903 = vmatpush.msrb.mxu2 %v7874_v62 }
0x1200   :  { %3904 = vmatpush.msrb.mxu2 %v7875_v61 }
0x1206   :  { %v3857_v3 = vpop.xlane.xlu0 %3856 }
0x1207   :  { %8194 = vrcp.f32 %v3857_v3 }
0x120d   :  { %v8195_v10 = vpop.eup %8194 }
0x120e   :  { %v3871_v37 = vmul.f32 %v8195_v10, %v9834_v23  ;;  %v3860_v11 = vpop.xlane.xlu2 %3859  ;;  %v3835_v6 = vpop.xlane.xlu0 %3834 }
0x120f   :  { %8196 = vrcp.f32 %v3860_v11  ;;  %v3841_v57 = vmax.f32 %v3835_v6, -1e+09 }
0x1210   :  { %7047 = vmatmul.msk.f32.vlgmr.msrb.gmra.mxu2 %vm631_vm1, %v3871_v37 }
0x1211   :  { %v3845_v54 = vsub.f32 %v9838_v34, %v3841_v57  ;;  %v4240_v34 = vsub.f32 %v9823_v24, %v4236_v4 }
0x1213   :  { %v3851_v27 = vmul.f32 1.442695, %v3845_v54  ;;  %v4245_v31 = vmul.f32 1.442695, %v4240_v34 }
0x1215   :  { %v8197_v30 = vpop.eup %8196 }
0x1216   :  { %v4057_v46 = vpop.xlane.xlu2 %4056  ;;  %v3872_v26 = vmul.f32 %v8197_v30, %v9840_v12 }
0x1218   :  { %7048 = vmatmul.msk.f32.gmra.mxu2 %vm631_vm1, %v3872_v26 }
0x121e   :  { %v3654_v52 = vpop.xlane.xlu2 %3653 }
0x121f   :  { %v3658_v43 = vmax.f32 %v3654_v52, -1e+09 }
0x1221   :  { %v3662_v0 = vsub.f32 %v9851_v9, %v3658_v43  ;;  %v7878_v36 = vpop.permute.xlu0 %7877 }
0x1222   :  { %v7879_v23 = vunpack.i.l.bf16 %v7878_v36  ;;  %v7880_v13 = vunpack.i.h.bf16 %v7878_v36 }
0x1223   :  { %v3669_v20 = vmul.f32 1.442695, %v3662_v0 }
0x1224   :  { %3940 = vmatpush.msra.mxu3 %v7879_v23 }
0x1225   :  { %8198 = vpow2.f32 %v3669_v20 }
0x1226   :  { %3941 = vmatpush.msra.mxu3 %v7880_v13  ;;  %v4035_v22 = vpop.xlane.xlu2 %4034  ;;  %v3838_v12 = vpop.xlane.xlu1 %3837  ;;  %8200 = vpow2.f32 %v4049_v33 }
0x1227   :  { %v4041_v39 = vmax.f32 %v4035_v22, -1e+09  ;;  %v3842_v15 = vmax.f32 %v3838_v12, -1e+09 }
0x1229   :  { %v4045_v63 = vsub.f32 %v9857_v16, %v4041_v39  ;;  %v3846_v29 = vsub.f32 %v9855_v14, %v3842_v15 }
0x122b   :  { %v9903_v9 = vpop.eup %8198  ;;  %v4051_v42 = vmul.f32 1.442695, %v4045_v63  ;;  %v3853_v44 = vmul.f32 1.442695, %v3846_v29 }
0x122c   :  { %v3680_v48 = vsel %vm631_vm1, %v9903_v9, 0.0  ;;  %v9909_v49 = vpop.eup %8200 }
0x122d   :  { %8202 = vpow2.f32 %v4051_v42  ;;  %3681 = vadd.xlane.f32.xlu0 %v3680_v48  ;;  %v4058_v38 = vsel %vm631_vm1, %v9909_v49, 0.0 }
0x122e   :  { %8204 = vpow2.f32 %v3853_v44  ;;  %v4038_v40 = vpop.xlane.xlu2 %4037 }
0x122f   :  { %v4042_v16 = vmax.f32 %v4038_v40, -1e+09  ;;  %8206 = vpow2.f32 %v3851_v27 }
0x1231   :  { %v4046_v14 = vsub.f32 %v9865_v25, %v4042_v16 }
0x1233   :  { %v9912_v35 = vpop.eup %8202  ;;  %v4053_v18 = vmul.f32 1.442695, %v4046_v14 }
0x1234   :  { %v9915_v60 = vpop.eup %8204  ;;  %v4061_v32 = vsel %vm631_vm1, %v9912_v35, 0.0 }
0x1235   :  { %8208 = vpow2.f32 %v4053_v18  ;;  %4059 = vadd.xlane.f32.xlu0 %v4058_v38  ;;  %4062 = vadd.xlane.f32.xlu2 %v4061_v32  ;;  %v3864_v25 = vsel %vm631_vm1, %v9915_v60, 0.0  ;;  %v9923_v24 = vpop.eup %8206 }
0x1236   :  { %v4231_v56 = vpop.xlane.xlu2 %4230  ;;  %3865 = vadd.xlane.f32.xlu1 %v3864_v25  ;;  %8210 = vpow2.f32 %v4245_v31  ;;  %v3861_v5 = vsel %vm631_vm1, %v9923_v24, 0.0 }
0x1237   :  { %8212 = vrcp.f32 %v4057_v46  ;;  %v4237_v46 = vmax.f32 %v4231_v56, -1e+09 }
0x1239   :  { %v4241_v36 = vsub.f32 %v9869_v8, %v4237_v46 }
0x123b   :  { %v9925_v1 = vpop.eup %8208  ;;  %v4247_v47 = vmul.f32 1.442695, %v4241_v36 }
0x123c   :  { %v4064_v62 = vsel %vm631_vm1, %v9925_v1, 0.0  ;;  %v9931_v10 = vpop.eup %8210 }
0x123d   :  { %3862 = vadd.xlane.f32.xlu0 %v3861_v5  ;;  %4065 = vadd.xlane.f32.xlu2 %v4064_v62  ;;  %v4254_v30 = vsel %vm631_vm1, %v9931_v10, 0.0  ;;  %v8213_v6 = vpop.eup %8212 }
0x123e   :  { %v4234_v61 = vpop.xlane.xlu2 %4233  ;;  %v4071_v43 = vmul.f32 %v8213_v6, %v9846_v41 }
0x123f   :  { %v4238_v3 = vmax.f32 %v4234_v61, -1e+09 }
0x1241   :  { %v4242_v37 = vsub.f32 %v9873_v55, %v4238_v3 }
0x1243   :  { %v4249_v11 = vmul.f32 1.442695, %v4242_v37 }
0x1245   :  { %8214 = vpow2.f32 %v4249_v11  ;;  %4255 = vadd.xlane.f32.xlu2 %v4254_v30 }
0x1246   :  { %v7883_v26 = vpop.permute.xlu2 %7882 }
0x1247   :  { %v7884_v45 = vunpack.i.l.bf16 %v7883_v26  ;;  %v7885_v52 = vunpack.i.h.bf16 %v7883_v26 }
0x1249   :  { %4101 = vmatpush.msra.mxu2 %v7884_v45 }
0x124b   :  { %v9937_v0 = vpop.eup %8214  ;;  %4102 = vmatpush.msra.mxu2 %v7885_v52 }
0x124c   :  { %7059 = vmatmul.msk.f32.vlgmr.msra.gmra.mxu2 %vm631_vm1, %v4071_v43  ;;  %v4260_v55 = vsel %vm631_vm1, %v9937_v0, 0.0 }
0x124d   :  { %4261 = vadd.xlane.f32.xlu2 %v4260_v55 }
0x124f   :  { %7887 = vrot.lane.b32.xlu1 %v9747_v58, %s8601_s15 }
0x1251   :  { %7892 = vrot.lane.b32.xlu0 %v9733_v17, %s8611_s16 }
0x1258   :  { %v9955_v33 = vpop.f32.mrf.mxu2 }
0x1259   :  { %7897 = vrot.lane.b32.xlu0 %v9747_v58, %s8611_s16 }
0x1260   :  { %v9957_v58 = vpop.f32.mrf.mxu2 }
0x1265   :  { %v3679_v41 = vpop.xlane.xlu1 %3678 }
0x1266   :  { %8216 = vrcp.f32 %v3679_v41 }
0x1267   :  { %8218 = vpow2.f32 %v4247_v47 }
0x126c   :  { %v8217_v23 = vpop.eup %8216 }
0x126d   :  { %v3689_v20 = vmul.f32 %v8217_v23, %v9887_v53  ;;  %v9951_v13 = vpop.eup %8218  ;;  %v4253_v63 = vpop.xlane.xlu1 %4252 }
0x126e   :  { %v4257_v17 = vsel %vm631_vm1, %v9951_v13, 0.0 }
0x126f   :  { %7037 = vmatmul.msk.f32.vlgmr.msrb.gmra.mxu3 %vm631_vm1, %v3689_v20 }
0x1279   :  { %4258 = vadd.xlane.f32.xlu1 %v4257_v17 }
0x1293   :  { %v3906_v22 = vpop.f32.mrf.mxu2 }
0x129b   :  { %v3909_v12 = vpop.f32.mrf.mxu2 }
0x129c   :  { %v7901_v8 = vpack.i.bf16 %v3909_v12, %v3906_v22  ;;  %v7630_v12 = vld [vmem:[#allocation8 + $0x78] sm:$0xff] }
0x129d   :  { %4454 = vmatpush.bf16.msra.mxu0 %v7630_v12 }
0x129e   :  { %7902 = vrot.lane.b32.xlu0 %v7901_v8, %s8611_s16  ;;  %v7629_v8 = vld [vmem:[#allocation8 + $0x70] sm:$0xff] }
0x12a0   :  { %v3682_v57 = vpop.xlane.xlu0 %3681 }
0x12a1   :  { %8220 = vrcp.f32 %v3682_v57  ;;  %4455 = vmatpush.bf16.msra.mxu0 %v7629_v8  ;;  %v7646_v8 = vld [vmem:[#allocation11 + $0x78] sm:$0xff] }
0x12a7   :  { %v8221_v53 = vpop.eup %8220 }
0x12a8   :  { %v4060_v39 = vpop.xlane.xlu0 %4059  ;;  %v3690_v15 = vmul.f32 %v8221_v53, %v9903_v9  ;;  %v4063_v54 = vpop.xlane.xlu2 %4062  ;;  %v7628_v53 = vld [vmem:[#allocation8 + $0x68] sm:$0xff] }
0x12a9   :  { %8222 = vrcp.f32 %v4060_v39  ;;  %v3866_v48 = vpop.xlane.xlu1 %3865  ;;  %4456 = vmatpush.bf16.msra.mxu0 %v7628_v53  ;;  %v7627_v39 = vld [vmem:[#allocation8 + $0x60] sm:$0xff] }
0x12aa   :  { %7038 = vmatmul.msk.f32.gmra.mxu3 %vm631_vm1, %v3690_v15 }
0x12ad   :  { %4457 = vmatpush.bf16.msra.mxu0 %v7627_v39  ;;  %v7644_v39 = vld [vmem:[#allocation11 + $0x68] sm:$0xff] }
0x12af   :  { %v8223_v29 = vpop.eup %8222 }
0x12b0   :  { %v3863_v42 = vpop.xlane.xlu0 %3862  ;;  %v4072_v44 = vmul.f32 %v8223_v29, %v9909_v49  ;;  %v4066_v27 = vpop.xlane.xlu2 %4065  ;;  %v7626_v29 = vld [vmem:[#allocation8 + $0x58] sm:$0xff] }
0x12b1   :  { %8224 = vrcp.f32 %v3863_v42  ;;  %4458 = vmatpush.bf16.msra.mxu0 %v7626_v29  ;;  %v7624_v42 = vld [vmem:[#allocation8 + $0x48] sm:$0xff]  ;;  %v7642_v29 = vld [vmem:[#allocation11 + $0x58] sm:$0xff] }
0x12b2   :  { %7060 = vmatmul.msk.f32.gmra.mxu2 %vm631_vm1, %v4072_v44  ;;  %8226 = vrcp.f32 %v3866_v48  ;;  %v7623_v44 = vld [vmem:[#allocation8 + $0x40] sm:$0xff] }
0x12b3   :  { %8228 = vrcp.f32 %v4253_v63 }
0x12b4   :  { %8230 = vrcp.f32 %v4063_v54  ;;  %v7625_v54 = vld [vmem:[#allocation8 + $0x50] sm:$0xff] }
0x12b5   :  { %4459 = vmatpush.bf16.msra.mxu0 %v7625_v54 }
0x12b7   :  { %v8225_v40 = vpop.eup %8224 }
0x12b8   :  { %v3873_v4 = vmul.f32 %v8225_v40, %v9923_v24  ;;  %v8227_v9 = vpop.eup %8226  ;;  %v4256_v49 = vpop.xlane.xlu2 %4255 }
0x12b9   :  { %v3874_v16 = vmul.f32 %v8227_v9, %v9915_v60  ;;  %v8229_v38 = vpop.eup %8228  ;;  %8232 = vrcp.f32 %v4256_v49  ;;  %4460 = vmatpush.bf16.msra.mxu0 %v7624_v42 }
0x12ba   :  { %7049 = vmatmul.msk.f32.vlgmr.msra.gmra.mxu3 %vm631_vm1, %v3873_v4  ;;  %v8231_v56 = vpop.eup %8230  ;;  %v4267_v24 = vmul.f32 %v8229_v38, %v9891_v50  ;;  %8234 = vrcp.f32 %v4066_v27 }
0x12bb   :  { %v4073_v60 = vmul.f32 %v8231_v56, %v9912_v35 }
0x12bd   :  { %4461 = vmatpush.bf16.msra.mxu0 %v7623_v44  ;;  %v7641_v44 = vld [vmem:[#allocation11 + $0x50] sm:$0xff] }
0x12bf   :  { %v8233_v62 = vpop.eup %8232 }
0x12c0   :  { %v8235_v3 = vpop.eup %8234  ;;  %v4268_v11 = vmul.f32 %v8233_v62, %v9931_v10  ;;  %v4262_v35 = vpop.xlane.xlu2 %4261 }
0x12c1   :  { %v7888_v14 = vpop.permute.xlu1 %7887  ;;  %v4074_v30 = vmul.f32 %v8235_v3, %v9925_v1 }
0x12c2   :  { %v7889_v34 = vunpack.i.l.bf16 %v7888_v14  ;;  %7050 = vmatmul.msk.f32.gmra.mxu3 %vm631_vm1, %v3874_v16  ;;  %v7890_v32 = vunpack.i.h.bf16 %v7888_v14 }
0x12c3   :  { %v7893_v18 = vpop.permute.xlu0 %7892 }
0x12c4   :  { %v7894_v25 = vunpack.i.l.bf16 %v7893_v18  ;;  %4136 = vmatpush.msrb.mxu3 %v7889_v34  ;;  %v7895_v31 = vunpack.i.h.bf16 %v7893_v18 }
0x12c6   :  { %4137 = vmatpush.msrb.mxu3 %v7890_v32  ;;  %4297 = vmatpush.msrb.mxu2 %v7894_v25 }
0x12c8   :  { %4298 = vmatpush.msrb.mxu2 %v7895_v31 }
0x12c9   :  { %7071 = vmatmul.msk.f32.vlgmr.msrb.gmra.mxu2 %vm631_vm1, %v4267_v24 }
0x12ca   :  { %7061 = vmatmul.msk.f32.vlgmr.msrb.gmra.mxu3 %vm631_vm1, %v4073_v60  ;;  %4774 = vmatpush.bf16.msra.mxu2 %v7646_v8 }
0x12cb   :  { %v7898_v5 = vpop.permute.xlu0 %7897 }
0x12cc   :  { %v7899_v61 = vunpack.i.l.bf16 %v7898_v5  ;;  %v7900_v37 = vunpack.i.h.bf16 %v7898_v5 }
0x12ce   :  { %4332 = vmatpush.msra.mxu3 %v7899_v61 }
0x12cf   :  { %v4104_v10 = vpop.f32.mrf.mxu2 }
0x12d0   :  { %4333 = vmatpush.msra.mxu3 %v7900_v37 }
0x12d1   :  { %7072 = vmatmul.msk.f32.gmra.mxu2 %vm631_vm1, %v4268_v11 }
0x12d2   :  { %7062 = vmatmul.msk.f32.gmra.mxu3 %vm631_vm1, %v4074_v30 }
0x12ec   :  { %v4259_v50 = vpop.xlane.xlu1 %4258 }
0x12ed   :  { %8236 = vrcp.f32 %v4259_v50 }
0x12ee   :  { %8238 = vrcp.f32 %v4262_v35 }
0x12f2   :  { %v9980_v1 = vpop.f32.mrf.mxu3 }
0x12f3   :  { %v8237_v26 = vpop.eup %8236 }
0x12f4   :  { %v4269_v6 = vmul.f32 %v8237_v26, %v9951_v13  ;;  %v8239_v45 = vpop.eup %8238 }
0x12f5   :  { %v4270_v52 = vmul.f32 %v8239_v45, %v9937_v0 }
0x12f6   :  { %7073 = vmatmul.msk.f32.vlgmr.msra.gmra.mxu3 %vm631_vm1, %v4269_v6 }
0x12fe   :  { %7074 = vmatmul.msk.f32.gmra.mxu3 %vm631_vm1, %v4270_v52 }
0x1310   :  { %v7903_v48 = vpop.permute.xlu0 %7902 }
0x1311   :  { %v7905_v4 = vunpack.i.h.bf16 %v7903_v48  ;;  %v7904_v27 = vunpack.i.l.bf16 %v7903_v48 }
0x1313   :  { %v4390_v34 = vsel %vm560_vm0, %v9957_v58, %v7905_v4  ;;  %v4389_v49 = vsel %vm560_vm0, %v9955_v33, %v7904_v27  ;;  %v7640_v4 = vld [vmem:[#allocation11 + $0x48] sm:$0xff] }
0x132d   :  { %v3746_v46 = vpop.f32.mrf.mxu3 }
0x1335   :  { %v4107_v43 = vpop.f32.mrf.mxu2 }
0x1336   :  { %v7906_v55 = vpack.i.bf16 %v4107_v43, %v4104_v10  ;;  %v8009_v10 = vld [vmem:[%s8679_s24 + $0x1] ss:$0 sm:$0xff]  ;;  %s8546_s24 = scalar_lea.hbm %s8545_s14, 32 }
0x1337   :  { %p8547_p12 = scmp.ne.s32.totalorder %s8545_s14, %s8546_s24 }
0x1338   :  { %7907 = vrot.lane.b32.xlu2 %v7906_v55, %s8601_s15 }
0x133d   :  { %v3943_v41 = vpop.f32.mrf.mxu3 }
0x1345   :  { %v3946_v47 = vpop.f32.mrf.mxu3 }
0x1346   :  { %v7916_v17 = vpack.i.bf16 %v3946_v47, %v3943_v41 }
0x134c   :  { %v4300_v36 = vpop.f32.mrf.mxu2 }
0x134d   :  { %v4139_v13 = vpop.f32.mrf.mxu3 }
0x1354   :  { %v4303_v23 = vpop.f32.mrf.mxu2 }
0x1355   :  { %v7911_v20 = vpack.i.bf16 %v4303_v23, %v4300_v36  ;;  %v4142_v0 = vpop.f32.mrf.mxu3 }
0x1356   :  { %v7921_v22 = vpack.i.bf16 %v4142_v0, %v4139_v13 }
0x1357   :  { %7912 = vrot.lane.b32.xlu0 %v7911_v20, %s8610_s6 }
0x135f   :  { %7917 = vrot.lane.b32.xlu0 %v7916_v17, %s8611_s16 }
0x1367   :  { %7922 = vrot.lane.b32.xlu0 %v7921_v22, %s8601_s15 }
0x1379   :  { %v4335_v57 = vpop.f32.mrf.mxu3 }
0x1381   :  { %v4338_v15 = vpop.f32.mrf.mxu3 }
0x1382   :  { %v7926_v63 = vpack.i.bf16 %v4338_v15, %v4335_v57  ;;  %v7645_v57 = vld [vmem:[#allocation11 + $0x70] sm:$0xff] }
0x1383   :  { %4775 = vmatpush.bf16.msra.mxu2 %v7645_v57 }
0x1384   :  { %7927 = vrot.lane.b32.xlu2 %v7926_v63, %s8610_s6  ;;  %v7643_v63 = vld [vmem:[#allocation11 + $0x60] sm:$0xff] }
0x1387   :  { %4776 = vmatpush.bf16.msra.mxu2 %v7644_v39 }
0x138b   :  { %4777 = vmatpush.bf16.msra.mxu2 %v7643_v63 }
0x138f   :  { %4778 = vmatpush.bf16.msra.mxu2 %v7642_v29 }
0x1392   :  { %v7908_v40 = vpop.permute.xlu2 %7907 }
0x1393   :  { %v7910_v9 = vunpack.i.h.bf16 %v7908_v40  ;;  %v7909_v16 = vunpack.i.l.bf16 %v7908_v40  ;;  %4779 = vmatpush.bf16.msra.mxu2 %v7641_v44 }
0x1395   :  { %v4394_v32 = vsel %vm1382_vm2, %v4390_v34, %v7910_v9  ;;  %v4393_v25 = vsel %vm1382_vm2, %v4389_v49, %v7909_v16  ;;  %v7639_v16 = vld [vmem:[#allocation11 + $0x40] sm:$0xff]  ;;  %v7638_v49 = vld [vmem:[#allocation10 + $0x78] sm:$0xff] }
0x1396   :  { %4704 = vmatpush.bf16.msra.mxu1 %v7638_v49 }
0x1397   :  { %4780 = vmatpush.bf16.msra.mxu2 %v7640_v4  ;;  %v8012_v4 = vld [vmem:[%s10518_s19 + $0x1] ss:$0 sm:$0xff] }
0x139b   :  { %4781 = vmatpush.bf16.msra.mxu2 %v7639_v16 }
0x139e   :  { %4782 = vmatmul.bf16.vlgmr.msra.gmra.mxu2 %v9243_v51 }
0x13ae   :  { %4787 = vmatmul.bf16.gmra.mxu2 %v9248_v19 }
0x13c9   :  { %v7913_v14 = vpop.permute.xlu0 %7912 }
0x13ca   :  { %v7915_v18 = vunpack.i.h.bf16 %v7913_v14  ;;  %v7914_v38 = vunpack.i.l.bf16 %v7913_v14 }
0x13cc   :  { %v4398_v56 = vsel %vm1387_vm3, %v4394_v32, %v7915_v18  ;;  %v4397_v31 = vsel %vm1387_vm3, %v4393_v25, %v7914_v38  ;;  %v7637_v18 = vld [vmem:[#allocation10 + $0x70] sm:$0xff]  ;;  %v7636_v38 = vld [vmem:[#allocation10 + $0x68] sm:$0xff]  ;;  %v7635_v32 = vld [vmem:[#allocation10 + $0x60] sm:$0xff] }
0x13cd   :  { %v4401_v24 = vpack.c.bf16 %v4398_v56, %v4397_v31  ;;  %4705 = vmatpush.bf16.msra.mxu1 %v7637_v18  ;;  %v7634_v25 = vld [vmem:[#allocation10 + $0x58] sm:$0xff]  ;;  %v7633_v56 = vld [vmem:[#allocation10 + $0x50] sm:$0xff] }
0x13cf   :  { %4462 = vmatmul.bf16.vlgmr.msra.gmra.mxu0 %v4401_v24  ;;  %v7632_v24 = vld [vmem:[#allocation10 + $0x48] sm:$0xff] }
0x13d1   :  { %v7918_v60 = vpop.permute.xlu0 %7917  ;;  %4706 = vmatpush.bf16.msra.mxu1 %v7636_v38 }
0x13d2   :  { %v7920_v62 = vunpack.i.h.bf16 %v7918_v60  ;;  %v7919_v58 = vunpack.i.l.bf16 %v7918_v60 }
0x13d4   :  { %v4392_v37 = vsel %vm560_vm0, %v3746_v46, %v7920_v62  ;;  %v4391_v11 = vsel %vm560_vm0, %v9980_v1, %v7919_v58  ;;  %v7631_v62 = vld [vmem:[#allocation10 + $0x40] sm:$0xff] }
0x13d5   :  { %4707 = vmatpush.bf16.msra.mxu1 %v7635_v32 }
0x13d9   :  { %v7923_v5 = vpop.permute.xlu0 %7922  ;;  %4708 = vmatpush.bf16.msra.mxu1 %v7634_v25 }
0x13da   :  { %v7925_v61 = vunpack.i.h.bf16 %v7923_v5  ;;  %v7924_v3 = vunpack.i.l.bf16 %v7923_v5 }
0x13dc   :  { %v4395_v35 = vsel %vm1382_vm2, %v4391_v11, %v7924_v3  ;;  %v4396_v26 = vsel %vm1382_vm2, %v4392_v37, %v7925_v61 }
0x13dd   :  { %4709 = vmatpush.bf16.msra.mxu1 %v7633_v56 }
0x13de   :  { %v7928_v33 = vpop.permute.xlu2 %7927 }
0x13df   :  { %v7930_v30 = vunpack.i.h.bf16 %v7928_v33  ;;  %v7929_v50 = vunpack.i.l.bf16 %v7928_v33 }
0x13e1   :  { %v4399_v6 = vsel %vm1387_vm3, %v4395_v35, %v7929_v50  ;;  %v4400_v45 = vsel %vm1387_vm3, %v4396_v26, %v7930_v30  ;;  %4710 = vmatpush.bf16.msra.mxu1 %v7632_v24 }
0x13e2   :  { %v4402_v52 = vpack.c.bf16 %v4400_v45, %v4399_v6 }
0x13e4   :  { %4467 = vmatmul.bf16.gmra.mxu0 %v4402_v52 }
0x13e5   :  { %4711 = vmatpush.bf16.msra.mxu1 %v7631_v62 }
0x144c   :  { %v4463_v43 = vpop.f32.mrf.mxu0 }
0x144d   :  { %v4464_v55 = vadd.f32 %v8009_v10, %v4463_v43 }
0x144f   :  { %v4473_v46 = vadd.f32 %v4464_v55, %v9709_v28 }
0x1451   :  { %4481 = vadd.xlane.f32.xlu0 %v4473_v46 }
0x1454   :  { %v4465_v41 = vpop.f32.mrf.mxu0 }
0x1455   :  { %v4466_v1 = vadd.f32 %v8009_v10, %v4465_v41 }
0x1457   :  { %v4474_v36 = vadd.f32 %v4466_v1, %v9711_v59  ;;  %v8010_v1 = vld [vmem:[%s10516_s0 + $0x1] ss:$0 sm:$0xff] }
0x1459   :  { %4483 = vadd.xlane.f32.xlu2 %v4474_v36 }
0x1461   :  { %v4468_v47 = vpop.f32.mrf.mxu0 }
0x1462   :  { %v4469_v23 = vadd.f32 %v8009_v10, %v4468_v47 }
0x1464   :  { %v4475_v20 = vadd.f32 %v4469_v23, %v9719_v7 }
0x1466   :  { %4485 = vadd.xlane.f32.xlu1 %v4475_v20 }
0x1469   :  { %v4470_v13 = vpop.f32.mrf.mxu0 }
0x146a   :  { %v4471_v17 = vadd.f32 %v8009_v10, %v4470_v13 }
0x146c   :  { %v4476_v0 = vadd.f32 %v4471_v17, %v9721_v2  ;;  %v8011_v17 = vld [vmem:[%s10517_s28 + $0x1] ss:$0 sm:$0xff] }
0x146e   :  { %4487 = vadd.xlane.f32.xlu1 %v4476_v0 }
0x14c4   :  { %v4482_v22 = vpop.xlane.xlu0 %4481 }
0x14c5   :  { %v4489_v12 = vmul.f32 %v4482_v22, %v9219_v21 }
0x14c7   :  { %v10008_v28 = vsub.f32 %v4473_v46, %v4489_v12 }
0x14c9   :  { %v4497_v59 = vmul.f32 %v10008_v28, %v10008_v28 }
0x14cb   :  { %4501 = vadd.xlane.f32.xlu1 %v4497_v59 }
0x14cc   :  { %v4484_v53 = vpop.xlane.xlu2 %4483 }
0x14cd   :  { %v4490_v7 = vmul.f32 %v4484_v53, %v9219_v21 }
0x14cf   :  { %v10013_v15 = vsub.f32 %v4474_v36, %v4490_v7 }
0x14d1   :  { %v4498_v2 = vmul.f32 %v10013_v15, %v10013_v15 }
0x14d3   :  { %4503 = vadd.xlane.f32.xlu1 %v4498_v2 }
0x14d9   :  { %v4486_v54 = vpop.xlane.xlu1 %4485 }
0x14da   :  { %v4491_v42 = vmul.f32 %v4486_v54, %v9219_v21 }
0x14dc   :  { %v10018_v48 = vsub.f32 %v4475_v20, %v4491_v42 }
0x14de   :  { %v4499_v40 = vmul.f32 %v10018_v48, %v10018_v48 }
0x14e0   :  { %4505 = vadd.xlane.f32.xlu1 %v4499_v40 }
0x14e1   :  { %v4488_v27 = vpop.xlane.xlu1 %4487 }
0x14e2   :  { %v4492_v9 = vmul.f32 %v4488_v27, %v9219_v21  ;;  %v4783_v27 = vpop.f32.mrf.mxu2 }
0x14e3   :  { %v4784_v16 = vadd.f32 %v8012_v4, %v4783_v27 }
0x14e4   :  { %v10023_v14 = vsub.f32 %v4476_v0, %v4492_v9 }
0x14e5   :  { %5047 = vrot.lane.b32.xlu0 %v4784_v16, %s8610_s6 }
0x14e6   :  { %v4500_v34 = vmul.f32 %v10023_v14, %v10023_v14 }
0x14e8   :  { %4507 = vadd.xlane.f32.xlu1 %v4500_v34 }
0x14ea   :  { %v4785_v56 = vpop.f32.mrf.mxu2 }
0x153e   :  { %v4502_v31 = vpop.xlane.xlu1 %4501 }
0x153f   :  { %v4509_v60 = vmul.f32 %v4502_v31, %v9219_v21  ;;  %v4786_v31 = vadd.f32 %v8012_v4, %v4785_v56 }
0x1541   :  { %v4513_v5 = vadd.f32 1e-05, %v4509_v60  ;;  %5049 = vrot.lane.b32.xlu2 %v4786_v31, %s8610_s6  ;;  %7209 = vmatpush.xpose.msk.msrb.mxu0 %vm560_vm0, %v4786_v31 }
0x1543   :  { %8240 = vrsqrt.f32 %v4513_v5  ;;  %vm4523_vm6 = vweird.f32 %v4513_v5 }
0x1545   :  { %7210 = vmatpush.xpose.msk.msrb.mxu0 %vm560_vm0, %v4784_v16 }
0x1546   :  { %v4504_v58 = vpop.xlane.xlu1 %4503 }
0x1547   :  { %v4510_v61 = vmul.f32 %v4504_v58, %v9219_v21 }
0x1549   :  { %v8241_v3 = vpop.eup %8240  ;;  %v4514_v33 = vadd.f32 1e-05, %v4510_v61  ;;  %v8013_v61 = vld [vmem:[%s10519_s11 + $0x1] ss:$0 sm:$0xff] }
0x154a   :  { %v4518_v37 = vmul.f32 %v8241_v3, %v4513_v5  ;;  %vm4524_vm5 = vweird.f32 %v8241_v3 }
0x154b   :  { %8242 = vrsqrt.f32 %v4514_v33  ;;  %vm4525_vm7 = vmor %vm4523_vm6, %vm4524_vm5  ;;  %vm4533_vm9 = vweird.f32 %v4514_v33 }
0x154c   :  { %v4519_v11 = vmul.f32 %v8241_v3, %v4518_v37 }
0x154e   :  { %v4520_v30 = vmul.f32 0.5, %v4519_v11 }
0x1550   :  { %v4521_v50 = vsub.f32 1.5, %v4520_v30 }
0x1551   :  { %v8243_v35 = vpop.eup %8242 }
0x1552   :  { %v4522_v26 = vmul.f32 %v8241_v3, %v4521_v50  ;;  %v4528_v6 = vmul.f32 %v8243_v35, %v4514_v33  ;;  %vm4534_vm8 = vweird.f32 %v8243_v35 }
0x1553   :  { %v4506_v45 = vpop.xlane.xlu1 %4505  ;;  %vm4535_vm10 = vmor %vm4533_vm9, %vm4534_vm8 }
0x1554   :  { %v4529_v52 = vmul.f32 %v8243_v35, %v4528_v6  ;;  %v4511_v10 = vmul.f32 %v4506_v45, %v9219_v21  ;;  %v4526_v43 = vsel %vm4525_vm7, %v8241_v3, %v4522_v26 }
0x1555   :  { %v4557_v36 = vmul.f32 %v4526_v43, %v10008_v28 }
0x1556   :  { %v4530_v55 = vmul.f32 0.5, %v4529_v52  ;;  %v4515_v46 = vadd.f32 1e-05, %v4511_v10 }
0x1557   :  { %v4564_v0 = vmul.f32 %v8010_v1, %v4557_v36 }
0x1558   :  { %v4531_v41 = vsub.f32 1.5, %v4530_v55  ;;  %8244 = vrsqrt.f32 %v4515_v46  ;;  %vm4543_vm12 = vweird.f32 %v4515_v46 }
0x1559   :  { %v10037_v53 = vadd.f32 %v8011_v17, %v4564_v0 }
0x155a   :  { %v4532_v47 = vmul.f32 %v8243_v35, %v4531_v41  ;;  %v5048_v41 = vpop.permute.xlu0 %5047 }
0x155b   :  { %v4508_v23 = vpop.xlane.xlu1 %4507 }
0x155c   :  { %v4536_v20 = vsel %vm4535_vm10, %v8243_v35, %v4532_v47  ;;  %v4512_v13 = vmul.f32 %v4508_v23, %v9219_v21  ;;  %v7654_v47 = vld [vmem:[#allocation13 + $0x78] sm:$0xff]  ;;  %v7653_v23 = vld [vmem:[#allocation13 + $0x70] sm:$0xff] }
0x155d   :  { %v4558_v22 = vmul.f32 %v4536_v20, %v10013_v15  ;;  %4844 = vmatpush.bf16.msrb.mxu3 %v7654_v47 }
0x155e   :  { %v8245_v12 = vpop.eup %8244  ;;  %v4516_v8 = vadd.f32 1e-05, %v4512_v13  ;;  %v7652_v13 = vld [vmem:[#allocation13 + $0x68] sm:$0xff] }
0x155f   :  { %v4565_v59 = vmul.f32 %v8010_v1, %v4558_v22  ;;  %v4538_v57 = vmul.f32 %v8245_v12, %v4515_v46  ;;  %vm4544_vm11 = vweird.f32 %v8245_v12  ;;  %v7650_v22 = vld [vmem:[#allocation13 + $0x58] sm:$0xff] }
0x1560   :  { %8246 = vrsqrt.f32 %v4516_v8  ;;  %vm4545_vm13 = vmor %vm4543_vm12, %vm4544_vm11  ;;  %vm4553_vm15 = vweird.f32 %v4516_v8 }
0x1561   :  { %v10039_v28 = vadd.f32 %v8011_v17, %v4565_v59  ;;  %v4539_v7 = vmul.f32 %v8245_v12, %v4538_v57  ;;  %4845 = vmatpush.bf16.msrb.mxu3 %v7653_v23  ;;  %v10093_v59 = vld [vmem:[%s10520_s8] sm:$0xff] }
0x1563   :  { %v4540_v39 = vmul.f32 0.5, %v4539_v7  ;;  %v4651_v2 = vpack.c.bf16 %v10039_v28, %v10037_v53  ;;  %v7649_v7 = vld [vmem:[#allocation13 + $0x50] sm:$0xff] }
0x1565   :  { %v4541_v63 = vsub.f32 1.5, %v4540_v39  ;;  %4712 = vmatmul.bf16.vlgmr.msra.gmra.mxu1 %v4651_v2  ;;  %4846 = vmatpush.bf16.msrb.mxu3 %v7652_v13 }
0x1566   :  { %v8247_v29 = vpop.eup %8246 }
0x1567   :  { %v4542_v54 = vmul.f32 %v8245_v12, %v4541_v63  ;;  %v4548_v15 = vmul.f32 %v8247_v29, %v4516_v8  ;;  %vm4554_vm14 = vweird.f32 %v8247_v29  ;;  %v7648_v63 = vld [vmem:[#allocation13 + $0x48] sm:$0xff] }
0x1568   :  { %vm4555_vm4 = vmor %vm4553_vm15, %vm4554_vm14 }
0x1569   :  { %v4549_v42 = vmul.f32 %v8247_v29, %v4548_v15  ;;  %v4546_v44 = vsel %vm4545_vm13, %v8245_v12, %v4542_v54  ;;  %v10099_v54 = vld [vmem:[%s10520_s8 + $0x8] sm:$0xff] }
0x156a   :  { %v4559_v34 = vmul.f32 %v4546_v44, %v10018_v48  ;;  %v7647_v44 = vld [vmem:[#allocation13 + $0x40] sm:$0xff] }
0x156b   :  { %v4550_v40 = vmul.f32 0.5, %v4549_v42 }
0x156c   :  { %v4566_v32 = vmul.f32 %v8010_v1, %v4559_v34 }
0x156d   :  { %v4551_v9 = vsub.f32 1.5, %v4550_v40 }
0x156e   :  { %v10047_v24 = vadd.f32 %v8011_v17, %v4566_v32 }
0x156f   :  { %v4552_v49 = vmul.f32 %v8247_v29, %v4551_v9 }
0x1571   :  { %v4556_v18 = vsel %vm4555_vm4, %v8247_v29, %v4552_v49 }
0x1572   :  { %v4560_v38 = vmul.f32 %v4556_v18, %v10023_v14  ;;  %v4788_v14 = vpop.f32.mrf.mxu2 }
0x1573   :  { %v4789_v58 = vadd.f32 %v8012_v4, %v4788_v14 }
0x1574   :  { %v4567_v25 = vmul.f32 %v8010_v1, %v4560_v38 }
0x1576   :  { %v10049_v60 = vadd.f32 %v8011_v17, %v4567_v25  ;;  %v7651_v17 = vld [vmem:[#allocation13 + $0x60] sm:$0xff] }
0x1577   :  { %4847 = vmatpush.bf16.msrb.mxu3 %v7651_v17 }
0x1578   :  { %v4652_v48 = vpack.c.bf16 %v10049_v60, %v10047_v24 }
0x157a   :  { %4717 = vmatmul.bf16.gmra.mxu1 %v4652_v48  ;;  %v4790_v5 = vpop.f32.mrf.mxu2 }
0x157b   :  { %v4791_v62 = vadd.f32 %v8012_v4, %v4790_v5  ;;  %4848 = vmatpush.bf16.msrb.mxu3 %v7650_v22 }
0x157d   :  { %5088 = vrot.lane.b32.xlu2 %v4791_v62, %s8610_s6  ;;  %7213 = vmatpush.xpose.msk.msrb.mxu1 %vm560_vm0, %v4791_v62 }
0x157f   :  { %4849 = vmatpush.bf16.msrb.mxu3 %v7649_v7 }
0x1581   :  { %7214 = vmatpush.xpose.msk.msrb.mxu1 %vm560_vm0, %v4789_v58 }
0x1583   :  { %4850 = vmatpush.bf16.msrb.mxu3 %v7648_v63 }
0x1585   :  { %5086 = vrot.lane.b32.xlu2 %v4789_v58, %s8610_s6 }
0x1587   :  { %4851 = vmatpush.bf16.msrb.mxu3 %v7647_v44  ;;  %v10169_v44 = vld [vmem:[%s10520_s8 + $0x10] sm:$0xff] }
0x158a   :  { %4852 = vmatmul.bf16.vlgmr.msrb.gmra.mxu3 %v9243_v51 }
0x159a   :  { %4857 = vmatmul.bf16.gmra.mxu3 %v9248_v19 }
0x159b   :  { %v5050_v43 = vpop.permute.xlu2 %5049 }
0x159c   :  { %7221 = vmatpush.xpose.msk.msra.mxu0 %vm560_vm0, %v5050_v43 }
0x15a0   :  { %7222 = vmatpush.xpose.msk.msra.mxu0 %vm560_vm0, %v5048_v41 }
0x15d7   :  { %v5089_v55 = vpop.permute.xlu2 %5088 }
0x15d8   :  { %7225 = vmatpush.xpose.msk.msra.mxu1 %vm560_vm0, %v5089_v55 }
0x15df   :  { %v5087_v46 = vpop.permute.xlu2 %5086 }
0x15e0   :  { %7226 = vmatpush.xpose.msk.msra.mxu1 %vm560_vm0, %v5087_v46  ;;  %v8014_v46 = vld [vmem:[%s10521_s7 + $0x1] ss:$0 sm:$0xff] }
0x15e2   :  { %v4713_v3 = vpop.f32.mrf.mxu1 }
0x15e3   :  { %v4714_v33 = vadd.f32 %v8013_v61, %v4713_v3 }
0x15e5   :  { %v4863_v37 = vmul.f32 0.17677669, %v4714_v33 }
0x15e7   :  { %5043 = vrot.lane.b32.xlu1 %v4863_v37, %s8610_s6  ;;  %5243 = vrot.lane.b32.xlu2 %v4863_v37, %s8601_s15 }
0x15e8   :  { %7211 = vmatmul.msk.f32.vlgmr.msrb.gmra.mxu0 %vm560_vm0, %v4863_v37 }
0x15ea   :  { %v4715_v11 = vpop.f32.mrf.mxu1 }
0x15eb   :  { %v4716_v30 = vadd.f32 %v8013_v61, %v4715_v11 }
0x15ed   :  { %v4864_v50 = vmul.f32 0.17677669, %v4716_v30 }
0x15ef   :  { %5288 = vrot.lane.b32.xlu2 %v4791_v62, %s8601_s15  ;;  %5247 = vrot.lane.b32.xlu1 %v4784_v16, %s8601_s15 }
0x15f0   :  { %5045 = vrot.lane.b32.xlu0 %v4864_v50, %s8610_s6  ;;  %7212 = vmatmul.msk.f32.gmra.mxu0 %vm560_vm0, %v4864_v50 }
0x15f7   :  { %v4718_v35 = vpop.f32.mrf.mxu1  ;;  %5443 = vrot.lane.b32.xlu2 %v4784_v16, %s8611_s16  ;;  %5445 = vrot.lane.b32.xlu1 %v4786_v31, %s8611_s16 }
0x15f8   :  { %v4719_v26 = vadd.f32 %v8013_v61, %v4718_v35  ;;  %5249 = vrot.lane.b32.xlu0 %v4786_v31, %s8601_s15 }
0x15fa   :  { %v4865_v6 = vmul.f32 0.17677669, %v4719_v26 }
0x15fc   :  { %7215 = vmatmul.msk.f32.vlgmr.msrb.gmra.mxu1 %vm560_vm0, %v4865_v6 }
0x15ff   :  { %v4720_v45 = vpop.f32.mrf.mxu1 }
0x1600   :  { %v4721_v52 = vadd.f32 %v8013_v61, %v4720_v45  ;;  %5245 = vrot.lane.b32.xlu0 %v4864_v50, %s8601_s15 }
0x1602   :  { %v4866_v10 = vmul.f32 0.17677669, %v4721_v52 }
0x1604   :  { %7216 = vmatmul.msk.f32.gmra.mxu1 %vm560_vm0, %v4866_v10  ;;  %5284 = vrot.lane.b32.xlu2 %v4866_v10, %s8601_s15 }
0x1605   :  { %5084 = vrot.lane.b32.xlu1 %v4866_v10, %s8610_s6 }
0x1608   :  { %5082 = vrot.lane.b32.xlu0 %v4865_v6, %s8610_s6 }
0x160c   :  { %5482 = vrot.lane.b32.xlu2 %v4789_v58, %s8611_s16 }
0x160d   :  { %5282 = vrot.lane.b32.xlu1 %v4865_v6, %s8601_s15  ;;  %v4853_v52 = vpop.f32.mrf.mxu3 }
0x160e   :  { %v4854_v23 = vadd.f32 %v8014_v46, %v4853_v52 }
0x1610   :  { %5286 = vrot.lane.b32.xlu0 %v4789_v58, %s8601_s15 }
0x1615   :  { %5441 = vrot.lane.b32.xlu1 %v4864_v50, %s8611_s16 }
0x1618   :  { %5439 = vrot.lane.b32.xlu0 %v4863_v37, %s8611_s16 }
0x161d   :  { %5478 = vrot.lane.b32.xlu1 %v4865_v6, %s8611_s16 }
0x1620   :  { %5484 = vrot.lane.b32.xlu0 %v4791_v62, %s8611_s16 }
0x1628   :  { %5480 = vrot.lane.b32.xlu0 %v4866_v10, %s8611_s16 }
0x1641   :  { %v5244_v1 = vpop.permute.xlu2 %5243 }
0x1649   :  { %v5289_v36 = vpop.permute.xlu2 %5288 }
0x164a   :  { %7237 = vmatpush.xpose.msk.msrb.mxu1 %vm560_vm0, %v5289_v36 }
0x1651   :  { %v5444_v27 = vpop.permute.xlu2 %5443 }
0x1659   :  { %v5044_v20 = vpop.permute.xlu1 %5043 }
0x165a   :  { %7223 = vmatmul.msk.f32.vlgmr.msra.gmra.mxu0 %vm560_vm0, %v5044_v20 }
0x165e   :  { %v5285_v51 = vpop.permute.xlu2 %5284 }
0x1661   :  { %v5248_v12 = vpop.permute.xlu1 %5247 }
0x1662   :  { %v5046_v0 = vpop.permute.xlu0 %5045 }
0x1663   :  { %7224 = vmatmul.msk.f32.gmra.mxu0 %vm560_vm0, %v5046_v0 }
0x1665   :  { %v4896_v8 = vpop.f32.mrf.mxu0 }
0x1666   :  { %v4897_v57 = vadd.f32 %v10093_v59, %v4896_v8  ;;  %v5483_v25 = vpop.permute.xlu2 %5482 }
0x1668   :  { %v4937_v39 = vsel %vm631_vm1, %v4897_v57, -inf }
0x1669   :  { %4938 = vmax.xlane.f32.xlu2 %v4937_v39  ;;  %v5446_v42 = vpop.permute.xlu1 %5445 }
0x166a   :  { %v5250_v2 = vpop.permute.xlu0 %5249 }
0x166b   :  { %7233 = vmatpush.xpose.msk.msrb.mxu0 %vm560_vm0, %v5250_v2 }
0x166d   :  { %v4899_v29 = vpop.f32.mrf.mxu0 }
0x166e   :  { %v4900_v15 = vadd.f32 %v10099_v54, %v4899_v29 }
0x166f   :  { %7234 = vmatpush.xpose.msk.msrb.mxu0 %vm560_vm0, %v5248_v12 }
0x1670   :  { %v4940_v40 = vsel %vm631_vm1, %v4900_v15, -inf }
0x1671   :  { %4941 = vmax.xlane.f32.xlu1 %v4940_v40 }
0x1672   :  { %v5246_v4 = vpop.permute.xlu0 %5245  ;;  %7235 = vmatmul.msk.f32.vlgmr.msrb.gmra.mxu0 %vm560_vm0, %v5244_v1  ;;  %v4855_v1 = vpop.f32.mrf.mxu3 }
0x1673   :  { %7245 = vmatpush.xpose.msk.msra.mxu0 %vm560_vm0, %v5446_v42  ;;  %v4856_v36 = vadd.f32 %v8014_v46, %v4855_v1 }
0x1675   :  { %5005 = vmatpush.msrb.mxu2 %v4856_v36  ;;  %v10160_v63 = vpack.i.bf16 %v4854_v23, %v4856_v36 }
0x1677   :  { %7246 = vmatpush.xpose.msk.msra.mxu0 %vm560_vm0, %v5444_v27  ;;  %v5085_v16 = vpop.permute.xlu1 %5084  ;;  %5006 = vmatpush.msrb.mxu2 %v4854_v23 }
0x167a   :  { %v5083_v9 = vpop.permute.xlu0 %5082  ;;  %7236 = vmatmul.msk.f32.gmra.mxu0 %vm560_vm0, %v5246_v4  ;;  %v4858_v0 = vpop.f32.mrf.mxu3 }
0x167b   :  { %7227 = vmatmul.msk.f32.vlgmr.msra.gmra.mxu1 %vm560_vm0, %v5083_v9  ;;  %v4859_v2 = vadd.f32 %v8014_v46, %v4858_v0 }
0x167f   :  { %v5283_v49 = vpop.permute.xlu1 %5282 }
0x1682   :  { %v5287_v34 = vpop.permute.xlu0 %5286  ;;  %v4860_v7 = vpop.f32.mrf.mxu3 }
0x1683   :  { %7228 = vmatmul.msk.f32.gmra.mxu1 %vm560_vm0, %v5085_v16  ;;  %v4861_v39 = vadd.f32 %v8014_v46, %v4860_v7 }
0x1684   :  { %7238 = vmatpush.xpose.msk.msrb.mxu1 %vm560_vm0, %v5287_v34 }
0x1685   :  { %5034 = vmatpush.msra.mxu3 %v4861_v39  ;;  %v10162_v29 = vpack.i.bf16 %v4859_v2, %v4861_v39 }
0x1687   :  { %v5442_v38 = vpop.permute.xlu1 %5441  ;;  %5035 = vmatpush.msra.mxu3 %v4859_v2 }
0x168a   :  { %v5440_v18 = vpop.permute.xlu0 %5439 }
0x168b   :  { %7239 = vmatmul.msk.f32.vlgmr.msrb.gmra.mxu1 %vm560_vm0, %v5283_v49  ;;  %7247 = vmatmul.msk.f32.vlgmr.msra.gmra.mxu0 %vm560_vm0, %v5440_v18  ;;  %v10178_v18 = vld [vmem:[%s10520_s8 + $0x18] sm:$0xff] }
0x168f   :  { %v5479_v56 = vpop.permute.xlu1 %5478 }
0x1692   :  { %v5485_v32 = vpop.permute.xlu0 %5484 }
0x1693   :  { %7240 = vmatmul.msk.f32.gmra.mxu1 %vm560_vm0, %v5285_v51  ;;  %7248 = vmatmul.msk.f32.gmra.mxu0 %vm560_vm0, %v5442_v38 }
0x1694   :  { %7249 = vmatpush.xpose.msk.msra.mxu1 %vm560_vm0, %v5485_v32 }
0x1698   :  { %7250 = vmatpush.xpose.msk.msra.mxu1 %vm560_vm0, %v5483_v25 }
0x169a   :  { %v5481_v19 = vpop.permute.xlu0 %5480 }
0x169b   :  { %7251 = vmatmul.msk.f32.vlgmr.msra.gmra.mxu1 %vm560_vm0, %v5479_v56 }
0x16a3   :  { %7252 = vmatmul.msk.f32.gmra.mxu1 %vm560_vm0, %v5481_v19 }
0x16d7   :  { %v5076_v31 = vpop.f32.mrf.mxu0 }
0x16d8   :  { %v10122_v48 = vadd.f32 %v10093_v59, %v5076_v31 }
0x16da   :  { %v5121_v14 = vsel %vm631_vm1, %v10122_v48, -inf }
0x16db   :  { %5122 = vmax.xlane.f32.xlu2 %v5121_v14 }
0x16dc   :  { %v4939_v61 = vpop.xlane.xlu2 %4938 }
0x16dd   :  { %v4949_v3 = vmax.f32 %v4939_v61, -1e+09 }
0x16df   :  { %v4953_v11 = vsub.f32 %v4897_v57, %v4949_v3 }
0x16e0   :  { %v5079_v5 = vpop.f32.mrf.mxu0 }
0x16e1   :  { %v10127_v62 = vadd.f32 %v10099_v54, %v5079_v5  ;;  %v4957_v35 = vmul.f32 1.442695, %v4953_v11 }
0x16e3   :  { %v5124_v58 = vsel %vm631_vm1, %v10127_v62, -inf  ;;  %8248 = vpow2.f32 %v4957_v35 }
0x16e4   :  { %5125 = vmax.xlane.f32.xlu0 %v5124_v58  ;;  %v4942_v30 = vpop.xlane.xlu1 %4941 }
0x16e5   :  { %v4950_v26 = vmax.f32 %v4942_v30, -1e+09 }
0x16e7   :  { %v4954_v10 = vsub.f32 %v4900_v15, %v4950_v26 }
0x16e9   :  { %v4959_v55 = vmul.f32 1.442695, %v4954_v10  ;;  %v10142_v41 = vpop.eup %8248 }
0x16ea   :  { %v4965_v47 = vsel %vm631_vm1, %v10142_v41, 0.0 }
0x16eb   :  { %8250 = vpow2.f32 %v4959_v55 }
0x16ef   :  { %v5276_v33 = vpop.f32.mrf.mxu0 }
0x16f0   :  { %v10132_v37 = vadd.f32 %v10093_v59, %v5276_v33 }
0x16f1   :  { %v10146_v20 = vpop.eup %8250 }
0x16f2   :  { %v5321_v50 = vsel %vm631_vm1, %v10132_v37, -inf  ;;  %v4968_v22 = vsel %vm631_vm1, %v10146_v20, 0.0 }
0x16f3   :  { %5322 = vmax.xlane.f32.xlu1 %v5321_v50 }
0x16f7   :  { %v5279_v6 = vpop.f32.mrf.mxu0 }
0x16f8   :  { %v10137_v45 = vadd.f32 %v10099_v54, %v5279_v6 }
0x16fa   :  { %v5324_v43 = vsel %vm631_vm1, %v10137_v45, -inf }
0x16fb   :  { %5325 = vmax.xlane.f32.xlu2 %v5324_v43 }
0x1703   :  { %4966 = vadd.xlane.f32.xlu2 %v4965_v47 }
0x1708   :  { %v5472_v13 = vpop.f32.mrf.mxu0 }
0x1709   :  { %v10149_v17 = vadd.f32 %v10093_v59, %v5472_v13 }
0x170b   :  { %4969 = vadd.xlane.f32.xlu2 %v4968_v22  ;;  %v5517_v12 = vsel %vm631_vm1, %v10149_v17, -inf }
0x170c   :  { %5518 = vmax.xlane.f32.xlu0 %v5517_v12 }
0x1710   :  { %v5475_v8 = vpop.f32.mrf.mxu0 }
0x1711   :  { %v10156_v57 = vadd.f32 %v10099_v54, %v5475_v8  ;;  %v4931_v54 = vpop.f32.mrf.mxu1 }
0x1712   :  { %v10172_v40 = vadd.f32 %v10169_v44, %v4931_v54 }
0x1713   :  { %v5520_v59 = vsel %vm631_vm1, %v10156_v57, -inf }
0x1714   :  { %5521 = vmax.xlane.f32.xlu0 %v5520_v59  ;;  %v4943_v16 = vsel %vm631_vm1, %v10172_v40, -inf }
0x1719   :  { %v4934_v15 = vpop.f32.mrf.mxu1 }
0x171a   :  { %v10207_v6 = vadd.f32 %v10178_v18, %v4934_v15 }
0x1721   :  { %v5115_v42 = vpop.f32.mrf.mxu1 }
0x1722   :  { %v10191_v14 = vadd.f32 %v10169_v44, %v5115_v42 }
0x1723   :  { %7937 = vrot.lane.b32.xlu2 %v10162_v29, %s8610_s6 }
0x1724   :  { %v5127_v58 = vsel %vm631_vm1, %v10191_v14, -inf }
0x1728   :  { %7932 = vrot.lane.b32.xlu0 %v10160_v63, %s8610_s6 }
0x1729   :  { %v5118_v34 = vpop.f32.mrf.mxu1 }
0x172a   :  { %v10181_v51 = vadd.f32 %v10178_v18, %v5118_v34 }
0x172c   :  { %v5130_v25 = vsel %vm631_vm1, %v10181_v51, -inf }
0x1731   :  { %v5315_v22 = vpop.f32.mrf.mxu1 }
0x1739   :  { %v5318_v7 = vpop.f32.mrf.mxu1 }
0x173a   :  { %v10228_v59 = vadd.f32 %v10178_v18, %v5318_v7 }
0x1741   :  { %v5511_v42 = vpop.f32.mrf.mxu1 }
0x174e   :  { %v5123_v4 = vpop.xlane.xlu2 %5122 }
0x174f   :  { %v5133_v27 = vmax.f32 %v5123_v4, -1e+09  ;;  %v5330_v4 = vsel %vm631_vm1, %v10228_v59, -inf }
0x1751   :  { %v5137_v9 = vsub.f32 %v10122_v48, %v5133_v27  ;;  %v10233_v27 = vadd.f32 %v10169_v44, %v5511_v42 }
0x1752   :  { %4944 = vmax.xlane.f32.xlu0 %v4943_v16  ;;  %v5514_v16 = vpop.f32.mrf.mxu1 }
0x1753   :  { %v5141_v49 = vmul.f32 1.442695, %v5137_v9  ;;  %v5523_v9 = vsel %vm631_vm1, %v10233_v27, -inf  ;;  %v10238_v34 = vadd.f32 %v10178_v18, %v5514_v16 }
0x1755   :  { %8252 = vpow2.f32 %v5141_v49  ;;  %v5526_v49 = vsel %vm631_vm1, %v10238_v34, -inf }
0x1757   :  { %v5126_v38 = vpop.xlane.xlu0 %5125 }
0x1758   :  { %v5134_v32 = vmax.f32 %v5126_v38, -1e+09 }
0x175a   :  { %v5138_v56 = vsub.f32 %v10127_v62, %v5134_v32  ;;  %5131 = vmax.xlane.f32.xlu0 %v5130_v25 }
0x175b   :  { %v10186_v19 = vpop.eup %8252 }
0x175c   :  { %v5143_v31 = vmul.f32 1.442695, %v5138_v56  ;;  %v5149_v48 = vsel %vm631_vm1, %v10186_v19, 0.0 }
0x175d   :  { %5150 = vadd.xlane.f32.xlu2 %v5149_v48 }
0x175e   :  { %8254 = vpow2.f32 %v5143_v31 }
0x1764   :  { %v10193_v5 = vpop.eup %8254 }
0x1765   :  { %v5152_v62 = vsel %vm631_vm1, %v10193_v5, 0.0  ;;  %5128 = vmax.xlane.f32.xlu2 %v5127_v58 }
0x1766   :  { %5153 = vadd.xlane.f32.xlu1 %v5152_v62  ;;  %v5323_v61 = vpop.xlane.xlu1 %5322 }
0x1767   :  { %v5333_v3 = vmax.f32 %v5323_v61, -1e+09 }
0x1769   :  { %v5337_v33 = vsub.f32 %v10132_v37, %v5333_v3  ;;  %v4946_v37 = vsel %vm631_vm1, %v10207_v6, -inf }
0x176b   :  { %v5341_v11 = vmul.f32 1.442695, %v5337_v33 }
0x176d   :  { %8256 = vpow2.f32 %v5341_v11 }
0x176e   :  { %7942 = vrot.lane.b32.xlu0 %v10160_v63, %s8601_s15  ;;  %v5326_v30 = vpop.xlane.xlu2 %5325 }
0x176f   :  { %v5334_v32 = vmax.f32 %v5326_v30, -1e+09 }
0x1771   :  { %v5338_v56 = vsub.f32 %v10137_v45, %v5334_v32 }
0x1773   :  { %v10202_v50 = vpop.eup %8256  ;;  %v5343_v48 = vmul.f32 1.442695, %v5338_v56 }
0x1774   :  { %v5349_v35 = vsel %vm631_vm1, %v10202_v50, 0.0 }
0x1775   :  { %5350 = vadd.xlane.f32.xlu1 %v5349_v35 }
0x1776   :  { %v4967_v26 = vpop.xlane.xlu2 %4966 }
0x1777   :  { %8258 = vrcp.f32 %v4967_v26 }
0x177d   :  { %v8259_v52 = vpop.eup %8258  ;;  %4947 = vmax.xlane.f32.xlu1 %v4946_v37 }
0x177e   :  { %v4981_v10 = vmul.f32 %v8259_v52, %v10142_v41  ;;  %v4970_v43 = vpop.xlane.xlu2 %4969 }
0x177f   :  { %8260 = vrcp.f32 %v4970_v43  ;;  %v5519_v55 = vpop.xlane.xlu0 %5518 }
0x1780   :  { %v5529_v46 = vmax.f32 %v5519_v55, -1e+09  ;;  %7217 = vmatmul.msk.f32.vlgmr.msrb.gmra.mxu2 %vm631_vm1, %v4981_v10 }
0x1782   :  { %v5533_v1 = vsub.f32 %v10149_v17, %v5529_v46  ;;  %v10221_v17 = vadd.f32 %v10169_v44, %v5315_v22 }
0x1784   :  { %v5537_v36 = vmul.f32 1.442695, %v5533_v1 }
0x1785   :  { %v8261_v47 = vpop.eup %8260 }
0x1786   :  { %8262 = vpow2.f32 %v5537_v36  ;;  %v4982_v23 = vmul.f32 %v8261_v47, %v10146_v20  ;;  %v7938_v13 = vpop.permute.xlu2 %7937  ;;  %v5327_v20 = vsel %vm631_vm1, %v10221_v17, -inf }
0x1787   :  { %v7939_v0 = vunpack.i.l.bf16 %v7938_v13  ;;  %v7940_v12 = vunpack.i.h.bf16 %v7938_v13  ;;  %v10223_v39 = vpop.xlane.xlu0 %5521 }
0x1788   :  { %7218 = vmatmul.msk.f32.gmra.mxu2 %vm631_vm1, %v4982_v23 }
0x1789   :  { %5234 = vmatpush.msrb.mxu3 %v7939_v0 }
0x178b   :  { %5235 = vmatpush.msrb.mxu3 %v7940_v12 }
0x178c   :  { %v10216_v41 = vpop.eup %8262 }
0x178d   :  { %v5545_v8 = vsel %vm631_vm1, %v10216_v41, 0.0 }
0x178e   :  { %5546 = vadd.xlane.f32.xlu1 %v5545_v8 }
0x1796   :  { %5328 = vmax.xlane.f32.xlu1 %v5327_v20 }
0x179a   :  { %v7933_v2 = vpop.permute.xlu0 %7932 }
0x179b   :  { %v7935_v54 = vunpack.i.h.bf16 %v7933_v2  ;;  %v7934_v15 = vunpack.i.l.bf16 %v7933_v2 }
0x179d   :  { %5197 = vmatpush.msra.mxu2 %v7934_v15 }
0x179e   :  { %5331 = vmax.xlane.f32.xlu1 %v5330_v4 }
0x179f   :  { %5198 = vmatpush.msra.mxu2 %v7935_v54 }
0x17a6   :  { %5524 = vmax.xlane.f32.xlu1 %v5523_v9 }
0x17ae   :  { %5527 = vmax.xlane.f32.xlu1 %v5526_v49 }
0x17c5   :  { %v4945_v38 = vpop.xlane.xlu0 %4944 }
0x17c6   :  { %v4951_v25 = vmax.f32 %v4945_v38, -1e+09 }
0x17c7   :  { %7952 = vrot.lane.b32.xlu1 %v10160_v63, %s8611_s16 }
0x17c8   :  { %v4955_v44 = vsub.f32 %v10172_v40, %v4951_v25 }
0x17ca   :  { %v4961_v31 = vmul.f32 1.442695, %v4955_v44 }
0x17cc   :  { %8264 = vpow2.f32 %v4961_v31 }
0x17cd   :  { %v5132_v63 = vpop.xlane.xlu0 %5131 }
0x17ce   :  { %v5136_v45 = vmax.f32 %v5132_v63, -1e+09 }
0x17d0   :  { %v5151_v58 = vpop.xlane.xlu2 %5150  ;;  %v5140_v30 = vsub.f32 %v10181_v51, %v5136_v45 }
0x17d1   :  { %8266 = vrcp.f32 %v5151_v58 }
0x17d2   :  { %v10246_v18 = vpop.eup %8264  ;;  %8268 = vpow2.f32 %v5343_v48  ;;  %v5147_v10 = vmul.f32 1.442695, %v5140_v30 }
0x17d3   :  { %v4971_v62 = vsel %vm631_vm1, %v10246_v18, 0.0 }
0x17d4   :  { %4972 = vadd.xlane.f32.xlu0 %v4971_v62 }
0x17d7   :  { %v8267_v61 = vpop.eup %8266 }
0x17d8   :  { %v10250_v3 = vpop.eup %8268  ;;  %v5165_v40 = vmul.f32 %v8267_v61, %v10186_v19  ;;  %v5129_v46 = vpop.xlane.xlu2 %5128 }
0x17d9   :  { %v5154_v33 = vpop.xlane.xlu1 %5153  ;;  %v5352_v11 = vsel %vm631_vm1, %v10250_v3, 0.0 }
0x17da   :  { %8270 = vrcp.f32 %v5154_v33  ;;  %7229 = vmatmul.msk.f32.vlgmr.msra.gmra.mxu2 %vm631_vm1, %v5165_v40 }
0x17db   :  { %8272 = vpow2.f32 %v5147_v10 }
0x17dc   :  { %5353 = vadd.xlane.f32.xlu0 %v5352_v11 }
0x17e0   :  { %v8271_v35 = vpop.eup %8270  ;;  %v7943_v26 = vpop.permute.xlu0 %7942 }
0x17e1   :  { %v7944_v37 = vunpack.i.l.bf16 %v7943_v26  ;;  %v5166_v52 = vmul.f32 %v8271_v35, %v10193_v5  ;;  %v7945_v19 = vunpack.i.h.bf16 %v7943_v26  ;;  %v10259_v55 = vpop.eup %8272  ;;  %v5135_v5 = vmax.f32 %v5129_v46, -1e+09 }
0x17e2   :  { %v5158_v47 = vsel %vm631_vm1, %v10259_v55, 0.0 }
0x17e3   :  { %7230 = vmatmul.msk.f32.gmra.mxu2 %vm631_vm1, %v5166_v52  ;;  %v5139_v0 = vsub.f32 %v10191_v14, %v5135_v5  ;;  %v5530_v14 = vmax.f32 %v10223_v39, -1e+09 }
0x17e4   :  { %5395 = vmatpush.msrb.mxu2 %v7944_v37 }
0x17e5   :  { %v5145_v12 = vmul.f32 1.442695, %v5139_v0  ;;  %v5534_v42 = vsub.f32 %v10156_v57, %v5530_v14 }
0x17e6   :  { %5396 = vmatpush.msrb.mxu2 %v7945_v19 }
0x17e7   :  { %v5539_v16 = vmul.f32 1.442695, %v5534_v42 }
0x17e8   :  { %v5351_v43 = vpop.xlane.xlu1 %5350 }
0x17e9   :  { %8274 = vrcp.f32 %v5351_v43 }
0x17ef   :  { %v8275_v1 = vpop.eup %8274 }
0x17f0   :  { %v5365_v51 = vmul.f32 %v8275_v1, %v10202_v50  ;;  %v4948_v36 = vpop.xlane.xlu1 %4947 }
0x17f1   :  { %v4952_v23 = vmax.f32 %v4948_v36, -1e+09  ;;  %5159 = vadd.xlane.f32.xlu1 %v5158_v47 }
0x17f2   :  { %7241 = vmatmul.msk.f32.vlgmr.msrb.gmra.mxu2 %vm631_vm1, %v5365_v51 }
0x17f3   :  { %v4956_v13 = vsub.f32 %v10207_v6, %v4952_v23 }
0x17f5   :  { %v4963_v22 = vmul.f32 1.442695, %v4956_v13 }
0x17f7   :  { %8276 = vpow2.f32 %v4963_v22 }
0x17f8   :  { %8278 = vpow2.f32 %v5145_v12 }
0x17fd   :  { %v10267_v8 = vpop.eup %8276 }
0x17fe   :  { %v4974_v50 = vsel %vm631_vm1, %v10267_v8, 0.0  ;;  %v10271_v20 = vpop.eup %8278 }
0x17ff   :  { %4975 = vadd.xlane.f32.xlu2 %v4974_v50  ;;  %v5155_v2 = vsel %vm631_vm1, %v10271_v20, 0.0 }
0x1801   :  { %v5547_v7 = vpop.xlane.xlu1 %5546 }
0x1803   :  { %v10301_v26 = vpop.f32.mrf.mxu2 }
0x1807   :  { %5156 = vadd.xlane.f32.xlu2 %v5155_v2 }
0x1809   :  { %v5329_v6 = vpop.xlane.xlu1 %5328 }
0x180a   :  { %v5335_v54 = vmax.f32 %v5329_v6, -1e+09 }
0x180b   :  { %v10309_v19 = vpop.f32.mrf.mxu2 }
0x180c   :  { %v5339_v15 = vsub.f32 %v10221_v17, %v5335_v54 }
0x180e   :  { %v5345_v4 = vmul.f32 1.442695, %v5339_v15 }
0x1810   :  { %8280 = vpow2.f32 %v5345_v4 }
0x1811   :  { %v5332_v9 = vpop.xlane.xlu1 %5331  ;;  %8282 = vpow2.f32 %v5539_v16 }
0x1812   :  { %v5336_v58 = vmax.f32 %v5332_v9, -1e+09 }
0x1814   :  { %v5340_v62 = vsub.f32 %v10228_v59, %v5336_v58 }
0x1816   :  { %v10278_v49 = vpop.eup %8280  ;;  %v5347_v61 = vmul.f32 1.442695, %v5340_v62 }
0x1817   :  { %v5355_v38 = vsel %vm631_vm1, %v10278_v49, 0.0  ;;  %v10282_v44 = vpop.eup %8282 }
0x1818   :  { %5356 = vadd.xlane.f32.xlu1 %v5355_v38  ;;  %v5548_v57 = vsel %vm631_vm1, %v10282_v44, 0.0 }
0x1819   :  { %v5525_v32 = vpop.xlane.xlu1 %5524 }
0x181a   :  { %v5531_v25 = vmax.f32 %v5525_v32, -1e+09 }
0x181c   :  { %v5535_v39 = vsub.f32 %v10233_v27, %v5531_v25 }
0x181e   :  { %v5541_v17 = vmul.f32 1.442695, %v5535_v39 }
0x181f   :  { %7947 = vrot.lane.b32.xlu2 %v10162_v29, %s8601_s15 }
0x1820   :  { %8284 = vpow2.f32 %v5541_v17  ;;  %5549 = vadd.xlane.f32.xlu1 %v5548_v57 }
0x1821   :  { %v5528_v48 = vpop.xlane.xlu1 %5527  ;;  %8286 = vpow2.f32 %v5347_v61 }
0x1822   :  { %v5532_v63 = vmax.f32 %v5528_v48, -1e+09 }
0x1824   :  { %v5536_v45 = vsub.f32 %v10238_v34, %v5532_v63 }
0x1826   :  { %v10289_v56 = vpop.eup %8284  ;;  %v5543_v11 = vmul.f32 1.442695, %v5536_v45 }
0x1827   :  { %v5551_v31 = vsel %vm631_vm1, %v10289_v56, 0.0  ;;  %v10297_v30 = vpop.eup %8286 }
0x1828   :  { %5552 = vadd.xlane.f32.xlu0 %v5551_v31  ;;  %8288 = vpow2.f32 %v5543_v11  ;;  %v5358_v59 = vsel %vm631_vm1, %v10297_v30, 0.0  ;;  %v7662_v11 = vld [vmem:[#allocation14 + $0x78] sm:$0xff] }
0x1829   :  { %5748 = vmatpush.bf16.msrb.mxu0 %v7662_v11 }
0x182e   :  { %v10303_v37 = vpop.eup %8288 }
0x182f   :  { %v5554_v34 = vsel %vm631_vm1, %v10303_v37, 0.0 }
0x1839   :  { %v7953_v27 = vpop.permute.xlu1 %7952 }
0x183a   :  { %v7954_v40 = vunpack.i.l.bf16 %v7953_v27  ;;  %v7955_v33 = vunpack.i.h.bf16 %v7953_v27 }
0x183c   :  { %7957 = vrot.lane.b32.xlu0 %v10162_v29, %s8611_s16  ;;  %5591 = vmatpush.msra.mxu2 %v7954_v40 }
0x183e   :  { %5592 = vmatpush.msra.mxu2 %v7955_v33 }
0x1847   :  { %v4973_v35 = vpop.xlane.xlu0 %4972 }
0x1848   :  { %8290 = vrcp.f32 %v4973_v35  ;;  %5359 = vadd.xlane.f32.xlu2 %v5358_v59  ;;  %v7660_v59 = vld [vmem:[#allocation14 + $0x68] sm:$0xff] }
0x184e   :  { %v8291_v29 = vpop.eup %8290 }
0x184f   :  { %v4983_v52 = vmul.f32 %v8291_v29, %v10246_v18  ;;  %v5354_v10 = vpop.xlane.xlu0 %5353 }
0x1850   :  { %8292 = vrcp.f32 %v5354_v10  ;;  %5555 = vadd.xlane.f32.xlu2 %v5554_v34 }
0x1851   :  { %7219 = vmatmul.msk.f32.vlgmr.msra.gmra.mxu3 %vm631_vm1, %v4983_v52  ;;  %8294 = vrcp.f32 %v5547_v7 }
0x1856   :  { %v8293_v43 = vpop.eup %8292 }
0x1857   :  { %v5366_v46 = vmul.f32 %v8293_v43, %v10250_v3  ;;  %v8295_v1 = vpop.eup %8294  ;;  %v7659_v43 = vld [vmem:[#allocation14 + $0x60] sm:$0xff] }
0x1858   :  { %v5561_v18 = vmul.f32 %v8295_v1, %v10216_v41  ;;  %v7657_v1 = vld [vmem:[#allocation14 + $0x50] sm:$0xff] }
0x1859   :  { %7242 = vmatmul.msk.f32.gmra.mxu2 %vm631_vm1, %v5366_v46  ;;  %v7658_v46 = vld [vmem:[#allocation14 + $0x58] sm:$0xff] }
0x185d   :  { %v5200_v51 = vpop.f32.mrf.mxu2 }
0x1861   :  { %7253 = vmatmul.msk.f32.vlgmr.msra.gmra.mxu2 %vm631_vm1, %v5561_v18  ;;  %v7655_v18 = vld [vmem:[#allocation14 + $0x40] sm:$0xff] }
0x1864   :  { %v5160_v3 = vpop.xlane.xlu1 %5159 }
0x1866   :  { %v5203_v36 = vpop.f32.mrf.mxu2 }
0x1867   :  { %v7961_v47 = vpack.i.bf16 %v5203_v36, %v5200_v51  ;;  %v7656_v51 = vld [vmem:[#allocation14 + $0x48] sm:$0xff] }
0x1869   :  { %7962 = vrot.lane.b32.xlu0 %v7961_v47, %s8611_s16 }
0x1872   :  { %v4976_v5 = vpop.xlane.xlu2 %4975 }
0x1873   :  { %8296 = vrcp.f32 %v4976_v5 }
0x1875   :  { %v5398_v31 = vpop.f32.mrf.mxu2 }
0x1879   :  { %v8297_v23 = vpop.eup %8296 }
0x187a   :  { %v5157_v13 = vpop.xlane.xlu2 %5156  ;;  %v4984_v0 = vmul.f32 %v8297_v23, %v10267_v8 }
0x187b   :  { %8298 = vrcp.f32 %v5157_v13 }
0x187c   :  { %7220 = vmatmul.msk.f32.gmra.mxu3 %vm631_vm1, %v4984_v0  ;;  %8300 = vrcp.f32 %v5160_v3 }
0x1881   :  { %v8299_v22 = vpop.eup %8298 }
0x1882   :  { %v5167_v41 = vmul.f32 %v8299_v22, %v10271_v20  ;;  %v7948_v12 = vpop.permute.xlu2 %7947  ;;  %v8301_v2 = vpop.eup %8300 }
0x1883   :  { %v7949_v50 = vunpack.i.l.bf16 %v7948_v12  ;;  %v7950_v7 = vunpack.i.h.bf16 %v7948_v12  ;;  %v5168_v6 = vmul.f32 %v8301_v2, %v10259_v55 }
0x1884   :  { %7231 = vmatmul.msk.f32.vlgmr.msrb.gmra.mxu3 %vm631_vm1, %v5167_v41 }
0x1885   :  { %5430 = vmatpush.msra.mxu3 %v7949_v50 }
0x1887   :  { %5431 = vmatpush.msra.mxu3 %v7950_v7 }
0x188b   :  { %v5357_v14 = vpop.xlane.xlu1 %5356 }
0x188c   :  { %8302 = vrcp.f32 %v5357_v14  ;;  %7232 = vmatmul.msk.f32.gmra.mxu3 %vm631_vm1, %v5168_v6 }
0x1892   :  { %v8303_v8 = vpop.eup %8302 }
0x1893   :  { %v5367_v54 = vmul.f32 %v8303_v8, %v10278_v49  ;;  %v5550_v15 = vpop.xlane.xlu1 %5549 }
0x1894   :  { %8304 = vrcp.f32 %v5550_v15 }
0x1895   :  { %7243 = vmatmul.msk.f32.vlgmr.msra.gmra.mxu3 %vm631_vm1, %v5367_v54 }
0x189a   :  { %v8305_v20 = vpop.eup %8304 }
0x189b   :  { %v5562_v42 = vmul.f32 %v8305_v20, %v10282_v44  ;;  %v5553_v4 = vpop.xlane.xlu0 %5552 }
0x189d   :  { %7254 = vmatmul.msk.f32.gmra.mxu2 %vm631_vm1, %v5562_v42 }
0x18ae   :  { %v7958_v9 = vpop.permute.xlu0 %7957 }
0x18af   :  { %v7959_v16 = vunpack.i.l.bf16 %v7958_v9  ;;  %v7960_v55 = vunpack.i.h.bf16 %v7958_v9 }
0x18b1   :  { %5626 = vmatpush.msrb.mxu3 %v7959_v16 }
0x18b3   :  { %5627 = vmatpush.msrb.mxu3 %v7960_v55 }
0x18bb   :  { %v5360_v38 = vpop.xlane.xlu2 %5359 }
0x18bc   :  { %8306 = vrcp.f32 %v5360_v38 }
0x18bd   :  { %8308 = vrcp.f32 %v5553_v4 }
0x18c2   :  { %v8307_v32 = vpop.eup %8306 }
0x18c3   :  { %v5368_v49 = vmul.f32 %v8307_v32, %v10297_v30  ;;  %v5556_v25 = vpop.xlane.xlu2 %5555  ;;  %v8309_v39 = vpop.eup %8308  ;;  %v7661_v30 = vld [vmem:[#allocation14 + $0x70] sm:$0xff] }
0x18c4   :  { %8310 = vrcp.f32 %v5556_v25  ;;  %v5563_v44 = vmul.f32 %v8309_v39, %v10289_v56  ;;  %5749 = vmatpush.bf16.msrb.mxu0 %v7661_v30 }
0x18c5   :  { %7244 = vmatmul.msk.f32.gmra.mxu3 %vm631_vm1, %v5368_v49 }
0x18c8   :  { %5750 = vmatpush.bf16.msrb.mxu0 %v7660_v59 }
0x18ca   :  { %v8311_v17 = vpop.eup %8310 }
0x18cb   :  { %v5564_v57 = vmul.f32 %v8311_v17, %v10303_v37  ;;  %v8015_v17 = vld [vmem:[%s10522_s18 + $0x1] ss:$0 sm:$0xff] }
0x18cc   :  { %5751 = vmatpush.bf16.msrb.mxu0 %v7659_v43 }
0x18cd   :  { %7255 = vmatmul.msk.f32.vlgmr.msrb.gmra.mxu3 %vm631_vm1, %v5563_v44 }
0x18d0   :  { %5752 = vmatpush.bf16.msrb.mxu0 %v7658_v46 }
0x18d4   :  { %v5037_v62 = vpop.f32.mrf.mxu3  ;;  %5753 = vmatpush.bf16.msrb.mxu0 %v7657_v1 }
0x18d5   :  { %7256 = vmatmul.msk.f32.gmra.mxu3 %vm631_vm1, %v5564_v57 }
0x18d8   :  { %5754 = vmatpush.bf16.msrb.mxu0 %v7656_v51  ;;  %v7399_v51 = vld [vmem:[%s10523_s22 + $0xf0] sm:$0xf] }
0x18db   :  { %v7963_v36 = vpop.permute.xlu0 %7962 }
0x18dc   :  { %v5401_v48 = vpop.f32.mrf.mxu2  ;;  %5755 = vmatpush.bf16.msrb.mxu0 %v7655_v18  ;;  %v7965_v5 = vunpack.i.h.bf16 %v7963_v36  ;;  %v7964_v23 = vunpack.i.l.bf16 %v7963_v36  ;;  %v7678_v18 = vld [vmem:[%s10523_s22 + $0xf4] sm:$0xf0]  ;;  %v7677_v36 = vld [vmem:[%s10523_s22 + $0xf4] sm:$0xf] }
0x18dd   :  { %v7966_v58 = vpack.i.bf16 %v5401_v48, %v5398_v31 }
0x18de   :  { %v5684_v22 = vsel %vm560_vm0, %v10309_v19, %v7965_v5  ;;  %v5683_v41 = vsel %vm560_vm0, %v10301_v26, %v7964_v23  ;;  %v7401_v5 = vld [vmem:[%s10523_s22 + $0xf8] sm:$0xf0] }
0x18df   :  { %7967 = vrot.lane.b32.xlu2 %v7966_v58, %s8601_s15  ;;  %v7404_v23 = vor.u32 %v7677_v36, %v7401_v5 }
0x18e1   :  { %6029 = vmatpush.bf16.msrb.mxu2 %v7404_v23 }
0x18e4   :  { %v5594_v56 = vpop.f32.mrf.mxu2 }
0x18ff   :  { %v5040_v27 = vpop.f32.mrf.mxu3 }
0x1907   :  { %v5237_v61 = vpop.f32.mrf.mxu3 }
0x190f   :  { %v5240_v63 = vpop.f32.mrf.mxu3 }
0x1910   :  { %v7976_v40 = vpack.i.bf16 %v5240_v63, %v5237_v61 }
0x1912   :  { %7977 = vrot.lane.b32.xlu1 %v7976_v40, %s8611_s16 }
0x1918   :  { %v5433_v35 = vpop.f32.mrf.mxu3 }
0x1920   :  { %v5597_v33 = vpop.f32.mrf.mxu2 }
0x1921   :  { %v7971_v45 = vpack.i.bf16 %v5597_v33, %v5594_v56 }
0x1923   :  { %7972 = vrot.lane.b32.xlu0 %v7971_v45, %s8610_s6 }
0x1939   :  { %v7968_v47 = vpop.permute.xlu2 %7967 }
0x193a   :  { %v7970_v13 = vunpack.i.h.bf16 %v7968_v47  ;;  %v7969_v0 = vunpack.i.l.bf16 %v7968_v47  ;;  %v7400_v47 = vor.u32 %v7678_v18, %v7399_v51 }
0x193c   :  { %v5688_v7 = vsel %vm1382_vm2, %v5684_v22, %v7970_v13  ;;  %v5687_v2 = vsel %vm1382_vm2, %v5683_v41, %v7969_v0  ;;  %6010 = vmatpush.bf16.msrb.mxu1 %v7400_v47  ;;  %v7391_v13 = vld [vmem:[%s10523_s22 + $0xe0] sm:$0xf]  ;;  %v7676_v0 = vld [vmem:[%s10523_s22 + $0xe4] sm:$0xf0]  ;;  %v7393_v41 = vld [vmem:[%s10523_s22 + $0xe8] sm:$0xf0] }
0x193d   :  { %v7392_v22 = vor.u32 %v7676_v0, %v7391_v13  ;;  %v8016_v0 = vld [vmem:[%s10524_s27 + $0x1] ss:$0 sm:$0xff] }
0x1940   :  { %6011 = vmatpush.bf16.msrb.mxu1 %v7392_v22 }
0x1948   :  { %v5436_v37 = vpop.f32.mrf.mxu3 }
0x1949   :  { %v7981_v29 = vpack.i.bf16 %v5436_v37, %v5433_v35 }
0x194b   :  { %7982 = vrot.lane.b32.xlu0 %v7981_v29, %s8601_s15 }
0x1950   :  { %v5629_v52 = vpop.f32.mrf.mxu3 }
0x1958   :  { %v5632_v10 = vpop.f32.mrf.mxu3 }
0x1959   :  { %v7986_v34 = vpack.i.bf16 %v5632_v10, %v5629_v52 }
0x195b   :  { %7987 = vrot.lane.b32.xlu0 %v7986_v34, %s8610_s6 }
0x1984   :  { %v7978_v15 = vpop.permute.xlu1 %7977 }
0x1985   :  { %v7980_v20 = vunpack.i.h.bf16 %v7978_v15  ;;  %v7979_v19 = vunpack.i.l.bf16 %v7978_v15  ;;  %v7672_v15 = vld [vmem:[%s10523_s22 + $0xc4] sm:$0xf0] }
0x1987   :  { %v5686_v9 = vsel %vm560_vm0, %v5040_v27, %v7980_v20  ;;  %v5685_v16 = vsel %vm560_vm0, %v5037_v62, %v7979_v19  ;;  %v7671_v20 = vld [vmem:[%s10523_s22 + $0xc4] sm:$0xf] }
0x1995   :  { %v7973_v3 = vpop.permute.xlu0 %7972 }
0x1996   :  { %v7975_v12 = vunpack.i.h.bf16 %v7973_v3  ;;  %v7974_v50 = vunpack.i.l.bf16 %v7973_v3  ;;  %v7675_v3 = vld [vmem:[%s10523_s22 + $0xe4] sm:$0xf] }
0x1998   :  { %v5691_v6 = vsel %vm1387_vm3, %v5687_v2, %v7974_v50  ;;  %v5692_v14 = vsel %vm1387_vm3, %v5688_v7, %v7975_v12  ;;  %v7396_v12 = vor.u32 %v7675_v3, %v7393_v41  ;;  %v7383_v50 = vld [vmem:[%s10523_s22 + $0xd0] sm:$0xf]  ;;  %v7674_v7 = vld [vmem:[%s10523_s22 + $0xd4] sm:$0xf0]  ;;  %v7673_v2 = vld [vmem:[%s10523_s22 + $0xd4] sm:$0xf] }
0x1999   :  { %v5695_v8 = vpack.c.bf16 %v5692_v14, %v5691_v6  ;;  %v7384_v6 = vor.u32 %v7674_v7, %v7383_v50  ;;  %v7385_v14 = vld [vmem:[%s10523_s22 + $0xd8] sm:$0xf0] }
0x199a   :  { %6030 = vmatpush.bf16.msrb.mxu2 %v7396_v12  ;;  %v8017_v12 = vld [vmem:[%s10525_s29 + $0x1] ss:$0 sm:$0xff] }
0x199b   :  { %5756 = vmatmul.bf16.vlgmr.msrb.gmra.mxu0 %v5695_v8  ;;  %v7388_v8 = vor.u32 %v7673_v2, %v7385_v14  ;;  %6012 = vmatpush.bf16.msrb.mxu1 %v7384_v6 }
0x199e   :  { %6031 = vmatpush.bf16.msrb.mxu2 %v7388_v8 }
0x19bd   :  { %v7983_v54 = vpop.permute.xlu0 %7982 }
0x19be   :  { %v7985_v42 = vunpack.i.h.bf16 %v7983_v54  ;;  %v7984_v4 = vunpack.i.l.bf16 %v7983_v54  ;;  %v7375_v54 = vld [vmem:[%s10523_s22 + $0xc0] sm:$0xf] }
0x19bf   :  { %v7376_v19 = vor.u32 %v7672_v15, %v7375_v54 }
0x19c0   :  { %v5690_v32 = vsel %vm1382_vm2, %v5686_v9, %v7985_v42  ;;  %v5689_v49 = vsel %vm1382_vm2, %v5685_v16, %v7984_v4  ;;  %v7377_v42 = vld [vmem:[%s10523_s22 + $0xc8] sm:$0xf0]  ;;  %v7670_v9 = vld [vmem:[%s10523_s22 + $0xb4] sm:$0xf0]  ;;  %v7669_v16 = vld [vmem:[%s10523_s22 + $0xb4] sm:$0xf] }
0x19c1   :  { %v7380_v4 = vor.u32 %v7671_v20, %v7377_v42  ;;  %6013 = vmatpush.bf16.msrb.mxu1 %v7376_v19  ;;  %v7694_v20 = vld [vmem:[%s10526_s12 + $0xf8] sm:$0xff] }
0x19c2   :  { %6178 = vmatpush.bf16.msra.mxu0 %v7694_v20 }
0x19c3   :  { %6032 = vmatpush.bf16.msrb.mxu2 %v7380_v4  ;;  %v7685_v4 = vld [vmem:[%s10526_s12 + $0xb0] sm:$0xff] }
0x19cd   :  { %v7988_v26 = vpop.permute.xlu0 %7987 }
0x19ce   :  { %v7990_v55 = vunpack.i.h.bf16 %v7988_v26  ;;  %v7989_v38 = vunpack.i.l.bf16 %v7988_v26  ;;  %v7367_v26 = vld [vmem:[%s10523_s22 + $0xb0] sm:$0xf] }
0x19d0   :  { %v5693_v25 = vsel %vm1387_vm3, %v5689_v49, %v7989_v38  ;;  %v5694_v39 = vsel %vm1387_vm3, %v5690_v32, %v7990_v55  ;;  %v7368_v55 = vor.u32 %v7670_v9, %v7367_v26  ;;  %v7369_v38 = vld [vmem:[%s10523_s22 + $0xb8] sm:$0xf0]  ;;  %v7359_v49 = vld [vmem:[%s10523_s22 + $0xa0] sm:$0xf]  ;;  %v7693_v26 = vld [vmem:[%s10526_s12 + $0xf0] sm:$0xff] }
0x19d1   :  { %v5696_v44 = vpack.c.bf16 %v5694_v39, %v5693_v25  ;;  %v7372_v32 = vor.u32 %v7669_v16, %v7369_v38  ;;  %v7668_v25 = vld [vmem:[%s10523_s22 + $0xa4] sm:$0xf0]  ;;  %v7667_v39 = vld [vmem:[%s10523_s22 + $0xa4] sm:$0xf]  ;;  %6179 = vmatpush.bf16.msra.mxu0 %v7693_v26 }
0x19d2   :  { %6014 = vmatpush.bf16.msrb.mxu1 %v7368_v55  ;;  %v7684_v38 = vld [vmem:[%s10526_s12 + $0xa8] sm:$0xff] }
0x19d3   :  { %5761 = vmatmul.bf16.gmra.mxu0 %v5696_v44  ;;  %6033 = vmatpush.bf16.msrb.mxu2 %v7372_v32  ;;  %v7360_v44 = vor.u32 %v7668_v25, %v7359_v49  ;;  %v7692_v32 = vld [vmem:[%s10526_s12 + $0xe8] sm:$0xff] }
0x19d5   :  { %6180 = vmatpush.bf16.msra.mxu0 %v7692_v32  ;;  %v8018_v32 = vld [vmem:[%s10528_s1 + $0x1] ss:$0 sm:$0xff] }
0x19d6   :  { %6015 = vmatpush.bf16.msrb.mxu1 %v7360_v44 }
0x1a18   :  { %v5757_v57 = vpop.f32.mrf.mxu0 }
0x1a19   :  { %v5758_v31 = vadd.f32 %v8015_v17, %v5757_v57 }
0x1a1b   :  { %v5767_v48 = vadd.f32 %v5758_v31, %v10037_v53  ;;  %v7351_v31 = vld [vmem:[%s10523_s22 + $0x90] sm:$0xf] }
0x1a1d   :  { %5775 = vadd.xlane.f32.xlu2 %v5767_v48 }
0x1a20   :  { %v5759_v58 = vpop.f32.mrf.mxu0 }
0x1a21   :  { %v5760_v62 = vadd.f32 %v8015_v17, %v5759_v58  ;;  %v7665_v58 = vld [vmem:[%s10523_s22 + $0x94] sm:$0xf] }
0x1a23   :  { %v5768_v27 = vadd.f32 %v5760_v62, %v10039_v28 }
0x1a25   :  { %5777 = vadd.xlane.f32.xlu0 %v5768_v27 }
0x1a50   :  { %v5762_v61 = vpop.f32.mrf.mxu0 }
0x1a51   :  { %v5763_v63 = vadd.f32 %v8015_v17, %v5762_v61 }
0x1a53   :  { %v5769_v40 = vadd.f32 %v5763_v63, %v10047_v24 }
0x1a55   :  { %5779 = vadd.xlane.f32.xlu1 %v5769_v40 }
0x1a58   :  { %v5764_v56 = vpop.f32.mrf.mxu0 }
0x1a59   :  { %v5765_v33 = vadd.f32 %v8015_v17, %v5764_v56  ;;  %v7361_v17 = vld [vmem:[%s10523_s22 + $0xa8] sm:$0xf0]  ;;  %v7343_v56 = vld [vmem:[%s10523_s22 + $0x80] sm:$0xf] }
0x1a5a   :  { %v7364_v57 = vor.u32 %v7667_v39, %v7361_v17  ;;  %v7683_v39 = vld [vmem:[%s10526_s12 + $0xa0] sm:$0xff] }
0x1a5b   :  { %v5770_v45 = vadd.f32 %v5765_v33, %v10049_v60  ;;  %v7664_v33 = vld [vmem:[%s10523_s22 + $0x84] sm:$0xf0] }
0x1a5c   :  { %6034 = vmatpush.bf16.msrb.mxu2 %v7364_v57 }
0x1a5d   :  { %5781 = vadd.xlane.f32.xlu2 %v5770_v45 }
0x1a90   :  { %v5776_v11 = vpop.xlane.xlu2 %5775 }
0x1a91   :  { %v5783_v30 = vmul.f32 %v5776_v11, %v9219_v21 }
0x1a93   :  { %v10357_v53 = vsub.f32 %v5767_v48, %v5783_v30  ;;  %v7666_v48 = vld [vmem:[%s10523_s22 + $0x94] sm:$0xf0]  ;;  %v7344_v30 = vor.u32 %v7664_v33, %v7343_v56 }
0x1a94   :  { %v7352_v62 = vor.u32 %v7666_v48, %v7351_v31 }
0x1a95   :  { %v5791_v35 = vmul.f32 %v10357_v53, %v10357_v53 }
0x1a96   :  { %6016 = vmatpush.bf16.msrb.mxu1 %v7352_v62 }
0x1a97   :  { %5795 = vadd.xlane.f32.xlu0 %v5791_v35  ;;  %v7345_v35 = vld [vmem:[%s10523_s22 + $0x88] sm:$0xf0] }
0x1a98   :  { %v5778_v28 = vpop.xlane.xlu0 %5777 }
0x1a99   :  { %v5784_v24 = vmul.f32 %v5778_v28, %v9219_v21 }
0x1a9a   :  { %6017 = vmatpush.bf16.msrb.mxu1 %v7344_v30 }
0x1a9b   :  { %v10362_v59 = vsub.f32 %v5768_v27, %v5784_v24  ;;  %v7353_v27 = vld [vmem:[%s10523_s22 + $0x98] sm:$0xf0] }
0x1a9c   :  { %v7356_v63 = vor.u32 %v7665_v58, %v7353_v27 }
0x1a9d   :  { %v5792_v60 = vmul.f32 %v10362_v59, %v10362_v59 }
0x1a9e   :  { %6035 = vmatpush.bf16.msrb.mxu2 %v7356_v63 }
0x1a9f   :  { %5797 = vadd.xlane.f32.xlu2 %v5792_v60 }
0x1ac8   :  { %v5780_v37 = vpop.xlane.xlu1 %5779 }
0x1ac9   :  { %v5785_v29 = vmul.f32 %v5780_v37, %v9219_v21 }
0x1acb   :  { %v10367_v52 = vsub.f32 %v5769_v40, %v5785_v29 }
0x1acd   :  { %v5793_v10 = vmul.f32 %v10367_v52, %v10367_v52 }
0x1acf   :  { %5799 = vadd.xlane.f32.xlu1 %v5793_v10 }
0x1ad0   :  { %v5782_v34 = vpop.xlane.xlu2 %5781 }
0x1ad1   :  { %v5786_v43 = vmul.f32 %v5782_v34, %v9219_v21 }
0x1ad3   :  { %v10372_v46 = vsub.f32 %v5770_v45, %v5786_v43  ;;  %v7663_v45 = vld [vmem:[%s10523_s22 + $0x84] sm:$0xf] }
0x1ad4   :  { %v7348_v28 = vor.u32 %v7663_v45, %v7345_v35  ;;  %v7682_v35 = vld [vmem:[%s10526_s12 + $0x98] sm:$0xff] }
0x1ad5   :  { %v5794_v1 = vmul.f32 %v10372_v46, %v10372_v46 }
0x1ad6   :  { %6036 = vmatpush.bf16.msrb.mxu2 %v7348_v28  ;;  %v7691_v28 = vld [vmem:[%s10526_s12 + $0xe0] sm:$0xff] }
0x1ad7   :  { %5801 = vadd.xlane.f32.xlu0 %v5794_v1  ;;  %6181 = vmatpush.bf16.msra.mxu0 %v7691_v28 }
0x1b0a   :  { %v5796_v61 = vpop.xlane.xlu0 %5795 }
0x1b0b   :  { %v5803_v40 = vmul.f32 %v5796_v61, %v9219_v21 }
0x1b0d   :  { %v5807_v11 = vadd.f32 1e-05, %v5803_v40 }
0x1b0f   :  { %8312 = vrsqrt.f32 %v5807_v11  ;;  %vm5817_vm1 = vweird.f32 %v5807_v11 }
0x1b12   :  { %v5798_v24 = vpop.xlane.xlu2 %5797 }
0x1b13   :  { %v5804_v60 = vmul.f32 %v5798_v24, %v9219_v21  ;;  %v7690_v24 = vld [vmem:[%s10526_s12 + $0xd8] sm:$0xff] }
0x1b14   :  { %6182 = vmatpush.bf16.msra.mxu0 %v7690_v24 }
0x1b15   :  { %v8313_v37 = vpop.eup %8312  ;;  %v5808_v29 = vadd.f32 1e-05, %v5804_v60  ;;  %v7680_v60 = vld [vmem:[%s10526_s12 + $0x88] sm:$0xff] }
0x1b16   :  { %v5812_v10 = vmul.f32 %v8313_v37, %v5807_v11  ;;  %vm5818_vm0 = vweird.f32 %v8313_v37 }
0x1b17   :  { %8314 = vrsqrt.f32 %v5808_v29  ;;  %vm5819_vm2 = vmor %vm5817_vm1, %vm5818_vm0  ;;  %vm5827_vm5 = vweird.f32 %v5808_v29 }
0x1b18   :  { %v5813_v34 = vmul.f32 %v8313_v37, %v5812_v10  ;;  %v7688_v10 = vld [vmem:[%s10526_s12 + $0xc8] sm:$0xff] }
0x1b1a   :  { %v5814_v43 = vmul.f32 0.5, %v5813_v34  ;;  %v7687_v34 = vld [vmem:[%s10526_s12 + $0xc0] sm:$0xff] }
0x1b1c   :  { %v5815_v1 = vsub.f32 1.5, %v5814_v43  ;;  %v7307_v43 = vld [vmem:[%s10527_s26 + $0x2] sm:$0x3] }
0x1b1d   :  { %v8315_v51 = vpop.eup %8314 }
0x1b1e   :  { %v5816_v18 = vmul.f32 %v8313_v37, %v5815_v1  ;;  %v5822_v36 = vmul.f32 %v8315_v51, %v5808_v29  ;;  %vm5828_vm3 = vweird.f32 %v8315_v51  ;;  %v7679_v29 = vld [vmem:[%s10526_s12 + $0x80] sm:$0xff] }
0x1b1f   :  { %vm5829_vm6 = vmor %vm5827_vm5, %vm5828_vm3 }
0x1b20   :  { %v5823_v47 = vmul.f32 %v8315_v51, %v5822_v36  ;;  %v5820_v5 = vsel %vm5819_vm2, %v8313_v37, %v5816_v18  ;;  %v7689_v37 = vld [vmem:[%s10526_s12 + $0xd0] sm:$0xff] }
0x1b21   :  { %v5851_v3 = vmul.f32 %v5820_v5, %v10357_v53  ;;  %6183 = vmatpush.bf16.msra.mxu0 %v7689_v37  ;;  %v5927_v5 = vperm.slane %v7307_v43, 1 }
0x1b22   :  { %v5824_v23 = vmul.f32 0.5, %v5823_v47 }
0x1b23   :  { %v5858_v50 = vmul.f32 %v8016_v0, %v5851_v3 }
0x1b24   :  { %v5825_v13 = vsub.f32 1.5, %v5824_v23 }
0x1b25   :  { %v10414_v6 = vadd.f32 %v8017_v12, %v5858_v50  ;;  %6184 = vmatpush.bf16.msra.mxu0 %v7688_v10 }
0x1b26   :  { %v5826_v22 = vmul.f32 %v8315_v51, %v5825_v13 }
0x1b28   :  { %v5830_v41 = vsel %vm5829_vm6, %v8315_v51, %v5826_v22  ;;  %v5926_v51 = vperm.slane %v7307_v43, 0 }
0x1b29   :  { %v5852_v7 = vmul.f32 %v5830_v41, %v10362_v59  ;;  %v7686_v59 = vld [vmem:[%s10526_s12 + $0xb8] sm:$0xff]  ;;  %6185 = vmatpush.bf16.msra.mxu0 %v7687_v34 }
0x1b2a   :  { %6159 = vmatpush.bf16.msra.mxu3 %v7686_v59 }
0x1b2b   :  { %v5859_v2 = vmul.f32 %v8016_v0, %v5852_v7 }
0x1b2d   :  { %v10416_v14 = vadd.f32 %v8017_v12, %v5859_v2 }
0x1b2e   :  { %6160 = vmatpush.bf16.msra.mxu3 %v7685_v4 }
0x1b2f   :  { %v5923_v53 = vpack.c.bf16 %v10416_v14, %v10414_v6 }
0x1b31   :  { %6018 = vmatmul.bf16.vlgmr.msrb.gmra.mxu1 %v5923_v53  ;;  %6037 = vmatmul.bf16.vlgmr.msrb.gmra.mxu2 %v5923_v53 }
0x1b32   :  { %6161 = vmatpush.bf16.msra.mxu3 %v7684_v38 }
0x1b36   :  { %6162 = vmatpush.bf16.msra.mxu3 %v7683_v39 }
0x1b3a   :  { %6163 = vmatpush.bf16.msra.mxu3 %v7682_v35 }
0x1b42   :  { %v5800_v8 = vpop.xlane.xlu1 %5799 }
0x1b43   :  { %v5805_v54 = vmul.f32 %v5800_v8, %v9219_v21 }
0x1b45   :  { %v5809_v15 = vadd.f32 1e-05, %v5805_v54 }
0x1b47   :  { %8316 = vrsqrt.f32 %v5809_v15  ;;  %vm5837_vm8 = vweird.f32 %v5809_v15 }
0x1b4a   :  { %v5802_v19 = vpop.xlane.xlu0 %5801 }
0x1b4b   :  { %v5806_v42 = vmul.f32 %v5802_v19, %v9219_v21 }
0x1b4d   :  { %v8317_v9 = vpop.eup %8316  ;;  %v5810_v16 = vadd.f32 1e-05, %v5806_v42 }
0x1b4e   :  { %v5832_v55 = vmul.f32 %v8317_v9, %v5809_v15  ;;  %vm5838_vm7 = vweird.f32 %v8317_v9 }
0x1b4f   :  { %8318 = vrsqrt.f32 %v5810_v16  ;;  %vm5839_vm9 = vmor %vm5837_vm8, %vm5838_vm7  ;;  %vm5847_vm11 = vweird.f32 %v5810_v16 }
0x1b50   :  { %v5833_v49 = vmul.f32 %v8317_v9, %v5832_v55 }
0x1b52   :  { %v5834_v25 = vmul.f32 0.5, %v5833_v49 }
0x1b54   :  { %v5835_v44 = vsub.f32 1.5, %v5834_v25 }
0x1b55   :  { %v8319_v17 = vpop.eup %8318 }
0x1b56   :  { %v5836_v57 = vmul.f32 %v8317_v9, %v5835_v44  ;;  %v5842_v31 = vmul.f32 %v8319_v17, %v5810_v16  ;;  %vm5848_vm10 = vweird.f32 %v8319_v17 }
0x1b57   :  { %vm5849_vm12 = vmor %vm5847_vm11, %vm5848_vm10 }
0x1b58   :  { %v5843_v48 = vmul.f32 %v8319_v17, %v5842_v31  ;;  %v5840_v58 = vsel %vm5839_vm9, %v8317_v9, %v5836_v57 }
0x1b59   :  { %v5853_v61 = vmul.f32 %v5840_v58, %v10367_v52 }
0x1b5a   :  { %v5844_v62 = vmul.f32 0.5, %v5843_v48 }
0x1b5b   :  { %v5860_v33 = vmul.f32 %v8016_v0, %v5853_v61 }
0x1b5c   :  { %v5845_v27 = vsub.f32 1.5, %v5844_v62 }
0x1b5d   :  { %v10431_v11 = vadd.f32 %v8017_v12, %v5860_v33 }
0x1b5e   :  { %v5846_v63 = vmul.f32 %v8319_v17, %v5845_v27 }
0x1b60   :  { %v5850_v40 = vsel %vm5849_vm12, %v8319_v17, %v5846_v63 }
0x1b61   :  { %v5854_v56 = vmul.f32 %v5850_v40, %v10372_v46  ;;  %v7681_v46 = vld [vmem:[%s10526_s12 + $0x90] sm:$0xff] }
0x1b62   :  { %6164 = vmatpush.bf16.msra.mxu3 %v7681_v46 }
0x1b63   :  { %v5861_v45 = vmul.f32 %v8016_v0, %v5854_v56 }
0x1b65   :  { %v10433_v30 = vadd.f32 %v8017_v12, %v5861_v45 }
0x1b66   :  { %6165 = vmatpush.bf16.msra.mxu3 %v7680_v60 }
0x1b67   :  { %v5924_v52 = vpack.c.bf16 %v10433_v30, %v10431_v11 }
0x1b69   :  { %6023 = vmatmul.bf16.gmra.mxu1 %v5924_v52  ;;  %6042 = vmatmul.bf16.gmra.mxu2 %v5924_v52 }
0x1b6a   :  { %6166 = vmatpush.bf16.msra.mxu3 %v7679_v29 }
0x1bae   :  { %v6019_v1 = vpop.f32.mrf.mxu1 }
0x1baf   :  { %v6020_v36 = vadd.f32 %v6019_v1, %v5926_v51 }
0x1bb1   :  { %v6048_v13 = vmax.f32 %v6020_v36, 0.0 }
0x1bb4   :  { %v6038_v18 = vpop.f32.mrf.mxu2 }
0x1bb5   :  { %v6039_v3 = vadd.f32 %v6038_v18, %v5927_v5 }
0x1bb6   :  { %v6021_v47 = vpop.f32.mrf.mxu1 }
0x1bb7   :  { %v6022_v23 = vadd.f32 %v6021_v47, %v5926_v51  ;;  %v6049_v50 = vmax.f32 %v6039_v3, 0.0  ;;  %v7702_v47 = vld [vmem:[%s8774_s30 + $0x38] sm:$0xff]  ;;  %v7697_v3 = vld [vmem:[%s8774_s30 + $0x10] sm:$0xff] }
0x1bb8   :  { %6369 = vmatpush.bf16.msra.mxu1 %v7702_v47 }
0x1bb9   :  { %v6050_v0 = vmax.f32 %v6022_v23, 0.0  ;;  %v7700_v23 = vld [vmem:[%s8774_s30 + $0x28] sm:$0xff] }
0x1bbb   :  { %v6056_v22 = vpack.c.bf16 %v6050_v0, %v6048_v13  ;;  %v7699_v13 = vld [vmem:[%s8774_s30 + $0x20] sm:$0xff]  ;;  %v7698_v0 = vld [vmem:[%s8774_s30 + $0x18] sm:$0xff] }
0x1bbc   :  { %v6040_v41 = vpop.f32.mrf.mxu2 }
0x1bbd   :  { %v6041_v12 = vadd.f32 %v6040_v41, %v5927_v5  ;;  %6167 = vmatmul.bf16.vlgmr.msra.gmra.mxu3 %v6056_v22  ;;  %v7696_v22 = vld [vmem:[%s8774_s30 + $0x8] sm:$0xff] }
0x1bbf   :  { %v6051_v7 = vmax.f32 %v6041_v12, 0.0 }
0x1bc1   :  { %v6057_v2 = vpack.c.bf16 %v6051_v7, %v6049_v50  ;;  %v7695_v7 = vld [vmem:[%s8774_s30] sm:$0xff] }
0x1bc3   :  { %6186 = vmatmul.bf16.vlgmr.msra.gmra.mxu0 %v6057_v2 }
0x1be6   :  { %v6024_v53 = vpop.f32.mrf.mxu1 }
0x1be7   :  { %v6025_v54 = vadd.f32 %v6024_v53, %v5926_v51 }
0x1be9   :  { %v6052_v20 = vmax.f32 %v6025_v54, 0.0 }
0x1bec   :  { %v6043_v8 = vpop.f32.mrf.mxu2 }
0x1bed   :  { %v6044_v42 = vadd.f32 %v6043_v8, %v5927_v5 }
0x1bee   :  { %v6026_v15 = vpop.f32.mrf.mxu1 }
0x1bef   :  { %v6027_v59 = vadd.f32 %v6026_v15, %v5926_v51  ;;  %v6053_v16 = vmax.f32 %v6044_v42, 0.0 }
0x1bf1   :  { %v6054_v19 = vmax.f32 %v6027_v59, 0.0 }
0x1bf3   :  { %v6058_v4 = vpack.c.bf16 %v6054_v19, %v6052_v20 }
0x1bf4   :  { %v6045_v26 = vpop.f32.mrf.mxu2 }
0x1bf5   :  { %v6046_v9 = vadd.f32 %v6045_v26, %v5927_v5  ;;  %6172 = vmatmul.bf16.gmra.mxu3 %v6058_v4  ;;  %v7701_v5 = vld [vmem:[%s8774_s30 + $0x30] sm:$0xff]  ;;  %s8548_s30 = scalar_lea.hbm %s8784_s9, 32 }
0x1bf6   :  { %6370 = vmatpush.bf16.msra.mxu1 %v7701_v5  ;;  %p8550_p0 = scmp.lt.s32.totalorder %s8548_s30, %s8546_s24 }
0x1bf7   :  { %v6055_v55 = vmax.f32 %v6046_v9, 0.0 }
0x1bf8   :  { %p8551_p1 = por %p8550_p0, %p8549_p13 }
0x1bf9   :  { %v6059_v38 = vpack.c.bf16 %v6055_v55, %v6053_v16 }
0x1bfa   :  { %6371 = vmatpush.bf16.msra.mxu1 %v7700_v23  ;;  %v8021_v23 = vld [vmem:[%s8779_s20] ss:$0 sm:$0xff]  ;;  %p8552_p2 = pnand %p8551_p1, %p8547_p12 }
0x1bfb   :  { %6191 = vmatmul.bf16.gmra.mxu0 %v6059_v38 }
0x1bfe   :  { %6372 = vmatpush.bf16.msra.mxu1 %v7699_v13 }
0x1c02   :  { %6373 = vmatpush.bf16.msra.mxu1 %v7698_v0 }
0x1c06   :  { %6374 = vmatpush.bf16.msra.mxu1 %v7697_v3 }
0x1c0a   :  { %6375 = vmatpush.bf16.msra.mxu1 %v7696_v22 }
0x1c0e   :  { %6376 = vmatpush.bf16.msra.mxu1 %v7695_v7 }
0x1c40   :  { %v6168_v49 = vpop.f32.mrf.mxu3  ;;  %v6187_v25 = vpop.f32.mrf.mxu0 }
0x1c41   :  { %v6169_v39 = vadd.f32 %v8018_v32, %v6168_v49 }
0x1c43   :  { %v6188_v44 = vadd.f32 %v6187_v25, %v6169_v39 }
0x1c45   :  { %v6197_v17 = vadd.f32 %v6188_v44, %v10414_v6  ;;  %v8020_v44 = vld [vmem:[%s8769_s4 + $0x1] ss:$0 sm:$0xff] }
0x1c47   :  { %6205 = vadd.xlane.f32.xlu2 %v6197_v17 }
0x1c48   :  { %v6170_v57 = vpop.f32.mrf.mxu3  ;;  %v6189_v48 = vpop.f32.mrf.mxu0 }
0x1c49   :  { %v6171_v31 = vadd.f32 %v8018_v32, %v6170_v57 }
0x1c4b   :  { %v6190_v58 = vadd.f32 %v6189_v48, %v6171_v31 }
0x1c4d   :  { %v6198_v62 = vadd.f32 %v6190_v58, %v10416_v14 }
0x1c4f   :  { %6207 = vadd.xlane.f32.xlu1 %v6198_v62 }
0x1c78   :  { %v6173_v27 = vpop.f32.mrf.mxu3  ;;  %v6192_v61 = vpop.f32.mrf.mxu0 }
0x1c79   :  { %v6174_v63 = vadd.f32 %v8018_v32, %v6173_v27 }
0x1c7b   :  { %v6193_v40 = vadd.f32 %v6192_v61, %v6174_v63 }
0x1c7d   :  { %v6199_v56 = vadd.f32 %v6193_v40, %v10431_v11 }
0x1c7f   :  { %6209 = vadd.xlane.f32.xlu0 %v6199_v56 }
0x1c80   :  { %v6175_v33 = vpop.f32.mrf.mxu3  ;;  %v6194_v52 = vpop.f32.mrf.mxu0 }
0x1c81   :  { %v6176_v45 = vadd.f32 %v8018_v32, %v6175_v33  ;;  %v8019_v32 = vld [vmem:[%s10529_s23 + $0x1] ss:$0 sm:$0xff] }
0x1c83   :  { %v6195_v35 = vadd.f32 %v6194_v52, %v6176_v45 }
0x1c85   :  { %v6200_v6 = vadd.f32 %v6195_v35, %v10433_v30 }
0x1c87   :  { %6211 = vadd.xlane.f32.xlu2 %v6200_v6 }
0x1cba   :  { %v6206_v28 = vpop.xlane.xlu2 %6205 }
0x1cbb   :  { %v6213_v46 = vmul.f32 %v6206_v28, %v9219_v21 }
0x1cbd   :  { %v6217_v24 = vsub.f32 %v6197_v17, %v6213_v46 }
0x1cbf   :  { %v6221_v14 = vmul.f32 %v6217_v24, %v6217_v24 }
0x1cc1   :  { %6225 = vadd.xlane.f32.xlu1 %v6221_v14 }
0x1cc2   :  { %v6208_v60 = vpop.xlane.xlu1 %6207 }
0x1cc3   :  { %v6214_v37 = vmul.f32 %v6208_v60, %v9219_v21 }
0x1cc5   :  { %v6218_v11 = vsub.f32 %v6198_v62, %v6214_v37 }
0x1cc7   :  { %v6222_v29 = vmul.f32 %v6218_v11, %v6218_v11 }
0x1cc9   :  { %6227 = vadd.xlane.f32.xlu0 %v6222_v29 }
0x1cf2   :  { %v6210_v10 = vpop.xlane.xlu0 %6209 }
0x1cf3   :  { %v6215_v30 = vmul.f32 %v6210_v10, %v9219_v21 }
0x1cf5   :  { %v10455_v34 = vsub.f32 %v6199_v56, %v6215_v30 }
0x1cf7   :  { %v6223_v43 = vmul.f32 %v10455_v34, %v10455_v34 }
0x1cf9   :  { %6229 = vadd.xlane.f32.xlu2 %v6223_v43 }
0x1cfa   :  { %v6212_v1 = vpop.xlane.xlu2 %6211 }
0x1cfb   :  { %v6216_v51 = vmul.f32 %v6212_v1, %v9219_v21 }
0x1cfd   :  { %v10460_v18 = vsub.f32 %v6200_v6, %v6216_v51 }
0x1cff   :  { %v6224_v36 = vmul.f32 %v10460_v18, %v10460_v18 }
0x1d01   :  { %6231 = vadd.xlane.f32.xlu1 %v6224_v36 }
0x1d34   :  { %v6226_v41 = vpop.xlane.xlu1 %6225 }
0x1d35   :  { %v6233_v12 = vmul.f32 %v6226_v41, %v9219_v21 }
0x1d37   :  { %v6237_v50 = vadd.f32 1e-05, %v6233_v12 }
0x1d39   :  { %8320 = vrsqrt.f32 %v6237_v50  ;;  %vm6247_vm14 = vweird.f32 %v6237_v50 }
0x1d3c   :  { %v6228_v2 = vpop.xlane.xlu0 %6227 }
0x1d3d   :  { %v6234_v53 = vmul.f32 %v6228_v2, %v9219_v21 }
0x1d3f   :  { %v8321_v8 = vpop.eup %8320  ;;  %v6238_v54 = vadd.f32 1e-05, %v6234_v53 }
0x1d40   :  { %v6242_v15 = vmul.f32 %v8321_v8, %v6237_v50  ;;  %vm6248_vm13 = vweird.f32 %v8321_v8 }
0x1d41   :  { %8322 = vrsqrt.f32 %v6238_v54  ;;  %vm6249_vm15 = vmor %vm6247_vm14, %vm6248_vm13  ;;  %vm6257_vm0 = vweird.f32 %v6238_v54 }
0x1d42   :  { %v6243_v59 = vmul.f32 %v8321_v8, %v6242_v15 }
0x1d44   :  { %v6244_v20 = vmul.f32 0.5, %v6243_v59 }
0x1d46   :  { %v6245_v19 = vsub.f32 1.5, %v6244_v20 }
0x1d47   :  { %v8323_v42 = vpop.eup %8322 }
0x1d48   :  { %v6246_v4 = vmul.f32 %v8321_v8, %v6245_v19  ;;  %v6252_v26 = vmul.f32 %v8323_v42, %v6238_v54  ;;  %vm6258_vm4 = vweird.f32 %v8323_v42 }
0x1d49   :  { %vm6259_vm1 = vmor %vm6257_vm0, %vm6258_vm4 }
0x1d4a   :  { %v6253_v9 = vmul.f32 %v8323_v42, %v6252_v26  ;;  %v6250_v16 = vsel %vm6249_vm15, %v8321_v8, %v6246_v4 }
0x1d4b   :  { %v6281_v49 = vmul.f32 %v6250_v16, %v6217_v24 }
0x1d4c   :  { %v6254_v55 = vmul.f32 0.5, %v6253_v9 }
0x1d4d   :  { %v6288_v17 = vmul.f32 %v8019_v32, %v6281_v49 }
0x1d4e   :  { %v6255_v38 = vsub.f32 1.5, %v6254_v55 }
0x1d4f   :  { %v6295_v48 = vadd.f32 %v8020_v44, %v6288_v17 }
0x1d50   :  { %v6256_v25 = vmul.f32 %v8323_v42, %v6255_v38 }
0x1d52   :  { %v6260_v39 = vsel %vm6259_vm1, %v8323_v42, %v6256_v25 }
0x1d53   :  { %v6282_v57 = vmul.f32 %v6260_v39, %v6218_v11 }
0x1d55   :  { %v6289_v31 = vmul.f32 %v8019_v32, %v6282_v57 }
0x1d57   :  { %v6296_v58 = vadd.f32 %v8020_v44, %v6289_v31 }
0x1d59   :  { %v6299_v62 = vpack.c.bf16 %v6296_v58, %v6295_v48 }
0x1d5b   :  { %6377 = vmatmul.bf16.vlgmr.msra.gmra.mxu1 %v6299_v62 }
0x1d6c   :  { %v6230_v27 = vpop.xlane.xlu2 %6229 }
0x1d6d   :  { %v6235_v61 = vmul.f32 %v6230_v27, %v9219_v21 }
0x1d6f   :  { %v6239_v63 = vadd.f32 1e-05, %v6235_v61 }
0x1d71   :  { %8324 = vrsqrt.f32 %v6239_v63  ;;  %vm6267_vm3 = vweird.f32 %v6239_v63 }
0x1d74   :  { %v6232_v40 = vpop.xlane.xlu1 %6231 }
0x1d75   :  { %v6236_v56 = vmul.f32 %v6232_v40, %v9219_v21 }
0x1d77   :  { %v8325_v33 = vpop.eup %8324  ;;  %v6240_v45 = vadd.f32 1e-05, %v6236_v56 }
0x1d78   :  { %v6262_v52 = vmul.f32 %v8325_v33, %v6239_v63  ;;  %vm6268_vm2 = vweird.f32 %v8325_v33 }
0x1d79   :  { %8326 = vrsqrt.f32 %v6240_v45  ;;  %vm6269_vm5 = vmor %vm6267_vm3, %vm6268_vm2  ;;  %vm6277_vm7 = vweird.f32 %v6240_v45 }
0x1d7a   :  { %v6263_v35 = vmul.f32 %v8325_v33, %v6262_v52 }
0x1d7c   :  { %v6264_v6 = vmul.f32 0.5, %v6263_v35 }
0x1d7e   :  { %v6265_v28 = vsub.f32 1.5, %v6264_v6 }
0x1d7f   :  { %v8327_v46 = vpop.eup %8326 }
0x1d80   :  { %v6266_v24 = vmul.f32 %v8325_v33, %v6265_v28  ;;  %v6272_v14 = vmul.f32 %v8327_v46, %v6240_v45  ;;  %vm6278_vm6 = vweird.f32 %v8327_v46 }
0x1d81   :  { %vm6279_vm8 = vmor %vm6277_vm7, %vm6278_vm6 }
0x1d82   :  { %v6273_v60 = vmul.f32 %v8327_v46, %v6272_v14  ;;  %v6270_v37 = vsel %vm6269_vm5, %v8325_v33, %v6266_v24 }
0x1d83   :  { %v6283_v21 = vmul.f32 %v6270_v37, %v10455_v34 }
0x1d84   :  { %v6274_v11 = vmul.f32 0.5, %v6273_v60 }
0x1d85   :  { %v6290_v1 = vmul.f32 %v8019_v32, %v6283_v21 }
0x1d86   :  { %v6275_v29 = vsub.f32 1.5, %v6274_v11 }
0x1d87   :  { %v6297_v36 = vadd.f32 %v8020_v44, %v6290_v1 }
0x1d88   :  { %v6276_v10 = vmul.f32 %v8327_v46, %v6275_v29 }
0x1d8a   :  { %v6280_v30 = vsel %vm6279_vm8, %v8327_v46, %v6276_v10 }
0x1d8b   :  { %v6284_v43 = vmul.f32 %v6280_v30, %v10460_v18 }
0x1d8d   :  { %v6291_v51 = vmul.f32 %v8019_v32, %v6284_v43 }
0x1d8f   :  { %v6298_v47 = vadd.f32 %v8020_v44, %v6291_v51 }
0x1d91   :  { %v6300_v5 = vpack.c.bf16 %v6298_v47, %v6297_v36 }
0x1d93   :  { %6382 = vmatmul.bf16.gmra.mxu1 %v6300_v5 }
0x1dd8   :  { %v6378_v13 = vpop.f32.mrf.mxu1 }
0x1dd9   :  { %v6379_v0 = vadd.f32 %v8021_v23, %v6378_v13 }
0x1ddb   :  { %6388 = vst [vmem:[#allocation16] sm:$0xff] %v6379_v0 }
0x1de0   :  { %v6380_v3 = vpop.f32.mrf.mxu1 }
0x1de1   :  { %v6381_v22 = vadd.f32 %v8021_v23, %v6380_v3 }
0x1de3   :  { %6389 = vst [vmem:[#allocation16 + $0x8] sm:$0xff] %v6381_v22 }
0x1e10   :  { %v6383_v34 = vpop.f32.mrf.mxu1 }
0x1e11   :  { %v6384_v41 = vadd.f32 %v8021_v23, %v6383_v34 }
0x1e13   :  { %6390 = vst [vmem:[#allocation16 + $0x10] sm:$0xff] %v6384_v41 }
0x1e18   :  { %v6385_v18 = vpop.f32.mrf.mxu1 }
0x1e19   :  { %v6386_v12 = vadd.f32 %v8021_v23, %v6385_v18 }
0x1e1b   :  { %6391 = vst [vmem:[#allocation16 + $0x18] sm:$0xff] %v6386_v12 }
0x1e1c   :  { %8555 = shalt.err (!%p8552_p2)
}
0x1e1d   :  { %s8614_s20 = smov 128   ;;  %s8615_s4 = smov 8  }
0x1e1e   :  { %6404 = dma.vmem_to_hbm [thread:$0]  %s6397_s25, 512, %s6399_s3, [#allocation4], %s8614_s20, %s8614_s20, %s8615_s4  }
0x1e1f   :  { %8566 = dma.done.wait [#allocation4], 512  }
0x1e20   :  { %8567 = vsyncadd [#allocation4], 4294966784 }
0x1e21   :  { %6409 = vsyncpa [#allocation3], 1 }
0x1e22   :  { %6410 = vsyncpa [#allocation6], 1 }
0x1e23   :  { %6411 = vsyncpa [#allocation9], 1 }
0x1e24   :  { %6412 = vsyncpa [#allocation12], 1 }
0x1e25   :  { %6413 = vsyncpa [#allocation15], 1 }
0x1e26   :  { %6414 = vsyncpa [#allocation4], 1 }

</bundles_post_ra>
